<compile_context>
chip_gen: v7x
topology: tpu7x:2x2x1
jax: 0.10.0
libtpu: 0.0.40
codegen_flags: <defaults>
</compile_context>

<pallas_src>
import functools

import jax
import jax.numpy as jnp
from jax.experimental import pallas as pl
from jax.experimental.pallas import tpu as pltpu

LN_EPS = 1e-5  # torch.nn.LayerNorm default


def kgsp_kernel(img_ref, w1_ref, wa2_ref, wo2_ref, wac_ref, woc_ref, vec_ref,
                score_ref, *, h1, offs):
    """One batch tile: (Linear-LN-ReLU-Linear-ReLU) x2 heads -> clf -> softmax -> outer."""
    x = img_ref[...]                                       # bf16 (bt, F)

    def vec(name):                                         # static, 128-aligned lane slice
        o, c = offs[name]
        return vec_ref[:, o:o + c]                         # f32 (1, c)

    # Fused first layer: attr and obj heads share x -> one MXU push over (F, 2*h1).
    h = jnp.dot(x, w1_ref[...], preferred_element_type=jnp.float32) + vec("b1")
    ha = h[:, :h1]                                         # attr branch pre-LN (bt, h1)
    ho = h[:, h1:]                                         # obj  branch pre-LN (bt, h1)

    def ln_relu(v, g, beta):
        # One-pass LayerNorm: E[v] and E[v^2] are independent reductions (XLU overlap).
        mu = jnp.mean(v, axis=-1, keepdims=True)
        ex2 = jnp.mean(v * v, axis=-1, keepdims=True)
        var = ex2 - mu * mu
        v = (v - mu) * jax.lax.rsqrt(var + LN_EPS) * g + beta
        # Dropout is identity in eval mode.
        return jnp.maximum(v, 0.0).astype(jnp.bfloat16)

    ha = ln_relu(ha, vec("ga"), vec("bta"))
    ho = ln_relu(ho, vec("go"), vec("bto"))

    def branch(v, w2_ref, b2, wc_ref, bc):
        f = jnp.dot(v, w2_ref[...], preferred_element_type=jnp.float32) + b2
        f = jnp.maximum(f, 0.0).astype(jnp.bfloat16)
        logits = jnp.dot(f, wc_ref[...], preferred_element_type=jnp.float32) + bc
        # Exactly-normalized softmax (rows must sum to 1 for downstream scoring).
        m = jnp.max(logits, axis=-1, keepdims=True)
        e = jnp.exp(logits - m)
        return e / jnp.sum(e, axis=-1, keepdims=True)

    attr_pred = branch(ha, wa2_ref, vec("ba2"), wac_ref, vec("bac"))   # (bt, A) f32
    obj_pred = branch(ho, wo2_ref, vec("bo2"), woc_ref, vec("boc"))    # (bt, O) f32

    # score[b, a, o] = attr_pred[b, a] * obj_pred[b, o]; stored unpadded, the
    # flatten to idx = a * n_objs + o is a free reshape in the wrapper.
    score_ref[...] = attr_pred[:, :, None] * obj_pred[:, None, :]


def _resident_spec(arr):
    """Whole-array block, constant index_map (stays VMEM-resident), single-buffered."""
    nd = arr.ndim
    idx = lambda i: (0,) * nd
    try:
        return pl.BlockSpec(arr.shape, idx, pipeline_mode=pl.Buffered(1))
    except (TypeError, AttributeError):   # older jax without pipeline_mode / Buffered
        return pl.BlockSpec(arr.shape, idx)


def _pick_bt(batch, target=256):
    """Batch tile: multiple of 8 (or == batch); <= target; >= 2 grid steps when possible."""
    if batch <= 8:
        return batch                       # tiny batch: single full tile
    bt = min(target, batch // 2)           # guarantee >= 2 grid steps (v7x dual-TC)
    bt = max(8, (bt // 8) * 8)             # sublane-aligned
    return bt


def kgsp_forward(img, params, *, n_attrs, n_objs, h1=768, bt=None):
    """Pallas implementation of KGSP.val_forward_revised (eval mode).

    Returns score of shape (B, n_attrs * n_objs), idx = attr_id * n_objs + obj_id,
    matching torch.bmm(attr_pred.unsqueeze(2), obj_pred.unsqueeze(1)).view(B, -1).
    """
    B, F = img.shape
    assert h1 % 128 == 0, "fused layer-1 lane split requires h1 % 128 == 0"
    # (n_attrs need not be 8-aligned: the out block covers the full attr dim.)

    if bt is None:
        bt = _pick_bt(B)          # 256-row default fills v6e/v7x MXU; pass bt=128 on v5e
    bt = max(1, min(bt, B))

    bf16 = jnp.bfloat16
    # Fuse the two first-layer weights (heads share the input) and cast all matmul
    # weights to bf16 -- weight bytes are the HBM roofline term at small/medium batch.
    w1 = jnp.concatenate([params["wa1"], params["wo1"]], axis=1).astype(bf16)   # (F, 2*h1)
    weights = [
        w1,
        params["wa2"].astype(bf16), params["wo2"].astype(bf16),
        params["wac"].astype(bf16), params["woc"].astype(bf16),
    ]

    # Pack the small (1, C) f32 vectors (biases + LN affine) into one lane-aligned
    # buffer -> one resident DMA instead of twelve.
    pieces = [
        ("b1", jnp.concatenate([params["ba1"], params["bo1"]], axis=1)),
        ("ga", params["ga"]), ("bta", params["bta"]),
        ("go", params["go"]), ("bto", params["bto"]),
        ("ba2", params["ba2"]), ("bo2", params["bo2"]),
        ("bac", params["bac"]), ("boc", params["boc"]),
    ]
    offs, cols, off = {}, [], 0
    for name, v in pieces:
        v = v.astype(jnp.float32)
        c = v.shape[1]
        cp = ((c + 127) // 128) * 128
        offs[name] = (off, c)
        cols.append(jnp.pad(v, ((0, 0), (0, cp - c))))
        off += cp
    vec = jnp.concatenate(cols, axis=1)                    # (1, C_total) f32

    grid_spec = pl.GridSpec(
        grid=(pl.cdiv(B, bt),),                            # edge block masked if bt ∤ B
        in_specs=[pl.BlockSpec((bt, F), lambda i: (i, 0))]
        + [_resident_spec(w) for w in weights]
        + [_resident_spec(vec)],
        out_specs=pl.BlockSpec((bt, n_attrs, n_objs), lambda i: (i, 0, 0)),
    )

    kern = functools.partial(kgsp_kernel, h1=h1, offs=offs)

    score = pl.pallas_call(
        kern,
        out_shape=jax.ShapeDtypeStruct((B, n_attrs, n_objs), jnp.float32),
        grid_spec=grid_spec,
        compiler_params=pltpu.CompilerParams(
            dimension_semantics=("parallel",),             # batch tiles shard across TCs
            vmem_limit_bytes=40 * 1024 * 1024,             # ample for bt<=512, safe on v7x
        ),
    )(img.astype(bf16), *weights, vec)

    # Collapsing the two minor dims of a row-major array is a free reshape
    # (no second HBM pass, no padding to slice away).
    return score.reshape(B, n_attrs * n_objs)


def make_params(key, feat_dim, h1, h2, n_attrs, n_objs):
    ks = jax.random.split(key, 8)

    def lin(k, din, dout, scale=0.02):
        kw, kb = jax.random.split(k)
        w = scale * jax.random.normal(kw, (din, dout), jnp.float32)
        b = scale * jax.random.normal(kb, (1, dout), jnp.float32)
        return w, b

    params = {}
    # attr head
    params["wa1"], params["ba1"] = lin(ks[0], feat_dim, h1)
    params["ga"] = jnp.ones((1, h1), jnp.float32)
    params["bta"] = jnp.zeros((1, h1), jnp.float32)
    params["wa2"], params["ba2"] = lin(ks[1], h1, h2)
    params["wac"], params["bac"] = lin(ks[2], h2, n_attrs)
    # obj head
    params["wo1"], params["bo1"] = lin(ks[3], feat_dim, h1)
    params["go"] = jnp.ones((1, h1), jnp.float32)
    params["bto"] = jnp.zeros((1, h1), jnp.float32)
    params["wo2"], params["bo2"] = lin(ks[4], h1, h2)
    params["woc"], params["boc"] = lin(ks[5], h2, n_objs)
    return params


def kgsp_reference(img, params):
    """Pure-JAX f32 reference of val_forward_revised (eval mode)."""

    def head(x, w1, b1, g, beta, w2, b2):
        h = x @ w1 + b1
        mu = jnp.mean(h, axis=-1, keepdims=True)
        var = jnp.mean((h - mu) ** 2, axis=-1, keepdims=True)
        h = (h - mu) / jnp.sqrt(var + LN_EPS) * g + beta
        h = jnp.maximum(h, 0.0)
        return jnp.maximum(h @ w2 + b2, 0.0)

    af = head(img, params["wa1"], params["ba1"], params["ga"], params["bta"],
              params["wa2"], params["ba2"])
    of = head(img, params["wo1"], params["bo1"], params["go"], params["bto"],
              params["wo2"], params["bo2"])
    ap = jax.nn.softmax(af @ params["wac"] + params["bac"], axis=-1)
    op = jax.nn.softmax(of @ params["woc"] + params["boc"], axis=-1)
    B = img.shape[0]
    return (ap[:, :, None] * op[:, None, :]).reshape(B, -1)


if __name__ == "__main__":
    # Small, module-consistent shapes: feat_dim input features, hard-coded
    # 768 / 1024 hidden dims from the MLP heads, small attr/obj vocabularies.
    B, FEAT_DIM, H1, H2 = 8, 512, 768, 1024
    N_ATTRS, N_OBJS = 16, 12

    key = jax.random.PRNGKey(0)
    k_img, k_par = jax.random.split(key)
    img = jax.random.normal(k_img, (B, FEAT_DIM), jnp.float32)
    params = make_params(k_par, FEAT_DIM, H1, H2, N_ATTRS, N_OBJS)

    run = jax.jit(functools.partial(kgsp_forward, n_attrs=N_ATTRS, n_objs=N_OBJS))
    score = run(img, params)
    jax.block_until_ready(score)

    ref = kgsp_reference(img, params)
    assert score.shape == (B, N_ATTRS * N_OBJS)
    # bf16 matmul weights inside the kernel -> relaxed tolerance vs the f32 reference.
    assert jnp.allclose(score, ref, rtol=5e-2, atol=5e-3), "mismatch vs reference"
    # Each row is an outer product of two exactly-normalized softmaxes -> sums to 1.
    assert jnp.allclose(jnp.sum(score, axis=-1), jnp.ones((B,)), rtol=1e-3, atol=1e-3)

    print("KERNEL_OK")
</pallas_src>

<mosaic_0001>
module attributes {stable_mosaic.version = 11 : i64} {
  func.func @kgsp_kernel(%arg0: i32, %arg1: memref<8x512xbf16, #tpu.memory_space<vmem>>, %arg2: memref<512x1536xbf16, #tpu.memory_space<vmem>>, %arg3: memref<768x1024xbf16, #tpu.memory_space<vmem>>, %arg4: memref<768x1024xbf16, #tpu.memory_space<vmem>>, %arg5: memref<1024x16xbf16, #tpu.memory_space<vmem>>, %arg6: memref<1024x12xbf16, #tpu.memory_space<vmem>>, %arg7: memref<1x6912xf32, #tpu.memory_space<vmem>>, %arg8: memref<8x16x12xf32, #tpu.memory_space<vmem>>) attributes {dimension_semantics = [#tpu.dimension_semantics<parallel>], iteration_bounds = array<i64: 1>, scalar_prefetch = 0 : i64, scratch_operands = 0 : i64, tpu.core_type = #tpu.core_type<tc>, window_params = [{transform_indices = @transform_0, window_bounds = array<i64: 8, 512>}, {pipeline_mode = #tpu.pipeline_mode<synchronous>, transform_indices = @transform_1, window_bounds = array<i64: 512, 1536>}, {pipeline_mode = #tpu.pipeline_mode<synchronous>, transform_indices = @transform_2, window_bounds = array<i64: 768, 1024>}, {pipeline_mode = #tpu.pipeline_mode<synchronous>, transform_indices = @transform_3, window_bounds = array<i64: 768, 1024>}, {pipeline_mode = #tpu.pipeline_mode<synchronous>, transform_indices = @transform_4, window_bounds = array<i64: 1024, 16>}, {pipeline_mode = #tpu.pipeline_mode<synchronous>, transform_indices = @transform_5, window_bounds = array<i64: 1024, 12>}, {pipeline_mode = #tpu.pipeline_mode<synchronous>, transform_indices = @transform_6, window_bounds = array<i64: 1, 6912>}, {transform_indices = @transform_7, window_bounds = array<i64: 8, 16, 12>}]} {
    %c0 = arith.constant 0 : index
    %c0_0 = arith.constant 0 : index
    %0 = vector.load %arg1[%c0, %c0_0] : memref<8x512xbf16, #tpu.memory_space<vmem>>, vector<8x512xbf16>
    %c0_1 = arith.constant 0 : index
    %c0_2 = arith.constant 0 : index
    %1 = vector.load %arg2[%c0_1, %c0_2] : memref<512x1536xbf16, #tpu.memory_space<vmem>>, vector<512x1536xbf16>
    %cst = arith.constant dense<0.000000e+00> : vector<8x1536xf32>
    %2 = tpu.matmul %0, %1, %cst {dimension_numbers = #tpu.dot_dimension_numbers<[1], [0], [0], [1], [0, 0, 1, 1], [], []>} : vector<8x512xbf16>, vector<512x1536xbf16>, vector<8x1536xf32> -> vector<8x1536xf32>
    %c0_3 = arith.constant 0 : index
    %c0_4 = arith.constant 0 : index
    %3 = vector.load %arg7[%c0_3, %c0_4] : memref<1x6912xf32, #tpu.memory_space<vmem>>, vector<1x1536xf32>
    %4 = vector.broadcast %3 : vector<1x1536xf32> to vector<8x1536xf32>
    %5 = arith.addf %2, %4 : vector<8x1536xf32>
    %6 = vector.extract_strided_slice %5 {offsets = [0, 0], sizes = [8, 768], strides = [1, 1]} : vector<8x1536xf32> to vector<8x768xf32>
    %7 = vector.extract_strided_slice %5 {offsets = [0, 768], sizes = [8, 768], strides = [1, 1]} : vector<8x1536xf32> to vector<8x768xf32>
    %c0_5 = arith.constant 0 : index
    %c1536 = arith.constant 1536 : index
    %8 = vector.load %arg7[%c0_5, %c1536] : memref<1x6912xf32, #tpu.memory_space<vmem>>, vector<1x768xf32>
    %c0_6 = arith.constant 0 : index
    %c2304 = arith.constant 2304 : index
    %9 = vector.load %arg7[%c0_6, %c2304] : memref<1x6912xf32, #tpu.memory_space<vmem>>, vector<1x768xf32>
    %cst_7 = arith.constant dense<0.000000e+00> : vector<8xf32>
    %10 = vector.multi_reduction <add>, %6, %cst_7 [1] : vector<8x768xf32> to vector<8xf32>
    %11 = vector.shape_cast %10 : vector<8xf32> to vector<8x1xf32>
    %cst_8 = arith.constant 7.680000e+02 : f32
    %12 = vector.broadcast %cst_8 : f32 to vector<8x1xf32>
    %13 = arith.divf %11, %12 : vector<8x1xf32>
    %14 = arith.mulf %6, %6 : vector<8x768xf32>
    %cst_9 = arith.constant dense<0.000000e+00> : vector<8xf32>
    %15 = vector.multi_reduction <add>, %14, %cst_9 [1] : vector<8x768xf32> to vector<8xf32>
    %16 = vector.shape_cast %15 : vector<8xf32> to vector<8x1xf32>
    %cst_10 = arith.constant 7.680000e+02 : f32
    %17 = vector.broadcast %cst_10 : f32 to vector<8x1xf32>
    %18 = arith.divf %16, %17 : vector<8x1xf32>
    %19 = arith.mulf %13, %13 : vector<8x1xf32>
    %20 = arith.subf %18, %19 : vector<8x1xf32>
    %21 = vector.broadcast %13 : vector<8x1xf32> to vector<8x768xf32>
    %22 = arith.subf %6, %21 : vector<8x768xf32>
    %cst_11 = arith.constant 9.99999974E-6 : f32
    %23 = vector.broadcast %cst_11 : f32 to vector<8x1xf32>
    %24 = arith.addf %20, %23 : vector<8x1xf32>
    %25 = math.rsqrt %24 : vector<8x1xf32>
    %26 = vector.broadcast %25 : vector<8x1xf32> to vector<8x768xf32>
    %27 = arith.mulf %22, %26 : vector<8x768xf32>
    %28 = vector.broadcast %8 : vector<1x768xf32> to vector<8x768xf32>
    %29 = arith.mulf %27, %28 : vector<8x768xf32>
    %30 = vector.broadcast %9 : vector<1x768xf32> to vector<8x768xf32>
    %31 = arith.addf %29, %30 : vector<8x768xf32>
    %cst_12 = arith.constant 0.000000e+00 : f32
    %32 = vector.broadcast %cst_12 : f32 to vector<8x768xf32>
    %33 = arith.maximumf %31, %32 : vector<8x768xf32>
    %34 = arith.truncf %33 : vector<8x768xf32> to vector<8x768xbf16>
    %c0_13 = arith.constant 0 : index
    %c3072 = arith.constant 3072 : index
    %35 = vector.load %arg7[%c0_13, %c3072] : memref<1x6912xf32, #tpu.memory_space<vmem>>, vector<1x768xf32>
    %c0_14 = arith.constant 0 : index
    %c3840 = arith.constant 3840 : index
    %36 = vector.load %arg7[%c0_14, %c3840] : memref<1x6912xf32, #tpu.memory_space<vmem>>, vector<1x768xf32>
    %cst_15 = arith.constant dense<0.000000e+00> : vector<8xf32>
    %37 = vector.multi_reduction <add>, %7, %cst_15 [1] : vector<8x768xf32> to vector<8xf32>
    %38 = vector.shape_cast %37 : vector<8xf32> to vector<8x1xf32>
    %cst_16 = arith.constant 7.680000e+02 : f32
    %39 = vector.broadcast %cst_16 : f32 to vector<8x1xf32>
    %40 = arith.divf %38, %39 : vector<8x1xf32>
    %41 = arith.mulf %7, %7 : vector<8x768xf32>
    %cst_17 = arith.constant dense<0.000000e+00> : vector<8xf32>
    %42 = vector.multi_reduction <add>, %41, %cst_17 [1] : vector<8x768xf32> to vector<8xf32>
    %43 = vector.shape_cast %42 : vector<8xf32> to vector<8x1xf32>
    %cst_18 = arith.constant 7.680000e+02 : f32
    %44 = vector.broadcast %cst_18 : f32 to vector<8x1xf32>
    %45 = arith.divf %43, %44 : vector<8x1xf32>
    %46 = arith.mulf %40, %40 : vector<8x1xf32>
    %47 = arith.subf %45, %46 : vector<8x1xf32>
    %48 = vector.broadcast %40 : vector<8x1xf32> to vector<8x768xf32>
    %49 = arith.subf %7, %48 : vector<8x768xf32>
    %cst_19 = arith.constant 9.99999974E-6 : f32
    %50 = vector.broadcast %cst_19 : f32 to vector<8x1xf32>
    %51 = arith.addf %47, %50 : vector<8x1xf32>
    %52 = math.rsqrt %51 : vector<8x1xf32>
    %53 = vector.broadcast %52 : vector<8x1xf32> to vector<8x768xf32>
    %54 = arith.mulf %49, %53 : vector<8x768xf32>
    %55 = vector.broadcast %35 : vector<1x768xf32> to vector<8x768xf32>
    %56 = arith.mulf %54, %55 : vector<8x768xf32>
    %57 = vector.broadcast %36 : vector<1x768xf32> to vector<8x768xf32>
    %58 = arith.addf %56, %57 : vector<8x768xf32>
    %cst_20 = arith.constant 0.000000e+00 : f32
    %59 = vector.broadcast %cst_20 : f32 to vector<8x768xf32>
    %60 = arith.maximumf %58, %59 : vector<8x768xf32>
    %61 = arith.truncf %60 : vector<8x768xf32> to vector<8x768xbf16>
    %c0_21 = arith.constant 0 : index
    %c4608 = arith.constant 4608 : index
    %62 = vector.load %arg7[%c0_21, %c4608] : memref<1x6912xf32, #tpu.memory_space<vmem>>, vector<1x1024xf32>
    %c0_22 = arith.constant 0 : index
    %c6656 = arith.constant 6656 : index
    %63 = vector.load %arg7[%c0_22, %c6656] : memref<1x6912xf32, #tpu.memory_space<vmem>>, vector<1x16xf32>
    %c0_23 = arith.constant 0 : index
    %c0_24 = arith.constant 0 : index
    %64 = vector.load %arg3[%c0_23, %c0_24] : memref<768x1024xbf16, #tpu.memory_space<vmem>>, vector<768x1024xbf16>
    %cst_25 = arith.constant dense<0.000000e+00> : vector<8x1024xf32>
    %65 = tpu.matmul %34, %64, %cst_25 {dimension_numbers = #tpu.dot_dimension_numbers<[1], [0], [0], [1], [0, 0, 1, 1], [], []>} : vector<8x768xbf16>, vector<768x1024xbf16>, vector<8x1024xf32> -> vector<8x1024xf32>
    %66 = vector.broadcast %62 : vector<1x1024xf32> to vector<8x1024xf32>
    %67 = arith.addf %65, %66 : vector<8x1024xf32>
    %cst_26 = arith.constant 0.000000e+00 : f32
    %68 = vector.broadcast %cst_26 : f32 to vector<8x1024xf32>
    %69 = arith.maximumf %67, %68 : vector<8x1024xf32>
    %70 = arith.truncf %69 : vector<8x1024xf32> to vector<8x1024xbf16>
    %c0_27 = arith.constant 0 : index
    %c0_28 = arith.constant 0 : index
    %71 = vector.load %arg5[%c0_27, %c0_28] : memref<1024x16xbf16, #tpu.memory_space<vmem>>, vector<1024x16xbf16>
    %cst_29 = arith.constant dense<0.000000e+00> : vector<8x16xf32>
    %72 = tpu.matmul %70, %71, %cst_29 {dimension_numbers = #tpu.dot_dimension_numbers<[1], [0], [0], [1], [0, 0, 1, 1], [], []>} : vector<8x1024xbf16>, vector<1024x16xbf16>, vector<8x16xf32> -> vector<8x16xf32>
    %73 = vector.broadcast %63 : vector<1x16xf32> to vector<8x16xf32>
    %74 = arith.addf %72, %73 : vector<8x16xf32>
    %cst_30 = arith.constant dense<0xFF800000> : vector<8xf32>
    %75 = vector.multi_reduction <maximumf>, %74, %cst_30 [1] : vector<8x16xf32> to vector<8xf32>
    %76 = vector.shape_cast %75 : vector<8xf32> to vector<8x1xf32>
    %77 = vector.broadcast %76 : vector<8x1xf32> to vector<8x16xf32>
    %78 = arith.subf %74, %77 : vector<8x16xf32>
    %79 = math.exp %78 : vector<8x16xf32>
    %cst_31 = arith.constant dense<0.000000e+00> : vector<8xf32>
    %80 = vector.multi_reduction <add>, %79, %cst_31 [1] : vector<8x16xf32> to vector<8xf32>
    %81 = vector.shape_cast %80 : vector<8xf32> to vector<8x1xf32>
    %82 = vector.broadcast %81 : vector<8x1xf32> to vector<8x16xf32>
    %83 = arith.divf %79, %82 : vector<8x16xf32>
    %c0_32 = arith.constant 0 : index
    %c5632 = arith.constant 5632 : index
    %84 = vector.load %arg7[%c0_32, %c5632] : memref<1x6912xf32, #tpu.memory_space<vmem>>, vector<1x1024xf32>
    %c0_33 = arith.constant 0 : index
    %c6784 = arith.constant 6784 : index
    %85 = vector.load %arg7[%c0_33, %c6784] : memref<1x6912xf32, #tpu.memory_space<vmem>>, vector<1x12xf32>
    %c0_34 = arith.constant 0 : index
    %c0_35 = arith.constant 0 : index
    %86 = vector.load %arg4[%c0_34, %c0_35] : memref<768x1024xbf16, #tpu.memory_space<vmem>>, vector<768x1024xbf16>
    %cst_36 = arith.constant dense<0.000000e+00> : vector<8x1024xf32>
    %87 = tpu.matmul %61, %86, %cst_36 {dimension_numbers = #tpu.dot_dimension_numbers<[1], [0], [0], [1], [0, 0, 1, 1], [], []>} : vector<8x768xbf16>, vector<768x1024xbf16>, vector<8x1024xf32> -> vector<8x1024xf32>
    %88 = vector.broadcast %84 : vector<1x1024xf32> to vector<8x1024xf32>
    %89 = arith.addf %87, %88 : vector<8x1024xf32>
    %cst_37 = arith.constant 0.000000e+00 : f32
    %90 = vector.broadcast %cst_37 : f32 to vector<8x1024xf32>
    %91 = arith.maximumf %89, %90 : vector<8x1024xf32>
    %92 = arith.truncf %91 : vector<8x1024xf32> to vector<8x1024xbf16>
    %c0_38 = arith.constant 0 : index
    %c0_39 = arith.constant 0 : index
    %93 = vector.load %arg6[%c0_38, %c0_39] : memref<1024x12xbf16, #tpu.memory_space<vmem>>, vector<1024x12xbf16>
    %cst_40 = arith.constant dense<0.000000e+00> : vector<8x12xf32>
    %94 = tpu.matmul %92, %93, %cst_40 {dimension_numbers = #tpu.dot_dimension_numbers<[1], [0], [0], [1], [0, 0, 1, 1], [], []>} : vector<8x1024xbf16>, vector<1024x12xbf16>, vector<8x12xf32> -> vector<8x12xf32>
    %95 = vector.broadcast %85 : vector<1x12xf32> to vector<8x12xf32>
    %96 = arith.addf %94, %95 : vector<8x12xf32>
    %cst_41 = arith.constant dense<0xFF800000> : vector<8xf32>
    %97 = vector.multi_reduction <maximumf>, %96, %cst_41 [1] : vector<8x12xf32> to vector<8xf32>
    %98 = vector.shape_cast %97 : vector<8xf32> to vector<8x1xf32>
    %99 = vector.broadcast %98 : vector<8x1xf32> to vector<8x12xf32>
    %100 = arith.subf %96, %99 : vector<8x12xf32>
    %101 = math.exp %100 : vector<8x12xf32>
    %cst_42 = arith.constant dense<0.000000e+00> : vector<8xf32>
    %102 = vector.multi_reduction <add>, %101, %cst_42 [1] : vector<8x12xf32> to vector<8xf32>
    %103 = vector.shape_cast %102 : vector<8xf32> to vector<8x1xf32>
    %104 = vector.broadcast %103 : vector<8x1xf32> to vector<8x12xf32>
    %105 = arith.divf %101, %104 : vector<8x12xf32>
    %106 = vector.shape_cast %83 : vector<8x16xf32> to vector<8x16x1xf32>
    %107 = vector.shape_cast %105 : vector<8x12xf32> to vector<8x1x12xf32>
    %108 = vector.broadcast %106 : vector<8x16x1xf32> to vector<8x16x12xf32>
    %109 = vector.broadcast %107 : vector<8x1x12xf32> to vector<8x16x12xf32>
    %110 = arith.mulf %108, %109 : vector<8x16x12xf32>
    %c0_43 = arith.constant 0 : index
    %c0_44 = arith.constant 0 : index
    %c0_45 = arith.constant 0 : index
    %111 = vector.load %arg8[%c0_43, %c0_44, %c0_45] : memref<8x16x12xf32, #tpu.memory_space<vmem>>, vector<8x16x12xf32>
    tpu.vector_store %arg8[%c0_43, %c0_44, %c0_45], %110 {strides = array<i32>} : memref<8x16x12xf32, #tpu.memory_space<vmem>>, vector<8x16x12xf32>,
    return
  }
  func.func @transform_0(%arg0: i32) -> (i32, i32) {
    %c0_i32 = arith.constant 0 : i32
    %c0_i32_0 = arith.constant 0 : i32
    return %arg0, %c0_i32 : i32, i32
  }
  func.func @transform_1(%arg0: i32) -> (i32, i32) {
    %c0_i32 = arith.constant 0 : i32
    %c0_i32_0 = arith.constant 0 : i32
    %c0_i32_1 = arith.constant 0 : i32
    return %c0_i32, %c0_i32_0 : i32, i32
  }
  func.func @transform_2(%arg0: i32) -> (i32, i32) {
    %c0_i32 = arith.constant 0 : i32
    %c0_i32_0 = arith.constant 0 : i32
    %c0_i32_1 = arith.constant 0 : i32
    return %c0_i32, %c0_i32_0 : i32, i32
  }
  func.func @transform_3(%arg0: i32) -> (i32, i32) {
    %c0_i32 = arith.constant 0 : i32
    %c0_i32_0 = arith.constant 0 : i32
    %c0_i32_1 = arith.constant 0 : i32
    return %c0_i32, %c0_i32_0 : i32, i32
  }
  func.func @transform_4(%arg0: i32) -> (i32, i32) {
    %c0_i32 = arith.constant 0 : i32
    %c0_i32_0 = arith.constant 0 : i32
    %c0_i32_1 = arith.constant 0 : i32
    return %c0_i32, %c0_i32_0 : i32, i32
  }
  func.func @transform_5(%arg0: i32) -> (i32, i32) {
    %c0_i32 = arith.constant 0 : i32
    %c0_i32_0 = arith.constant 0 : i32
    %c0_i32_1 = arith.constant 0 : i32
    return %c0_i32, %c0_i32_0 : i32, i32
  }
  func.func @transform_6(%arg0: i32) -> (i32, i32) {
    %c0_i32 = arith.constant 0 : i32
    %c0_i32_0 = arith.constant 0 : i32
    %c0_i32_1 = arith.constant 0 : i32
    return %c0_i32, %c0_i32_0 : i32, i32
  }
  func.func @transform_7(%arg0: i32) -> (i32, i32, i32) {
    %c0_i32 = arith.constant 0 : i32
    %c0_i32_0 = arith.constant 0 : i32
    %c0_i32_1 = arith.constant 0 : i32
    return %arg0, %c0_i32, %c0_i32_0 : i32, i32, i32
  }
}

</mosaic_0001>

<bundles_post_ra>
// kernel: kgsp_forward.1
= control target key start
LH: loop header
LB: loop body
LE: loop exit
PB: predicated region body
PF: predicated region fallthrough
CT: control target
= control target key end

     0   :  { %vm6689_vm0 = vcmask 130048   ;;  %vm10234_vm1 = vcmask 97280   ;;  %s17198_s1 = inlined_call_operand.vmem [shape: bf16[512,1536], index: 1, kind: input, shape index: {}]   ;;  %s17199_s0 = inlined_call_operand.vmem [shape: bf16[8,512], index: 0, kind: input, shape index: {}]   ;;  %s17200_s2 = inlined_call_operand.vmem [shape: bf16[768,1024], index: 2, kind: input, shape index: {}]   ;;  %s17201_s6 = inlined_call_operand.vmem [shape: f32[1,6912], index: 6, kind: input, shape index: {}]   ;;  %s17202_s4 = inlined_call_operand.vmem [shape: bf16[1024,16], index: 4, kind: input, shape index: {}]   ;;  %s17203_s3 = inlined_call_operand.vmem [shape: bf16[768,1024], index: 3, kind: input, shape index: {}]   ;;  %s17204_s5 = inlined_call_operand.vmem [shape: bf16[1024,12], index: 5, kind: input, shape index: {}]   ;;  %s17205_s7 = inlined_call_operand.vmem [shape: f32[8,16,12], index: 7, kind: output, shape index: {}]  }
   0x1   :  { %v12039_v0 = vld [vmem:[%s17198_s1 + $0x4] ss:$48 sps:$4 sm:$0xff]   ;;  %v12041_v1 = vld [vmem:[%s17198_s1] ss:$48 sps:$4 sm:$0xff]   ;;  %v12042_v2 = vld [vmem:[%s17198_s1 + $0xc] ss:$48 sps:$4 sm:$0xff]  }
   0x2   :  { %2411 = vmatprep.subr.bf16.mxu0 %v12039_v0  ;;  %v12044_v3 = vld [vmem:[%s17198_s1 + $0x64] ss:$48 sps:$4 sm:$0xff]   ;;  %v12046_v4 = vld [vmem:[%s17198_s1 + $0x8] ss:$48 sps:$4 sm:$0xff]   ;;  %v12047_v5 = vld [vmem:[%s17198_s1 + $0x60] ss:$48 sps:$4 sm:$0xff]   ;;  %2493 = vmatprep.subr.bf16.mxu1 %v12042_v2 }
   0x3   :  { %2412 = vmatpush1.bf16.msra.mxu0 %v12041_v1  ;;  %v12048_v6 = vld [vmem:[%s17198_s1 + $0x6c] ss:$48 sps:$4 sm:$0xff]   ;;  %2494 = vmatpush1.bf16.msra.mxu1 %v12046_v4  ;;  %v12050_v7 = vld [vmem:[%s17198_s1 + $0xc4] ss:$48 sps:$4 sm:$0xff]   ;;  %v12052_v8 = vld [vmem:[%s17198_s1 + $0x68] ss:$48 sps:$4 sm:$0xff]  }
   0x4   :  { %2413 = vmatprep.subr.bf16.mxu0 %v12044_v3  ;;  %2495 = vmatprep.subr.bf16.mxu1 %v12048_v6  ;;  %v12053_v9 = vld [vmem:[%s17198_s1 + $0xc0] ss:$48 sps:$4 sm:$0xff]   ;;  %v12054_v10 = vld [vmem:[%s17198_s1 + $0xcc] ss:$48 sps:$4 sm:$0xff]   ;;  %v12056_v11 = vld [vmem:[%s17198_s1 + $0x124] ss:$48 sps:$4 sm:$0xff]  }
   0x5   :  { %v12058_v12 = vld [vmem:[%s17198_s1 + $0xc8] ss:$48 sps:$4 sm:$0xff]   ;;  %v12060_v13 = vld [vmem:[%s17198_s1 + $0x12c] ss:$48 sps:$4 sm:$0xff]   ;;  %v12059_v14 = vld [vmem:[%s17198_s1 + $0x120] ss:$48 sps:$4 sm:$0xff]  }
   0x6   :  { %v12062_v15 = vld [vmem:[%s17198_s1 + $0x184] ss:$48 sps:$4 sm:$0xff]   ;;  %v12064_v16 = vld [vmem:[%s17198_s1 + $0x128] ss:$48 sps:$4 sm:$0xff]   ;;  %v12066_v17 = vld [vmem:[%s17198_s1 + $0x18c] ss:$48 sps:$4 sm:$0xff]  }
   0x7   :  { %2414 = vmatpush1.bf16.msra.mxu0 %v12047_v5  ;;  %2496 = vmatpush1.bf16.msra.mxu1 %v12052_v8  ;;  %v12065_v18 = vld [vmem:[%s17198_s1 + $0x180] ss:$48 sps:$4 sm:$0xff]   ;;  %v12068_v19 = vld [vmem:[%s17198_s1 + $0x1e4] ss:$48 sps:$4 sm:$0xff]   ;;  %v12070_v20 = vld [vmem:[%s17198_s1 + $0x188] ss:$48 sps:$4 sm:$0xff]  }
   0x8   :  { %2415 = vmatprep.subr.bf16.mxu0 %v12050_v7  ;;  %2497 = vmatprep.subr.bf16.mxu1 %v12054_v10  ;;  %v12072_v21 = vld [vmem:[%s17198_s1 + $0x1ec] ss:$48 sps:$4 sm:$0xff]   ;;  %v12071_v22 = vld [vmem:[%s17198_s1 + $0x1e0] ss:$48 sps:$4 sm:$0xff]   ;;  %v12074_v23 = vld [vmem:[%s17198_s1 + $0x244] ss:$48 sps:$4 sm:$0xff]  }
   0x9   :  { %v12076_v24 = vld [vmem:[%s17198_s1 + $0x1e8] ss:$48 sps:$4 sm:$0xff]   ;;  %v12078_v25 = vld [vmem:[%s17198_s1 + $0x24c] ss:$48 sps:$4 sm:$0xff]   ;;  %v12077_v26 = vld [vmem:[%s17198_s1 + $0x240] ss:$48 sps:$4 sm:$0xff]  }
   0xa   :  { %v12080_v27 = vld [vmem:[%s17198_s1 + $0x2a4] ss:$48 sps:$4 sm:$0xff]   ;;  %v12082_v28 = vld [vmem:[%s17198_s1 + $0x248] ss:$48 sps:$4 sm:$0xff]   ;;  %v12084_v29 = vld [vmem:[%s17198_s1 + $0x2ac] ss:$48 sps:$4 sm:$0xff]  }
   0xb   :  { %2416 = vmatpush1.bf16.msra.mxu0 %v12053_v9  ;;  %2498 = vmatpush1.bf16.msra.mxu1 %v12058_v12  ;;  %v12083_v30 = vld [vmem:[%s17198_s1 + $0x2a0] ss:$48 sps:$4 sm:$0xff]   ;;  %v12086_v31 = vld [vmem:[%s17198_s1 + $0x304] ss:$48 sps:$4 sm:$0xff]   ;;  %v12088_v32 = vld [vmem:[%s17198_s1 + $0x2a8] ss:$48 sps:$4 sm:$0xff]  }
   0xc   :  { %2417 = vmatprep.subr.bf16.mxu0 %v12056_v11  ;;  %2499 = vmatprep.subr.bf16.mxu1 %v12060_v13  ;;  %v12090_v33 = vld [vmem:[%s17198_s1 + $0x30c] ss:$48 sps:$4 sm:$0xff]   ;;  %v12089_v34 = vld [vmem:[%s17198_s1 + $0x300] ss:$48 sps:$4 sm:$0xff]   ;;  %v12092_v35 = vld [vmem:[%s17198_s1 + $0x364] ss:$48 sps:$4 sm:$0xff]  }
   0xd   :  { %v12094_v36 = vld [vmem:[%s17198_s1 + $0x308] ss:$48 sps:$4 sm:$0xff]   ;;  %v12096_v37 = vld [vmem:[%s17198_s1 + $0x36c] ss:$48 sps:$4 sm:$0xff]   ;;  %v12095_v38 = vld [vmem:[%s17198_s1 + $0x360] ss:$48 sps:$4 sm:$0xff]  }
   0xe   :  { %v12098_v39 = vld [vmem:[%s17198_s1 + $0x3c4] ss:$48 sps:$4 sm:$0xff]   ;;  %v12100_v40 = vld [vmem:[%s17198_s1 + $0x368] ss:$48 sps:$4 sm:$0xff]   ;;  %v12102_v41 = vld [vmem:[%s17198_s1 + $0x3cc] ss:$48 sps:$4 sm:$0xff]  }
   0xf   :  { %2418 = vmatpush1.bf16.msra.mxu0 %v12059_v14  ;;  %2500 = vmatpush1.bf16.msra.mxu1 %v12064_v16  ;;  %v12101_v42 = vld [vmem:[%s17198_s1 + $0x3c0] ss:$48 sps:$4 sm:$0xff]   ;;  %v12104_v43 = vld [vmem:[%s17198_s1 + $0x424] ss:$48 sps:$4 sm:$0xff]   ;;  %v12106_v44 = vld [vmem:[%s17198_s1 + $0x3c8] ss:$48 sps:$4 sm:$0xff]  }
  0x10   :  { %2419 = vmatprep.subr.bf16.mxu0 %v12062_v15  ;;  %2501 = vmatprep.subr.bf16.mxu1 %v12066_v17  ;;  %v12108_v45 = vld [vmem:[%s17198_s1 + $0x42c] ss:$48 sps:$4 sm:$0xff]   ;;  %v27_v46 = vld [vmem:[%s17199_s0] sm:$0xff]  ;;  %v12112_v50 = vld [vmem:[%s17198_s1 + $0x428] ss:$48 sps:$4 sm:$0xff]  }
  0x11   :  { %v12107_v47 = vld [vmem:[%s17198_s1 + $0x420] ss:$48 sps:$4 sm:$0xff]   ;;  %v12946_v48 = vcombine.high %v27_v46, %v27_v46  ;;  %v12110_v49 = vld [vmem:[%s17198_s1 + $0x484] ss:$48 sps:$4 sm:$0xff]   ;;  %v12114_v51 = vld [vmem:[%s17198_s1 + $0x48c] ss:$48 sps:$4 sm:$0xff]   ;;  %v13004_v3 = vcombine.low %v27_v46, %v27_v46 }
  0x12   :  { %v12113_v52 = vld [vmem:[%s17198_s1 + $0x480] ss:$48 sps:$4 sm:$0xff]   ;;  %v12116_v53 = vld [vmem:[%s17198_s1 + $0x4e4] ss:$48 sps:$4 sm:$0xff]   ;;  %v12118_v54 = vld [vmem:[%s17198_s1 + $0x488] ss:$48 sps:$4 sm:$0xff]  }
  0x13   :  { %2420 = vmatpush1.bf16.msra.mxu0 %v12065_v18  ;;  %2502 = vmatpush1.bf16.msra.mxu1 %v12070_v20  ;;  %v12120_v55 = vld [vmem:[%s17198_s1 + $0x4ec] ss:$48 sps:$4 sm:$0xff]   ;;  %v12119_v56 = vld [vmem:[%s17198_s1 + $0x4e0] ss:$48 sps:$4 sm:$0xff]   ;;  %v12122_v57 = vld [vmem:[%s17198_s1 + $0x544] ss:$48 sps:$4 sm:$0xff]  }
  0x14   :  { %2421 = vmatprep.subr.bf16.mxu0 %v12068_v19  ;;  %2503 = vmatprep.subr.bf16.mxu1 %v12072_v21  ;;  %v12124_v58 = vld [vmem:[%s17198_s1 + $0x4e8] ss:$48 sps:$4 sm:$0xff]   ;;  %v12126_v59 = vld [vmem:[%s17198_s1 + $0x54c] ss:$48 sps:$4 sm:$0xff]   ;;  %v12125_v60 = vld [vmem:[%s17198_s1 + $0x540] ss:$48 sps:$4 sm:$0xff]  }
  0x15   :  { %2443 = vmatprep.mubr.bf16.mxu0 %v12946_v48  ;;  %2525 = vmatprep.mubr.bf16.mxu1 %v12946_v48  ;;  %v12128_v61 = vld [vmem:[%s17198_s1 + $0x5a4] ss:$48 sps:$4 sm:$0xff]   ;;  %v12130_v62 = vld [vmem:[%s17198_s1 + $0x548] ss:$48 sps:$4 sm:$0xff]   ;;  %v12132_v63 = vld [vmem:[%s17198_s1 + $0x5ac] ss:$48 sps:$4 sm:$0xff]  }
  0x16   :  { %v12131_v0 = vld [vmem:[%s17198_s1 + $0x5a0] ss:$48 sps:$4 sm:$0xff]   ;;  %v12137_v1 = vld [vmem:[%s17198_s1 + $0x604] ss:$48 sps:$4 sm:$0xff]   ;;  %v12138_v2 = vld [vmem:[%s17198_s1 + $0x5a8] ss:$48 sps:$4 sm:$0xff]  }
  0x17   :  { %2422 = vmatpush1.bf16.msra.mxu0 %v12071_v22  ;;  %2504 = vmatpush1.bf16.msra.mxu1 %v12076_v24  ;;  %v12142_v4 = vld [vmem:[%s17198_s1 + $0x60c] ss:$48 sps:$4 sm:$0xff]   ;;  %v12135_v5 = vld [vmem:[%s17198_s1 + $0x600] ss:$48 sps:$4 sm:$0xff]   ;;  %v12145_v6 = vld [vmem:[%s17198_s1 + $0x664] ss:$48 sps:$4 sm:$0xff]  }
  0x18   :  { %2423 = vmatprep.subr.bf16.mxu0 %v12074_v23  ;;  %2505 = vmatprep.subr.bf16.mxu1 %v12078_v25  ;;  %v12140_v7 = vld [vmem:[%s17198_s1 + $0x608] ss:$48 sps:$4 sm:$0xff]   ;;  %v12148_v8 = vld [vmem:[%s17198_s1 + $0x66c] ss:$48 sps:$4 sm:$0xff]   ;;  %v12143_v9 = vld [vmem:[%s17198_s1 + $0x660] ss:$48 sps:$4 sm:$0xff]  }
  0x19   :  { %v12151_v10 = vld [vmem:[%s17198_s1 + $0x6c4] ss:$48 sps:$4 sm:$0xff]   ;;  %v12146_v11 = vld [vmem:[%s17198_s1 + $0x668] ss:$48 sps:$4 sm:$0xff]   ;;  %v12154_v12 = vld [vmem:[%s17198_s1 + $0x6cc] ss:$48 sps:$4 sm:$0xff]  }
  0x1a   :  { %v12149_v13 = vld [vmem:[%s17198_s1 + $0x6c0] ss:$48 sps:$4 sm:$0xff]   ;;  %v12157_v14 = vld [vmem:[%s17198_s1 + $0x724] ss:$48 sps:$4 sm:$0xff]   ;;  %v12152_v15 = vld [vmem:[%s17198_s1 + $0x6c8] ss:$48 sps:$4 sm:$0xff]  }
  0x1b   :  { %2424 = vmatpush1.bf16.msra.mxu0 %v12077_v26  ;;  %2506 = vmatpush1.bf16.msra.mxu1 %v12082_v28  ;;  %v12160_v16 = vld [vmem:[%s17198_s1 + $0x72c] ss:$48 sps:$4 sm:$0xff]   ;;  %v12155_v17 = vld [vmem:[%s17198_s1 + $0x720] ss:$48 sps:$4 sm:$0xff]   ;;  %v12163_v18 = vld [vmem:[%s17198_s1 + $0x784] ss:$48 sps:$4 sm:$0xff]  }
  0x1c   :  { %2425 = vmatprep.subr.bf16.mxu0 %v12080_v27  ;;  %2507 = vmatprep.subr.bf16.mxu1 %v12084_v29  ;;  %v12158_v19 = vld [vmem:[%s17198_s1 + $0x728] ss:$48 sps:$4 sm:$0xff]   ;;  %v12166_v20 = vld [vmem:[%s17198_s1 + $0x78c] ss:$48 sps:$4 sm:$0xff]   ;;  %v12161_v21 = vld [vmem:[%s17198_s1 + $0x780] ss:$48 sps:$4 sm:$0xff]  }
  0x1d   :  { %v12169_v22 = vld [vmem:[%s17198_s1 + $0x7e4] ss:$48 sps:$4 sm:$0xff]   ;;  %v12164_v23 = vld [vmem:[%s17198_s1 + $0x788] ss:$48 sps:$4 sm:$0xff]   ;;  %v12172_v24 = vld [vmem:[%s17198_s1 + $0x7ec] ss:$48 sps:$4 sm:$0xff]  }
  0x1e   :  { %v12167_v25 = vld [vmem:[%s17198_s1 + $0x7e0] ss:$48 sps:$4 sm:$0xff]   ;;  %v12175_v26 = vld [vmem:[%s17198_s1 + $0x844] ss:$48 sps:$4 sm:$0xff]   ;;  %v13080_v27 = vld [vmem:[%s17199_s0 + $0x8] sm:$0xff] }
  0x1f   :  { %2426 = vmatpush1.bf16.msra.mxu0 %v12083_v30  ;;  %2508 = vmatpush1.bf16.msra.mxu1 %v12088_v32  ;;  %v12170_v28 = vld [vmem:[%s17198_s1 + $0x7e8] ss:$48 sps:$4 sm:$0xff]   ;;  %v13087_v29 = vcombine.high %v13080_v27, %v13080_v27  ;;  %v12178_v30 = vld [vmem:[%s17198_s1 + $0x84c] ss:$48 sps:$4 sm:$0xff]   ;;  %v12181_v32 = vld [vmem:[%s17198_s1 + $0x8a4] ss:$48 sps:$4 sm:$0xff]  }
  0x20   :  { %2427 = vmatprep.subr.bf16.mxu0 %v12086_v31  ;;  %2509 = vmatprep.subr.bf16.mxu1 %v12090_v33  ;;  %v12173_v31 = vld [vmem:[%s17198_s1 + $0x840] ss:$48 sps:$4 sm:$0xff]   ;;  %v12176_v33 = vld [vmem:[%s17198_s1 + $0x848] ss:$48 sps:$4 sm:$0xff]   ;;  %v12202_v46 = vld [vmem:[%s17198_s1 + $0x9cc] ss:$48 sps:$4 sm:$0xff]  }
  0x23   :  { %2428 = vmatpush1.bf16.msra.mxu0 %v12089_v34  ;;  %2510 = vmatpush1.bf16.msra.mxu1 %v12094_v36  ;;  %v12184_v34 = vld [vmem:[%s17198_s1 + $0x8ac] ss:$48 sps:$4 sm:$0xff]   ;;  %v12187_v36 = vld [vmem:[%s17198_s1 + $0x904] ss:$48 sps:$4 sm:$0xff]  }
  0x24   :  { %2429 = vmatprep.subr.bf16.mxu0 %v12092_v35  ;;  %2511 = vmatprep.subr.bf16.mxu1 %v12096_v37  ;;  %v12179_v35 = vld [vmem:[%s17198_s1 + $0x8a0] ss:$48 sps:$4 sm:$0xff]   ;;  %v12182_v37 = vld [vmem:[%s17198_s1 + $0x8a8] ss:$48 sps:$4 sm:$0xff]  }
  0x27   :  { %2430 = vmatpush1.bf16.msra.mxu0 %v12095_v38  ;;  %2512 = vmatpush1.bf16.msra.mxu1 %v12100_v40  ;;  %v12190_v38 = vld [vmem:[%s17198_s1 + $0x90c] ss:$48 sps:$4 sm:$0xff]   ;;  %v12193_v40 = vld [vmem:[%s17198_s1 + $0x964] ss:$48 sps:$4 sm:$0xff]  }
  0x28   :  { %2431 = vmatprep.subr.bf16.mxu0 %v12098_v39  ;;  %2513 = vmatprep.subr.bf16.mxu1 %v12102_v41  ;;  %v12185_v39 = vld [vmem:[%s17198_s1 + $0x900] ss:$48 sps:$4 sm:$0xff]   ;;  %v12188_v41 = vld [vmem:[%s17198_s1 + $0x908] ss:$48 sps:$4 sm:$0xff]  }
  0x2b   :  { %2432 = vmatpush1.bf16.msra.mxu0 %v12101_v42  ;;  %2514 = vmatpush1.bf16.msra.mxu1 %v12106_v44  ;;  %v12196_v42 = vld [vmem:[%s17198_s1 + $0x96c] ss:$48 sps:$4 sm:$0xff]   ;;  %v12199_v44 = vld [vmem:[%s17198_s1 + $0x9c4] ss:$48 sps:$4 sm:$0xff]  }
  0x2c   :  { %2433 = vmatprep.subr.bf16.mxu0 %v12104_v43  ;;  %2515 = vmatprep.subr.bf16.mxu1 %v12108_v45  ;;  %v12191_v43 = vld [vmem:[%s17198_s1 + $0x960] ss:$48 sps:$4 sm:$0xff]   ;;  %v12194_v45 = vld [vmem:[%s17198_s1 + $0x968] ss:$48 sps:$4 sm:$0xff]  }
  0x2f   :  { %2434 = vmatpush1.bf16.msra.mxu0 %v12107_v47  ;;  %2516 = vmatpush1.bf16.msra.mxu1 %v12112_v50  ;;  %v12197_v47 = vld [vmem:[%s17198_s1 + $0x9c0] ss:$48 sps:$4 sm:$0xff]   ;;  %v12200_v50 = vld [vmem:[%s17198_s1 + $0x9c8] ss:$48 sps:$4 sm:$0xff]  }
  0x30   :  { %2435 = vmatprep.subr.bf16.mxu0 %v12110_v49  ;;  %2517 = vmatprep.subr.bf16.mxu1 %v12114_v51  ;;  %v12205_v49 = vld [vmem:[%s17198_s1 + $0xa24] ss:$48 sps:$4 sm:$0xff]   ;;  %v12208_v51 = vld [vmem:[%s17198_s1 + $0xa2c] ss:$48 sps:$4 sm:$0xff]  }
  0x33   :  { %2436 = vmatpush1.bf16.msra.mxu0 %v12113_v52  ;;  %2518 = vmatpush1.bf16.msra.mxu1 %v12118_v54  ;;  %v12203_v52 = vld [vmem:[%s17198_s1 + $0xa20] ss:$48 sps:$4 sm:$0xff]   ;;  %v12206_v54 = vld [vmem:[%s17198_s1 + $0xa28] ss:$48 sps:$4 sm:$0xff]  }
  0x34   :  { %2437 = vmatprep.subr.bf16.mxu0 %v12116_v53  ;;  %2519 = vmatprep.subr.bf16.mxu1 %v12120_v55  ;;  %v12211_v53 = vld [vmem:[%s17198_s1 + $0xa84] ss:$48 sps:$4 sm:$0xff]   ;;  %v12214_v55 = vld [vmem:[%s17198_s1 + $0xa8c] ss:$48 sps:$4 sm:$0xff]  }
  0x37   :  { %2438 = vmatpush1.bf16.msra.mxu0 %v12119_v56  ;;  %2520 = vmatpush1.bf16.msra.mxu1 %v12124_v58  ;;  %v12209_v56 = vld [vmem:[%s17198_s1 + $0xa80] ss:$48 sps:$4 sm:$0xff]   ;;  %v12212_v58 = vld [vmem:[%s17198_s1 + $0xa88] ss:$48 sps:$4 sm:$0xff]  }
  0x38   :  { %2439 = vmatprep.subr.bf16.mxu0 %v12122_v57  ;;  %2521 = vmatprep.subr.bf16.mxu1 %v12126_v59  ;;  %v12217_v57 = vld [vmem:[%s17198_s1 + $0xae4] ss:$48 sps:$4 sm:$0xff]   ;;  %v12220_v59 = vld [vmem:[%s17198_s1 + $0xaec] ss:$48 sps:$4 sm:$0xff]  }
  0x3b   :  { %2440 = vmatpush1.bf16.msra.mxu0 %v12125_v60  ;;  %2522 = vmatpush1.bf16.msra.mxu1 %v12130_v62  ;;  %v12215_v60 = vld [vmem:[%s17198_s1 + $0xae0] ss:$48 sps:$4 sm:$0xff]   ;;  %v12218_v62 = vld [vmem:[%s17198_s1 + $0xae8] ss:$48 sps:$4 sm:$0xff]  }
  0x3c   :  { %2441 = vmatprep.subr.bf16.mxu0 %v12128_v61  ;;  %2523 = vmatprep.subr.bf16.mxu1 %v12132_v63  ;;  %v12223_v61 = vld [vmem:[%s17198_s1 + $0xb44] ss:$48 sps:$4 sm:$0xff]   ;;  %v12226_v63 = vld [vmem:[%s17198_s1 + $0xb4c] ss:$48 sps:$4 sm:$0xff]  }
  0x3f   :  { %2442 = vmatpush1.bf16.msra.mxu0 %v12131_v0  ;;  %2524 = vmatpush1.bf16.msra.mxu1 %v12138_v2  ;;  %v12221_v0 = vld [vmem:[%s17198_s1 + $0xb40] ss:$48 sps:$4 sm:$0xff]   ;;  %v12224_v2 = vld [vmem:[%s17198_s1 + $0xb48] ss:$48 sps:$4 sm:$0xff]  }
  0x40   :  { %2452 = vmatprep.subr.bf16.mxu0 %v12137_v1  ;;  %2534 = vmatprep.subr.bf16.mxu1 %v12142_v4  ;;  %v12229_v1 = vld [vmem:[%s17198_s1 + $0xba4] ss:$48 sps:$4 sm:$0xff]   ;;  %v12233_v4 = vld [vmem:[%s17198_s1 + $0xbac] ss:$48 sps:$4 sm:$0xff]  }
  0x42   :  { %2444 = vmatmul.mubr.bf16.vlgmr.msra.gmra.mrb[0].mxu0 %v13004_v3  ;;  %2526 = vmatmul.mubr.bf16.vlgmr.msra.gmra.mrb[0].mxu1 %v13004_v3 }
  0x43   :  { %2453 = vmatpush1.bf16.msra.mxu0 %v12135_v5  ;;  %2535 = vmatpush1.bf16.msra.mxu1 %v12140_v7  ;;  %v12227_v5 = vld [vmem:[%s17198_s1 + $0xba0] ss:$48 sps:$4 sm:$0xff]   ;;  %v12231_v7 = vld [vmem:[%s17198_s1 + $0xba8] ss:$48 sps:$4 sm:$0xff]  }
  0x44   :  { %2454 = vmatprep.subr.bf16.mxu0 %v12145_v6  ;;  %2536 = vmatprep.subr.bf16.mxu1 %v12148_v8  ;;  %v12237_v6 = vld [vmem:[%s17198_s1 + $0x14] ss:$48 sps:$4 sm:$0xff]   ;;  %v13213_v8 = vcombine.low %v13080_v27, %v13080_v27 }
  0x45   :  { %2484 = vmatprep.mubr.bf16.mxu0 %v13087_v29  ;;  %2566 = vmatprep.mubr.bf16.mxu1 %v13087_v29  ;;  %v12264_v27 = vld [vmem:[%s17198_s1 + $0x1f4] ss:$48 sps:$4 sm:$0xff]  }
  0x47   :  { %2455 = vmatpush1.bf16.msra.mxu0 %v12143_v9  ;;  %2537 = vmatpush1.bf16.msra.mxu1 %v12146_v11  ;;  %v12243_v9 = vld [vmem:[%s17198_s1 + $0x1c] ss:$48 sps:$4 sm:$0xff]   ;;  %v12240_v11 = vld [vmem:[%s17198_s1 + $0x74] ss:$48 sps:$4 sm:$0xff]  }
  0x48   :  { %2456 = vmatprep.subr.bf16.mxu0 %v12151_v10  ;;  %2538 = vmatprep.subr.bf16.mxu1 %v12154_v12  ;;  %v12235_v10 = vld [vmem:[%s17198_s1 + $0x10] ss:$48 sps:$4 sm:$0xff]   ;;  %v12241_v12 = vld [vmem:[%s17198_s1 + $0x18] ss:$48 sps:$4 sm:$0xff]  }
  0x4b   :  { %2457 = vmatpush1.bf16.msra.mxu0 %v12149_v13  ;;  %2539 = vmatpush1.bf16.msra.mxu1 %v12152_v15  ;;  %v12249_v13 = vld [vmem:[%s17198_s1 + $0x7c] ss:$48 sps:$4 sm:$0xff]   ;;  %v12246_v15 = vld [vmem:[%s17198_s1 + $0xd4] ss:$48 sps:$4 sm:$0xff]  }
  0x4c   :  { %2458 = vmatprep.subr.bf16.mxu0 %v12157_v14  ;;  %2540 = vmatprep.subr.bf16.mxu1 %v12160_v16  ;;  %v12238_v14 = vld [vmem:[%s17198_s1 + $0x70] ss:$48 sps:$4 sm:$0xff]   ;;  %v12247_v16 = vld [vmem:[%s17198_s1 + $0x78] ss:$48 sps:$4 sm:$0xff]  }
  0x4f   :  { %2459 = vmatpush1.bf16.msra.mxu0 %v12155_v17  ;;  %2541 = vmatpush1.bf16.msra.mxu1 %v12158_v19  ;;  %v12255_v17 = vld [vmem:[%s17198_s1 + $0xdc] ss:$48 sps:$4 sm:$0xff]   ;;  %v12252_v19 = vld [vmem:[%s17198_s1 + $0x134] ss:$48 sps:$4 sm:$0xff]  }
  0x50   :  { %2460 = vmatprep.subr.bf16.mxu0 %v12163_v18  ;;  %2542 = vmatprep.subr.bf16.mxu1 %v12166_v20  ;;  %v12244_v18 = vld [vmem:[%s17198_s1 + $0xd0] ss:$48 sps:$4 sm:$0xff]   ;;  %v12253_v20 = vld [vmem:[%s17198_s1 + $0xd8] ss:$48 sps:$4 sm:$0xff]  }
  0x53   :  { %2461 = vmatpush1.bf16.msra.mxu0 %v12161_v21  ;;  %2543 = vmatpush1.bf16.msra.mxu1 %v12164_v23  ;;  %v12261_v21 = vld [vmem:[%s17198_s1 + $0x13c] ss:$48 sps:$4 sm:$0xff]   ;;  %v12258_v23 = vld [vmem:[%s17198_s1 + $0x194] ss:$48 sps:$4 sm:$0xff]  }
  0x54   :  { %2462 = vmatprep.subr.bf16.mxu0 %v12169_v22  ;;  %2544 = vmatprep.subr.bf16.mxu1 %v12172_v24  ;;  %v12250_v22 = vld [vmem:[%s17198_s1 + $0x130] ss:$48 sps:$4 sm:$0xff]   ;;  %v12259_v24 = vld [vmem:[%s17198_s1 + $0x138] ss:$48 sps:$4 sm:$0xff]  }
  0x57   :  { %2463 = vmatpush1.bf16.msra.mxu0 %v12167_v25  ;;  %2545 = vmatpush1.bf16.msra.mxu1 %v12170_v28  ;;  %v12267_v25 = vld [vmem:[%s17198_s1 + $0x19c] ss:$48 sps:$4 sm:$0xff]   ;;  %v12265_v28 = vld [vmem:[%s17198_s1 + $0x198] ss:$48 sps:$4 sm:$0xff]  }
  0x58   :  { %2464 = vmatprep.subr.bf16.mxu0 %v12175_v26  ;;  %2546 = vmatprep.subr.bf16.mxu1 %v12178_v30  ;;  %v12256_v26 = vld [vmem:[%s17198_s1 + $0x190] ss:$48 sps:$4 sm:$0xff]   ;;  %v12273_v30 = vld [vmem:[%s17198_s1 + $0x1fc] ss:$48 sps:$4 sm:$0xff]  }
  0x5b   :  { %2465 = vmatpush1.bf16.msra.mxu0 %v12173_v31  ;;  %2547 = vmatpush1.bf16.msra.mxu1 %v12176_v33  ;;  %v12262_v31 = vld [vmem:[%s17198_s1 + $0x1f0] ss:$48 sps:$4 sm:$0xff]   ;;  %v12271_v33 = vld [vmem:[%s17198_s1 + $0x1f8] ss:$48 sps:$4 sm:$0xff]  }
  0x5c   :  { %2466 = vmatprep.subr.bf16.mxu0 %v12181_v32  ;;  %2548 = vmatprep.subr.bf16.mxu1 %v12184_v34  ;;  %v12270_v32 = vld [vmem:[%s17198_s1 + $0x254] ss:$48 sps:$4 sm:$0xff]   ;;  %v12279_v34 = vld [vmem:[%s17198_s1 + $0x25c] ss:$48 sps:$4 sm:$0xff]  }
  0x5f   :  { %2467 = vmatpush1.bf16.msra.mxu0 %v12179_v35  ;;  %2549 = vmatpush1.bf16.msra.mxu1 %v12182_v37  ;;  %v12268_v35 = vld [vmem:[%s17198_s1 + $0x250] ss:$48 sps:$4 sm:$0xff]   ;;  %v12277_v37 = vld [vmem:[%s17198_s1 + $0x258] ss:$48 sps:$4 sm:$0xff]  }
  0x60   :  { %2468 = vmatprep.subr.bf16.mxu0 %v12187_v36  ;;  %2550 = vmatprep.subr.bf16.mxu1 %v12190_v38  ;;  %v12276_v36 = vld [vmem:[%s17198_s1 + $0x2b4] ss:$48 sps:$4 sm:$0xff]   ;;  %v12285_v38 = vld [vmem:[%s17198_s1 + $0x2bc] ss:$48 sps:$4 sm:$0xff]  }
  0x63   :  { %2469 = vmatpush1.bf16.msra.mxu0 %v12185_v39  ;;  %2551 = vmatpush1.bf16.msra.mxu1 %v12188_v41  ;;  %v12274_v39 = vld [vmem:[%s17198_s1 + $0x2b0] ss:$48 sps:$4 sm:$0xff]   ;;  %v12283_v41 = vld [vmem:[%s17198_s1 + $0x2b8] ss:$48 sps:$4 sm:$0xff]  }
  0x64   :  { %2470 = vmatprep.subr.bf16.mxu0 %v12193_v40  ;;  %2552 = vmatprep.subr.bf16.mxu1 %v12196_v42  ;;  %v12282_v40 = vld [vmem:[%s17198_s1 + $0x314] ss:$48 sps:$4 sm:$0xff]   ;;  %v12291_v42 = vld [vmem:[%s17198_s1 + $0x31c] ss:$48 sps:$4 sm:$0xff]  }
  0x67   :  { %2471 = vmatpush1.bf16.msra.mxu0 %v12191_v43  ;;  %2553 = vmatpush1.bf16.msra.mxu1 %v12194_v45  ;;  %v12280_v43 = vld [vmem:[%s17198_s1 + $0x310] ss:$48 sps:$4 sm:$0xff]   ;;  %v12289_v45 = vld [vmem:[%s17198_s1 + $0x318] ss:$48 sps:$4 sm:$0xff]  }
  0x68   :  { %2472 = vmatprep.subr.bf16.mxu0 %v12199_v44  ;;  %2554 = vmatprep.subr.bf16.mxu1 %v12202_v46  ;;  %v12288_v44 = vld [vmem:[%s17198_s1 + $0x374] ss:$48 sps:$4 sm:$0xff]   ;;  %v12297_v46 = vld [vmem:[%s17198_s1 + $0x37c] ss:$48 sps:$4 sm:$0xff]  }
  0x6b   :  { %2473 = vmatpush1.bf16.msra.mxu0 %v12197_v47  ;;  %2555 = vmatpush1.bf16.msra.mxu1 %v12200_v50  ;;  %v12286_v47 = vld [vmem:[%s17198_s1 + $0x370] ss:$48 sps:$4 sm:$0xff]   ;;  %v12295_v50 = vld [vmem:[%s17198_s1 + $0x378] ss:$48 sps:$4 sm:$0xff]  }
  0x6c   :  { %2474 = vmatprep.subr.bf16.mxu0 %v12205_v49  ;;  %2556 = vmatprep.subr.bf16.mxu1 %v12208_v51  ;;  %v12294_v49 = vld [vmem:[%s17198_s1 + $0x3d4] ss:$48 sps:$4 sm:$0xff]   ;;  %v12303_v51 = vld [vmem:[%s17198_s1 + $0x3dc] ss:$48 sps:$4 sm:$0xff]  }
  0x6f   :  { %2475 = vmatpush1.bf16.msra.mxu0 %v12203_v52  ;;  %2557 = vmatpush1.bf16.msra.mxu1 %v12206_v54  ;;  %v12292_v52 = vld [vmem:[%s17198_s1 + $0x3d0] ss:$48 sps:$4 sm:$0xff]   ;;  %v12301_v54 = vld [vmem:[%s17198_s1 + $0x3d8] ss:$48 sps:$4 sm:$0xff]  }
  0x70   :  { %2476 = vmatprep.subr.bf16.mxu0 %v12211_v53  ;;  %2558 = vmatprep.subr.bf16.mxu1 %v12214_v55  ;;  %v12300_v53 = vld [vmem:[%s17198_s1 + $0x434] ss:$48 sps:$4 sm:$0xff]   ;;  %v12309_v55 = vld [vmem:[%s17198_s1 + $0x43c] ss:$48 sps:$4 sm:$0xff]  }
  0x73   :  { %2477 = vmatpush1.bf16.msra.mxu0 %v12209_v56  ;;  %2559 = vmatpush1.bf16.msra.mxu1 %v12212_v58  ;;  %v12298_v56 = vld [vmem:[%s17198_s1 + $0x430] ss:$48 sps:$4 sm:$0xff]   ;;  %v12307_v58 = vld [vmem:[%s17198_s1 + $0x438] ss:$48 sps:$4 sm:$0xff]  }
  0x74   :  { %2478 = vmatprep.subr.bf16.mxu0 %v12217_v57  ;;  %2560 = vmatprep.subr.bf16.mxu1 %v12220_v59  ;;  %v12306_v57 = vld [vmem:[%s17198_s1 + $0x494] ss:$48 sps:$4 sm:$0xff]   ;;  %v12315_v59 = vld [vmem:[%s17198_s1 + $0x49c] ss:$48 sps:$4 sm:$0xff]  }
  0x77   :  { %2479 = vmatpush1.bf16.msra.mxu0 %v12215_v60  ;;  %2561 = vmatpush1.bf16.msra.mxu1 %v12218_v62  ;;  %v12304_v60 = vld [vmem:[%s17198_s1 + $0x490] ss:$48 sps:$4 sm:$0xff]   ;;  %v12313_v62 = vld [vmem:[%s17198_s1 + $0x498] ss:$48 sps:$4 sm:$0xff]  }
  0x78   :  { %2480 = vmatprep.subr.bf16.mxu0 %v12223_v61  ;;  %2562 = vmatprep.subr.bf16.mxu1 %v12226_v63  ;;  %v12312_v61 = vld [vmem:[%s17198_s1 + $0x4f4] ss:$48 sps:$4 sm:$0xff]   ;;  %v12321_v63 = vld [vmem:[%s17198_s1 + $0x4fc] ss:$48 sps:$4 sm:$0xff]  }
  0x7b   :  { %2481 = vmatpush1.bf16.msra.mxu0 %v12221_v0  ;;  %2563 = vmatpush1.bf16.msra.mxu1 %v12224_v2  ;;  %v12310_v0 = vld [vmem:[%s17198_s1 + $0x4f0] ss:$48 sps:$4 sm:$0xff]   ;;  %v12319_v2 = vld [vmem:[%s17198_s1 + $0x4f8] ss:$48 sps:$4 sm:$0xff]  }
  0x7c   :  { %2482 = vmatprep.subr.bf16.mxu0 %v12229_v1  ;;  %2564 = vmatprep.subr.bf16.mxu1 %v12233_v4  ;;  %v12318_v1 = vld [vmem:[%s17198_s1 + $0x554] ss:$48 sps:$4 sm:$0xff]   ;;  %v12327_v4 = vld [vmem:[%s17198_s1 + $0x55c] ss:$48 sps:$4 sm:$0xff]  }
  0x7f   :  { %2483 = vmatpush1.bf16.msra.mxu0 %v12227_v5  ;;  %2565 = vmatpush1.bf16.msra.mxu1 %v12231_v7  ;;  %v12316_v5 = vld [vmem:[%s17198_s1 + $0x550] ss:$48 sps:$4 sm:$0xff]   ;;  %v12325_v7 = vld [vmem:[%s17198_s1 + $0x558] ss:$48 sps:$4 sm:$0xff]  }
  0x80   :  { %2575 = vmatprep.subr.bf16.mxu0 %v12237_v6  ;;  %2657 = vmatprep.subr.bf16.mxu1 %v12243_v9  ;;  %v12324_v6 = vld [vmem:[%s17198_s1 + $0x5b4] ss:$48 sps:$4 sm:$0xff]   ;;  %v12333_v9 = vld [vmem:[%s17198_s1 + $0x5bc] ss:$48 sps:$4 sm:$0xff]  }
  0x82   :  { %2485 = vmatmul.mubr.bf16.vlgmr.msra.gmra.mrb[0].mxu0 %v13213_v8  ;;  %2567 = vmatmul.mubr.bf16.vlgmr.msra.gmra.mrb[0].mxu1 %v13213_v8 }
  0x83   :  { %2576 = vmatpush1.bf16.msra.mxu0 %v12235_v10  ;;  %2607 = vmatprep.mubr.bf16.mxu0 %v12946_v48  ;;  %v12322_v10 = vld [vmem:[%s17198_s1 + $0x5b0] ss:$48 sps:$4 sm:$0xff]  }
  0x84   :  { %2577 = vmatprep.subr.bf16.mxu0 %v12240_v11  ;;  %2658 = vmatpush1.bf16.msra.mxu1 %v12241_v12  ;;  %v12330_v11 = vld [vmem:[%s17198_s1 + $0x614] ss:$48 sps:$4 sm:$0xff]   ;;  %v12331_v12 = vld [vmem:[%s17198_s1 + $0x5b8] ss:$48 sps:$4 sm:$0xff]  }
  0x85   :  { %2689 = vmatprep.mubr.bf16.mxu1 %v12946_v48  ;;  %2659 = vmatprep.subr.bf16.mxu1 %v12249_v13  ;;  %v12339_v13 = vld [vmem:[%s17198_s1 + $0x61c] ss:$48 sps:$4 sm:$0xff]  }
  0x87   :  { %2578 = vmatpush1.bf16.msra.mxu0 %v12238_v14  ;;  %v12328_v14 = vld [vmem:[%s17198_s1 + $0x610] ss:$48 sps:$4 sm:$0xff]  }
  0x88   :  { %2579 = vmatprep.subr.bf16.mxu0 %v12246_v15  ;;  %2660 = vmatpush1.bf16.msra.mxu1 %v12247_v16  ;;  %v12336_v15 = vld [vmem:[%s17198_s1 + $0x674] ss:$48 sps:$4 sm:$0xff]   ;;  %v12337_v16 = vld [vmem:[%s17198_s1 + $0x618] ss:$48 sps:$4 sm:$0xff]  }
  0x89   :  { %2661 = vmatprep.subr.bf16.mxu1 %v12255_v17  ;;  %v12345_v17 = vld [vmem:[%s17198_s1 + $0x67c] ss:$48 sps:$4 sm:$0xff]  }
  0x8b   :  { %2580 = vmatpush1.bf16.msra.mxu0 %v12244_v18  ;;  %v12334_v18 = vld [vmem:[%s17198_s1 + $0x670] ss:$48 sps:$4 sm:$0xff]  }
  0x8c   :  { %2581 = vmatprep.subr.bf16.mxu0 %v12252_v19  ;;  %2662 = vmatpush1.bf16.msra.mxu1 %v12253_v20  ;;  %v12342_v19 = vld [vmem:[%s17198_s1 + $0x6d4] ss:$48 sps:$4 sm:$0xff]   ;;  %v12343_v20 = vld [vmem:[%s17198_s1 + $0x678] ss:$48 sps:$4 sm:$0xff]  }
  0x8d   :  { %2663 = vmatprep.subr.bf16.mxu1 %v12261_v21  ;;  %v12351_v21 = vld [vmem:[%s17198_s1 + $0x6dc] ss:$48 sps:$4 sm:$0xff]  }
  0x8f   :  { %2582 = vmatpush1.bf16.msra.mxu0 %v12250_v22  ;;  %v12340_v22 = vld [vmem:[%s17198_s1 + $0x6d0] ss:$48 sps:$4 sm:$0xff]  }
  0x90   :  { %2583 = vmatprep.subr.bf16.mxu0 %v12258_v23  ;;  %2664 = vmatpush1.bf16.msra.mxu1 %v12259_v24  ;;  %v12348_v23 = vld [vmem:[%s17198_s1 + $0x734] ss:$48 sps:$4 sm:$0xff]   ;;  %v12349_v24 = vld [vmem:[%s17198_s1 + $0x6d8] ss:$48 sps:$4 sm:$0xff]  }
  0x91   :  { %2665 = vmatprep.subr.bf16.mxu1 %v12267_v25  ;;  %v12357_v25 = vld [vmem:[%s17198_s1 + $0x73c] ss:$48 sps:$4 sm:$0xff]  }
  0x93   :  { %2584 = vmatpush1.bf16.msra.mxu0 %v12256_v26  ;;  %v12346_v26 = vld [vmem:[%s17198_s1 + $0x730] ss:$48 sps:$4 sm:$0xff]  }
  0x94   :  { %2585 = vmatprep.subr.bf16.mxu0 %v12264_v27  ;;  %2666 = vmatpush1.bf16.msra.mxu1 %v12265_v28  ;;  %v12354_v27 = vld [vmem:[%s17198_s1 + $0x794] ss:$48 sps:$4 sm:$0xff]   ;;  %v12355_v28 = vld [vmem:[%s17198_s1 + $0x738] ss:$48 sps:$4 sm:$0xff]  }
  0x95   :  { %2667 = vmatprep.subr.bf16.mxu1 %v12273_v30  ;;  %v12363_v30 = vld [vmem:[%s17198_s1 + $0x79c] ss:$48 sps:$4 sm:$0xff]  }
  0x97   :  { %2586 = vmatpush1.bf16.msra.mxu0 %v12262_v31  ;;  %v12352_v31 = vld [vmem:[%s17198_s1 + $0x790] ss:$48 sps:$4 sm:$0xff]  }
  0x98   :  { %2587 = vmatprep.subr.bf16.mxu0 %v12270_v32  ;;  %2668 = vmatpush1.bf16.msra.mxu1 %v12271_v33  ;;  %v12360_v32 = vld [vmem:[%s17198_s1 + $0x7f4] ss:$48 sps:$4 sm:$0xff]   ;;  %v12361_v33 = vld [vmem:[%s17198_s1 + $0x798] ss:$48 sps:$4 sm:$0xff]  }
  0x99   :  { %2669 = vmatprep.subr.bf16.mxu1 %v12279_v34  ;;  %v12369_v34 = vld [vmem:[%s17198_s1 + $0x7fc] ss:$48 sps:$4 sm:$0xff]  }
  0x9b   :  { %2588 = vmatpush1.bf16.msra.mxu0 %v12268_v35  ;;  %v12358_v35 = vld [vmem:[%s17198_s1 + $0x7f0] ss:$48 sps:$4 sm:$0xff]  }
  0x9c   :  { %2589 = vmatprep.subr.bf16.mxu0 %v12276_v36  ;;  %2670 = vmatpush1.bf16.msra.mxu1 %v12277_v37  ;;  %v12366_v36 = vld [vmem:[%s17198_s1 + $0x854] ss:$48 sps:$4 sm:$0xff]   ;;  %v12367_v37 = vld [vmem:[%s17198_s1 + $0x7f8] ss:$48 sps:$4 sm:$0xff]  }
  0x9d   :  { %2671 = vmatprep.subr.bf16.mxu1 %v12285_v38  ;;  %v12375_v38 = vld [vmem:[%s17198_s1 + $0x85c] ss:$48 sps:$4 sm:$0xff]  }
  0x9f   :  { %2590 = vmatpush1.bf16.msra.mxu0 %v12274_v39  ;;  %v12364_v39 = vld [vmem:[%s17198_s1 + $0x850] ss:$48 sps:$4 sm:$0xff]  }
  0xa0   :  { %2591 = vmatprep.subr.bf16.mxu0 %v12282_v40  ;;  %2672 = vmatpush1.bf16.msra.mxu1 %v12283_v41  ;;  %v12372_v40 = vld [vmem:[%s17198_s1 + $0x8b4] ss:$48 sps:$4 sm:$0xff]   ;;  %v12373_v41 = vld [vmem:[%s17198_s1 + $0x858] ss:$48 sps:$4 sm:$0xff]  }
  0xa1   :  { %2673 = vmatprep.subr.bf16.mxu1 %v12291_v42  ;;  %v12381_v42 = vld [vmem:[%s17198_s1 + $0x8bc] ss:$48 sps:$4 sm:$0xff]  }
  0xa3   :  { %2592 = vmatpush1.bf16.msra.mxu0 %v12280_v43  ;;  %v12370_v43 = vld [vmem:[%s17198_s1 + $0x8b0] ss:$48 sps:$4 sm:$0xff]  }
  0xa4   :  { %2593 = vmatprep.subr.bf16.mxu0 %v12288_v44  ;;  %2674 = vmatpush1.bf16.msra.mxu1 %v12289_v45  ;;  %v12378_v44 = vld [vmem:[%s17198_s1 + $0x914] ss:$48 sps:$4 sm:$0xff]   ;;  %v12379_v45 = vld [vmem:[%s17198_s1 + $0x8b8] ss:$48 sps:$4 sm:$0xff]  }
  0xa5   :  { %2675 = vmatprep.subr.bf16.mxu1 %v12297_v46  ;;  %v12387_v46 = vld [vmem:[%s17198_s1 + $0x91c] ss:$48 sps:$4 sm:$0xff]  }
  0xa7   :  { %2594 = vmatpush1.bf16.msra.mxu0 %v12286_v47  ;;  %v12376_v47 = vld [vmem:[%s17198_s1 + $0x910] ss:$48 sps:$4 sm:$0xff]  }
  0xa8   :  { %2595 = vmatprep.subr.bf16.mxu0 %v12294_v49  ;;  %2676 = vmatpush1.bf16.msra.mxu1 %v12295_v50  ;;  %v12384_v49 = vld [vmem:[%s17198_s1 + $0x974] ss:$48 sps:$4 sm:$0xff]   ;;  %v12385_v50 = vld [vmem:[%s17198_s1 + $0x918] ss:$48 sps:$4 sm:$0xff]  }
  0xa9   :  { %2677 = vmatprep.subr.bf16.mxu1 %v12303_v51  ;;  %v12393_v51 = vld [vmem:[%s17198_s1 + $0x97c] ss:$48 sps:$4 sm:$0xff]  }
  0xab   :  { %2596 = vmatpush1.bf16.msra.mxu0 %v12292_v52  ;;  %v12382_v52 = vld [vmem:[%s17198_s1 + $0x970] ss:$48 sps:$4 sm:$0xff]  }
  0xac   :  { %2597 = vmatprep.subr.bf16.mxu0 %v12300_v53  ;;  %2678 = vmatpush1.bf16.msra.mxu1 %v12301_v54  ;;  %v12390_v53 = vld [vmem:[%s17198_s1 + $0x9d4] ss:$48 sps:$4 sm:$0xff]   ;;  %v12391_v54 = vld [vmem:[%s17198_s1 + $0x978] ss:$48 sps:$4 sm:$0xff]  }
  0xad   :  { %2679 = vmatprep.subr.bf16.mxu1 %v12309_v55  ;;  %v12399_v55 = vld [vmem:[%s17198_s1 + $0x9dc] ss:$48 sps:$4 sm:$0xff]  }
  0xaf   :  { %2598 = vmatpush1.bf16.msra.mxu0 %v12298_v56  ;;  %v12388_v56 = vld [vmem:[%s17198_s1 + $0x9d0] ss:$48 sps:$4 sm:$0xff]  }
  0xb0   :  { %2599 = vmatprep.subr.bf16.mxu0 %v12306_v57  ;;  %2680 = vmatpush1.bf16.msra.mxu1 %v12307_v58  ;;  %v12396_v57 = vld [vmem:[%s17198_s1 + $0xa34] ss:$48 sps:$4 sm:$0xff]   ;;  %v12397_v58 = vld [vmem:[%s17198_s1 + $0x9d8] ss:$48 sps:$4 sm:$0xff]  }
  0xb1   :  { %2681 = vmatprep.subr.bf16.mxu1 %v12315_v59  ;;  %v12405_v59 = vld [vmem:[%s17198_s1 + $0xa3c] ss:$48 sps:$4 sm:$0xff]  }
  0xb3   :  { %2600 = vmatpush1.bf16.msra.mxu0 %v12304_v60  ;;  %v12394_v60 = vld [vmem:[%s17198_s1 + $0xa30] ss:$48 sps:$4 sm:$0xff]  }
  0xb4   :  { %2601 = vmatprep.subr.bf16.mxu0 %v12312_v61  ;;  %2682 = vmatpush1.bf16.msra.mxu1 %v12313_v62  ;;  %v12402_v61 = vld [vmem:[%s17198_s1 + $0xa94] ss:$48 sps:$4 sm:$0xff]   ;;  %v12403_v62 = vld [vmem:[%s17198_s1 + $0xa38] ss:$48 sps:$4 sm:$0xff]  }
  0xb5   :  { %2683 = vmatprep.subr.bf16.mxu1 %v12321_v63  ;;  %v12411_v63 = vld [vmem:[%s17198_s1 + $0xa9c] ss:$48 sps:$4 sm:$0xff]  }
  0xb7   :  { %2602 = vmatpush1.bf16.msra.mxu0 %v12310_v0  ;;  %v12400_v0 = vld [vmem:[%s17198_s1 + $0xa90] ss:$48 sps:$4 sm:$0xff]  }
  0xb8   :  { %2603 = vmatprep.subr.bf16.mxu0 %v12318_v1  ;;  %2684 = vmatpush1.bf16.msra.mxu1 %v12319_v2  ;;  %v12408_v1 = vld [vmem:[%s17198_s1 + $0xaf4] ss:$48 sps:$4 sm:$0xff]   ;;  %v12409_v2 = vld [vmem:[%s17198_s1 + $0xa98] ss:$48 sps:$4 sm:$0xff]  }
  0xb9   :  { %2685 = vmatprep.subr.bf16.mxu1 %v12327_v4  ;;  %v12417_v4 = vld [vmem:[%s17198_s1 + $0xafc] ss:$48 sps:$4 sm:$0xff]  }
  0xbb   :  { %2604 = vmatpush1.bf16.msra.mxu0 %v12316_v5  ;;  %v12406_v5 = vld [vmem:[%s17198_s1 + $0xaf0] ss:$48 sps:$4 sm:$0xff]  }
  0xbc   :  { %2605 = vmatprep.subr.bf16.mxu0 %v12324_v6  ;;  %2686 = vmatpush1.bf16.msra.mxu1 %v12325_v7  ;;  %v12414_v6 = vld [vmem:[%s17198_s1 + $0xb54] ss:$48 sps:$4 sm:$0xff]   ;;  %v12415_v7 = vld [vmem:[%s17198_s1 + $0xaf8] ss:$48 sps:$4 sm:$0xff]  }
  0xbd   :  { %2687 = vmatprep.subr.bf16.mxu1 %v12333_v9  ;;  %v12423_v9 = vld [vmem:[%s17198_s1 + $0xb5c] ss:$48 sps:$4 sm:$0xff]  }
  0xbf   :  { %2606 = vmatpush1.bf16.msra.mxu0 %v12322_v10  ;;  %v12412_v10 = vld [vmem:[%s17198_s1 + $0xb50] ss:$48 sps:$4 sm:$0xff]  }
  0xc0   :  { %2616 = vmatprep.subr.bf16.mxu0 %v12330_v11  ;;  %2688 = vmatpush1.bf16.msra.mxu1 %v12331_v12  ;;  %v12420_v11 = vld [vmem:[%s17198_s1 + $0xbb4] ss:$48 sps:$4 sm:$0xff]   ;;  %v12421_v12 = vld [vmem:[%s17198_s1 + $0xb58] ss:$48 sps:$4 sm:$0xff]  }
  0xc1   :  { %2698 = vmatprep.subr.bf16.mxu1 %v12339_v13  ;;  %v12426_v13 = vld [vmem:[%s17198_s1 + $0xbbc] ss:$48 sps:$4 sm:$0xff]  }
  0xc2   :  { %2608 = vmatmul.mubr.bf16.vlgmr.msra.gmra.mrb[4].mxu0 %v13004_v3 }
  0xc3   :  { %2617 = vmatpush1.bf16.msra.mxu0 %v12328_v14  ;;  %2648 = vmatprep.mubr.bf16.mxu0 %v13087_v29  ;;  %v12418_v14 = vld [vmem:[%s17198_s1 + $0xbb0] ss:$48 sps:$4 sm:$0xff]  }
  0xc4   :  { %2618 = vmatprep.subr.bf16.mxu0 %v12336_v15  ;;  %2690 = vmatmul.mubr.bf16.vlgmr.msra.gmra.mrb[4].mxu1 %v13004_v3  ;;  %v12429_v15 = vld [vmem:[%s17198_s1 + $0x24] ss:$48 sps:$4 sm:$0xff]  }
  0xc5   :  { %2699 = vmatpush1.bf16.msra.mxu1 %v12337_v16  ;;  %2730 = vmatprep.mubr.bf16.mxu1 %v13087_v29  ;;  %v12424_v16 = vld [vmem:[%s17198_s1 + $0xbb8] ss:$48 sps:$4 sm:$0xff]  }
  0xc6   :  { %2700 = vmatprep.subr.bf16.mxu1 %v12345_v17  ;;  %v12435_v17 = vld [vmem:[%s17198_s1 + $0x2c] ss:$48 sps:$4 sm:$0xff]  }
  0xc7   :  { %2619 = vmatpush1.bf16.msra.mxu0 %v12334_v18  ;;  %v12427_v18 = vld [vmem:[%s17198_s1 + $0x20] ss:$48 sps:$4 sm:$0xff]  }
  0xc8   :  { %2620 = vmatprep.subr.bf16.mxu0 %v12342_v19  ;;  %v12432_v19 = vld [vmem:[%s17198_s1 + $0x84] ss:$48 sps:$4 sm:$0xff]  }
  0xc9   :  { %2701 = vmatpush1.bf16.msra.mxu1 %v12343_v20  ;;  %v12433_v20 = vld [vmem:[%s17198_s1 + $0x28] ss:$48 sps:$4 sm:$0xff]  }
  0xca   :  { %2702 = vmatprep.subr.bf16.mxu1 %v12351_v21  ;;  %v12441_v21 = vld [vmem:[%s17198_s1 + $0x8c] ss:$48 sps:$4 sm:$0xff]  }
  0xcb   :  { %2621 = vmatpush1.bf16.msra.mxu0 %v12340_v22  ;;  %v12430_v22 = vld [vmem:[%s17198_s1 + $0x80] ss:$48 sps:$4 sm:$0xff]  }
  0xcc   :  { %2622 = vmatprep.subr.bf16.mxu0 %v12348_v23  ;;  %v12438_v23 = vld [vmem:[%s17198_s1 + $0xe4] ss:$48 sps:$4 sm:$0xff]  }
  0xcd   :  { %2703 = vmatpush1.bf16.msra.mxu1 %v12349_v24  ;;  %v12439_v24 = vld [vmem:[%s17198_s1 + $0x88] ss:$48 sps:$4 sm:$0xff]  }
  0xce   :  { %2704 = vmatprep.subr.bf16.mxu1 %v12357_v25  ;;  %v12447_v25 = vld [vmem:[%s17198_s1 + $0xec] ss:$48 sps:$4 sm:$0xff]  }
  0xcf   :  { %2623 = vmatpush1.bf16.msra.mxu0 %v12346_v26  ;;  %v12436_v26 = vld [vmem:[%s17198_s1 + $0xe0] ss:$48 sps:$4 sm:$0xff]  }
  0xd0   :  { %2624 = vmatprep.subr.bf16.mxu0 %v12354_v27  ;;  %v12444_v27 = vld [vmem:[%s17198_s1 + $0x144] ss:$48 sps:$4 sm:$0xff]  }
  0xd1   :  { %2705 = vmatpush1.bf16.msra.mxu1 %v12355_v28  ;;  %v12453_v28 = vld [vmem:[%s17198_s1 + $0x14c] ss:$48 sps:$4 sm:$0xff]  }
  0xd2   :  { %2706 = vmatprep.subr.bf16.mxu1 %v12363_v30  ;;  %v12442_v30 = vld [vmem:[%s17198_s1 + $0x140] ss:$48 sps:$4 sm:$0xff]  }
  0xd3   :  { %2625 = vmatpush1.bf16.msra.mxu0 %v12352_v31  ;;  %v12450_v31 = vld [vmem:[%s17198_s1 + $0x1a4] ss:$48 sps:$4 sm:$0xff]  }
  0xd4   :  { %2626 = vmatprep.subr.bf16.mxu0 %v12360_v32  ;;  %v12451_v32 = vld [vmem:[%s17198_s1 + $0x148] ss:$48 sps:$4 sm:$0xff]  }
  0xd5   :  { %2707 = vmatpush1.bf16.msra.mxu1 %v12361_v33  ;;  %v12459_v33 = vld [vmem:[%s17198_s1 + $0x1ac] ss:$48 sps:$4 sm:$0xff]  }
  0xd6   :  { %2708 = vmatprep.subr.bf16.mxu1 %v12369_v34  ;;  %v12448_v34 = vld [vmem:[%s17198_s1 + $0x1a0] ss:$48 sps:$4 sm:$0xff]  }
  0xd7   :  { %2627 = vmatpush1.bf16.msra.mxu0 %v12358_v35  ;;  %v12456_v35 = vld [vmem:[%s17198_s1 + $0x204] ss:$48 sps:$4 sm:$0xff]  }
  0xd8   :  { %2628 = vmatprep.subr.bf16.mxu0 %v12366_v36  ;;  %v12457_v36 = vld [vmem:[%s17198_s1 + $0x1a8] ss:$48 sps:$4 sm:$0xff]  }
  0xd9   :  { %2709 = vmatpush1.bf16.msra.mxu1 %v12367_v37  ;;  %v12465_v37 = vld [vmem:[%s17198_s1 + $0x20c] ss:$48 sps:$4 sm:$0xff]  }
  0xda   :  { %2710 = vmatprep.subr.bf16.mxu1 %v12375_v38  ;;  %v12454_v38 = vld [vmem:[%s17198_s1 + $0x200] ss:$48 sps:$4 sm:$0xff]  }
  0xdb   :  { %2629 = vmatpush1.bf16.msra.mxu0 %v12364_v39  ;;  %v12462_v39 = vld [vmem:[%s17198_s1 + $0x264] ss:$48 sps:$4 sm:$0xff]  }
  0xdc   :  { %2630 = vmatprep.subr.bf16.mxu0 %v12372_v40  ;;  %v12463_v40 = vld [vmem:[%s17198_s1 + $0x208] ss:$48 sps:$4 sm:$0xff]  }
  0xdd   :  { %2711 = vmatpush1.bf16.msra.mxu1 %v12373_v41  ;;  %v12471_v41 = vld [vmem:[%s17198_s1 + $0x26c] ss:$48 sps:$4 sm:$0xff]  }
  0xde   :  { %2712 = vmatprep.subr.bf16.mxu1 %v12381_v42  ;;  %v12460_v42 = vld [vmem:[%s17198_s1 + $0x260] ss:$48 sps:$4 sm:$0xff]  }
  0xdf   :  { %2631 = vmatpush1.bf16.msra.mxu0 %v12370_v43  ;;  %v12468_v43 = vld [vmem:[%s17198_s1 + $0x2c4] ss:$48 sps:$4 sm:$0xff]  }
  0xe0   :  { %2632 = vmatprep.subr.bf16.mxu0 %v12378_v44  ;;  %v12469_v44 = vld [vmem:[%s17198_s1 + $0x268] ss:$48 sps:$4 sm:$0xff]  }
  0xe1   :  { %2713 = vmatpush1.bf16.msra.mxu1 %v12379_v45  ;;  %v12477_v45 = vld [vmem:[%s17198_s1 + $0x2cc] ss:$48 sps:$4 sm:$0xff]  }
  0xe2   :  { %2714 = vmatprep.subr.bf16.mxu1 %v12387_v46  ;;  %v12466_v46 = vld [vmem:[%s17198_s1 + $0x2c0] ss:$48 sps:$4 sm:$0xff]  }
  0xe3   :  { %2633 = vmatpush1.bf16.msra.mxu0 %v12376_v47  ;;  %v12474_v47 = vld [vmem:[%s17198_s1 + $0x324] ss:$48 sps:$4 sm:$0xff]  }
  0xe4   :  { %2634 = vmatprep.subr.bf16.mxu0 %v12384_v49  ;;  %v12475_v49 = vld [vmem:[%s17198_s1 + $0x2c8] ss:$48 sps:$4 sm:$0xff]  }
  0xe5   :  { %2715 = vmatpush1.bf16.msra.mxu1 %v12385_v50  ;;  %v12483_v50 = vld [vmem:[%s17198_s1 + $0x32c] ss:$48 sps:$4 sm:$0xff]  }
  0xe6   :  { %2716 = vmatprep.subr.bf16.mxu1 %v12393_v51  ;;  %v12472_v51 = vld [vmem:[%s17198_s1 + $0x320] ss:$48 sps:$4 sm:$0xff]  }
  0xe7   :  { %2635 = vmatpush1.bf16.msra.mxu0 %v12382_v52  ;;  %v12480_v52 = vld [vmem:[%s17198_s1 + $0x384] ss:$48 sps:$4 sm:$0xff]  }
  0xe8   :  { %2636 = vmatprep.subr.bf16.mxu0 %v12390_v53  ;;  %v12481_v53 = vld [vmem:[%s17198_s1 + $0x328] ss:$48 sps:$4 sm:$0xff]  }
  0xe9   :  { %2717 = vmatpush1.bf16.msra.mxu1 %v12391_v54  ;;  %v12489_v54 = vld [vmem:[%s17198_s1 + $0x38c] ss:$48 sps:$4 sm:$0xff]  }
  0xea   :  { %2718 = vmatprep.subr.bf16.mxu1 %v12399_v55  ;;  %v12478_v55 = vld [vmem:[%s17198_s1 + $0x380] ss:$48 sps:$4 sm:$0xff]  }
  0xeb   :  { %2637 = vmatpush1.bf16.msra.mxu0 %v12388_v56  ;;  %v12486_v56 = vld [vmem:[%s17198_s1 + $0x3e4] ss:$48 sps:$4 sm:$0xff]  }
  0xec   :  { %2638 = vmatprep.subr.bf16.mxu0 %v12396_v57  ;;  %v12487_v57 = vld [vmem:[%s17198_s1 + $0x388] ss:$48 sps:$4 sm:$0xff]  }
  0xed   :  { %2719 = vmatpush1.bf16.msra.mxu1 %v12397_v58  ;;  %v12495_v58 = vld [vmem:[%s17198_s1 + $0x3ec] ss:$48 sps:$4 sm:$0xff]  }
  0xee   :  { %2720 = vmatprep.subr.bf16.mxu1 %v12405_v59  ;;  %v12484_v59 = vld [vmem:[%s17198_s1 + $0x3e0] ss:$48 sps:$4 sm:$0xff]  }
  0xef   :  { %2639 = vmatpush1.bf16.msra.mxu0 %v12394_v60  ;;  %v12492_v60 = vld [vmem:[%s17198_s1 + $0x444] ss:$48 sps:$4 sm:$0xff]  }
  0xf0   :  { %2640 = vmatprep.subr.bf16.mxu0 %v12402_v61  ;;  %v12493_v61 = vld [vmem:[%s17198_s1 + $0x3e8] ss:$48 sps:$4 sm:$0xff]  }
  0xf1   :  { %2721 = vmatpush1.bf16.msra.mxu1 %v12403_v62  ;;  %v12501_v62 = vld [vmem:[%s17198_s1 + $0x44c] ss:$48 sps:$4 sm:$0xff]  }
  0xf2   :  { %2722 = vmatprep.subr.bf16.mxu1 %v12411_v63  ;;  %v12490_v63 = vld [vmem:[%s17198_s1 + $0x440] ss:$48 sps:$4 sm:$0xff]  }
  0xf3   :  { %2641 = vmatpush1.bf16.msra.mxu0 %v12400_v0  ;;  %v12498_v0 = vld [vmem:[%s17198_s1 + $0x4a4] ss:$48 sps:$4 sm:$0xff]  }
  0xf4   :  { %2642 = vmatprep.subr.bf16.mxu0 %v12408_v1  ;;  %v12499_v1 = vld [vmem:[%s17198_s1 + $0x448] ss:$48 sps:$4 sm:$0xff]  }
  0xf5   :  { %2723 = vmatpush1.bf16.msra.mxu1 %v12409_v2  ;;  %v12507_v2 = vld [vmem:[%s17198_s1 + $0x4ac] ss:$48 sps:$4 sm:$0xff]  }
  0xf6   :  { %2724 = vmatprep.subr.bf16.mxu1 %v12417_v4  ;;  %v12496_v4 = vld [vmem:[%s17198_s1 + $0x4a0] ss:$48 sps:$4 sm:$0xff]  }
  0xf7   :  { %2643 = vmatpush1.bf16.msra.mxu0 %v12406_v5  ;;  %v12504_v5 = vld [vmem:[%s17198_s1 + $0x504] ss:$48 sps:$4 sm:$0xff]  }
  0xf8   :  { %2644 = vmatprep.subr.bf16.mxu0 %v12414_v6  ;;  %v12505_v6 = vld [vmem:[%s17198_s1 + $0x4a8] ss:$48 sps:$4 sm:$0xff]  }
  0xf9   :  { %2725 = vmatpush1.bf16.msra.mxu1 %v12415_v7  ;;  %v12513_v7 = vld [vmem:[%s17198_s1 + $0x50c] ss:$48 sps:$4 sm:$0xff]  }
  0xfa   :  { %2726 = vmatprep.subr.bf16.mxu1 %v12423_v9  ;;  %v12502_v9 = vld [vmem:[%s17198_s1 + $0x500] ss:$48 sps:$4 sm:$0xff]  }
  0xfb   :  { %2645 = vmatpush1.bf16.msra.mxu0 %v12412_v10  ;;  %v12510_v10 = vld [vmem:[%s17198_s1 + $0x564] ss:$48 sps:$4 sm:$0xff]  }
  0xfc   :  { %2646 = vmatprep.subr.bf16.mxu0 %v12420_v11  ;;  %v12511_v11 = vld [vmem:[%s17198_s1 + $0x508] ss:$48 sps:$4 sm:$0xff]  }
  0xfd   :  { %2727 = vmatpush1.bf16.msra.mxu1 %v12421_v12  ;;  %v12519_v12 = vld [vmem:[%s17198_s1 + $0x56c] ss:$48 sps:$4 sm:$0xff]  }
  0xfe   :  { %2728 = vmatprep.subr.bf16.mxu1 %v12426_v13  ;;  %v12508_v13 = vld [vmem:[%s17198_s1 + $0x560] ss:$48 sps:$4 sm:$0xff]  }
  0xff   :  { %2647 = vmatpush1.bf16.msra.mxu0 %v12418_v14  ;;  %v12516_v14 = vld [vmem:[%s17198_s1 + $0x5c4] ss:$48 sps:$4 sm:$0xff]  }
 0x100   :  { %2739 = vmatprep.subr.bf16.mxu0 %v12429_v15  ;;  %v12517_v15 = vld [vmem:[%s17198_s1 + $0x568] ss:$48 sps:$4 sm:$0xff]  }
 0x101   :  { %2729 = vmatpush1.bf16.msra.mxu1 %v12424_v16  ;;  %v12525_v16 = vld [vmem:[%s17198_s1 + $0x5cc] ss:$48 sps:$4 sm:$0xff]  }
 0x102   :  { %2649 = vmatmul.mubr.bf16.vlgmr.msra.gmra.mrb[4].mxu0 %v13213_v8  ;;  %2821 = vmatprep.subr.bf16.mxu1 %v12435_v17  ;;  %v12514_v17 = vld [vmem:[%s17198_s1 + $0x5c0] ss:$48 sps:$4 sm:$0xff]  }
 0x103   :  { %2740 = vmatpush1.bf16.msra.mxu0 %v12427_v18  ;;  %2771 = vmatprep.mubr.bf16.mxu0 %v12946_v48  ;;  %v12522_v18 = vld [vmem:[%s17198_s1 + $0x624] ss:$48 sps:$4 sm:$0xff]  }
 0x104   :  { %2741 = vmatprep.subr.bf16.mxu0 %v12432_v19  ;;  %2731 = vmatmul.mubr.bf16.vlgmr.msra.gmra.mrb[4].mxu1 %v13213_v8  ;;  %v12523_v19 = vld [vmem:[%s17198_s1 + $0x5c8] ss:$48 sps:$4 sm:$0xff]  }
 0x105   :  { %2822 = vmatpush1.bf16.msra.mxu1 %v12433_v20  ;;  %2853 = vmatprep.mubr.bf16.mxu1 %v12946_v48  ;;  %v12445_v48 = vld [vmem:[%s17198_s1 + $0xe8] ss:$48 sps:$4 sm:$0xff]   ;;  %v12531_v20 = vld [vmem:[%s17198_s1 + $0x62c] ss:$48 sps:$4 sm:$0xff]  }
 0x106   :  { %2823 = vmatprep.subr.bf16.mxu1 %v12441_v21  ;;  %v12520_v21 = vld [vmem:[%s17198_s1 + $0x620] ss:$48 sps:$4 sm:$0xff]  }
 0x107   :  { %2742 = vmatpush1.bf16.msra.mxu0 %v12430_v22  ;;  %v12528_v22 = vld [vmem:[%s17198_s1 + $0x684] ss:$48 sps:$4 sm:$0xff]  }
 0x108   :  { %2743 = vmatprep.subr.bf16.mxu0 %v12438_v23  ;;  %v12529_v23 = vld [vmem:[%s17198_s1 + $0x628] ss:$48 sps:$4 sm:$0xff]  }
 0x109   :  { %2824 = vmatpush1.bf16.msra.mxu1 %v12439_v24  ;;  %v12537_v24 = vld [vmem:[%s17198_s1 + $0x68c] ss:$48 sps:$4 sm:$0xff]  }
 0x10a   :  { %2825 = vmatprep.subr.bf16.mxu1 %v12447_v25  ;;  %v12526_v25 = vld [vmem:[%s17198_s1 + $0x680] ss:$48 sps:$4 sm:$0xff]  }
 0x10b   :  { %2744 = vmatpush1.bf16.msra.mxu0 %v12436_v26  ;;  %v12534_v26 = vld [vmem:[%s17198_s1 + $0x6e4] ss:$48 sps:$4 sm:$0xff]  }
 0x10c   :  { %2745 = vmatprep.subr.bf16.mxu0 %v12444_v27  ;;  %v12535_v27 = vld [vmem:[%s17198_s1 + $0x688] ss:$48 sps:$4 sm:$0xff]  }
 0x10d   :  { %2826 = vmatpush1.bf16.msra.mxu1 %v12445_v48  ;;  %v12543_v48 = vld [vmem:[%s17198_s1 + $0x6ec] ss:$48 sps:$4 sm:$0xff]  }
 0x10e   :  { %2827 = vmatprep.subr.bf16.mxu1 %v12453_v28  ;;  %v12540_v28 = vld [vmem:[%s17198_s1 + $0x744] ss:$48 sps:$4 sm:$0xff]  }
 0x10f   :  { %2746 = vmatpush1.bf16.msra.mxu0 %v12442_v30  ;;  %v12549_v30 = vld [vmem:[%s17198_s1 + $0x74c] ss:$48 sps:$4 sm:$0xff]  }
 0x110   :  { %2747 = vmatprep.subr.bf16.mxu0 %v12450_v31  ;;  %v12538_v31 = vld [vmem:[%s17198_s1 + $0x740] ss:$48 sps:$4 sm:$0xff]  }
 0x111   :  { %2828 = vmatpush1.bf16.msra.mxu1 %v12451_v32  ;;  %v12546_v32 = vld [vmem:[%s17198_s1 + $0x7a4] ss:$48 sps:$4 sm:$0xff]  }
 0x112   :  { %2829 = vmatprep.subr.bf16.mxu1 %v12459_v33  ;;  %v12547_v33 = vld [vmem:[%s17198_s1 + $0x748] ss:$48 sps:$4 sm:$0xff]  }
 0x113   :  { %2748 = vmatpush1.bf16.msra.mxu0 %v12448_v34  ;;  %v12555_v34 = vld [vmem:[%s17198_s1 + $0x7ac] ss:$48 sps:$4 sm:$0xff]  }
 0x114   :  { %2749 = vmatprep.subr.bf16.mxu0 %v12456_v35  ;;  %v12544_v35 = vld [vmem:[%s17198_s1 + $0x7a0] ss:$48 sps:$4 sm:$0xff]  }
 0x115   :  { %2830 = vmatpush1.bf16.msra.mxu1 %v12457_v36  ;;  %v12552_v36 = vld [vmem:[%s17198_s1 + $0x804] ss:$48 sps:$4 sm:$0xff]  }
 0x116   :  { %2831 = vmatprep.subr.bf16.mxu1 %v12465_v37  ;;  %v12553_v37 = vld [vmem:[%s17198_s1 + $0x7a8] ss:$48 sps:$4 sm:$0xff]  }
 0x117   :  { %2750 = vmatpush1.bf16.msra.mxu0 %v12454_v38  ;;  %v12561_v38 = vld [vmem:[%s17198_s1 + $0x80c] ss:$48 sps:$4 sm:$0xff]  }
 0x118   :  { %2751 = vmatprep.subr.bf16.mxu0 %v12462_v39  ;;  %v12550_v39 = vld [vmem:[%s17198_s1 + $0x800] ss:$48 sps:$4 sm:$0xff]  }
 0x119   :  { %2832 = vmatpush1.bf16.msra.mxu1 %v12463_v40  ;;  %v12558_v40 = vld [vmem:[%s17198_s1 + $0x864] ss:$48 sps:$4 sm:$0xff]  }
 0x11a   :  { %2833 = vmatprep.subr.bf16.mxu1 %v12471_v41 }
 0x11b   :  { %2752 = vmatpush1.bf16.msra.mxu0 %v12460_v42  ;;  %v12559_v42 = vld [vmem:[%s17198_s1 + $0x808] ss:$48 sps:$4 sm:$0xff]  }
 0x11c   :  { %2753 = vmatprep.subr.bf16.mxu0 %v12468_v43 }
 0x11d   :  { %2834 = vmatpush1.bf16.msra.mxu1 %v12469_v44  ;;  %v12567_v44 = vld [vmem:[%s17198_s1 + $0x86c] ss:$48 sps:$4 sm:$0xff]  }
 0x11e   :  { %2835 = vmatprep.subr.bf16.mxu1 %v12477_v45 }
 0x11f   :  { %2754 = vmatpush1.bf16.msra.mxu0 %v12466_v46 }
 0x120   :  { %2755 = vmatprep.subr.bf16.mxu0 %v12474_v47  ;;  %v12556_v47 = vld [vmem:[%s17198_s1 + $0x860] ss:$48 sps:$4 sm:$0xff]  }
 0x121   :  { %2836 = vmatpush1.bf16.msra.mxu1 %v12475_v49 }
 0x122   :  { %2837 = vmatprep.subr.bf16.mxu1 %v12483_v50 }
 0x123   :  { %2756 = vmatpush1.bf16.msra.mxu0 %v12472_v51  ;;  %v12564_v51 = vld [vmem:[%s17198_s1 + $0x8c4] ss:$48 sps:$4 sm:$0xff]  }
 0x124   :  { %2757 = vmatprep.subr.bf16.mxu0 %v12480_v52  ;;  %v12565_v52 = vld [vmem:[%s17198_s1 + $0x868] ss:$48 sps:$4 sm:$0xff]  }
 0x125   :  { %2838 = vmatpush1.bf16.msra.mxu1 %v12481_v53 }
 0x126   :  { %2839 = vmatprep.subr.bf16.mxu1 %v12489_v54  ;;  %v12573_v54 = vld [vmem:[%s17198_s1 + $0x8cc] ss:$48 sps:$4 sm:$0xff]  }
 0x127   :  { %2758 = vmatpush1.bf16.msra.mxu0 %v12478_v55 }
 0x128   :  { %2759 = vmatprep.subr.bf16.mxu0 %v12486_v56  ;;  %v12562_v56 = vld [vmem:[%s17198_s1 + $0x8c0] ss:$48 sps:$4 sm:$0xff]  }
 0x129   :  { %2840 = vmatpush1.bf16.msra.mxu1 %v12487_v57  ;;  %v12570_v57 = vld [vmem:[%s17198_s1 + $0x924] ss:$48 sps:$4 sm:$0xff]  }
 0x12a   :  { %2841 = vmatprep.subr.bf16.mxu1 %v12495_v58  ;;  %v12571_v58 = vld [vmem:[%s17198_s1 + $0x8c8] ss:$48 sps:$4 sm:$0xff]  }
 0x12b   :  { %2760 = vmatpush1.bf16.msra.mxu0 %v12484_v59  ;;  %v12579_v59 = vld [vmem:[%s17198_s1 + $0x92c] ss:$48 sps:$4 sm:$0xff]  }
 0x12c   :  { %2761 = vmatprep.subr.bf16.mxu0 %v12492_v60  ;;  %v12568_v60 = vld [vmem:[%s17198_s1 + $0x920] ss:$48 sps:$4 sm:$0xff]  }
 0x12d   :  { %2842 = vmatpush1.bf16.msra.mxu1 %v12493_v61  ;;  %v12576_v61 = vld [vmem:[%s17198_s1 + $0x984] ss:$48 sps:$4 sm:$0xff]  }
 0x12e   :  { %2843 = vmatprep.subr.bf16.mxu1 %v12501_v62  ;;  %v12577_v62 = vld [vmem:[%s17198_s1 + $0x928] ss:$48 sps:$4 sm:$0xff]  }
 0x12f   :  { %2762 = vmatpush1.bf16.msra.mxu0 %v12490_v63  ;;  %v12585_v63 = vld [vmem:[%s17198_s1 + $0x98c] ss:$48 sps:$4 sm:$0xff]  }
 0x130   :  { %2763 = vmatprep.subr.bf16.mxu0 %v12498_v0  ;;  %v12574_v0 = vld [vmem:[%s17198_s1 + $0x980] ss:$48 sps:$4 sm:$0xff]  }
 0x131   :  { %2844 = vmatpush1.bf16.msra.mxu1 %v12499_v1  ;;  %v12582_v1 = vld [vmem:[%s17198_s1 + $0x9e4] ss:$48 sps:$4 sm:$0xff]  }
 0x132   :  { %2845 = vmatprep.subr.bf16.mxu1 %v12507_v2  ;;  %v12583_v2 = vld [vmem:[%s17198_s1 + $0x988] ss:$48 sps:$4 sm:$0xff]  }
 0x133   :  { %2764 = vmatpush1.bf16.msra.mxu0 %v12496_v4  ;;  %v12591_v4 = vld [vmem:[%s17198_s1 + $0x9ec] ss:$48 sps:$4 sm:$0xff]  }
 0x134   :  { %2765 = vmatprep.subr.bf16.mxu0 %v12504_v5  ;;  %v12580_v5 = vld [vmem:[%s17198_s1 + $0x9e0] ss:$48 sps:$4 sm:$0xff]  }
 0x135   :  { %2846 = vmatpush1.bf16.msra.mxu1 %v12505_v6  ;;  %v12588_v6 = vld [vmem:[%s17198_s1 + $0xa44] ss:$48 sps:$4 sm:$0xff]  }
 0x136   :  { %2847 = vmatprep.subr.bf16.mxu1 %v12513_v7  ;;  %v12589_v7 = vld [vmem:[%s17198_s1 + $0x9e8] ss:$48 sps:$4 sm:$0xff]  }
 0x137   :  { %2766 = vmatpush1.bf16.msra.mxu0 %v12502_v9  ;;  %v12597_v9 = vld [vmem:[%s17198_s1 + $0xa4c] ss:$48 sps:$4 sm:$0xff]  }
 0x138   :  { %2767 = vmatprep.subr.bf16.mxu0 %v12510_v10  ;;  %v12586_v10 = vld [vmem:[%s17198_s1 + $0xa40] ss:$48 sps:$4 sm:$0xff]  }
 0x139   :  { %2848 = vmatpush1.bf16.msra.mxu1 %v12511_v11  ;;  %v12594_v11 = vld [vmem:[%s17198_s1 + $0xaa4] ss:$48 sps:$4 sm:$0xff]  }
 0x13a   :  { %2849 = vmatprep.subr.bf16.mxu1 %v12519_v12  ;;  %v12595_v12 = vld [vmem:[%s17198_s1 + $0xa48] ss:$48 sps:$4 sm:$0xff]  }
 0x13b   :  { %2768 = vmatpush1.bf16.msra.mxu0 %v12508_v13  ;;  %v12603_v13 = vld [vmem:[%s17198_s1 + $0xaac] ss:$48 sps:$4 sm:$0xff]  }
 0x13c   :  { %2769 = vmatprep.subr.bf16.mxu0 %v12516_v14  ;;  %v12592_v14 = vld [vmem:[%s17198_s1 + $0xaa0] ss:$48 sps:$4 sm:$0xff]  }
 0x13d   :  { %2850 = vmatpush1.bf16.msra.mxu1 %v12517_v15  ;;  %v12600_v15 = vld [vmem:[%s17198_s1 + $0xb04] ss:$48 sps:$4 sm:$0xff]  }
 0x13e   :  { %2851 = vmatprep.subr.bf16.mxu1 %v12525_v16  ;;  %v12601_v16 = vld [vmem:[%s17198_s1 + $0xaa8] ss:$48 sps:$4 sm:$0xff]  }
 0x13f   :  { %2770 = vmatpush1.bf16.msra.mxu0 %v12514_v17  ;;  %v12609_v17 = vld [vmem:[%s17198_s1 + $0xb0c] ss:$48 sps:$4 sm:$0xff]  }
 0x140   :  { %2780 = vmatprep.subr.bf16.mxu0 %v12522_v18  ;;  %v12598_v18 = vld [vmem:[%s17198_s1 + $0xb00] ss:$48 sps:$4 sm:$0xff]  }
 0x141   :  { %2852 = vmatpush1.bf16.msra.mxu1 %v12523_v19  ;;  %v12606_v19 = vld [vmem:[%s17198_s1 + $0xb64] ss:$48 sps:$4 sm:$0xff]  }
 0x142   :  { %2772 = vmatmul.mubr.bf16.vlgmr.msra.gmra.mrb[8].mxu0 %v13004_v3  ;;  %2862 = vmatprep.subr.bf16.mxu1 %v12531_v20  ;;  %v12607_v20 = vld [vmem:[%s17198_s1 + $0xb08] ss:$48 sps:$4 sm:$0xff]  }
 0x143   :  { %2781 = vmatpush1.bf16.msra.mxu0 %v12520_v21  ;;  %2812 = vmatprep.mubr.bf16.mxu0 %v13087_v29  ;;  %v12615_v21 = vld [vmem:[%s17198_s1 + $0xb6c] ss:$48 sps:$4 sm:$0xff]  }
 0x144   :  { %2782 = vmatprep.subr.bf16.mxu0 %v12528_v22  ;;  %2854 = vmatmul.mubr.bf16.vlgmr.msra.gmra.mrb[8].mxu1 %v13004_v3  ;;  %v12532_v3 = vld [vmem:[%s17198_s1 + $0x6e0] ss:$48 sps:$4 sm:$0xff]  }
 0x145   :  { %2863 = vmatpush1.bf16.msra.mxu1 %v12529_v23  ;;  %2894 = vmatprep.mubr.bf16.mxu1 %v13087_v29  ;;  %v12541_v29 = vld [vmem:[%s17198_s1 + $0x6e8] ss:$48 sps:$4 sm:$0xff]   ;;  %v12604_v22 = vld [vmem:[%s17198_s1 + $0xb60] ss:$48 sps:$4 sm:$0xff]   ;;  %v12612_v23 = vld [vmem:[%s17198_s1 + $0xbc4] ss:$48 sps:$4 sm:$0xff]  }
 0x146   :  { %2864 = vmatprep.subr.bf16.mxu1 %v12537_v24  ;;  %v12613_v24 = vld [vmem:[%s17198_s1 + $0xb68] ss:$48 sps:$4 sm:$0xff]  }
 0x147   :  { %2783 = vmatpush1.bf16.msra.mxu0 %v12526_v25  ;;  %v3158_v25 = vld [vmem:[%s17200_s2] sm:$0xff] }
 0x148   :  { %2784 = vmatprep.subr.bf16.mxu0 %v12534_v26  ;;  %v3162_v26 = vld [vmem:[%s17200_s2 + $0x20] sm:$0xff] }
 0x149   :  { %2865 = vmatpush1.bf16.msra.mxu1 %v12535_v27  ;;  %v12618_v27 = vld [vmem:[%s17198_s1 + $0xbcc] ss:$48 sps:$4 sm:$0xff]  }
 0x14a   :  { %2866 = vmatprep.subr.bf16.mxu1 %v12543_v48  ;;  %v12610_v48 = vld [vmem:[%s17198_s1 + $0xbc0] ss:$48 sps:$4 sm:$0xff]  }
 0x14b   :  { %2785 = vmatpush1.bf16.msra.mxu0 %v12532_v3  ;;  %v3159_v3 = vld [vmem:[%s17200_s2 + $0x8] sm:$0xff] }
 0x14c   :  { %2786 = vmatprep.subr.bf16.mxu0 %v12540_v28  ;;  %v3163_v28 = vld [vmem:[%s17200_s2 + $0x28] sm:$0xff] }
 0x14d   :  { %2867 = vmatpush1.bf16.msra.mxu1 %v12541_v29  ;;  %v10849_v29 = vcombine.high %v3158_v25, %v3162_v26 }
 0x14e   :  { %2868 = vmatprep.subr.bf16.mxu1 %v12549_v30  ;;  %v12616_v30 = vld [vmem:[%s17198_s1 + $0xbc8] ss:$48 sps:$4 sm:$0xff]  }
 0x14f   :  { %2787 = vmatpush1.bf16.msra.mxu0 %v12538_v31  ;;  %v3166_v31 = vld [vmem:[%s17200_s2 + $0x40] sm:$0xff] }
 0x150   :  { %2788 = vmatprep.subr.bf16.mxu0 %v12546_v32  ;;  %v3170_v32 = vld [vmem:[%s17200_s2 + $0x60] sm:$0xff] }
 0x151   :  { %2869 = vmatpush1.bf16.msra.mxu1 %v12547_v33  ;;  %v10851_v33 = vcombine.high %v3159_v3, %v3163_v28 }
 0x152   :  { %2870 = vmatprep.subr.bf16.mxu1 %v12555_v34  ;;  %v10848_v34 = vcombine.low %v3158_v25, %v3162_v26 }
 0x153   :  { %2789 = vmatpush1.bf16.msra.mxu0 %v12544_v35  ;;  %v3167_v35 = vld [vmem:[%s17200_s2 + $0x48] sm:$0xff] }
 0x154   :  { %2790 = vmatprep.subr.bf16.mxu0 %v12552_v36  ;;  %v3171_v36 = vld [vmem:[%s17200_s2 + $0x68] sm:$0xff] }
 0x155   :  { %v13876_v41 = vpop.f32.mrb[0].mxu0  ;;  %2871 = vmatpush1.bf16.msra.mxu1 %v12553_v37  ;;  %v13886_v46 = vpop.f32.mrb[0].mxu1  ;;  %v10857_v37 = vcombine.high %v3166_v31, %v3170_v32 }
 0x156   :  { %v13881_v43 = vpop.f32.mrb[1].mxu0  ;;  %2872 = vmatprep.subr.bf16.mxu1 %v12561_v38  ;;  %v13891_v50 = vpop.f32.mrb[1].mxu1  ;;  %v10850_v38 = vcombine.low %v3159_v3, %v3163_v28  ;;  %v3191_v3 = vld [vmem:[%s17200_s2 + $0x108] sm:$0xff] }
 0x157   :  { %v2490_v45 = vpop.f32.mrb[2].mxu0  ;;  %2791 = vmatpush1.bf16.msra.mxu0 %v12550_v39  ;;  %v2572_v53 = vpop.f32.mrb[2].mxu1  ;;  %v3174_v39 = vld [vmem:[%s17200_s2 + $0x80] sm:$0xff] }
 0x158   :  { %v2491_v49 = vpop.f32.mrb[3].mxu0  ;;  %2792 = vmatprep.subr.bf16.mxu0 %v12558_v40  ;;  %v2573_v55 = vpop.f32.mrb[3].mxu1  ;;  %v3178_v40 = vld [vmem:[%s17200_s2 + $0xa0] sm:$0xff]  ;;  %v3175_v45 = vld [vmem:[%s17200_s2 + $0x88] sm:$0xff] }
 0x159   :  { %2873 = vmatpush1.bf16.msra.mxu1 %v12559_v42  ;;  %v10859_v42 = vcombine.high %v3167_v35, %v3171_v36  ;;  %v10865_v49 = vcombine.high %v3174_v39, %v3178_v40  ;;  %v10864_v53 = vcombine.low %v3174_v39, %v3178_v40  ;;  %v417_v55 = vlaneseq }
 0x15a   :  { %2874 = vmatprep.subr.bf16.mxu1 %v12567_v44  ;;  %v10856_v44 = vcombine.low %v3166_v31, %v3170_v32  ;;  %v3195_v32 = vld [vmem:[%s17200_s2 + $0x128] sm:$0xff] }
 0x15b   :  { %2793 = vmatpush1.bf16.msra.mxu0 %v12556_v47  ;;  %v3179_v47 = vld [vmem:[%s17200_s2 + $0xa8] sm:$0xff]  ;;  %v10882_v40 = vcombine.low %v3191_v3, %v3195_v32 }
 0x15c   :  { %2794 = vmatprep.subr.bf16.mxu0 %v12564_v51  ;;  %v10858_v51 = vcombine.low %v3167_v35, %v3171_v36 }
 0x15d   :  { %2875 = vmatpush1.bf16.msra.mxu1 %v12565_v52  ;;  %v10867_v52 = vcombine.high %v3175_v45, %v3179_v47 }
 0x15e   :  { %2876 = vmatprep.subr.bf16.mxu1 %v12573_v54  ;;  %v10866_v54 = vcombine.low %v3175_v45, %v3179_v47 }
 0x15f   :  { %2795 = vmatpush1.bf16.msra.mxu0 %v12562_v56  ;;  %v14042_v56 = vshrl.u32 %v417_v55, 7  ;;  %v3203_v55 = vld [vmem:[%s17200_s2 + $0x168] sm:$0xff] }
 0x160   :  { %2796 = vmatprep.subr.bf16.mxu0 %v12570_v57 }
 0x161   :  { %2877 = vmatpush1.bf16.msra.mxu1 %v12571_v58  ;;  %v14045_v57 = vsub.s32 0, %v14042_v56  ;;  %v14053_v58 = vld [vmem:[%s17201_s6] sm:$0xff] }
 0x162   :  { %2878 = vmatprep.subr.bf16.mxu1 %v12579_v59 }
 0x163   :  { %2797 = vmatpush1.bf16.msra.mxu0 %v12568_v60  ;;  %v420_v59 = vrot.slane %v14053_v58, %v14045_v57 }
 0x164   :  { %2798 = vmatprep.subr.bf16.mxu0 %v12576_v61  ;;  %v14060_v61 = vsub.s32 2, %v14042_v56 }
 0x165   :  { %2879 = vmatpush1.bf16.msra.mxu1 %v12577_v62  ;;  %v14063_v62 = vsub.s32 3, %v14042_v56 }
 0x166   :  { %2880 = vmatprep.subr.bf16.mxu1 %v12585_v63  ;;  %v14066_v63 = vadd.f32 %v13876_v41, %v420_v59 }
 0x167   :  { %2799 = vmatpush1.bf16.msra.mxu0 %v12574_v0 }
 0x168   :  { %2800 = vmatprep.subr.bf16.mxu0 %v12582_v1  ;;  %v428_v1 = vrot.slane %v14053_v58, %v14060_v61 }
 0x169   :  { %2881 = vmatpush1.bf16.msra.mxu1 %v12583_v2  ;;  %v432_v2 = vrot.slane %v14053_v58, %v14063_v62 }
 0x16a   :  { %2882 = vmatprep.subr.bf16.mxu1 %v12591_v4  ;;  %v2914_v4 = vmul.f32 %v14066_v63, %v14066_v63 }
 0x16b   :  { %2801 = vmatpush1.bf16.msra.mxu0 %v12580_v5 }
 0x16c   :  { %2802 = vmatprep.subr.bf16.mxu0 %v12588_v6  ;;  %v14080_v6 = vadd.f32 %v13886_v46, %v428_v1 }
 0x16d   :  { %2883 = vmatpush1.bf16.msra.mxu1 %v12589_v7  ;;  %v14088_v7 = vadd.f32 %v13891_v50, %v432_v2  ;;  %v3186_v50 = vld [vmem:[%s17200_s2 + $0xe0] sm:$0xff] }
 0x16e   :  { %2884 = vmatprep.subr.bf16.mxu1 %v12597_v9  ;;  %v14091_v9 = vsub.s32 5, %v14042_v56 }
 0x16f   :  { %2803 = vmatpush1.bf16.msra.mxu0 %v12586_v10 }
 0x170   :  { %2804 = vmatprep.subr.bf16.mxu0 %v12594_v11  ;;  %v2916_v11 = vmul.f32 %v14080_v6, %v14080_v6 }
 0x171   :  { %2885 = vmatpush1.bf16.msra.mxu1 %v12595_v12 }
 0x172   :  { %2886 = vmatprep.subr.bf16.mxu1 %v12603_v13  ;;  %v3182_v13 = vld [vmem:[%s17200_s2 + $0xc0] sm:$0xff] }
 0x173   :  { %2805 = vmatpush1.bf16.msra.mxu0 %v12592_v14  ;;  %v3183_v14 = vld [vmem:[%s17200_s2 + $0xc8] sm:$0xff] }
 0x174   :  { %2806 = vmatprep.subr.bf16.mxu0 %v12600_v15  ;;  %v2917_v15 = vmul.f32 %v14088_v7, %v14088_v7 }
 0x175   :  { %2887 = vmatpush1.bf16.msra.mxu1 %v12601_v16  ;;  %v440_v16 = vrot.slane %v14053_v58, %v14091_v9 }
 0x176   :  { %2888 = vmatprep.subr.bf16.mxu1 %v12609_v17  ;;  %v10873_v17 = vcombine.high %v3182_v13, %v3186_v50 }
 0x177   :  { %2807 = vmatpush1.bf16.msra.mxu0 %v12598_v18  ;;  %v3187_v18 = vld [vmem:[%s17200_s2 + $0xe8] sm:$0xff] }
 0x178   :  { %2808 = vmatprep.subr.bf16.mxu0 %v12606_v19 }
 0x179   :  { %2889 = vmatpush1.bf16.msra.mxu1 %v12607_v20  ;;  %v10872_v20 = vcombine.low %v3182_v13, %v3186_v50  ;;  %v3214_v50 = vld [vmem:[%s17200_s2 + $0x1c0] sm:$0xff] }
 0x17a   :  { %2890 = vmatprep.subr.bf16.mxu1 %v12615_v21  ;;  %v10874_v21 = vcombine.low %v3183_v14, %v3187_v18 }
 0x17b   :  { %2809 = vmatpush1.bf16.msra.mxu0 %v12604_v22  ;;  %v10875_v22 = vcombine.high %v3183_v14, %v3187_v18  ;;  %v3218_v14 = vld [vmem:[%s17200_s2 + $0x1e0] sm:$0xff] }
 0x17c   :  { %2810 = vmatprep.subr.bf16.mxu0 %v12612_v23  ;;  %v10904_v18 = vcombine.low %v3214_v50, %v3218_v14 }
 0x17d   :  { %2891 = vmatpush1.bf16.msra.mxu1 %v12613_v24 }
 0x17e   :  { %2892 = vmatprep.subr.bf16.mxu1 %v12618_v27  ;;  %v3190_v27 = vld [vmem:[%s17200_s2 + $0x100] sm:$0xff] }
 0x17f   :  { %2811 = vmatpush1.bf16.msra.mxu0 %v12610_v48  ;;  %v3194_v48 = vld [vmem:[%s17200_s2 + $0x120] sm:$0xff] }
 0x180   :  { %5503 = vmatprep.subr.bf16.mxu0 %v10849_v29  ;;  %v10881_v31 = vcombine.high %v3190_v27, %v3194_v48  ;;  %v10880_v39 = vcombine.low %v3190_v27, %v3194_v48 }
 0x181   :  { %2893 = vmatpush1.bf16.msra.mxu1 %v12616_v30 }
 0x182   :  { %2813 = vmatmul.mubr.bf16.vlgmr.msra.gmra.mrb[8].mxu0 %v13213_v8  ;;  %5626 = vmatprep.subr.bf16.mxu1 %v10851_v33 }
 0x183   :  { %5504 = vmatpush1.bf16.msra.mxu0 %v10848_v34 }
 0x184   :  { %2895 = vmatmul.mubr.bf16.vlgmr.msra.gmra.mrb[8].mxu1 %v13213_v8  ;;  %5505 = vmatprep.subr.bf16.mxu0 %v10857_v37  ;;  %v14048_v8 = vsub.s32 1, %v14042_v56 }
 0x185   :  { %5627 = vmatpush1.bf16.msra.mxu1 %v10850_v38 }
 0x186   :  { %5628 = vmatprep.subr.bf16.mxu1 %v10859_v42  ;;  %v424_v60 = vrot.slane %v14053_v58, %v14048_v8 }
 0x187   :  { %5506 = vmatpush1.bf16.msra.mxu0 %v10856_v44 }
 0x188   :  { %5507 = vmatprep.subr.bf16.mxu0 %v10865_v49  ;;  %v14069_v0 = vadd.f32 %v13881_v43, %v424_v60  ;;  %v14085_v43 = vsub.s32 4, %v14042_v56  ;;  %v10883_v49 = vcombine.high %v3191_v3, %v3195_v32  ;;  %v3231_v32 = vld [vmem:[%s17200_s2 + $0x248] sm:$0xff] }
 0x189   :  { %5629 = vmatpush1.bf16.msra.mxu1 %v10858_v51  ;;  %v3198_v51 = vld [vmem:[%s17200_s2 + $0x140] sm:$0xff] }
 0x18a   :  { %5630 = vmatprep.subr.bf16.mxu1 %v10867_v52  ;;  %v2915_v5 = vmul.f32 %v14069_v0, %v14069_v0  ;;  %v2905_v41 = vadd.f32 %v14069_v0, %v14066_v63  ;;  %v436_v46 = vrot.slane %v14053_v58, %v14085_v43  ;;  %v3202_v52 = vld [vmem:[%s17200_s2 + $0x160] sm:$0xff] }
 0x18b   :  { %5508 = vmatpush1.bf16.msra.mxu0 %v10864_v53  ;;  %v3199_v53 = vld [vmem:[%s17200_s2 + $0x148] sm:$0xff]  ;;  %v10889_v59 = vcombine.high %v3198_v51, %v3202_v52 }
 0x18c   :  { %v2920_v10 = vadd.f32 %v2915_v5, %v2914_v4  ;;  %v2906_v12 = vadd.f32 %v14080_v6, %v2905_v41  ;;  %5509 = vmatprep.subr.bf16.mxu0 %v10873_v17  ;;  %v10890_v60 = vcombine.low %v3199_v53, %v3203_v55  ;;  %v10891_v1 = vcombine.high %v3199_v53, %v3203_v55  ;;  %v3206_v4 = vld [vmem:[%s17200_s2 + $0x180] sm:$0xff]  ;;  %v3207_v41 = vld [vmem:[%s17200_s2 + $0x188] sm:$0xff] }
 0x18d   :  { %5631 = vmatpush1.bf16.msra.mxu1 %v10866_v54  ;;  %v10888_v54 = vcombine.low %v3198_v51, %v3202_v52  ;;  %v3210_v5 = vld [vmem:[%s17200_s2 + $0x1a0] sm:$0xff]  ;;  %v3219_v17 = vld [vmem:[%s17200_s2 + $0x1e8] sm:$0xff] }
 0x18e   :  { %v2921_v19 = vadd.f32 %v2920_v10, %v2916_v11  ;;  %v2907_v26 = vadd.f32 %v14088_v7, %v2906_v12  ;;  %5632 = vmatprep.subr.bf16.mxu1 %v10875_v22  ;;  %v10897_v10 = vcombine.high %v3206_v4, %v3210_v5  ;;  %v3211_v11 = vld [vmem:[%s17200_s2 + $0x1a8] sm:$0xff]  ;;  %v10896_v12 = vcombine.low %v3206_v4, %v3210_v5  ;;  %v3246_v52 = vld [vmem:[%s17200_s2 + $0x2c0] sm:$0xff] }
 0x18f   :  { %5510 = vmatpush1.bf16.msra.mxu0 %v10872_v20  ;;  %v10898_v13 = vcombine.low %v3207_v41, %v3211_v11  ;;  %v3222_v20 = vld [vmem:[%s17200_s2 + $0x200] sm:$0xff]  ;;  %v3223_v22 = vld [vmem:[%s17200_s2 + $0x208] sm:$0xff] }
 0x190   :  { %v2922_v36 = vadd.f32 %v2921_v19, %v2917_v15  ;;  %5511 = vmatprep.subr.bf16.mxu0 %v10881_v31  ;;  %v3215_v15 = vld [vmem:[%s17200_s2 + $0x1c8] sm:$0xff]  ;;  %v3234_v31 = vld [vmem:[%s17200_s2 + $0x260] sm:$0xff] }
 0x191   :  { %5633 = vmatpush1.bf16.msra.mxu1 %v10874_v21  ;;  %v10907_v19 = vcombine.high %v3215_v15, %v3219_v17  ;;  %v3226_v21 = vld [vmem:[%s17200_s2 + $0x220] sm:$0xff]  ;;  %v3255_v5 = vld [vmem:[%s17200_s2 + $0x308] sm:$0xff] }
 0x192   :  { %5634 = vmatprep.subr.bf16.mxu1 %v10883_v49  ;;  %v10912_v48 = vcombine.low %v3222_v20, %v3226_v21  ;;  %v3250_v53 = vld [vmem:[%s17200_s2 + $0x2e0] sm:$0xff] }
 0x193   :  { %5512 = vmatpush1.bf16.msra.mxu0 %v10880_v39  ;;  %v3238_v39 = vld [vmem:[%s17200_s2 + $0x280] sm:$0xff]  ;;  %v10937_v55 = vcombine.high %v3246_v52, %v3250_v53 }
 0x194   :  { %5513 = vmatprep.subr.bf16.mxu0 %v10889_v59  ;;  %v3251_v59 = vld [vmem:[%s17200_s2 + $0x2e8] sm:$0xff]  ;;  %v3258_v4 = vld [vmem:[%s17200_s2 + $0x320] sm:$0xff] }
 0x195   :  { %5635 = vmatpush1.bf16.msra.mxu1 %v10882_v40  ;;  %v3242_v40 = vld [vmem:[%s17200_s2 + $0x2a0] sm:$0xff] }
 0x196   :  { %5636 = vmatprep.subr.bf16.mxu1 %v10891_v1 }
 0x197   :  { %5514 = vmatpush1.bf16.msra.mxu0 %v10888_v54  ;;  %v3247_v54 = vld [vmem:[%s17200_s2 + $0x2c8] sm:$0xff] }
 0x198   :  { %5515 = vmatprep.subr.bf16.mxu0 %v10897_v10  ;;  %v10939_v1 = vcombine.high %v3247_v54, %v3251_v59 }
 0x199   :  { %5637 = vmatpush1.bf16.msra.mxu1 %v10890_v60  ;;  %v10936_v60 = vcombine.low %v3246_v52, %v3250_v53  ;;  %v14302_v52 = vsub.s32 6, %v14042_v56  ;;  %v14305_v53 = vsub.s32 7, %v14042_v56 }
 0x19b   :  { %5516 = vmatpush1.bf16.msra.mxu0 %v10896_v12  ;;  %v3262_v12 = vld [vmem:[%s17200_s2 + $0x340] sm:$0xff] }
 0x1d5   :  { %v2650_v23 = vpop.f32.mrb[4].mxu0 }
 0x1d6   :  { %v14114_v24 = vadd.f32 %v2650_v23, %v436_v46  ;;  %v2652_v25 = vpop.f32.mrb[5].mxu0  ;;  %v10899_v46 = vcombine.high %v3207_v41, %v3211_v11  ;;  %v10906_v23 = vcombine.low %v3215_v15, %v3219_v17  ;;  %v10938_v41 = vcombine.low %v3247_v54, %v3251_v59  ;;  %v3259_v11 = vld [vmem:[%s17200_s2 + $0x328] sm:$0xff] }
 0x1d7   :  { %v14126_v28 = vadd.f32 %v2652_v25, %v440_v16  ;;  %v2654_v29 = vpop.f32.mrb[6].mxu0  ;;  %v14128_v30 = vpop.f32.mrb[4].mxu1  ;;  %v10905_v16 = vcombine.high %v3214_v50, %v3218_v14  ;;  %v10913_v25 = vcombine.high %v3222_v20, %v3226_v21  ;;  %v3263_v14 = vld [vmem:[%s17200_s2 + $0x348] sm:$0xff]  ;;  %v10946_v17 = vcombine.low %v3255_v5, %v3259_v11 }
 0x1d8   :  { %v2918_v33 = vmul.f32 %v14114_v24, %v14114_v24  ;;  %v2655_v34 = vpop.f32.mrb[7].mxu0  ;;  %v2908_v35 = vadd.f32 %v14114_v24, %v2907_v26  ;;  %v14136_v37 = vpop.f32.mrb[5].mxu1  ;;  %5638 = vmatprep.subr.bf16.mxu1 %v10899_v46  ;;  %v3227_v26 = vld [vmem:[%s17200_s2 + $0x228] sm:$0xff]  ;;  %v3230_v29 = vld [vmem:[%s17200_s2 + $0x240] sm:$0xff]  ;;  %v444_v54 = vrot.slane %v14053_v58, %v14302_v52 }
 0x1d9   :  { %v2736_v38 = vpop.f32.mrb[6].mxu1  ;;  %v2919_v44 = vmul.f32 %v14126_v28, %v14126_v28  ;;  %5639 = vmatpush1.bf16.msra.mxu1 %v10898_v13  ;;  %5517 = vmatprep.subr.bf16.mxu0 %v10905_v16  ;;  %v10915_v27 = vcombine.high %v3223_v22, %v3227_v26  ;;  %v10914_v3 = vcombine.low %v3223_v22, %v3227_v26  ;;  %v3266_v46 = vld [vmem:[%s17200_s2 + $0x360] sm:$0xff]  ;;  %v3267_v15 = vld [vmem:[%s17200_s2 + $0x368] sm:$0xff] }
 0x1da   :  { %v2909_v42 = vadd.f32 %v14126_v28, %v2908_v35  ;;  %v2923_v45 = vadd.f32 %v2922_v36, %v2918_v33  ;;  %v2737_v47 = vpop.f32.mrb[7].mxu1  ;;  %5640 = vmatprep.subr.bf16.mxu1 %v10907_v19  ;;  %5518 = vmatpush1.bf16.msra.mxu0 %v10904_v18  ;;  %v10920_v33 = vcombine.low %v3230_v29, %v3234_v31  ;;  %v3235_v35 = vld [vmem:[%s17200_s2 + $0x268] sm:$0xff]  ;;  %v3270_v18 = vld [vmem:[%s17200_s2 + $0x380] sm:$0xff] }
 0x1db   :  { %5519 = vmatprep.subr.bf16.mxu0 %v10913_v25  ;;  %v10921_v34 = vcombine.high %v3230_v29, %v3234_v31  ;;  %v10923_v36 = vcombine.high %v3231_v32, %v3235_v35  ;;  %v10922_v38 = vcombine.low %v3231_v32, %v3235_v35  ;;  %v10928_v47 = vcombine.low %v3238_v39, %v3242_v40  ;;  %v3274_v19 = vld [vmem:[%s17200_s2 + $0x3a0] sm:$0xff]  ;;  %v3271_v22 = vld [vmem:[%s17200_s2 + $0x388] sm:$0xff] }
 0x1dc   :  { %2910 = vadd.xlane.f32.xlu0 %v2909_v42  ;;  %v2924_v2 = vadd.f32 %v2923_v45, %v2919_v44  ;;  %v3239_v42 = vld [vmem:[%s17200_s2 + $0x288] sm:$0xff]  ;;  %v10929_v44 = vcombine.high %v3238_v39, %v3242_v40  ;;  %v10947_v13 = vcombine.high %v3255_v5, %v3259_v11  ;;  %v10953_v16 = vcombine.high %v3262_v12, %v3266_v46  ;;  %v14276_v39 = vld [vmem:[%s17200_s2 + $0x400] sm:$0xff] }
 0x1dd   :  { %5641 = vmatpush1.bf16.msra.mxu1 %v10906_v23  ;;  %v3243_v45 = vld [vmem:[%s17200_s2 + $0x2a8] sm:$0xff]  ;;  %v10955_v20 = vcombine.high %v3263_v14, %v3267_v15  ;;  %v10952_v21 = vcombine.low %v3262_v12, %v3266_v46  ;;  %v10961_v25 = vcombine.high %v3270_v18, %v3274_v19  ;;  %v10954_v26 = vcombine.low %v3263_v14, %v3267_v15  ;;  %v14281_v40 = vld [vmem:[%s17200_s2 + $0x420] sm:$0xff] }
 0x1de   :  { %5642 = vmatprep.subr.bf16.mxu1 %v10915_v27  ;;  %5520 = vmatpush1.bf16.msra.mxu0 %v10912_v48  ;;  %v10931_v49 = vcombine.high %v3239_v42, %v3243_v45  ;;  %v10930_v51 = vcombine.low %v3239_v42, %v3243_v45  ;;  %v3275_v23 = vld [vmem:[%s17200_s2 + $0x3a8] sm:$0xff]  ;;  %v3278_v27 = vld [vmem:[%s17200_s2 + $0x3c0] sm:$0xff]  ;;  %v10960_v29 = vcombine.low %v3270_v18, %v3274_v19 }
 0x1df   :  { %5521 = vmatprep.subr.bf16.mxu0 %v10921_v34  ;;  %v3282_v48 = vld [vmem:[%s17200_s2 + $0x3e0] sm:$0xff]  ;;  %v3279_v31 = vld [vmem:[%s17200_s2 + $0x3c8] sm:$0xff]  ;;  %v10962_v34 = vcombine.low %v3271_v22, %v3275_v23 }
 0x1e0   :  { %2925 = vadd.xlane.f32.xlu0 %v2924_v2  ;;  %v3254_v2 = vld [vmem:[%s17200_s2 + $0x300] sm:$0xff]  ;;  %v3283_v32 = vld [vmem:[%s17200_s2 + $0x3e8] sm:$0xff] }
 0x1e1   :  { %5643 = vmatpush1.bf16.msra.mxu1 %v10914_v3  ;;  %v10945_v10 = vcombine.high %v3254_v2, %v3258_v4  ;;  %v10944_v50 = vcombine.low %v3254_v2, %v3258_v4  ;;  %v10963_v3 = vcombine.high %v3271_v22, %v3275_v23  ;;  %v10971_v35 = vcombine.high %v3279_v31, %v3283_v32  ;;  %v14286_v42 = vld [vmem:[%s17200_s2 + $0x408] sm:$0xff] }
 0x1e2   :  { %5644 = vmatprep.subr.bf16.mxu1 %v10923_v36  ;;  %5522 = vmatpush1.bf16.msra.mxu0 %v10920_v33  ;;  %v10969_v33 = vcombine.high %v3278_v27, %v3282_v48  ;;  %v10968_v36 = vcombine.low %v3278_v27, %v3282_v48  ;;  %v14293_v45 = vld [vmem:[%s17200_s2 + $0x428] sm:$0xff] }
 0x1e3   :  { %5523 = vmatprep.subr.bf16.mxu0 %v10929_v44  ;;  %v10977_v44 = vcombine.high %v14276_v39, %v14281_v40  ;;  %v414_v59 = vld [vmem:[%s17201_s6 + $0x8] sm:$0xf] }
 0x1e4   :  { %v452_v5 = vrot.slane %v414_v59, %v14045_v57  ;;  %v464_v46 = vrot.slane %v414_v59, %v14063_v62 }
 0x1e5   :  { %5645 = vmatpush1.bf16.msra.mxu1 %v10922_v38  ;;  %v10970_v38 = vcombine.low %v3279_v31, %v3283_v32 }
 0x1e6   :  { %5646 = vmatprep.subr.bf16.mxu1 %v10931_v49  ;;  %5524 = vmatpush1.bf16.msra.mxu0 %v10928_v47  ;;  %v10976_v47 = vcombine.low %v14276_v39, %v14281_v40  ;;  %v10978_v49 = vcombine.low %v14286_v42, %v14293_v45  ;;  %v3314_v39 = vld [vmem:[%s17200_s2 + $0x4e0] sm:$0xff]  ;;  %v3311_v40 = vld [vmem:[%s17200_s2 + $0x4c8] sm:$0xff] }
 0x1e7   :  { %5525 = vmatprep.subr.bf16.mxu0 %v10937_v55  ;;  %v448_v55 = vrot.slane %v14053_v58, %v14305_v53  ;;  %v456_v58 = vrot.slane %v414_v59, %v14048_v8 }
 0x1e9   :  { %5647 = vmatpush1.bf16.msra.mxu1 %v10930_v51  ;;  %v10979_v51 = vcombine.high %v14286_v42, %v14293_v45  ;;  %v3315_v42 = vld [vmem:[%s17200_s2 + $0x4e8] sm:$0xff] }
 0x1ea   :  { %5648 = vmatprep.subr.bf16.mxu1 %v10939_v1  ;;  %5526 = vmatpush1.bf16.msra.mxu0 %v10936_v60  ;;  %v14315_v60 = vadd.f32 %v14128_v30, %v444_v54  ;;  %v14318_v1 = vadd.f32 %v14136_v37, %v448_v55  ;;  %v2903_v55 = vld [vmem:[%s17201_s6 + $0xc] sm:$0x3f] }
 0x1eb   :  { %5527 = vmatprep.subr.bf16.mxu0 %v10945_v10  ;;  %v460_v10 = vrot.slane %v414_v59, %v14060_v61  ;;  %v2904_v59 = vld [vmem:[%s17201_s6 + $0x12] sm:$0x3f] }
 0x1ec   :  { %v3040_v2 = vmul.f32 %v14315_v60, %v14315_v60  ;;  %v3041_v4 = vmul.f32 %v14318_v1, %v14318_v1 }
 0x1ed   :  { %5649 = vmatpush1.bf16.msra.mxu1 %v10938_v41  ;;  %v3032_v41 = vadd.f32 %v14318_v1, %v14315_v60 }
 0x1ee   :  { %5650 = vmatprep.subr.bf16.mxu1 %v10947_v13  ;;  %5528 = vmatpush1.bf16.msra.mxu0 %v10944_v50  ;;  %v3046_v11 = vadd.f32 %v3041_v4, %v3040_v2  ;;  %v2952_v2 = vrot.slane %v2903_v55, %v14048_v8  ;;  %v2948_v4 = vrot.slane %v2903_v55, %v14045_v57 }
 0x1ef   :  { %5529 = vmatprep.subr.bf16.mxu0 %v10953_v16 }
 0x1f1   :  { %5651 = vmatpush1.bf16.msra.mxu1 %v10946_v17 }
 0x1f2   :  { %5652 = vmatprep.subr.bf16.mxu1 %v10955_v20  ;;  %5530 = vmatpush1.bf16.msra.mxu0 %v10952_v21 }
 0x1f3   :  { %5531 = vmatprep.subr.bf16.mxu0 %v10961_v25 }
 0x1f5   :  { %5653 = vmatpush1.bf16.msra.mxu1 %v10954_v26 }
 0x1f6   :  { %5654 = vmatprep.subr.bf16.mxu1 %v10963_v3  ;;  %5532 = vmatpush1.bf16.msra.mxu0 %v10960_v29 }
 0x1f7   :  { %5533 = vmatprep.subr.bf16.mxu0 %v10969_v33 }
 0x1f9   :  { %5655 = vmatpush1.bf16.msra.mxu1 %v10962_v34 }
 0x1fa   :  { %5656 = vmatprep.subr.bf16.mxu1 %v10971_v35  ;;  %5534 = vmatpush1.bf16.msra.mxu0 %v10968_v36 }
 0x1fb   :  { %5544 = vmatprep.subr.bf16.mxu0 %v10977_v44 }
 0x1fd   :  { %5657 = vmatpush1.bf16.msra.mxu1 %v10970_v38 }
 0x1fe   :  { %5667 = vmatprep.subr.bf16.mxu1 %v10979_v51 }
 0x255   :  { %v2814_v30 = vpop.f32.mrb[8].mxu0 }
 0x256   :  { %v14329_v12 = vadd.f32 %v2814_v30, %v452_v5  ;;  %v2816_v37 = vpop.f32.mrb[9].mxu0  ;;  %v2960_v5 = vrot.slane %v2903_v55, %v14063_v62  ;;  %v2968_v30 = vrot.slane %v2903_v55, %v14091_v9 }
 0x257   :  { %v14332_v13 = vadd.f32 %v2816_v37, %v456_v58  ;;  %v2896_v50 = vpop.f32.mrb[8].mxu1  ;;  %v2818_v14 = vpop.f32.mrb[10].mxu0  ;;  %v2989_v58 = vrot.slane %v2904_v59, %v14048_v8 }
 0x258   :  { %v3033_v15 = vadd.f32 %v14329_v12, %v3032_v41  ;;  %v3042_v16 = vmul.f32 %v14329_v12, %v14329_v12  ;;  %v14337_v17 = vadd.f32 %v2896_v50, %v460_v10  ;;  %v2898_v18 = vpop.f32.mrb[9].mxu1  ;;  %v2819_v19 = vpop.f32.mrb[11].mxu0  ;;  %v2985_v41 = vrot.slane %v2904_v59, %v14045_v57 }
 0x259   :  { %v3043_v20 = vmul.f32 %v14332_v13, %v14332_v13  ;;  %v2900_v21 = vpop.f32.mrb[10].mxu1  ;;  %v14343_v25 = vadd.f32 %v2898_v18, %v464_v46  ;;  %v2956_v10 = vrot.slane %v2903_v55, %v14060_v61 }
 0x25a   :  { %v3047_v22 = vadd.f32 %v3046_v11, %v3042_v16  ;;  %v3044_v23 = vmul.f32 %v14337_v17, %v14337_v17  ;;  %v3034_v26 = vadd.f32 %v14332_v13, %v3033_v15  ;;  %v2901_v27 = vpop.f32.mrb[11].mxu1  ;;  %v2997_v15 = vrot.slane %v2904_v59, %v14063_v62 }
 0x25b   :  { %v3045_v3 = vmul.f32 %v14343_v25, %v14343_v25  ;;  %v2993_v16 = vrot.slane %v2904_v59, %v14060_v61 }
 0x25c   :  { %v3035_v48 = vadd.f32 %v14337_v17, %v3034_v26  ;;  %v3048_v29 = vadd.f32 %v3047_v22, %v3043_v20 }
 0x25e   :  { %v3036_v31 = vadd.f32 %v14343_v25, %v3035_v48  ;;  %v3049_v32 = vadd.f32 %v3048_v29, %v3044_v23 }
 0x260   :  { %3037 = vadd.xlane.f32.xlu1 %v3036_v31  ;;  %v3050_v33 = vadd.f32 %v3049_v32, %v3045_v3 }
 0x264   :  { %3051 = vadd.xlane.f32.xlu1 %v3050_v33 }
 0x269   :  { %v2911_v34 = vpop.xlane.xlu0 %2910 }
 0x26a   :  { %v2913_v35 = vmul.f32 0.0013020834, %v2911_v34 }
 0x26c   :  { %v2928_v38 = vmul.f32 %v2913_v35, %v2913_v35  ;;  %v2931_v11 = vsub.f32 %v14069_v0, %v2913_v35  ;;  %v2930_v37 = vsub.f32 %v14066_v63, %v2913_v35  ;;  %v2933_v46 = vsub.f32 %v14088_v7, %v2913_v35 }
 0x26d   :  { %v2926_v36 = vpop.xlane.xlu0 %2925  ;;  %v2932_v50 = vsub.f32 %v14080_v6, %v2913_v35  ;;  %v2935_v18 = vsub.f32 %v14126_v28, %v2913_v35  ;;  %v2934_v19 = vsub.f32 %v14114_v24, %v2913_v35  ;;  %v3005_v63 = vrot.slane %v2904_v59, %v14091_v9 }
 0x26e   :  { %v2927_v44 = vmul.f32 0.0013020834, %v2926_v36  ;;  %v2964_v7 = vrot.slane %v2903_v55, %v14085_v43  ;;  %v3001_v35 = vrot.slane %v2904_v59, %v14085_v43  ;;  %v3295_v55 = vld [vmem:[%s17200_s2 + $0x448] sm:$0xff] }
 0x270   :  { %v2929_v51 = vsub.f32 %v2927_v44, %v2928_v38  ;;  %v3294_v44 = vld [vmem:[%s17200_s2 + $0x440] sm:$0xff] }
 0x272   :  { %v2936_v54 = vadd.f32 1e-05, %v2929_v51 }
 0x274   :  { %12747 = vrsqrt.f32 %v2936_v54  ;;  %v3298_v54 = vld [vmem:[%s17200_s2 + $0x460] sm:$0xff] }
 0x27e   :  { %v12748_v14 = vpop.eup %12747 }
 0x27f   :  { %v2939_v20 = vmul.f32 %v12748_v14, %v2931_v11  ;;  %v2938_v21 = vmul.f32 %v12748_v14, %v2930_v37  ;;  %v2941_v22 = vmul.f32 %v12748_v14, %v2933_v46  ;;  %v2940_v23 = vmul.f32 %v12748_v14, %v2932_v50  ;;  %v3303_v11 = vld [vmem:[%s17200_s2 + $0x488] sm:$0xff] }
 0x280   :  { %v2943_v0 = vmul.f32 %v12748_v14, %v2935_v18  ;;  %v2942_v26 = vmul.f32 %v12748_v14, %v2934_v19  ;;  %v3307_v37 = vld [vmem:[%s17200_s2 + $0x4a8] sm:$0xff]  ;;  %v10984_v50 = vcombine.low %v3294_v44, %v3298_v54  ;;  %v3310_v18 = vld [vmem:[%s17200_s2 + $0x4c0] sm:$0xff]  ;;  %v11003_v19 = vcombine.high %v3311_v40, %v3315_v42 }
 0x281   :  { %v2976_v6 = vmul.f32 %v2952_v2, %v2939_v20  ;;  %v2975_v27 = vmul.f32 %v2948_v4, %v2938_v21  ;;  %v2978_v48 = vmul.f32 %v2960_v5, %v2941_v22  ;;  %v2977_v3 = vmul.f32 %v2956_v10, %v2940_v23  ;;  %v3299_v2 = vld [vmem:[%s17200_s2 + $0x468] sm:$0xff]  ;;  %v3302_v5 = vld [vmem:[%s17200_s2 + $0x480] sm:$0xff] }
 0x282   :  { %v2980_v29 = vmul.f32 %v2968_v30, %v2943_v0  ;;  %v2979_v34 = vmul.f32 %v2964_v7, %v2942_v26  ;;  %v10987_v10 = vcombine.high %v3295_v55, %v3299_v2  ;;  %v3306_v30 = vld [vmem:[%s17200_s2 + $0x4a0] sm:$0xff]  ;;  %v10986_v14 = vcombine.low %v3295_v55, %v3299_v2  ;;  %v3319_v22 = vld [vmem:[%s17200_s2 + $0x508] sm:$0xff] }
 0x283   :  { %v3013_v31 = vadd.f32 %v2989_v58, %v2976_v6  ;;  %v3012_v32 = vadd.f32 %v2985_v41, %v2975_v27  ;;  %v3015_v28 = vadd.f32 %v2997_v15, %v2978_v48  ;;  %v14373_v33 = vadd.f32 %v2993_v16, %v2977_v3  ;;  %v3318_v20 = vld [vmem:[%s17200_s2 + $0x500] sm:$0xff]  ;;  %v3323_v23 = vld [vmem:[%s17200_s2 + $0x528] sm:$0xff] }
 0x284   :  { %v14375_v24 = vadd.f32 %v3005_v63, %v2980_v29  ;;  %v14397_v58 = vadd.f32 %v3001_v35, %v2979_v34  ;;  %v10985_v41 = vcombine.high %v3294_v44, %v3298_v54  ;;  %v10993_v15 = vcombine.high %v3302_v5, %v3306_v30  ;;  %v3322_v21 = vld [vmem:[%s17200_s2 + $0x520] sm:$0xff]  ;;  %v3327_v48 = vld [vmem:[%s17200_s2 + $0x548] sm:$0xff] }
 0x285   :  { %v3019_v36 = vmax.f32 %v3013_v31, 0.0  ;;  %v3018_v38 = vmax.f32 %v3012_v32, 0.0  ;;  %v3021_v51 = vmax.f32 %v3015_v28, 0.0  ;;  %v10995_v16 = vcombine.high %v3303_v11, %v3307_v37  ;;  %v3326_v6 = vld [vmem:[%s17200_s2 + $0x540] sm:$0xff]  ;;  %v3331_v3 = vld [vmem:[%s17200_s2 + $0x568] sm:$0xff] }
 0x286   :  { %v10992_v45 = vcombine.low %v3302_v5, %v3306_v30  ;;  %v11000_v0 = vcombine.low %v3310_v18, %v3314_v39  ;;  %v11002_v63 = vcombine.low %v3311_v40, %v3315_v42  ;;  %v11009_v26 = vcombine.high %v3318_v20, %v3322_v21  ;;  %v3330_v27 = vld [vmem:[%s17200_s2 + $0x560] sm:$0xff] }
 0x287   :  { %v14390_v59 = vpack.c.bf16 %v3019_v36, %v3019_v36  ;;  %v14392_v4 = vpack.c.bf16 %v3018_v38, %v3018_v38  ;;  %v14412_v46 = vpack.c.bf16 %v3021_v51, %v3021_v51  ;;  %v11011_v7 = vcombine.high %v3319_v22, %v3323_v23  ;;  %v3334_v34 = vld [vmem:[%s17200_s2 + $0x580] sm:$0xff]  ;;  %v3335_v36 = vld [vmem:[%s17200_s2 + $0x588] sm:$0xff] }
 0x288   :  { %v11008_v29 = vcombine.low %v3318_v20, %v3322_v21  ;;  %v11010_v31 = vcombine.low %v3319_v22, %v3323_v23  ;;  %v11017_v32 = vcombine.high %v3326_v6, %v3330_v27  ;;  %v11019_v28 = vcombine.high %v3327_v48, %v3331_v3  ;;  %v3338_v35 = vld [vmem:[%s17200_s2 + $0x5a0] sm:$0xff]  ;;  %v3339_v38 = vld [vmem:[%s17200_s2 + $0x5a8] sm:$0xff] }
 0x289   :  { %5535 = vmatprep.mubr.bf16.mxu0 %v14390_v59  ;;  %5658 = vmatprep.mubr.bf16.mxu1 %v14390_v59  ;;  %v11016_v44 = vcombine.low %v3326_v6, %v3330_v27  ;;  %v11018_v51 = vcombine.low %v3327_v48, %v3331_v3  ;;  %v11025_v54 = vcombine.high %v3334_v34, %v3338_v35  ;;  %v3342_v2 = vld [vmem:[%s17200_s2 + $0x5c0] sm:$0xff]  ;;  %v3363_v20 = vld [vmem:[%s17200_s2 + $0x668] sm:$0xff] }
 0x28a   :  { %5536 = vmatmul.mubr.bf16.vlgmr.msra.gmra.mrb[12].mxu0 %v14392_v4  ;;  %5659 = vmatmul.mubr.bf16.vlgmr.msra.gmra.mrb[12].mxu1 %v14392_v4  ;;  %v11027_v55 = vcombine.high %v3335_v36, %v3339_v38  ;;  %v3346_v5 = vld [vmem:[%s17200_s2 + $0x5e0] sm:$0xff]  ;;  %v11024_v30 = vcombine.low %v3334_v34, %v3338_v35  ;;  %v3371_v6 = vld [vmem:[%s17200_s2 + $0x6a8] sm:$0xff] }
 0x28b   :  { %5545 = vmatpush1.bf16.msra.mxu0 %v10976_v47  ;;  %5668 = vmatpush1.bf16.msra.mxu1 %v10978_v49  ;;  %v10994_v47 = vcombine.low %v3303_v11, %v3307_v37  ;;  %v11001_v49 = vcombine.high %v3310_v18, %v3314_v39  ;;  %v11026_v11 = vcombine.low %v3335_v36, %v3339_v38  ;;  %v3355_v18 = vld [vmem:[%s17200_s2 + $0x628] sm:$0xff] }
 0x28c   :  { %5576 = vmatprep.mubr.bf16.mxu0 %v14412_v46  ;;  %5699 = vmatprep.mubr.bf16.mxu1 %v14412_v46  ;;  %v11033_v37 = vcombine.high %v3342_v2, %v3346_v5  ;;  %v11032_v39 = vcombine.low %v3342_v2, %v3346_v5  ;;  %v3379_v34 = vld [vmem:[%s17200_s2 + $0x6e8] sm:$0xff] }
 0x28d   :  { %5546 = vmatprep.subr.bf16.mxu0 %v10985_v41  ;;  %5669 = vmatprep.subr.bf16.mxu1 %v10987_v10  ;;  %v3343_v41 = vld [vmem:[%s17200_s2 + $0x5c8] sm:$0xff] }
 0x28e   :  { %v3347_v10 = vld [vmem:[%s17200_s2 + $0x5e8] sm:$0xff] }
 0x28f   :  { %5547 = vmatpush1.bf16.msra.mxu0 %v10984_v50  ;;  %5670 = vmatpush1.bf16.msra.mxu1 %v10986_v14  ;;  %v11035_v50 = vcombine.high %v3343_v41, %v3347_v10  ;;  %v3350_v14 = vld [vmem:[%s17200_s2 + $0x600] sm:$0xff]  ;;  %v11034_v40 = vcombine.low %v3343_v41, %v3347_v10  ;;  %v3387_v2 = vld [vmem:[%s17200_s2 + $0x728] sm:$0xff] }
 0x290   :  { %5548 = vmatprep.subr.bf16.mxu0 %v10993_v15  ;;  %5671 = vmatprep.subr.bf16.mxu1 %v10995_v16  ;;  %v3354_v15 = vld [vmem:[%s17200_s2 + $0x620] sm:$0xff]  ;;  %v3351_v16 = vld [vmem:[%s17200_s2 + $0x608] sm:$0xff] }
 0x291   :  { %v11041_v42 = vcombine.high %v3350_v14, %v3354_v15  ;;  %v11040_v21 = vcombine.low %v3350_v14, %v3354_v15  ;;  %v11042_v22 = vcombine.low %v3351_v16, %v3355_v18  ;;  %v3395_v14 = vld [vmem:[%s17200_s2 + $0x768] sm:$0xff] }
 0x293   :  { %5549 = vmatpush1.bf16.msra.mxu0 %v10992_v45  ;;  %5672 = vmatpush1.bf16.msra.mxu1 %v10994_v47  ;;  %v11043_v45 = vcombine.high %v3351_v16, %v3355_v18  ;;  %v3358_v47 = vld [vmem:[%s17200_s2 + $0x640] sm:$0xff] }
 0x294   :  { %5550 = vmatprep.subr.bf16.mxu0 %v11001_v49  ;;  %5673 = vmatprep.subr.bf16.mxu1 %v11003_v19  ;;  %v3362_v49 = vld [vmem:[%s17200_s2 + $0x660] sm:$0xff]  ;;  %v3359_v19 = vld [vmem:[%s17200_s2 + $0x648] sm:$0xff] }
 0x295   :  { %v11049_v23 = vcombine.high %v3358_v47, %v3362_v49  ;;  %v11048_v27 = vcombine.low %v3358_v47, %v3362_v49  ;;  %v11050_v48 = vcombine.low %v3359_v19, %v3363_v20  ;;  %v3403_v47 = vld [vmem:[%s17200_s2 + $0x7a8] sm:$0xff] }
 0x297   :  { %5551 = vmatpush1.bf16.msra.mxu0 %v11000_v0  ;;  %5674 = vmatpush1.bf16.msra.mxu1 %v11002_v63  ;;  %v11051_v0 = vcombine.high %v3359_v19, %v3363_v20  ;;  %v3366_v63 = vld [vmem:[%s17200_s2 + $0x680] sm:$0xff] }
 0x298   :  { %5552 = vmatprep.subr.bf16.mxu0 %v11009_v26  ;;  %5675 = vmatprep.subr.bf16.mxu1 %v11011_v7  ;;  %v3370_v26 = vld [vmem:[%s17200_s2 + $0x6a0] sm:$0xff]  ;;  %v3367_v7 = vld [vmem:[%s17200_s2 + $0x688] sm:$0xff] }
 0x299   :  { %v11057_v3 = vcombine.high %v3366_v63, %v3370_v26  ;;  %v11056_v35 = vcombine.low %v3366_v63, %v3370_v26  ;;  %v11058_v36 = vcombine.low %v3367_v7, %v3371_v6  ;;  %v3411_v63 = vld [vmem:[%s17200_s2 + $0x7e8] sm:$0xff] }
 0x29b   :  { %5553 = vmatpush1.bf16.msra.mxu0 %v11008_v29  ;;  %5676 = vmatpush1.bf16.msra.mxu1 %v11010_v31  ;;  %v11059_v29 = vcombine.high %v3367_v7, %v3371_v6  ;;  %v3374_v31 = vld [vmem:[%s17200_s2 + $0x6c0] sm:$0xff] }
 0x29c   :  { %5554 = vmatprep.subr.bf16.mxu0 %v11017_v32  ;;  %5677 = vmatprep.subr.bf16.mxu1 %v11019_v28  ;;  %v3378_v32 = vld [vmem:[%s17200_s2 + $0x6e0] sm:$0xff]  ;;  %v3375_v28 = vld [vmem:[%s17200_s2 + $0x6c8] sm:$0xff] }
 0x29d   :  { %v11065_v38 = vcombine.high %v3374_v31, %v3378_v32  ;;  %v11064_v5 = vcombine.low %v3374_v31, %v3378_v32  ;;  %v11066_v41 = vcombine.low %v3375_v28, %v3379_v34  ;;  %v3419_v31 = vld [vmem:[%s17200_s2 + $0x828] sm:$0xff] }
 0x29f   :  { %5555 = vmatpush1.bf16.msra.mxu0 %v11016_v44  ;;  %5678 = vmatpush1.bf16.msra.mxu1 %v11018_v51  ;;  %v11067_v44 = vcombine.high %v3375_v28, %v3379_v34  ;;  %v3382_v51 = vld [vmem:[%s17200_s2 + $0x700] sm:$0xff]  ;;  %v3020_v34 = vmax.f32 %v14373_v33, 0.0  ;;  %v3427_v33 = vld [vmem:[%s17200_s2 + $0x868] sm:$0xff] }
 0x2a0   :  { %5556 = vmatprep.subr.bf16.mxu0 %v11025_v54  ;;  %5679 = vmatprep.subr.bf16.mxu1 %v11027_v55  ;;  %v3386_v54 = vld [vmem:[%s17200_s2 + $0x720] sm:$0xff]  ;;  %v3383_v55 = vld [vmem:[%s17200_s2 + $0x708] sm:$0xff] }
 0x2a1   :  { %v11073_v10 = vcombine.high %v3382_v51, %v3386_v54  ;;  %v11072_v15 = vcombine.low %v3382_v51, %v3386_v54  ;;  %v11074_v16 = vcombine.low %v3383_v55, %v3387_v2  ;;  %v3426_v51 = vld [vmem:[%s17200_s2 + $0x860] sm:$0xff]  ;;  %v3423_v54 = vld [vmem:[%s17200_s2 + $0x848] sm:$0xff] }
 0x2a3   :  { %5557 = vmatpush1.bf16.msra.mxu0 %v11024_v30  ;;  %5680 = vmatpush1.bf16.msra.mxu1 %v11026_v11  ;;  %v11075_v30 = vcombine.high %v3383_v55, %v3387_v2  ;;  %v3390_v11 = vld [vmem:[%s17200_s2 + $0x740] sm:$0xff] }
 0x2a4   :  { %5558 = vmatprep.subr.bf16.mxu0 %v11033_v37  ;;  %5681 = vmatprep.subr.bf16.mxu1 %v11035_v50  ;;  %v3394_v37 = vld [vmem:[%s17200_s2 + $0x760] sm:$0xff]  ;;  %v3391_v50 = vld [vmem:[%s17200_s2 + $0x748] sm:$0xff] }
 0x2a5   :  { %v11081_v18 = vcombine.high %v3390_v11, %v3394_v37  ;;  %v11080_v49 = vcombine.low %v3390_v11, %v3394_v37  ;;  %v11082_v19 = vcombine.low %v3391_v50, %v3395_v14  ;;  %v3434_v11 = vld [vmem:[%s17200_s2 + $0x8a0] sm:$0xff]  ;;  %v3431_v37 = vld [vmem:[%s17200_s2 + $0x888] sm:$0xff] }
 0x2a7   :  { %5559 = vmatpush1.bf16.msra.mxu0 %v11032_v39  ;;  %5682 = vmatpush1.bf16.msra.mxu1 %v11034_v40  ;;  %v11083_v39 = vcombine.high %v3391_v50, %v3395_v14  ;;  %v3398_v40 = vld [vmem:[%s17200_s2 + $0x780] sm:$0xff]  ;;  %v3435_v50 = vld [vmem:[%s17200_s2 + $0x8a8] sm:$0xff] }
 0x2a8   :  { %5560 = vmatprep.subr.bf16.mxu0 %v11041_v42  ;;  %5683 = vmatprep.subr.bf16.mxu1 %v11043_v45  ;;  %v3402_v42 = vld [vmem:[%s17200_s2 + $0x7a0] sm:$0xff]  ;;  %v3399_v45 = vld [vmem:[%s17200_s2 + $0x788] sm:$0xff] }
 0x2a9   :  { %v11089_v20 = vcombine.high %v3398_v40, %v3402_v42  ;;  %v11088_v26 = vcombine.low %v3398_v40, %v3402_v42  ;;  %v11090_v7 = vcombine.low %v3399_v45, %v3403_v47  ;;  %v3442_v40 = vld [vmem:[%s17200_s2 + $0x8e0] sm:$0xff]  ;;  %v3439_v42 = vld [vmem:[%s17200_s2 + $0x8c8] sm:$0xff] }
 0x2ab   :  { %5561 = vmatpush1.bf16.msra.mxu0 %v11040_v21  ;;  %5684 = vmatpush1.bf16.msra.mxu1 %v11042_v22  ;;  %v11091_v21 = vcombine.high %v3399_v45, %v3403_v47  ;;  %v3406_v22 = vld [vmem:[%s17200_s2 + $0x7c0] sm:$0xff]  ;;  %v3443_v45 = vld [vmem:[%s17200_s2 + $0x8e8] sm:$0xff] }
 0x2ac   :  { %5562 = vmatprep.subr.bf16.mxu0 %v11049_v23  ;;  %5685 = vmatprep.subr.bf16.mxu1 %v11051_v0  ;;  %v3410_v23 = vld [vmem:[%s17200_s2 + $0x7e0] sm:$0xff]  ;;  %v3407_v0 = vld [vmem:[%s17200_s2 + $0x7c8] sm:$0xff] }
 0x2ad   :  { %v11097_v6 = vcombine.high %v3406_v22, %v3410_v23  ;;  %v11096_v32 = vcombine.low %v3406_v22, %v3410_v23  ;;  %v11098_v28 = vcombine.low %v3407_v0, %v3411_v63  ;;  %v3450_v22 = vld [vmem:[%s17200_s2 + $0x920] sm:$0xff]  ;;  %v3447_v23 = vld [vmem:[%s17200_s2 + $0x908] sm:$0xff] }
 0x2af   :  { %5563 = vmatpush1.bf16.msra.mxu0 %v11048_v27  ;;  %5686 = vmatpush1.bf16.msra.mxu1 %v11050_v48  ;;  %v11099_v27 = vcombine.high %v3407_v0, %v3411_v63  ;;  %v3414_v48 = vld [vmem:[%s17200_s2 + $0x800] sm:$0xff]  ;;  %v3451_v0 = vld [vmem:[%s17200_s2 + $0x928] sm:$0xff] }
 0x2b0   :  { %5564 = vmatprep.subr.bf16.mxu0 %v11057_v3  ;;  %5687 = vmatprep.subr.bf16.mxu1 %v11059_v29  ;;  %v3418_v3 = vld [vmem:[%s17200_s2 + $0x820] sm:$0xff]  ;;  %v3415_v29 = vld [vmem:[%s17200_s2 + $0x808] sm:$0xff] }
 0x2b1   :  { %v11104_v55 = vcombine.low %v3414_v48, %v3418_v3  ;;  %v11106_v2 = vcombine.low %v3415_v29, %v3419_v31 }
 0x2b3   :  { %5565 = vmatpush1.bf16.msra.mxu0 %v11056_v35  ;;  %5688 = vmatpush1.bf16.msra.mxu1 %v11058_v36  ;;  %v11105_v35 = vcombine.high %v3414_v48, %v3418_v3  ;;  %v11107_v36 = vcombine.high %v3415_v29, %v3419_v31  ;;  %v3458_v48 = vld [vmem:[%s17200_s2 + $0x960] sm:$0xff]  ;;  %v3455_v3 = vld [vmem:[%s17200_s2 + $0x948] sm:$0xff] }
 0x2b4   :  { %5566 = vmatprep.subr.bf16.mxu0 %v11065_v38  ;;  %5689 = vmatprep.subr.bf16.mxu1 %v11067_v44  ;;  %v3023_v38 = vmax.f32 %v14375_v24, 0.0  ;;  %v3422_v44 = vld [vmem:[%s17200_s2 + $0x840] sm:$0xff]  ;;  %v14604_v24 = vpack.c.bf16 %v3020_v34, %v3020_v34  ;;  %v3459_v29 = vld [vmem:[%s17200_s2 + $0x968] sm:$0xff] }
 0x2b5   :  { %v11112_v14 = vcombine.low %v3422_v44, %v3426_v51  ;;  %v11147_v34 = vcombine.high %v3455_v3, %v3459_v29 }
 0x2b7   :  { %5567 = vmatpush1.bf16.msra.mxu0 %v11064_v5  ;;  %5690 = vmatpush1.bf16.msra.mxu1 %v11066_v41  ;;  %v14606_v5 = vpack.c.bf16 %v3023_v38, %v3023_v38  ;;  %v11113_v41 = vcombine.high %v3422_v44, %v3426_v51  ;;  %v3463_v38 = vld [vmem:[%s17200_s2 + $0x988] sm:$0xff] }
 0x2b8   :  { %5568 = vmatprep.subr.bf16.mxu0 %v11073_v10  ;;  %5691 = vmatprep.subr.bf16.mxu1 %v11075_v30  ;;  %v11115_v10 = vcombine.high %v3423_v54, %v3427_v33  ;;  %v3430_v30 = vld [vmem:[%s17200_s2 + $0x880] sm:$0xff]  ;;  %v3467_v44 = vld [vmem:[%s17200_s2 + $0x9a8] sm:$0xff] }
 0x2b9   :  { %v11120_v47 = vcombine.low %v3430_v30, %v3434_v11 }
 0x2bb   :  { %5569 = vmatpush1.bf16.msra.mxu0 %v11072_v15  ;;  %5692 = vmatpush1.bf16.msra.mxu1 %v11074_v16  ;;  %v11114_v15 = vcombine.low %v3423_v54, %v3427_v33  ;;  %v11121_v16 = vcombine.high %v3430_v30, %v3434_v11  ;;  %v11146_v54 = vcombine.low %v3455_v3, %v3459_v29  ;;  %v3475_v30 = vld [vmem:[%s17200_s2 + $0x9e8] sm:$0xff] }
 0x2bc   :  { %5570 = vmatprep.subr.bf16.mxu0 %v11081_v18  ;;  %5693 = vmatprep.subr.bf16.mxu1 %v11083_v39  ;;  %v11123_v18 = vcombine.high %v3431_v37, %v3435_v50  ;;  %v3438_v39 = vld [vmem:[%s17200_s2 + $0x8c0] sm:$0xff] }
 0x2bd   :  { %v11128_v63 = vcombine.low %v3438_v39, %v3442_v40 }
 0x2bf   :  { %5571 = vmatpush1.bf16.msra.mxu0 %v11080_v49  ;;  %5694 = vmatpush1.bf16.msra.mxu1 %v11082_v19  ;;  %v11122_v49 = vcombine.low %v3431_v37, %v3435_v50  ;;  %v11129_v19 = vcombine.high %v3438_v39, %v3442_v40  ;;  %v11154_v37 = vcombine.low %v3463_v38, %v3467_v44  ;;  %v3483_v39 = vld [vmem:[%s17200_s2 + $0xa28] sm:$0xff] }
 0x2c0   :  { %5572 = vmatprep.subr.bf16.mxu0 %v11089_v20  ;;  %5695 = vmatprep.subr.bf16.mxu1 %v11091_v21  ;;  %v11131_v20 = vcombine.high %v3439_v42, %v3443_v45  ;;  %v3446_v21 = vld [vmem:[%s17200_s2 + $0x900] sm:$0xff] }
 0x2c1   :  { %v11136_v31 = vcombine.low %v3446_v21, %v3450_v22 }
 0x2c3   :  { %5573 = vmatpush1.bf16.msra.mxu0 %v11088_v26  ;;  %5696 = vmatpush1.bf16.msra.mxu1 %v11090_v7  ;;  %v11130_v26 = vcombine.low %v3439_v42, %v3443_v45  ;;  %v11137_v7 = vcombine.high %v3446_v21, %v3450_v22  ;;  %v3491_v21 = vld [vmem:[%s17200_s2 + $0xa68] sm:$0xff] }
 0x2c4   :  { %5574 = vmatprep.subr.bf16.mxu0 %v11097_v6  ;;  %5697 = vmatprep.subr.bf16.mxu1 %v11099_v27  ;;  %v11139_v6 = vcombine.high %v3447_v23, %v3451_v0  ;;  %v3454_v27 = vld [vmem:[%s17200_s2 + $0x940] sm:$0xff] }
 0x2c5   :  { %v11144_v51 = vcombine.low %v3454_v27, %v3458_v48 }
 0x2c7   :  { %5575 = vmatpush1.bf16.msra.mxu0 %v11096_v32  ;;  %5698 = vmatpush1.bf16.msra.mxu1 %v11098_v28  ;;  %v11138_v32 = vcombine.low %v3447_v23, %v3451_v0  ;;  %v11145_v28 = vcombine.high %v3454_v27, %v3458_v48  ;;  %v3499_v27 = vld [vmem:[%s17200_s2 + $0xaa8] sm:$0xff] }
 0x2c8   :  { %5585 = vmatprep.subr.bf16.mxu0 %v11105_v35  ;;  %5708 = vmatprep.subr.bf16.mxu1 %v11107_v36  ;;  %v3462_v35 = vld [vmem:[%s17200_s2 + $0x980] sm:$0xff] }
 0x2c9   :  { %v3466_v36 = vld [vmem:[%s17200_s2 + $0x9a0] sm:$0xff] }
 0x2ca   :  { %5577 = vmatmul.mubr.bf16.vlgmr.msra.gmra.mrb[12].mxu0 %v14604_v24  ;;  %5700 = vmatmul.mubr.bf16.vlgmr.msra.gmra.mrb[12].mxu1 %v14604_v24  ;;  %v11153_v33 = vcombine.high %v3462_v35, %v3466_v36  ;;  %v11152_v11 = vcombine.low %v3462_v35, %v3466_v36  ;;  %v3503_v36 = vld [vmem:[%s17200_s2 + $0xac8] sm:$0xff] }
 0x2cb   :  { %5586 = vmatpush1.bf16.msra.mxu0 %v11104_v55  ;;  %5617 = vmatprep.mubr.bf16.mxu0 %v14606_v5  ;;  %v11155_v55 = vcombine.high %v3463_v38, %v3467_v44  ;;  %v3507_v38 = vld [vmem:[%s17200_s2 + $0xae8] sm:$0xff] }
 0x2cc   :  { %5709 = vmatpush1.bf16.msra.mxu1 %v11106_v2  ;;  %5740 = vmatprep.mubr.bf16.mxu1 %v14606_v5  ;;  %v3470_v2 = vld [vmem:[%s17200_s2 + $0x9c0] sm:$0xff] }
 0x2cd   :  { %5587 = vmatprep.subr.bf16.mxu0 %v11113_v41  ;;  %5710 = vmatprep.subr.bf16.mxu1 %v11115_v10  ;;  %v3474_v41 = vld [vmem:[%s17200_s2 + $0x9e0] sm:$0xff]  ;;  %v3471_v10 = vld [vmem:[%s17200_s2 + $0x9c8] sm:$0xff] }
 0x2ce   :  { %v11161_v50 = vcombine.high %v3470_v2, %v3474_v41  ;;  %v11160_v40 = vcombine.low %v3470_v2, %v3474_v41  ;;  %v11162_v42 = vcombine.low %v3471_v10, %v3475_v30  ;;  %v11195_v2 = vcombine.high %v3503_v36, %v3507_v38  ;;  %v3510_v41 = vld [vmem:[%s17200_s2 + $0xb00] sm:$0xff] }
 0x2cf   :  { %5588 = vmatpush1.bf16.msra.mxu0 %v11112_v14  ;;  %v11163_v14 = vcombine.high %v3471_v10, %v3475_v30  ;;  %v3514_v10 = vld [vmem:[%s17200_s2 + $0xb20] sm:$0xff] }
 0x2d0   :  { %5711 = vmatpush1.bf16.msra.mxu1 %v11114_v15  ;;  %5589 = vmatprep.subr.bf16.mxu0 %v11121_v16  ;;  %v3478_v15 = vld [vmem:[%s17200_s2 + $0xa00] sm:$0xff] }
 0x2d1   :  { %5712 = vmatprep.subr.bf16.mxu1 %v11123_v18  ;;  %v3482_v16 = vld [vmem:[%s17200_s2 + $0xa20] sm:$0xff]  ;;  %v3479_v18 = vld [vmem:[%s17200_s2 + $0xa08] sm:$0xff] }
 0x2d2   :  { %v11169_v45 = vcombine.high %v3478_v15, %v3482_v16  ;;  %v11168_v22 = vcombine.low %v3478_v15, %v3482_v16  ;;  %v11170_v23 = vcombine.low %v3479_v18, %v3483_v39  ;;  %v11194_v15 = vcombine.low %v3503_v36, %v3507_v38 }
 0x2d3   :  { %5590 = vmatpush1.bf16.msra.mxu0 %v11120_v47  ;;  %v11171_v47 = vcombine.high %v3479_v18, %v3483_v39  ;;  %v11201_v16 = vcombine.high %v3510_v41, %v3514_v10  ;;  %v3518_v39 = vld [vmem:[%s17200_s2 + $0xb40] sm:$0xff] }
 0x2d4   :  { %5713 = vmatpush1.bf16.msra.mxu1 %v11122_v49  ;;  %5591 = vmatprep.subr.bf16.mxu0 %v11129_v19  ;;  %v3486_v49 = vld [vmem:[%s17200_s2 + $0xa40] sm:$0xff] }
 0x2d5   :  { %5714 = vmatprep.subr.bf16.mxu1 %v11131_v20  ;;  %v3490_v19 = vld [vmem:[%s17200_s2 + $0xa60] sm:$0xff]  ;;  %v3487_v20 = vld [vmem:[%s17200_s2 + $0xa48] sm:$0xff] }
 0x2d6   :  { %v11177_v0 = vcombine.high %v3486_v49, %v3490_v19  ;;  %v11176_v48 = vcombine.low %v3486_v49, %v3490_v19  ;;  %v11178_v3 = vcombine.low %v3487_v20, %v3491_v21  ;;  %v11200_v49 = vcombine.low %v3510_v41, %v3514_v10  ;;  %v3160_v41 = vld [vmem:[%s17200_s2 + $0x10] sm:$0xff] }
 0x2d7   :  { %5592 = vmatpush1.bf16.msra.mxu0 %v11128_v63  ;;  %v11179_v63 = vcombine.high %v3487_v20, %v3491_v21  ;;  %v3164_v10 = vld [vmem:[%s17200_s2 + $0x30] sm:$0xff] }
 0x2d8   :  { %5715 = vmatpush1.bf16.msra.mxu1 %v11130_v26  ;;  %5593 = vmatprep.subr.bf16.mxu0 %v11137_v7  ;;  %v3494_v26 = vld [vmem:[%s17200_s2 + $0xa80] sm:$0xff] }
 0x2d9   :  { %5716 = vmatprep.subr.bf16.mxu1 %v11139_v6  ;;  %v3498_v7 = vld [vmem:[%s17200_s2 + $0xaa0] sm:$0xff]  ;;  %v3495_v6 = vld [vmem:[%s17200_s2 + $0xa88] sm:$0xff] }
 0x2da   :  { %v11185_v29 = vcombine.high %v3494_v26, %v3498_v7  ;;  %v11184_v44 = vcombine.low %v3494_v26, %v3498_v7  ;;  %v3534_v7 = vld [vmem:[%s17200_s2 + $0xbc0] sm:$0xff] }
 0x2db   :  { %5594 = vmatpush1.bf16.msra.mxu0 %v11136_v31 }
 0x2dc   :  { %5717 = vmatpush1.bf16.msra.mxu1 %v11138_v32  ;;  %5595 = vmatprep.subr.bf16.mxu0 %v11145_v28  ;;  %v11187_v32 = vcombine.high %v3495_v6, %v3499_v27  ;;  %v3502_v28 = vld [vmem:[%s17200_s2 + $0xac0] sm:$0xff] }
 0x2dd   :  { %5718 = vmatprep.subr.bf16.mxu1 %v11147_v34  ;;  %v3506_v34 = vld [vmem:[%s17200_s2 + $0xae0] sm:$0xff] }
 0x2df   :  { %5596 = vmatpush1.bf16.msra.mxu0 %v11144_v51 }
 0x2e0   :  { %5719 = vmatpush1.bf16.msra.mxu1 %v11146_v54  ;;  %5597 = vmatprep.subr.bf16.mxu0 %v11153_v33  ;;  %v11186_v54 = vcombine.low %v3495_v6, %v3499_v27  ;;  %v11193_v33 = vcombine.high %v3502_v28, %v3506_v34 }
 0x2e1   :  { %5720 = vmatprep.subr.bf16.mxu1 %v11155_v55 }
 0x2e3   :  { %5598 = vmatpush1.bf16.msra.mxu0 %v11152_v11  ;;  %v3511_v11 = vld [vmem:[%s17200_s2 + $0xb08] sm:$0xff] }
 0x2e4   :  { %5721 = vmatpush1.bf16.msra.mxu1 %v11154_v37  ;;  %5599 = vmatprep.subr.bf16.mxu0 %v11161_v50  ;;  %v3515_v37 = vld [vmem:[%s17200_s2 + $0xb28] sm:$0xff]  ;;  %v11192_v50 = vcombine.low %v3502_v28, %v3506_v34  ;;  %v3031_v34 = vld [vmem:[%s17201_s6 + $0x1e] sm:$0x3f] }
 0x2e5   :  { %5722 = vmatprep.subr.bf16.mxu1 %v11163_v14  ;;  %v11203_v18 = vcombine.high %v3511_v11, %v3515_v37  ;;  %v11202_v19 = vcombine.low %v3511_v11, %v3515_v37 }
 0x2e7   :  { %5600 = vmatpush1.bf16.msra.mxu0 %v11160_v40  ;;  %v3522_v40 = vld [vmem:[%s17200_s2 + $0xb60] sm:$0xff] }
 0x2e8   :  { %5723 = vmatpush1.bf16.msra.mxu1 %v11162_v42  ;;  %5601 = vmatprep.subr.bf16.mxu0 %v11169_v45  ;;  %v3519_v45 = vld [vmem:[%s17200_s2 + $0xb48] sm:$0xff]  ;;  %v11209_v20 = vcombine.high %v3518_v39, %v3522_v40  ;;  %v11208_v26 = vcombine.low %v3518_v39, %v3522_v40 }
 0x2e9   :  { %5724 = vmatprep.subr.bf16.mxu1 %v11171_v47  ;;  %v3523_v47 = vld [vmem:[%s17200_s2 + $0xb68] sm:$0xff] }
 0x2ea   :  { %v11211_v21 = vcombine.high %v3519_v45, %v3523_v47  ;;  %v11210_v6 = vcombine.low %v3519_v45, %v3523_v47  ;;  %v10853_v45 = vcombine.high %v3160_v41, %v3164_v10 }
 0x2eb   :  { %5602 = vmatpush1.bf16.msra.mxu0 %v11168_v22  ;;  %v3526_v22 = vld [vmem:[%s17200_s2 + $0xb80] sm:$0xff] }
 0x2ec   :  { %5725 = vmatpush1.bf16.msra.mxu1 %v11170_v23  ;;  %5603 = vmatprep.subr.bf16.mxu0 %v11177_v0  ;;  %v3530_v23 = vld [vmem:[%s17200_s2 + $0xba0] sm:$0xff]  ;;  %v3527_v0 = vld [vmem:[%s17200_s2 + $0xb88] sm:$0xff] }
 0x2ed   :  { %v3038_v31 = vpop.xlane.xlu1 %3037  ;;  %5726 = vmatprep.subr.bf16.mxu1 %v11179_v63  ;;  %v3531_v63 = vld [vmem:[%s17200_s2 + $0xba8] sm:$0xff]  ;;  %v11217_v27 = vcombine.high %v3526_v22, %v3530_v23  ;;  %v11216_v28 = vcombine.low %v3526_v22, %v3530_v23 }
 0x2ee   :  { %v14726_v35 = vmul.f32 0.0013020834, %v3038_v31  ;;  %v11219_v31 = vcombine.high %v3527_v0, %v3531_v63  ;;  %v11218_v36 = vcombine.low %v3527_v0, %v3531_v63  ;;  %v10852_v63 = vcombine.low %v3160_v41, %v3164_v10  ;;  %v3184_v41 = vld [vmem:[%s17200_s2 + $0xd0] sm:$0xff] }
 0x2ef   :  { %5604 = vmatpush1.bf16.msra.mxu0 %v11176_v48  ;;  %v3538_v48 = vld [vmem:[%s17200_s2 + $0xbe0] sm:$0xff]  ;;  %v3188_v10 = vld [vmem:[%s17200_s2 + $0xf0] sm:$0xff] }
 0x2f0   :  { %5727 = vmatpush1.bf16.msra.mxu1 %v11178_v3  ;;  %v3054_v51 = vmul.f32 %v14726_v35, %v14726_v35  ;;  %5605 = vmatprep.subr.bf16.mxu0 %v11185_v29  ;;  %v3535_v3 = vld [vmem:[%s17200_s2 + $0xbc8] sm:$0xff]  ;;  %v11224_v38 = vcombine.low %v3534_v7, %v3538_v48  ;;  %v3059_v11 = vsub.f32 %v14332_v13, %v14726_v35 }
 0x2f1   :  { %v3052_v55 = vpop.xlane.xlu1 %3051  ;;  %5728 = vmatprep.subr.bf16.mxu1 %v11187_v32  ;;  %v3539_v29 = vld [vmem:[%s17200_s2 + $0xbe8] sm:$0xff]  ;;  %v3030_v32 = vld [vmem:[%s17201_s6 + $0x18] sm:$0x3f]  ;;  %v3058_v37 = vsub.f32 %v14329_v12, %v14726_v35  ;;  %v3061_v13 = vsub.f32 %v14343_v25, %v14726_v35  ;;  %v3060_v12 = vsub.f32 %v14337_v17, %v14726_v35  ;;  %v3131_v17 = vrot.slane %v3031_v34, %v14091_v9 }
 0x2f2   :  { %v3053_v30 = vmul.f32 0.0013020834, %v3052_v55  ;;  %v3086_v55 = vrot.slane %v3030_v32, %v14063_v62 }
 0x2f3   :  { %5606 = vmatpush1.bf16.msra.mxu0 %v11184_v44  ;;  %v11225_v44 = vcombine.high %v3534_v7, %v3538_v48  ;;  %v3173_v7 = vld [vmem:[%s17200_s2 + $0x78] sm:$0xff] }
 0x2f4   :  { %v3055_v14 = vsub.f32 %v3053_v30, %v3054_v51  ;;  %5729 = vmatpush1.bf16.msra.mxu1 %v11186_v54  ;;  %5607 = vmatprep.subr.bf16.mxu0 %v11193_v33  ;;  %v11226_v51 = vcombine.low %v3535_v3, %v3539_v29  ;;  %v11227_v54 = vcombine.high %v3535_v3, %v3539_v29  ;;  %v3022_v33 = vmax.f32 %v14397_v58, 0.0 }
 0x2f5   :  { %5730 = vmatprep.subr.bf16.mxu1 %v11195_v2  ;;  %v3082_v2 = vrot.slane %v3030_v32, %v14060_v61  ;;  %v3056_v30 = vsub.f32 %v14315_v60, %v14726_v35  ;;  %v3123_v58 = vrot.slane %v3031_v34, %v14063_v62  ;;  %v3119_v60 = vrot.slane %v3031_v34, %v14060_v61 }
 0x2f6   :  { %v3062_v42 = vadd.f32 1e-05, %v3055_v14  ;;  %v3161_v14 = vld [vmem:[%s17200_s2 + $0x18] sm:$0xff]  ;;  %v14836_v0 = vpack.c.bf16 %v3022_v33, %v3022_v33 }
 0x2f7   :  { %5608 = vmatpush1.bf16.msra.mxu0 %v11192_v50 }
 0x2f8   :  { %12749 = vrsqrt.f32 %v3062_v42  ;;  %5731 = vmatpush1.bf16.msra.mxu1 %v11194_v15  ;;  %5609 = vmatprep.subr.bf16.mxu0 %v11201_v16  ;;  %v3165_v15 = vld [vmem:[%s17200_s2 + $0x38] sm:$0xff]  ;;  %v3094_v16 = vrot.slane %v3030_v32, %v14091_v9  ;;  %v3090_v42 = vrot.slane %v3030_v32, %v14085_v43  ;;  %v3176_v32 = vld [vmem:[%s17200_s2 + $0x90] sm:$0xff] }
 0x2f9   :  { %5732 = vmatprep.subr.bf16.mxu1 %v11203_v18  ;;  %v10854_v48 = vcombine.low %v3161_v14, %v3165_v15 }
 0x2fb   :  { %5610 = vmatpush1.bf16.msra.mxu0 %v11200_v49  ;;  %v10855_v49 = vcombine.high %v3161_v14, %v3165_v15  ;;  %v3192_v15 = vld [vmem:[%s17200_s2 + $0x110] sm:$0xff] }
 0x2fc   :  { %5733 = vmatpush1.bf16.msra.mxu1 %v11202_v19  ;;  %5611 = vmatprep.subr.bf16.mxu0 %v11209_v20  ;;  %v3127_v19 = vrot.slane %v3031_v34, %v14085_v43  ;;  %v3168_v20 = vld [vmem:[%s17200_s2 + $0x50] sm:$0xff] }
 0x2fd   :  { %5734 = vmatprep.subr.bf16.mxu1 %v11211_v21  ;;  %v3172_v21 = vld [vmem:[%s17200_s2 + $0x70] sm:$0xff] }
 0x2ff   :  { %5612 = vmatpush1.bf16.msra.mxu0 %v11208_v26  ;;  %v3169_v26 = vld [vmem:[%s17200_s2 + $0x58] sm:$0xff] }
 0x300   :  { %5735 = vmatpush1.bf16.msra.mxu1 %v11210_v6  ;;  %5613 = vmatprep.subr.bf16.mxu0 %v11217_v27  ;;  %v10862_v33 = vcombine.low %v3169_v26, %v3173_v7 }
 0x301   :  { %5736 = vmatprep.subr.bf16.mxu1 %v11219_v31  ;;  %v10861_v31 = vcombine.high %v3168_v20, %v3172_v21 }
 0x302   :  { %v14806_v50 = vpop.eup %12749 }
 0x303   :  { %5614 = vmatpush1.bf16.msra.mxu0 %v11216_v28  ;;  %v14821_v18 = vmul.f32 %v14806_v50, %v3056_v30  ;;  %v3067_v39 = vmul.f32 %v14806_v50, %v3059_v11  ;;  %v3066_v40 = vmul.f32 %v14806_v50, %v3058_v37  ;;  %v3069_v25 = vmul.f32 %v14806_v50, %v3061_v13  ;;  %v3180_v28 = vld [vmem:[%s17200_s2 + $0xb0] sm:$0xff]  ;;  %v3185_v30 = vld [vmem:[%s17200_s2 + $0xd8] sm:$0xff] }
 0x304   :  { %5737 = vmatpush1.bf16.msra.mxu1 %v11218_v36  ;;  %5615 = vmatprep.subr.bf16.mxu0 %v11225_v44  ;;  %v3068_v47 = vmul.f32 %v14806_v50, %v3060_v12  ;;  %v3177_v44 = vld [vmem:[%s17200_s2 + $0x98] sm:$0xff]  ;;  %v10877_v37 = vcombine.high %v3184_v41, %v3188_v10  ;;  %v10876_v12 = vcombine.low %v3184_v41, %v3188_v10 }
 0x305   :  { %5738 = vmatprep.subr.bf16.mxu1 %v11227_v54  ;;  %v3104_v22 = vmul.f32 %v3086_v55, %v3067_v39  ;;  %v3103_v23 = vmul.f32 %v3082_v2, %v3066_v40  ;;  %v3106_v6 = vmul.f32 %v3094_v16, %v3069_v25  ;;  %v10860_v54 = vcombine.low %v3168_v20, %v3172_v21  ;;  %v3189_v11 = vld [vmem:[%s17200_s2 + $0xf8] sm:$0xff]  ;;  %v3204_v25 = vld [vmem:[%s17200_s2 + $0x170] sm:$0xff] }
 0x306   :  { %v3105_v27 = vmul.f32 %v3090_v42, %v3068_v47  ;;  %v10869_v55 = vcombine.high %v3176_v32, %v3180_v28  ;;  %v10879_v14 = vcombine.high %v3185_v30, %v3189_v11  ;;  %v3193_v13 = vld [vmem:[%s17200_s2 + $0x118] sm:$0xff]  ;;  %v10878_v39 = vcombine.low %v3185_v30, %v3189_v11 }
 0x307   :  { %5616 = vmatpush1.bf16.msra.mxu0 %v11224_v38  ;;  %v14844_v3 = vadd.f32 %v3123_v58, %v3104_v22  ;;  %v14846_v29 = vadd.f32 %v3119_v60, %v3103_v23  ;;  %v14854_v34 = vadd.f32 %v3131_v17, %v3106_v6  ;;  %v10863_v38 = vcombine.high %v3169_v26, %v3173_v7  ;;  %v3196_v60 = vld [vmem:[%s17200_s2 + $0x130] sm:$0xff]  ;;  %v3197_v16 = vld [vmem:[%s17200_s2 + $0x138] sm:$0xff] }
 0x308   :  { %5739 = vmatpush1.bf16.msra.mxu1 %v11226_v51  ;;  %5749 = vmatprep.subr.bf16.mxu0 %v10853_v45  ;;  %v14856_v36 = vadd.f32 %v3127_v19, %v3105_v27  ;;  %v3181_v51 = vld [vmem:[%s17200_s2 + $0xb8] sm:$0xff]  ;;  %v10885_v40 = vcombine.high %v3192_v15, %v3196_v60  ;;  %v10887_v42 = vcombine.high %v3193_v13, %v3197_v16  ;;  %v3200_v45 = vld [vmem:[%s17200_s2 + $0x150] sm:$0xff] }
 0x309   :  { %5872 = vmatprep.subr.bf16.mxu1 %v10855_v49  ;;  %v10871_v2 = vcombine.high %v3177_v44, %v3181_v51  ;;  %v10870_v58 = vcombine.low %v3177_v44, %v3181_v51  ;;  %v3201_v47 = vld [vmem:[%s17200_s2 + $0x158] sm:$0xff]  ;;  %v10884_v17 = vcombine.low %v3192_v15, %v3196_v60  ;;  %v10886_v19 = vcombine.low %v3193_v13, %v3197_v16  ;;  %v3208_v22 = vld [vmem:[%s17200_s2 + $0x190] sm:$0xff] }
 0x30a   :  { %5618 = vmatmul.mubr.bf16.vlgmr.msra.gmra.mrb[12].mxu0 %v14836_v0  ;;  %v3205_v49 = vld [vmem:[%s17200_s2 + $0x178] sm:$0xff]  ;;  %v10893_v20 = vcombine.high %v3200_v45, %v3204_v25  ;;  %v3212_v23 = vld [vmem:[%s17200_s2 + $0x1b0] sm:$0xff]  ;;  %v10892_v7 = vcombine.low %v3200_v45, %v3204_v25 }
 0x30b   :  { %5741 = vmatmul.mubr.bf16.vlgmr.msra.gmra.mrb[12].mxu1 %v14836_v0  ;;  %5750 = vmatpush1.bf16.msra.mxu0 %v10852_v63  ;;  %v10895_v21 = vcombine.high %v3201_v47, %v3205_v49  ;;  %v3209_v63 = vld [vmem:[%s17200_s2 + $0x198] sm:$0xff]  ;;  %v10894_v6 = vcombine.low %v3201_v47, %v3205_v49  ;;  %v10901_v27 = vcombine.high %v3208_v22, %v3212_v23 }
 0x30c   :  { %5781 = vmatprep.mubr.bf16.mxu0 %v14390_v59  ;;  %5873 = vmatpush1.bf16.msra.mxu1 %v10854_v48  ;;  %v3213_v26 = vld [vmem:[%s17200_s2 + $0x1b8] sm:$0xff]  ;;  %v10900_v44 = vcombine.low %v3208_v22, %v3212_v23 }
 0x30d   :  { %5904 = vmatprep.mubr.bf16.mxu1 %v14390_v59  ;;  %5751 = vmatprep.subr.bf16.mxu0 %v10861_v31  ;;  %v10868_v59 = vcombine.low %v3176_v32, %v3180_v28  ;;  %v10903_v48 = vcombine.high %v3209_v63, %v3213_v26  ;;  %v3216_v31 = vld [vmem:[%s17200_s2 + $0x1d0] sm:$0xff]  ;;  %v3217_v28 = vld [vmem:[%s17200_s2 + $0x1d8] sm:$0xff]  ;;  %v10902_v51 = vcombine.low %v3209_v63, %v3213_v26 }
 0x30e   :  { %5874 = vmatprep.subr.bf16.mxu1 %v10863_v38  ;;  %v3220_v32 = vld [vmem:[%s17200_s2 + $0x1f0] sm:$0xff]  ;;  %v3221_v38 = vld [vmem:[%s17200_s2 + $0x1f8] sm:$0xff] }
 0x30f   :  { %5752 = vmatpush1.bf16.msra.mxu0 %v10860_v54  ;;  %v10909_v54 = vcombine.high %v3216_v31, %v3220_v32  ;;  %v3225_v41 = vld [vmem:[%s17200_s2 + $0x218] sm:$0xff]  ;;  %v10908_v30 = vcombine.low %v3216_v31, %v3220_v32  ;;  %v10910_v11 = vcombine.low %v3217_v28, %v3221_v38 }
 0x310   :  { %5875 = vmatpush1.bf16.msra.mxu1 %v10862_v33  ;;  %5753 = vmatprep.subr.bf16.mxu0 %v10869_v55  ;;  %v10911_v33 = vcombine.high %v3217_v28, %v3221_v38  ;;  %v3224_v55 = vld [vmem:[%s17200_s2 + $0x210] sm:$0xff]  ;;  %v3229_v10 = vld [vmem:[%s17200_s2 + $0x238] sm:$0xff] }
 0x311   :  { %5876 = vmatprep.subr.bf16.mxu1 %v10871_v2  ;;  %v3228_v2 = vld [vmem:[%s17200_s2 + $0x230] sm:$0xff]  ;;  %v3233_v15 = vld [vmem:[%s17200_s2 + $0x258] sm:$0xff]  ;;  %v10918_v16 = vcombine.low %v3225_v41, %v3229_v10 }
 0x312   :  { %v3237_v60 = vld [vmem:[%s17200_s2 + $0x278] sm:$0xff]  ;;  %v10916_v13 = vcombine.low %v3224_v55, %v3228_v2 }
 0x313   :  { %5754 = vmatpush1.bf16.msra.mxu0 %v10868_v59  ;;  %v10917_v59 = vcombine.high %v3224_v55, %v3228_v2  ;;  %v3241_v45 = vld [vmem:[%s17200_s2 + $0x298] sm:$0xff]  ;;  %v10926_v49 = vcombine.low %v3233_v15, %v3237_v60 }
 0x314   :  { %5877 = vmatpush1.bf16.msra.mxu1 %v10870_v58  ;;  %5755 = vmatprep.subr.bf16.mxu0 %v10877_v37  ;;  %v10919_v58 = vcombine.high %v3225_v41, %v3229_v10  ;;  %v3232_v37 = vld [vmem:[%s17200_s2 + $0x250] sm:$0xff]  ;;  %v3245_v25 = vld [vmem:[%s17200_s2 + $0x2b8] sm:$0xff] }
 0x315   :  { %5878 = vmatprep.subr.bf16.mxu1 %v10879_v14  ;;  %v3236_v14 = vld [vmem:[%s17200_s2 + $0x270] sm:$0xff]  ;;  %v3249_v22 = vld [vmem:[%s17200_s2 + $0x2d8] sm:$0xff]  ;;  %v10934_v26 = vcombine.low %v3241_v45, %v3245_v25 }
 0x316   :  { %v10924_v47 = vcombine.low %v3232_v37, %v3236_v14  ;;  %v3253_v23 = vld [vmem:[%s17200_s2 + $0x2f8] sm:$0xff] }
 0x317   :  { %5756 = vmatpush1.bf16.msra.mxu0 %v10876_v12  ;;  %v10925_v12 = vcombine.high %v3232_v37, %v3236_v14  ;;  %v3257_v31 = vld [vmem:[%s17200_s2 + $0x318] sm:$0xff]  ;;  %v10942_v38 = vcombine.low %v3249_v22, %v3253_v23 }
 0x318   :  { %5879 = vmatpush1.bf16.msra.mxu1 %v10878_v39  ;;  %5757 = vmatprep.subr.bf16.mxu0 %v10885_v40  ;;  %v10927_v39 = vcombine.high %v3233_v15, %v3237_v60  ;;  %v3240_v40 = vld [vmem:[%s17200_s2 + $0x290] sm:$0xff]  ;;  %v3261_v32 = vld [vmem:[%s17200_s2 + $0x338] sm:$0xff] }
 0x319   :  { %5880 = vmatprep.subr.bf16.mxu1 %v10887_v42  ;;  %v3244_v42 = vld [vmem:[%s17200_s2 + $0x2b0] sm:$0xff]  ;;  %v3265_v55 = vld [vmem:[%s17200_s2 + $0x358] sm:$0xff]  ;;  %v10950_v10 = vcombine.low %v3257_v31, %v3261_v32 }
 0x31a   :  { %v10932_v63 = vcombine.low %v3240_v40, %v3244_v42  ;;  %v3269_v2 = vld [vmem:[%s17200_s2 + $0x378] sm:$0xff] }
 0x31b   :  { %5758 = vmatpush1.bf16.msra.mxu0 %v10884_v17  ;;  %v10933_v17 = vcombine.high %v3240_v40, %v3244_v42  ;;  %v3273_v37 = vld [vmem:[%s17200_s2 + $0x398] sm:$0xff]  ;;  %v10958_v60 = vcombine.low %v3265_v55, %v3269_v2 }
 0x31c   :  { %5881 = vmatpush1.bf16.msra.mxu1 %v10886_v19  ;;  %5759 = vmatprep.subr.bf16.mxu0 %v10893_v20  ;;  %v10935_v19 = vcombine.high %v3241_v45, %v3245_v25  ;;  %v3248_v20 = vld [vmem:[%s17200_s2 + $0x2d0] sm:$0xff]  ;;  %v3277_v14 = vld [vmem:[%s17200_s2 + $0x3b8] sm:$0xff] }
 0x31d   :  { %5882 = vmatprep.subr.bf16.mxu1 %v10895_v21  ;;  %v3252_v21 = vld [vmem:[%s17200_s2 + $0x2f0] sm:$0xff]  ;;  %v3281_v40 = vld [vmem:[%s17200_s2 + $0x3d8] sm:$0xff]  ;;  %v10966_v25 = vcombine.low %v3273_v37, %v3277_v14 }
 0x31e   :  { %v10940_v28 = vcombine.low %v3248_v20, %v3252_v21  ;;  %v3285_v42 = vld [vmem:[%s17200_s2 + $0x3f8] sm:$0xff] }
 0x31f   :  { %5760 = vmatpush1.bf16.msra.mxu0 %v10892_v7  ;;  %v10941_v7 = vcombine.high %v3248_v20, %v3252_v21  ;;  %v3289_v20 = vld [vmem:[%s17200_s2 + $0x418] sm:$0xff] }
 0x320   :  { %5883 = vmatpush1.bf16.msra.mxu1 %v10894_v6  ;;  %5761 = vmatprep.subr.bf16.mxu0 %v10901_v27  ;;  %v10943_v6 = vcombine.high %v3249_v22, %v3253_v23  ;;  %v3256_v27 = vld [vmem:[%s17200_s2 + $0x310] sm:$0xff]  ;;  %v3293_v21 = vld [vmem:[%s17200_s2 + $0x438] sm:$0xff]  ;;  %v10974_v23 = vcombine.low %v3281_v40, %v3285_v42 }
 0x321   :  { %5884 = vmatprep.subr.bf16.mxu1 %v10903_v48  ;;  %v3260_v48 = vld [vmem:[%s17200_s2 + $0x330] sm:$0xff] }
 0x322   :  { %v10948_v41 = vcombine.low %v3256_v27, %v3260_v48 }
 0x323   :  { %5762 = vmatpush1.bf16.msra.mxu0 %v10900_v44  ;;  %v10949_v44 = vcombine.high %v3256_v27, %v3260_v48  ;;  %v3297_v48 = vld [vmem:[%s17200_s2 + $0x458] sm:$0xff] }
 0x324   :  { %5885 = vmatpush1.bf16.msra.mxu1 %v10902_v51  ;;  %5763 = vmatprep.subr.bf16.mxu0 %v10909_v54  ;;  %v10951_v51 = vcombine.high %v3257_v31, %v3261_v32  ;;  %v3264_v54 = vld [vmem:[%s17200_s2 + $0x350] sm:$0xff]  ;;  %v3301_v31 = vld [vmem:[%s17200_s2 + $0x478] sm:$0xff]  ;;  %v10982_v32 = vcombine.low %v3289_v20, %v3293_v21 }
 0x325   :  { %5886 = vmatprep.subr.bf16.mxu1 %v10911_v33  ;;  %v3268_v33 = vld [vmem:[%s17200_s2 + $0x370] sm:$0xff] }
 0x326   :  { %v10956_v15 = vcombine.low %v3264_v54, %v3268_v33 }
 0x327   :  { %5764 = vmatpush1.bf16.msra.mxu0 %v10908_v30  ;;  %v10957_v30 = vcombine.high %v3264_v54, %v3268_v33  ;;  %v3305_v54 = vld [vmem:[%s17200_s2 + $0x498] sm:$0xff] }
 0x328   :  { %5887 = vmatpush1.bf16.msra.mxu1 %v10910_v11  ;;  %5765 = vmatprep.subr.bf16.mxu0 %v10917_v59  ;;  %v10959_v11 = vcombine.high %v3265_v55, %v3269_v2  ;;  %v3272_v59 = vld [vmem:[%s17200_s2 + $0x390] sm:$0xff]  ;;  %v3309_v33 = vld [vmem:[%s17200_s2 + $0x4b8] sm:$0xff] }
 0x329   :  { %5888 = vmatprep.subr.bf16.mxu1 %v10919_v58  ;;  %v3276_v58 = vld [vmem:[%s17200_s2 + $0x3b0] sm:$0xff] }
 0x32a   :  { %v10964_v45 = vcombine.low %v3272_v59, %v3276_v58  ;;  %v3312_v2 = vld [vmem:[%s17200_s2 + $0x4d0] sm:$0xff] }
 0x32b   :  { %5766 = vmatpush1.bf16.msra.mxu0 %v10916_v13  ;;  %v10965_v13 = vcombine.high %v3272_v59, %v3276_v58  ;;  %v3317_v59 = vld [vmem:[%s17200_s2 + $0x4f8] sm:$0xff] }
 0x32c   :  { %5889 = vmatpush1.bf16.msra.mxu1 %v10918_v16  ;;  %5767 = vmatprep.subr.bf16.mxu0 %v10925_v12  ;;  %v10967_v16 = vcombine.high %v3273_v37, %v3277_v14  ;;  %v3280_v12 = vld [vmem:[%s17200_s2 + $0x3d0] sm:$0xff] }
 0x32d   :  { %5890 = vmatprep.subr.bf16.mxu1 %v10927_v39  ;;  %v3284_v39 = vld [vmem:[%s17200_s2 + $0x3f0] sm:$0xff] }
 0x32e   :  { %v10972_v22 = vcombine.low %v3280_v12, %v3284_v39  ;;  %v3320_v37 = vld [vmem:[%s17200_s2 + $0x510] sm:$0xff] }
 0x32f   :  { %5768 = vmatpush1.bf16.msra.mxu0 %v10924_v47  ;;  %v10973_v47 = vcombine.high %v3280_v12, %v3284_v39  ;;  %v3328_v39 = vld [vmem:[%s17200_s2 + $0x550] sm:$0xff] }
 0x330   :  { %5891 = vmatpush1.bf16.msra.mxu1 %v10926_v49  ;;  %5769 = vmatprep.subr.bf16.mxu0 %v10933_v17  ;;  %v10975_v49 = vcombine.high %v3281_v40, %v3285_v42  ;;  %v3288_v17 = vld [vmem:[%s17200_s2 + $0x410] sm:$0xff] }
 0x331   :  { %5892 = vmatprep.subr.bf16.mxu1 %v10935_v19  ;;  %v3292_v19 = vld [vmem:[%s17200_s2 + $0x430] sm:$0xff] }
 0x332   :  { %v10980_v27 = vcombine.low %v3288_v17, %v3292_v19 }
 0x333   :  { %5770 = vmatpush1.bf16.msra.mxu0 %v10932_v63  ;;  %v10981_v63 = vcombine.high %v3288_v17, %v3292_v19  ;;  %v3336_v19 = vld [vmem:[%s17200_s2 + $0x590] sm:$0xff] }
 0x334   :  { %5893 = vmatpush1.bf16.msra.mxu1 %v10934_v26  ;;  %5771 = vmatprep.subr.bf16.mxu0 %v10941_v7  ;;  %v10983_v26 = vcombine.high %v3289_v20, %v3293_v21  ;;  %v3296_v7 = vld [vmem:[%s17200_s2 + $0x450] sm:$0xff] }
 0x335   :  { %5894 = vmatprep.subr.bf16.mxu1 %v10943_v6  ;;  %v3300_v6 = vld [vmem:[%s17200_s2 + $0x470] sm:$0xff] }
 0x336   :  { %v10988_v55 = vcombine.low %v3296_v7, %v3300_v6 }
 0x337   :  { %5772 = vmatpush1.bf16.msra.mxu0 %v10940_v28  ;;  %v10989_v28 = vcombine.high %v3296_v7, %v3300_v6  ;;  %v3344_v6 = vld [vmem:[%s17200_s2 + $0x5d0] sm:$0xff] }
 0x338   :  { %5895 = vmatpush1.bf16.msra.mxu1 %v10942_v38  ;;  %5773 = vmatprep.subr.bf16.mxu0 %v10949_v44  ;;  %v3304_v38 = vld [vmem:[%s17200_s2 + $0x490] sm:$0xff] }
 0x339   :  { %5896 = vmatprep.subr.bf16.mxu1 %v10951_v51  ;;  %v3308_v44 = vld [vmem:[%s17200_s2 + $0x4b0] sm:$0xff]  ;;  %v10991_v51 = vcombine.high %v3297_v48, %v3301_v31 }
 0x33a   :  { %v10996_v58 = vcombine.low %v3304_v38, %v3308_v44 }
 0x33b   :  { %5774 = vmatpush1.bf16.msra.mxu0 %v10948_v41  ;;  %v10990_v41 = vcombine.low %v3297_v48, %v3301_v31  ;;  %v3348_v31 = vld [vmem:[%s17200_s2 + $0x5f0] sm:$0xff] }
 0x33c   :  { %5897 = vmatpush1.bf16.msra.mxu1 %v10950_v10  ;;  %5775 = vmatprep.subr.bf16.mxu0 %v10957_v30  ;;  %v10997_v10 = vcombine.high %v3304_v38, %v3308_v44  ;;  %v3316_v30 = vld [vmem:[%s17200_s2 + $0x4f0] sm:$0xff]  ;;  %v3349_v38 = vld [vmem:[%s17200_s2 + $0x5f8] sm:$0xff] }
 0x33d   :  { %5898 = vmatprep.subr.bf16.mxu1 %v10959_v11  ;;  %v10999_v11 = vcombine.high %v3305_v54, %v3309_v33  ;;  %v11005_v14 = vcombine.high %v3312_v2, %v3316_v30  ;;  %v11004_v12 = vcombine.low %v3312_v2, %v3316_v30  ;;  %v11036_v30 = vcombine.low %v3344_v6, %v3348_v31 }
 0x33f   :  { %5776 = vmatpush1.bf16.msra.mxu0 %v10956_v15  ;;  %v3324_v15 = vld [vmem:[%s17200_s2 + $0x530] sm:$0xff] }
 0x340   :  { %5899 = vmatpush1.bf16.msra.mxu1 %v10958_v60  ;;  %5777 = vmatprep.subr.bf16.mxu0 %v10965_v13  ;;  %v3321_v13 = vld [vmem:[%s17200_s2 + $0x518] sm:$0xff]  ;;  %v11013_v42 = vcombine.high %v3320_v37, %v3324_v15  ;;  %v11012_v17 = vcombine.low %v3320_v37, %v3324_v15 }
 0x341   :  { %5900 = vmatprep.subr.bf16.mxu1 %v10967_v16  ;;  %v3325_v16 = vld [vmem:[%s17200_s2 + $0x538] sm:$0xff] }
 0x342   :  { %v11014_v20 = vcombine.low %v3321_v13, %v3325_v16 }
 0x343   :  { %5778 = vmatpush1.bf16.msra.mxu0 %v10964_v45  ;;  %v3332_v45 = vld [vmem:[%s17200_s2 + $0x570] sm:$0xff] }
 0x344   :  { %5901 = vmatpush1.bf16.msra.mxu1 %v10966_v25  ;;  %5779 = vmatprep.subr.bf16.mxu0 %v10973_v47  ;;  %v11015_v25 = vcombine.high %v3321_v13, %v3325_v16  ;;  %v3329_v47 = vld [vmem:[%s17200_s2 + $0x558] sm:$0xff]  ;;  %v11021_v21 = vcombine.high %v3328_v39, %v3332_v45  ;;  %v11020_v7 = vcombine.low %v3328_v39, %v3332_v45 }
 0x345   :  { %5902 = vmatprep.subr.bf16.mxu1 %v10975_v49  ;;  %v3333_v49 = vld [vmem:[%s17200_s2 + $0x578] sm:$0xff] }
 0x347   :  { %5780 = vmatpush1.bf16.msra.mxu0 %v10972_v22  ;;  %v3340_v22 = vld [vmem:[%s17200_s2 + $0x5b0] sm:$0xff] }
 0x348   :  { %5903 = vmatpush1.bf16.msra.mxu1 %v10974_v23  ;;  %5790 = vmatprep.subr.bf16.mxu0 %v10981_v63  ;;  %v11023_v23 = vcombine.high %v3329_v47, %v3333_v49  ;;  %v3337_v63 = vld [vmem:[%s17200_s2 + $0x598] sm:$0xff]  ;;  %v11029_v48 = vcombine.high %v3336_v19, %v3340_v22  ;;  %v11028_v44 = vcombine.low %v3336_v19, %v3340_v22 }
 0x349   :  { %5913 = vmatprep.subr.bf16.mxu1 %v10983_v26  ;;  %v3341_v26 = vld [vmem:[%s17200_s2 + $0x5b8] sm:$0xff] }
 0x34a   :  { %5782 = vmatmul.mubr.bf16.vlgmr.msra.gmra.mrb[16].mxu0 %v14392_v4 }
 0x34b   :  { %5905 = vmatmul.mubr.bf16.vlgmr.msra.gmra.mrb[16].mxu1 %v14392_v4  ;;  %5791 = vmatpush1.bf16.msra.mxu0 %v10980_v27  ;;  %v3313_v4 = vld [vmem:[%s17200_s2 + $0x4d8] sm:$0xff]  ;;  %v11022_v27 = vcombine.low %v3329_v47, %v3333_v49 }
 0x34c   :  { %5822 = vmatprep.mubr.bf16.mxu0 %v14412_v46  ;;  %5914 = vmatpush1.bf16.msra.mxu1 %v10982_v32  ;;  %v11007_v60 = vcombine.high %v3313_v4, %v3317_v59  ;;  %v11006_v40 = vcombine.low %v3313_v4, %v3317_v59  ;;  %v11031_v32 = vcombine.high %v3337_v63, %v3341_v26 }
 0x34d   :  { %5945 = vmatprep.mubr.bf16.mxu1 %v14412_v46  ;;  %5792 = vmatprep.subr.bf16.mxu0 %v10989_v28  ;;  %v10998_v46 = vcombine.low %v3305_v54, %v3309_v33  ;;  %v3345_v28 = vld [vmem:[%s17200_s2 + $0x5d8] sm:$0xff]  ;;  %v11030_v54 = vcombine.low %v3337_v63, %v3341_v26  ;;  %v11037_v33 = vcombine.high %v3344_v6, %v3348_v31 }
 0x34e   :  { %5915 = vmatprep.subr.bf16.mxu1 %v10991_v51  ;;  %v3352_v51 = vld [vmem:[%s17200_s2 + $0x610] sm:$0xff]  ;;  %v11039_v2 = vcombine.high %v3345_v28, %v3349_v38  ;;  %v11038_v4 = vcombine.low %v3345_v28, %v3349_v38 }
 0x34f   :  { %5793 = vmatpush1.bf16.msra.mxu0 %v10988_v55  ;;  %v3356_v55 = vld [vmem:[%s17200_s2 + $0x630] sm:$0xff] }
 0x350   :  { %5916 = vmatpush1.bf16.msra.mxu1 %v10990_v41  ;;  %5794 = vmatprep.subr.bf16.mxu0 %v10997_v10  ;;  %v3353_v41 = vld [vmem:[%s17200_s2 + $0x618] sm:$0xff]  ;;  %v11045_v59 = vcombine.high %v3352_v51, %v3356_v55  ;;  %v11044_v15 = vcombine.low %v3352_v51, %v3356_v55 }
 0x351   :  { %5917 = vmatprep.subr.bf16.mxu1 %v10999_v11  ;;  %v3357_v10 = vld [vmem:[%s17200_s2 + $0x638] sm:$0xff]  ;;  %v3360_v11 = vld [vmem:[%s17200_s2 + $0x650] sm:$0xff] }
 0x352   :  { %v11047_v37 = vcombine.high %v3353_v41, %v3357_v10  ;;  %v11046_v13 = vcombine.low %v3353_v41, %v3357_v10 }
 0x353   :  { %5795 = vmatpush1.bf16.msra.mxu0 %v10996_v58  ;;  %v3364_v58 = vld [vmem:[%s17200_s2 + $0x670] sm:$0xff] }
 0x354   :  { %5918 = vmatpush1.bf16.msra.mxu1 %v10998_v46  ;;  %5796 = vmatprep.subr.bf16.mxu0 %v11005_v14  ;;  %v3361_v46 = vld [vmem:[%s17200_s2 + $0x658] sm:$0xff]  ;;  %v11053_v16 = vcombine.high %v3360_v11, %v3364_v58  ;;  %v11052_v45 = vcombine.low %v3360_v11, %v3364_v58 }
 0x355   :  { %5919 = vmatprep.subr.bf16.mxu1 %v11007_v60  ;;  %v3365_v14 = vld [vmem:[%s17200_s2 + $0x678] sm:$0xff]  ;;  %v3368_v60 = vld [vmem:[%s17200_s2 + $0x690] sm:$0xff] }
 0x356   :  { %v11055_v39 = vcombine.high %v3361_v46, %v3365_v14  ;;  %v11054_v47 = vcombine.low %v3361_v46, %v3365_v14 }
 0x357   :  { %5797 = vmatpush1.bf16.msra.mxu0 %v11004_v12  ;;  %v3372_v12 = vld [vmem:[%s17200_s2 + $0x6b0] sm:$0xff] }
 0x358   :  { %5920 = vmatpush1.bf16.msra.mxu1 %v11006_v40  ;;  %5798 = vmatprep.subr.bf16.mxu0 %v11013_v42  ;;  %v3369_v40 = vld [vmem:[%s17200_s2 + $0x698] sm:$0xff]  ;;  %v11061_v49 = vcombine.high %v3368_v60, %v3372_v12  ;;  %v11060_v22 = vcombine.low %v3368_v60, %v3372_v12 }
 0x359   :  { %5921 = vmatprep.subr.bf16.mxu1 %v11015_v25  ;;  %v3373_v42 = vld [vmem:[%s17200_s2 + $0x6b8] sm:$0xff]  ;;  %v3376_v25 = vld [vmem:[%s17200_s2 + $0x6d0] sm:$0xff] }
 0x35a   :  { %v11063_v19 = vcombine.high %v3369_v40, %v3373_v42  ;;  %v11062_v63 = vcombine.low %v3369_v40, %v3373_v42 }
 0x35b   :  { %5799 = vmatpush1.bf16.msra.mxu0 %v11012_v17  ;;  %v3380_v17 = vld [vmem:[%s17200_s2 + $0x6f0] sm:$0xff] }
 0x35c   :  { %5922 = vmatpush1.bf16.msra.mxu1 %v11014_v20  ;;  %5800 = vmatprep.subr.bf16.mxu0 %v11021_v21  ;;  %v3377_v20 = vld [vmem:[%s17200_s2 + $0x6d8] sm:$0xff]  ;;  %v11069_v26 = vcombine.high %v3376_v25, %v3380_v17  ;;  %v11068_v31 = vcombine.low %v3376_v25, %v3380_v17 }
 0x35d   :  { %5923 = vmatprep.subr.bf16.mxu1 %v11023_v23  ;;  %v3381_v21 = vld [vmem:[%s17200_s2 + $0x6f8] sm:$0xff]  ;;  %v3384_v23 = vld [vmem:[%s17200_s2 + $0x710] sm:$0xff] }
 0x35e   :  { %v11071_v6 = vcombine.high %v3377_v20, %v3381_v21  ;;  %v11070_v28 = vcombine.low %v3377_v20, %v3381_v21  ;;  %v3424_v21 = vld [vmem:[%s17200_s2 + $0x850] sm:$0xff] }
 0x35f   :  { %5801 = vmatpush1.bf16.msra.mxu0 %v11020_v7  ;;  %v3388_v7 = vld [vmem:[%s17200_s2 + $0x730] sm:$0xff] }
 0x360   :  { %5924 = vmatpush1.bf16.msra.mxu1 %v11022_v27  ;;  %5802 = vmatprep.subr.bf16.mxu0 %v11029_v48  ;;  %v3385_v27 = vld [vmem:[%s17200_s2 + $0x718] sm:$0xff]  ;;  %v11077_v38 = vcombine.high %v3384_v23, %v3388_v7  ;;  %v11076_v55 = vcombine.low %v3384_v23, %v3388_v7 }
 0x361   :  { %5925 = vmatprep.subr.bf16.mxu1 %v11031_v32  ;;  %v3389_v48 = vld [vmem:[%s17200_s2 + $0x738] sm:$0xff]  ;;  %v3392_v32 = vld [vmem:[%s17200_s2 + $0x750] sm:$0xff] }
 0x362   :  { %v11079_v51 = vcombine.high %v3385_v27, %v3389_v48  ;;  %v11078_v41 = vcombine.low %v3385_v27, %v3389_v48 }
 0x363   :  { %5803 = vmatpush1.bf16.msra.mxu0 %v11028_v44  ;;  %v3396_v44 = vld [vmem:[%s17200_s2 + $0x770] sm:$0xff] }
 0x364   :  { %5926 = vmatpush1.bf16.msra.mxu1 %v11030_v54  ;;  %5804 = vmatprep.subr.bf16.mxu0 %v11037_v33  ;;  %v3393_v54 = vld [vmem:[%s17200_s2 + $0x758] sm:$0xff]  ;;  %v11085_v10 = vcombine.high %v3392_v32, %v3396_v44  ;;  %v11084_v58 = vcombine.low %v3392_v32, %v3396_v44 }
 0x365   :  { %5927 = vmatprep.subr.bf16.mxu1 %v11039_v2  ;;  %v3397_v33 = vld [vmem:[%s17200_s2 + $0x778] sm:$0xff]  ;;  %v3400_v2 = vld [vmem:[%s17200_s2 + $0x790] sm:$0xff] }
 0x366   :  { %v11087_v11 = vcombine.high %v3393_v54, %v3397_v33  ;;  %v11086_v46 = vcombine.low %v3393_v54, %v3397_v33 }
 0x367   :  { %5805 = vmatpush1.bf16.msra.mxu0 %v11036_v30  ;;  %v3404_v30 = vld [vmem:[%s17200_s2 + $0x7b0] sm:$0xff] }
 0x368   :  { %5928 = vmatpush1.bf16.msra.mxu1 %v11038_v4  ;;  %5806 = vmatprep.subr.bf16.mxu0 %v11045_v59  ;;  %v3401_v4 = vld [vmem:[%s17200_s2 + $0x798] sm:$0xff]  ;;  %v11093_v14 = vcombine.high %v3400_v2, %v3404_v30  ;;  %v11092_v12 = vcombine.low %v3400_v2, %v3404_v30  ;;  %v3444_v2 = vld [vmem:[%s17200_s2 + $0x8f0] sm:$0xff] }
 0x369   :  { %5929 = vmatprep.subr.bf16.mxu1 %v11047_v37  ;;  %v3405_v59 = vld [vmem:[%s17200_s2 + $0x7b8] sm:$0xff]  ;;  %v3408_v37 = vld [vmem:[%s17200_s2 + $0x7d0] sm:$0xff] }
 0x36a   :  { %v11095_v60 = vcombine.high %v3401_v4, %v3405_v59  ;;  %v11094_v40 = vcombine.low %v3401_v4, %v3405_v59  ;;  %v3448_v4 = vld [vmem:[%s17200_s2 + $0x910] sm:$0xff] }
 0x36b   :  { %5807 = vmatpush1.bf16.msra.mxu0 %v11044_v15  ;;  %v3412_v15 = vld [vmem:[%s17200_s2 + $0x7f0] sm:$0xff] }
 0x36c   :  { %5930 = vmatpush1.bf16.msra.mxu1 %v11046_v13  ;;  %5808 = vmatprep.subr.bf16.mxu0 %v11053_v16  ;;  %v3409_v13 = vld [vmem:[%s17200_s2 + $0x7d8] sm:$0xff]  ;;  %v11101_v42 = vcombine.high %v3408_v37, %v3412_v15  ;;  %v11100_v17 = vcombine.low %v3408_v37, %v3412_v15  ;;  %v3452_v59 = vld [vmem:[%s17200_s2 + $0x930] sm:$0xff] }
 0x36d   :  { %5931 = vmatprep.subr.bf16.mxu1 %v11055_v39  ;;  %v3413_v16 = vld [vmem:[%s17200_s2 + $0x7f8] sm:$0xff]  ;;  %v3416_v39 = vld [vmem:[%s17200_s2 + $0x810] sm:$0xff]  ;;  %v11141_v15 = vcombine.high %v3448_v4, %v3452_v59 }
 0x36e   :  { %v11103_v25 = vcombine.high %v3409_v13, %v3413_v16  ;;  %v3453_v37 = vld [vmem:[%s17200_s2 + $0x938] sm:$0xff] }
 0x36f   :  { %5809 = vmatpush1.bf16.msra.mxu0 %v11052_v45  ;;  %v3420_v45 = vld [vmem:[%s17200_s2 + $0x830] sm:$0xff] }
 0x370   :  { %5932 = vmatpush1.bf16.msra.mxu1 %v11054_v47  ;;  %5810 = vmatprep.subr.bf16.mxu0 %v11061_v49  ;;  %v3417_v47 = vld [vmem:[%s17200_s2 + $0x818] sm:$0xff]  ;;  %v11109_v20 = vcombine.high %v3416_v39, %v3420_v45  ;;  %v11108_v7 = vcombine.low %v3416_v39, %v3420_v45 }
 0x371   :  { %5933 = vmatprep.subr.bf16.mxu1 %v11063_v19  ;;  %v3421_v49 = vld [vmem:[%s17200_s2 + $0x838] sm:$0xff]  ;;  %v11102_v19 = vcombine.low %v3409_v13, %v3413_v16  ;;  %v3456_v13 = vld [vmem:[%s17200_s2 + $0x950] sm:$0xff] }
 0x372   :  { %v11111_v23 = vcombine.high %v3417_v47, %v3421_v49  ;;  %v11110_v27 = vcombine.low %v3417_v47, %v3421_v49  ;;  %v3460_v16 = vld [vmem:[%s17200_s2 + $0x970] sm:$0xff]  ;;  %v3461_v39 = vld [vmem:[%s17200_s2 + $0x978] sm:$0xff] }
 0x373   :  { %5811 = vmatpush1.bf16.msra.mxu0 %v11060_v22  ;;  %v3428_v22 = vld [vmem:[%s17200_s2 + $0x870] sm:$0xff]  ;;  %v11149_v45 = vcombine.high %v3456_v13, %v3460_v16 }
 0x374   :  { %5934 = vmatpush1.bf16.msra.mxu1 %v11062_v63  ;;  %5812 = vmatprep.subr.bf16.mxu0 %v11069_v26  ;;  %v3425_v63 = vld [vmem:[%s17200_s2 + $0x858] sm:$0xff]  ;;  %v11117_v48 = vcombine.high %v3424_v21, %v3428_v22  ;;  %v11116_v44 = vcombine.low %v3424_v21, %v3428_v22  ;;  %v3464_v47 = vld [vmem:[%s17200_s2 + $0x990] sm:$0xff] }
 0x375   :  { %5935 = vmatprep.subr.bf16.mxu1 %v11071_v6  ;;  %v3429_v26 = vld [vmem:[%s17200_s2 + $0x878] sm:$0xff]  ;;  %v3432_v6 = vld [vmem:[%s17200_s2 + $0x890] sm:$0xff] }
 0x376   :  { %v11119_v32 = vcombine.high %v3425_v63, %v3429_v26  ;;  %v3468_v49 = vld [vmem:[%s17200_s2 + $0x9b0] sm:$0xff] }
 0x377   :  { %5813 = vmatpush1.bf16.msra.mxu0 %v11068_v31  ;;  %v3436_v31 = vld [vmem:[%s17200_s2 + $0x8b0] sm:$0xff]  ;;  %v11157_v22 = vcombine.high %v3464_v47, %v3468_v49 }
 0x378   :  { %5936 = vmatpush1.bf16.msra.mxu1 %v11070_v28  ;;  %5814 = vmatprep.subr.bf16.mxu0 %v11077_v38  ;;  %v3433_v28 = vld [vmem:[%s17200_s2 + $0x898] sm:$0xff]  ;;  %v11125_v54 = vcombine.high %v3432_v6, %v3436_v31 }
 0x379   :  { %5937 = vmatprep.subr.bf16.mxu1 %v11079_v51  ;;  %v3437_v38 = vld [vmem:[%s17200_s2 + $0x8b8] sm:$0xff]  ;;  %v11118_v51 = vcombine.low %v3425_v63, %v3429_v26  ;;  %v3472_v63 = vld [vmem:[%s17200_s2 + $0x9d0] sm:$0xff] }
 0x37a   :  { %v11127_v33 = vcombine.high %v3433_v28, %v3437_v38  ;;  %v3476_v26 = vld [vmem:[%s17200_s2 + $0x9f0] sm:$0xff] }
 0x37b   :  { %5815 = vmatpush1.bf16.msra.mxu0 %v11076_v55  ;;  %v3440_v55 = vld [vmem:[%s17200_s2 + $0x8d0] sm:$0xff] }
 0x37c   :  { %5938 = vmatpush1.bf16.msra.mxu1 %v11078_v41  ;;  %5816 = vmatprep.subr.bf16.mxu0 %v11085_v10  ;;  %v3445_v41 = vld [vmem:[%s17200_s2 + $0x8f8] sm:$0xff]  ;;  %v11126_v10 = vcombine.low %v3433_v28, %v3437_v38  ;;  %v11133_v30 = vcombine.high %v3440_v55, %v3444_v2  ;;  %v3480_v28 = vld [vmem:[%s17200_s2 + $0xa10] sm:$0xff] }
 0x37d   :  { %5939 = vmatprep.subr.bf16.mxu1 %v11087_v11  ;;  %v3484_v38 = vld [vmem:[%s17200_s2 + $0xa30] sm:$0xff] }
 0x37f   :  { %5817 = vmatpush1.bf16.msra.mxu0 %v11084_v58  ;;  %v3449_v58 = vld [vmem:[%s17200_s2 + $0x918] sm:$0xff] }
 0x380   :  { %5940 = vmatpush1.bf16.msra.mxu1 %v11086_v46  ;;  %5818 = vmatprep.subr.bf16.mxu0 %v11093_v14  ;;  %v11132_v46 = vcombine.low %v3440_v55, %v3444_v2  ;;  %v11173_v55 = vcombine.high %v3480_v28, %v3484_v38 }
 0x381   :  { %5941 = vmatprep.subr.bf16.mxu1 %v11095_v60  ;;  %v11143_v60 = vcombine.high %v3449_v58, %v3453_v37 }
 0x383   :  { %5819 = vmatpush1.bf16.msra.mxu0 %v11092_v12  ;;  %v3457_v12 = vld [vmem:[%s17200_s2 + $0x958] sm:$0xff] }
 0x384   :  { %5942 = vmatpush1.bf16.msra.mxu1 %v11094_v40  ;;  %5820 = vmatprep.subr.bf16.mxu0 %v11101_v42  ;;  %v11140_v40 = vcombine.low %v3448_v4, %v3452_v59  ;;  %v11142_v42 = vcombine.low %v3449_v58, %v3453_v37  ;;  %v11150_v21 = vcombine.low %v3457_v12, %v3461_v39  ;;  %v3496_v58 = vld [vmem:[%s17200_s2 + $0xa90] sm:$0xff] }
 0x385   :  { %5943 = vmatprep.subr.bf16.mxu1 %v11103_v25  ;;  %v11151_v25 = vcombine.high %v3457_v12, %v3461_v39  ;;  %v3500_v37 = vld [vmem:[%s17200_s2 + $0xab0] sm:$0xff] }
 0x386   :  { %v3504_v12 = vld [vmem:[%s17200_s2 + $0xad0] sm:$0xff] }
 0x387   :  { %5821 = vmatpush1.bf16.msra.mxu0 %v11100_v17  ;;  %v3465_v17 = vld [vmem:[%s17200_s2 + $0x998] sm:$0xff]  ;;  %v3508_v39 = vld [vmem:[%s17200_s2 + $0xaf0] sm:$0xff] }
 0x388   :  { %5944 = vmatpush1.bf16.msra.mxu1 %v11102_v19  ;;  %5831 = vmatprep.subr.bf16.mxu0 %v11109_v20  ;;  %v3469_v19 = vld [vmem:[%s17200_s2 + $0x9b8] sm:$0xff]  ;;  %v11148_v20 = vcombine.low %v3456_v13, %v3460_v16  ;;  %v11189_v13 = vcombine.high %v3496_v58, %v3500_v37 }
 0x389   :  { %5954 = vmatprep.subr.bf16.mxu1 %v11111_v23  ;;  %v11159_v23 = vcombine.high %v3465_v17, %v3469_v19 }
 0x38a   :  { %5823 = vmatmul.mubr.bf16.vlgmr.msra.gmra.mrb[16].mxu0 %v14604_v24 }
 0x38b   :  { %5946 = vmatmul.mubr.bf16.vlgmr.msra.gmra.mrb[16].mxu1 %v14604_v24  ;;  %5832 = vmatpush1.bf16.msra.mxu0 %v11108_v7  ;;  %v3441_v24 = vld [vmem:[%s17200_s2 + $0x8d8] sm:$0xff] }
 0x38c   :  { %5863 = vmatprep.mubr.bf16.mxu0 %v14606_v5  ;;  %5955 = vmatpush1.bf16.msra.mxu1 %v11110_v27  ;;  %v11135_v11 = vcombine.high %v3441_v24, %v3445_v41  ;;  %v11134_v14 = vcombine.low %v3441_v24, %v3445_v41  ;;  %v3473_v7 = vld [vmem:[%s17200_s2 + $0x9d8] sm:$0xff]  ;;  %v11156_v27 = vcombine.low %v3464_v47, %v3468_v49  ;;  %v3488_v24 = vld [vmem:[%s17200_s2 + $0xa50] sm:$0xff] }
 0x38d   :  { %5986 = vmatprep.mubr.bf16.mxu1 %v14606_v5  ;;  %5833 = vmatprep.subr.bf16.mxu0 %v11117_v48  ;;  %v11124_v5 = vcombine.low %v3432_v6, %v3436_v31  ;;  %v3477_v6 = vld [vmem:[%s17200_s2 + $0x9f8] sm:$0xff]  ;;  %v11158_v48 = vcombine.low %v3465_v17, %v3469_v19  ;;  %v11165_v31 = vcombine.high %v3472_v63, %v3476_v26  ;;  %v3492_v41 = vld [vmem:[%s17200_s2 + $0xa70] sm:$0xff] }
 0x38e   :  { %5956 = vmatprep.subr.bf16.mxu1 %v11119_v32  ;;  %v11167_v32 = vcombine.high %v3473_v7, %v3477_v6  ;;  %v11181_v4 = vcombine.high %v3488_v24, %v3492_v41  ;;  %v11197_v47 = vcombine.high %v3504_v12, %v3508_v39  ;;  %v3512_v17 = vld [vmem:[%s17200_s2 + $0xb10] sm:$0xff] }
 0x38f   :  { %5834 = vmatpush1.bf16.msra.mxu0 %v11116_v44  ;;  %v3481_v44 = vld [vmem:[%s17200_s2 + $0xa18] sm:$0xff]  ;;  %v3516_v19 = vld [vmem:[%s17200_s2 + $0xb30] sm:$0xff] }
 0x390   :  { %5957 = vmatpush1.bf16.msra.mxu1 %v11118_v51  ;;  %5835 = vmatprep.subr.bf16.mxu0 %v11125_v54  ;;  %v3485_v51 = vld [vmem:[%s17200_s2 + $0xa38] sm:$0xff]  ;;  %v11164_v54 = vcombine.low %v3472_v63, %v3476_v26  ;;  %v11205_v63 = vcombine.high %v3512_v17, %v3516_v19 }
 0x391   :  { %5958 = vmatprep.subr.bf16.mxu1 %v11127_v33  ;;  %v11166_v33 = vcombine.low %v3473_v7, %v3477_v6  ;;  %v11175_v2 = vcombine.high %v3481_v44, %v3485_v51  ;;  %v3520_v7 = vld [vmem:[%s17200_s2 + $0xb50] sm:$0xff] }
 0x392   :  { %v3524_v6 = vld [vmem:[%s17200_s2 + $0xb70] sm:$0xff] }
 0x393   :  { %5836 = vmatpush1.bf16.msra.mxu0 %v11124_v5  ;;  %v3489_v5 = vld [vmem:[%s17200_s2 + $0xa58] sm:$0xff] }
 0x394   :  { %5959 = vmatpush1.bf16.msra.mxu1 %v11126_v10  ;;  %5837 = vmatprep.subr.bf16.mxu0 %v11133_v30  ;;  %v3493_v10 = vld [vmem:[%s17200_s2 + $0xa78] sm:$0xff]  ;;  %v11172_v30 = vcombine.low %v3480_v28, %v3484_v38  ;;  %v11213_v28 = vcombine.high %v3520_v7, %v3524_v6 }
 0x395   :  { %5960 = vmatprep.subr.bf16.mxu1 %v11135_v11  ;;  %v11174_v11 = vcombine.low %v3481_v44, %v3485_v51  ;;  %v11183_v59 = vcombine.high %v3489_v5, %v3493_v10  ;;  %v3528_v44 = vld [vmem:[%s17200_s2 + $0xb90] sm:$0xff] }
 0x396   :  { %v3532_v51 = vld [vmem:[%s17200_s2 + $0xbb0] sm:$0xff] }
 0x397   :  { %5838 = vmatpush1.bf16.msra.mxu0 %v11132_v46  ;;  %v3497_v46 = vld [vmem:[%s17200_s2 + $0xa98] sm:$0xff] }
 0x398   :  { %5961 = vmatpush1.bf16.msra.mxu1 %v11134_v14  ;;  %5839 = vmatprep.subr.bf16.mxu0 %v11141_v15  ;;  %v3501_v14 = vld [vmem:[%s17200_s2 + $0xab8] sm:$0xff]  ;;  %v11180_v15 = vcombine.low %v3488_v24, %v3492_v41  ;;  %v11221_v24 = vcombine.high %v3528_v44, %v3532_v51 }
 0x399   :  { %5962 = vmatprep.subr.bf16.mxu1 %v11143_v60  ;;  %v11182_v60 = vcombine.low %v3489_v5, %v3493_v10  ;;  %v11191_v16 = vcombine.high %v3497_v46, %v3501_v14  ;;  %v3536_v5 = vld [vmem:[%s17200_s2 + $0xbd0] sm:$0xff] }
 0x39a   :  { %v3540_v10 = vld [vmem:[%s17200_s2 + $0xbf0] sm:$0xff] }
 0x39b   :  { %5840 = vmatpush1.bf16.msra.mxu0 %v11140_v40  ;;  %v3505_v40 = vld [vmem:[%s17200_s2 + $0xad8] sm:$0xff] }
 0x39c   :  { %5963 = vmatpush1.bf16.msra.mxu1 %v11142_v42  ;;  %5841 = vmatprep.subr.bf16.mxu0 %v11149_v45  ;;  %v3509_v42 = vld [vmem:[%s17200_s2 + $0xaf8] sm:$0xff]  ;;  %v11188_v45 = vcombine.low %v3496_v58, %v3500_v37  ;;  %v11229_v58 = vcombine.high %v3536_v5, %v3540_v10 }
 0x39d   :  { %5964 = vmatprep.subr.bf16.mxu1 %v11151_v25  ;;  %v11190_v25 = vcombine.low %v3497_v46, %v3501_v14  ;;  %v11199_v49 = vcombine.high %v3505_v40, %v3509_v42  ;;  %v11228_v46 = vcombine.low %v3536_v5, %v3540_v10  ;;  %v12645_v5 = vld [vmem:[%s17202_s4 + $0x30] sm:$0xff]  }
 0x39f   :  { %5842 = vmatpush1.bf16.msra.mxu0 %v11148_v20  ;;  %v3513_v20 = vld [vmem:[%s17200_s2 + $0xb18] sm:$0xff] }
 0x3a0   :  { %5965 = vmatpush1.bf16.msra.mxu1 %v11150_v21  ;;  %5843 = vmatprep.subr.bf16.mxu0 %v11157_v22  ;;  %v3517_v21 = vld [vmem:[%s17200_s2 + $0xb38] sm:$0xff]  ;;  %v11196_v22 = vcombine.low %v3504_v12, %v3508_v39  ;;  %v12623_v12 = vld [vmem:[%s17202_s4 + $0x48] sm:$0xff]  }
 0x3a1   :  { %5966 = vmatprep.subr.bf16.mxu1 %v11159_v23  ;;  %v11198_v23 = vcombine.low %v3505_v40, %v3509_v42  ;;  %v11207_v26 = vcombine.high %v3513_v20, %v3517_v21  ;;  %v12624_v39 = vld [vmem:[%s17202_s4 + $0xc8] sm:$0xff]  }
 0x3a2   :  { %v12625_v40 = vld [vmem:[%s17202_s4 + $0x8] sm:$0xff]  }
 0x3a3   :  { %5844 = vmatpush1.bf16.msra.mxu0 %v11156_v27  ;;  %v3521_v27 = vld [vmem:[%s17200_s2 + $0xb58] sm:$0xff]  ;;  %v12626_v42 = vld [vmem:[%s17202_s4 + $0x88] sm:$0xff]  }
 0x3a4   :  { %5967 = vmatpush1.bf16.msra.mxu1 %v11158_v48  ;;  %5845 = vmatprep.subr.bf16.mxu0 %v11165_v31  ;;  %v3525_v48 = vld [vmem:[%s17200_s2 + $0xb78] sm:$0xff]  ;;  %v11204_v31 = vcombine.low %v3512_v17, %v3516_v19 }
 0x3a5   :  { %5968 = vmatprep.subr.bf16.mxu1 %v11167_v32  ;;  %v11206_v32 = vcombine.low %v3513_v20, %v3517_v21  ;;  %v11215_v38 = vcombine.high %v3521_v27, %v3525_v48  ;;  %v12632_v17 = vld [vmem:[%s17202_s4 + $0xd8] sm:$0xff]   ;;  %v12635_v21 = vld [vmem:[%s17202_s4 + $0x60] sm:$0xff]  }
 0x3a6   :  { %v12633_v19 = vld [vmem:[%s17202_s4 + $0x18] sm:$0xff]  }
 0x3a7   :  { %5846 = vmatpush1.bf16.msra.mxu0 %v11164_v54  ;;  %v3529_v54 = vld [vmem:[%s17200_s2 + $0xb98] sm:$0xff] }
 0x3a8   :  { %5969 = vmatpush1.bf16.msra.mxu1 %v11166_v33  ;;  %5847 = vmatprep.subr.bf16.mxu0 %v11173_v55  ;;  %v3533_v33 = vld [vmem:[%s17200_s2 + $0xbb8] sm:$0xff]  ;;  %v11212_v55 = vcombine.low %v3520_v7, %v3524_v6  ;;  %v12639_v7 = vld [vmem:[%s17202_s4 + $0x68] sm:$0xff]  }
 0x3a9   :  { %5970 = vmatprep.subr.bf16.mxu1 %v11175_v2  ;;  %v11214_v2 = vcombine.low %v3521_v27, %v3525_v48  ;;  %v11223_v41 = vcombine.high %v3529_v54, %v3533_v33  ;;  %v12634_v20 = vld [vmem:[%s17202_s4 + $0x98] sm:$0xff]   ;;  %v12640_v6 = vld [vmem:[%s17202_s4 + $0xe8] sm:$0xff]  }
 0x3aa   :  { %v12641_v48 = vld [vmem:[%s17202_s4 + $0x28] sm:$0xff]  }
 0x3ab   :  { %5848 = vmatpush1.bf16.msra.mxu0 %v11172_v30  ;;  %v3537_v30 = vld [vmem:[%s17200_s2 + $0xbd8] sm:$0xff] }
 0x3ac   :  { %5971 = vmatpush1.bf16.msra.mxu1 %v11174_v11  ;;  %5849 = vmatprep.subr.bf16.mxu0 %v11181_v4  ;;  %v3541_v11 = vld [vmem:[%s17200_s2 + $0xbf8] sm:$0xff]  ;;  %v11220_v4 = vcombine.low %v3528_v44, %v3532_v51 }
 0x3ad   :  { %5972 = vmatprep.subr.bf16.mxu1 %v11183_v59  ;;  %v11222_v59 = vcombine.low %v3529_v54, %v3533_v33  ;;  %v11231_v37 = vcombine.high %v3537_v30, %v3541_v11  ;;  %v11230_v14 = vcombine.low %v3537_v30, %v3541_v11  ;;  %v12644_v54 = vld [vmem:[%s17202_s4 + $0xf0] sm:$0xff]  }
 0x3af   :  { %5850 = vmatpush1.bf16.msra.mxu0 %v11180_v15  ;;  %v12619_v15 = vld [vmem:[%s17202_s4 + $0x40] sm:$0xff]  }
 0x3b0   :  { %5973 = vmatpush1.bf16.msra.mxu1 %v11182_v60  ;;  %5851 = vmatprep.subr.bf16.mxu0 %v11189_v13  ;;  %v12620_v60 = vld [vmem:[%s17202_s4 + $0xc0] sm:$0xff]  }
 0x3b1   :  { %5974 = vmatprep.subr.bf16.mxu1 %v11191_v16  ;;  %v12621_v13 = vld [vmem:[%s17202_s4] sm:$0xff]  }
 0x3b2   :  { %v12622_v16 = vld [vmem:[%s17202_s4 + $0x80] sm:$0xff]  }
 0x3b3   :  { %5852 = vmatpush1.bf16.msra.mxu0 %v11188_v45  ;;  %v12627_v45 = vld [vmem:[%s17202_s4 + $0x50] sm:$0xff]  }
 0x3b4   :  { %5975 = vmatpush1.bf16.msra.mxu1 %v11190_v25  ;;  %5853 = vmatprep.subr.bf16.mxu0 %v11197_v47  ;;  %v12629_v25 = vld [vmem:[%s17202_s4 + $0x10] sm:$0xff]  }
 0x3b5   :  { %5976 = vmatprep.subr.bf16.mxu1 %v11199_v49  ;;  %v12630_v47 = vld [vmem:[%s17202_s4 + $0x90] sm:$0xff]   ;;  %v12631_v49 = vld [vmem:[%s17202_s4 + $0x58] sm:$0xff]  }
 0x3b7   :  { %5854 = vmatpush1.bf16.msra.mxu0 %v11196_v22  ;;  %v12636_v22 = vld [vmem:[%s17202_s4 + $0xe0] sm:$0xff]  }
 0x3b8   :  { %5977 = vmatpush1.bf16.msra.mxu1 %v11198_v23  ;;  %5855 = vmatprep.subr.bf16.mxu0 %v11205_v63  ;;  %v12637_v23 = vld [vmem:[%s17202_s4 + $0x20] sm:$0xff]  }
 0x3b9   :  { %5978 = vmatprep.subr.bf16.mxu1 %v11207_v26  ;;  %v12638_v63 = vld [vmem:[%s17202_s4 + $0xa0] sm:$0xff]  }
 0x3ba   :  { %v15481_v26 = vld [vmem:[%s17201_s6 + $0x24] sm:$0xff] }
 0x3bb   :  { %5856 = vmatpush1.bf16.msra.mxu0 %v11204_v31  ;;  %v3550_v27 = vrot.slane %v15481_v26, %v14048_v8  ;;  %v3546_v31 = vrot.slane %v15481_v26, %v14045_v57  ;;  %v3554_v51 = vrot.slane %v15481_v26, %v14060_v61 }
 0x3bc   :  { %5979 = vmatpush1.bf16.msra.mxu1 %v11206_v32  ;;  %5857 = vmatprep.subr.bf16.mxu0 %v11213_v28  ;;  %v3558_v32 = vrot.slane %v15481_v26, %v14063_v62  ;;  %v12642_v28 = vld [vmem:[%s17202_s4 + $0xa8] sm:$0xff]  }
 0x3bd   :  { %5980 = vmatprep.subr.bf16.mxu1 %v11215_v38  ;;  %v12643_v38 = vld [vmem:[%s17202_s4 + $0x70] sm:$0xff]  }
 0x3bf   :  { %5858 = vmatpush1.bf16.msra.mxu0 %v11212_v55 }
 0x3c0   :  { %5981 = vmatpush1.bf16.msra.mxu1 %v11214_v2  ;;  %5859 = vmatprep.subr.bf16.mxu0 %v11221_v24 }
 0x3c1   :  { %5982 = vmatprep.subr.bf16.mxu1 %v11223_v41 }
 0x3c3   :  { %5860 = vmatpush1.bf16.msra.mxu0 %v11220_v4 }
 0x3c4   :  { %5983 = vmatpush1.bf16.msra.mxu1 %v11222_v59  ;;  %5861 = vmatprep.subr.bf16.mxu0 %v11229_v58  ;;  %v12646_v59 = vld [vmem:[%s17202_s4 + $0xb0] sm:$0xff]   ;;  %v12647_v58 = vld [vmem:[%s17202_s4 + $0x78] sm:$0xff]  }
 0x3c5   :  { %5984 = vmatprep.subr.bf16.mxu1 %v11231_v37 }
 0x3c7   :  { %5862 = vmatpush1.bf16.msra.mxu0 %v11228_v46 }
 0x3c8   :  { %5985 = vmatpush1.bf16.msra.mxu1 %v11230_v14  ;;  %11746 = vmatprep.subr.bf16.mxu0 %v12619_v15  ;;  %v12648_v15 = vld [vmem:[%s17202_s4 + $0xf8] sm:$0xff]  }
 0x3c9   :  { %11768 = vmatprep.subr.bf16.mxu1 %v12620_v60 }
 0x3ca   :  { %5864 = vmatmul.mubr.bf16.vlgmr.msra.gmra.mrb[16].mxu0 %v14836_v0 }
 0x3cb   :  { %5987 = vmatmul.mubr.bf16.vlgmr.msra.gmra.mrb[16].mxu1 %v14836_v0  ;;  %11747 = vmatpush3.bf16.msra.mxu0 %v12621_v13  ;;  %v12628_v0 = vld [vmem:[%s17202_s4 + $0xd0] sm:$0xff]  }
 0x3cc   :  { %11769 = vmatpush3.bf16.msra.mxu1 %v12622_v16  ;;  %11748 = vmatprep.subr.bf16.mxu0 %v12623_v12  ;;  %v12649_v16 = vld [vmem:[%s17202_s4 + $0x38] sm:$0xff]  }
 0x3cd   :  { %11770 = vmatprep.subr.bf16.mxu1 %v12624_v39 }
 0x3cf   :  { %11749 = vmatpush3.bf16.msra.mxu0 %v12625_v40  ;;  %v12650_v40 = vld [vmem:[%s17202_s4 + $0xb8] sm:$0xff]  }
 0x3d0   :  { %11771 = vmatpush3.bf16.msra.mxu1 %v12626_v42  ;;  %11750 = vmatprep.subr.bf16.mxu0 %v12627_v45  ;;  %v12651_v42 = vld [vmem:[%s17202_s4 + $0x140] sm:$0xff]  }
 0x3d1   :  { %11772 = vmatprep.subr.bf16.mxu1 %v12628_v0  ;;  %v12652_v0 = vld [vmem:[%s17202_s4 + $0x1c0] sm:$0xff]  }
 0x3d3   :  { %11751 = vmatpush3.bf16.msra.mxu0 %v12629_v25  ;;  %v12653_v25 = vld [vmem:[%s17202_s4 + $0x100] sm:$0xff]  }
 0x3d4   :  { %11773 = vmatpush3.bf16.msra.mxu1 %v12630_v47  ;;  %11752 = vmatprep.subr.bf16.mxu0 %v12631_v49  ;;  %v12654_v49 = vld [vmem:[%s17202_s4 + $0x180] sm:$0xff]  }
 0x3d5   :  { %11774 = vmatprep.subr.bf16.mxu1 %v12632_v17  ;;  %v12655_v17 = vld [vmem:[%s17202_s4 + $0x148] sm:$0xff]  }
 0x3d7   :  { %11753 = vmatpush3.bf16.msra.mxu0 %v12633_v19 }
 0x3d8   :  { %11775 = vmatpush3.bf16.msra.mxu1 %v12634_v20  ;;  %11754 = vmatprep.subr.bf16.mxu0 %v12635_v21  ;;  %v12656_v20 = vld [vmem:[%s17202_s4 + $0x1c8] sm:$0xff]  }
 0x3d9   :  { %11776 = vmatprep.subr.bf16.mxu1 %v12636_v22  ;;  %v12657_v21 = vld [vmem:[%s17202_s4 + $0x108] sm:$0xff]  }
 0x3da   :  { %v12658_v22 = vld [vmem:[%s17202_s4 + $0x188] sm:$0xff]  }
 0x3db   :  { %11755 = vmatpush3.bf16.msra.mxu0 %v12637_v23  ;;  %v12659_v23 = vld [vmem:[%s17202_s4 + $0x150] sm:$0xff]  }
 0x3dc   :  { %11777 = vmatpush3.bf16.msra.mxu1 %v12638_v63  ;;  %11756 = vmatprep.subr.bf16.mxu0 %v12639_v7  ;;  %v12660_v63 = vld [vmem:[%s17202_s4 + $0x1d0] sm:$0xff]  }
 0x3dd   :  { %v5619_v44 = vpop.f32.mrb[12].mxu0  ;;  %11778 = vmatprep.subr.bf16.mxu1 %v12640_v6  ;;  %v12661_v7 = vld [vmem:[%s17202_s4 + $0x110] sm:$0xff]  }
 0x3de   :  { %v5742_v33 = vpop.f32.mrb[12].mxu1  ;;  %v5621_v55 = vpop.f32.mrb[13].mxu0  ;;  %v11934_v10 = vadd.f32 %v5619_v44, %v3546_v31  ;;  %v12662_v6 = vld [vmem:[%s17202_s4 + $0x190] sm:$0xff]   ;;  %v12665_v31 = vld [vmem:[%s17202_s4 + $0x118] sm:$0xff]   ;;  %v12669_v44 = vld [vmem:[%s17202_s4 + $0x120] sm:$0xff]  }
 0x3df   :  { %v11935_v2 = vadd.f32 %v5621_v55, %v3550_v27  ;;  %v5744_v24 = vpop.f32.mrb[13].mxu1  ;;  %v5623_v41 = vpop.f32.mrb[14].mxu0  ;;  %11757 = vmatpush3.bf16.msra.mxu0 %v12641_v48  ;;  %v11936_v37 = vadd.f32 %v5742_v33, %v3554_v51  ;;  %v12663_v27 = vld [vmem:[%s17202_s4 + $0x158] sm:$0xff]   ;;  %v12670_v51 = vld [vmem:[%s17202_s4 + $0x1a0] sm:$0xff]   ;;  %v12672_v33 = vld [vmem:[%s17202_s4 + $0x1e8] sm:$0xff]  }
 0x3e0   :  { %v11937_v30 = vadd.f32 %v5744_v24, %v3558_v32  ;;  %v5746_v11 = vpop.f32.mrb[14].mxu1  ;;  %11779 = vmatpush3.bf16.msra.mxu1 %v12642_v28  ;;  %v5624_v4 = vpop.f32.mrb[15].mxu0  ;;  %11758 = vmatprep.subr.bf16.mxu0 %v12643_v38  ;;  %v5995_v12 = vmax.f32 %v11934_v10, 0.0  ;;  %v12664_v48 = vld [vmem:[%s17202_s4 + $0x1d8] sm:$0xff]   ;;  %v12667_v28 = vld [vmem:[%s17202_s4 + $0x160] sm:$0xff]   ;;  %v12673_v55 = vld [vmem:[%s17202_s4 + $0x128] sm:$0xff]  }
 0x3e1   :  { %v5996_v46 = vmax.f32 %v11935_v2, 0.0  ;;  %v5747_v14 = vpop.f32.mrb[15].mxu1  ;;  %11780 = vmatprep.subr.bf16.mxu1 %v12644_v54  ;;  %v5997_v45 = vmax.f32 %v11936_v37, 0.0  ;;  %v12666_v32 = vld [vmem:[%s17202_s4 + $0x198] sm:$0xff]   ;;  %v12668_v38 = vld [vmem:[%s17202_s4 + $0x1e0] sm:$0xff]   ;;  %v12671_v54 = vld [vmem:[%s17202_s4 + $0x168] sm:$0xff]  }
 0x3e2   :  { %v5998_v60 = vmax.f32 %v11937_v30, 0.0  ;;  %v6003_v47 = vpack.c.bf16 %v5995_v12, %v5995_v12  ;;  %v12674_v2 = vld [vmem:[%s17202_s4 + $0x1a8] sm:$0xff]   ;;  %v12675_v24 = vld [vmem:[%s17202_s4 + $0x170] sm:$0xff]   ;;  %v12679_v30 = vld [vmem:[%s17202_s4 + $0x178] sm:$0xff]   ;;  %v3057_v12 = vsub.f32 %v14318_v1, %v14726_v35  ;;  %v3570_v35 = vrot.slane %v15481_v26, %v14302_v52 }
 0x3e3   :  { %v6004_v13 = vpack.c.bf16 %v5996_v46, %v5996_v46  ;;  %11759 = vmatpush3.bf16.msra.mxu0 %v12645_v5  ;;  %v6005_v19 = vpack.c.bf16 %v5997_v45, %v5997_v45  ;;  %v12676_v41 = vld [vmem:[%s17202_s4 + $0x1f0] sm:$0xff]   ;;  %v12680_v11 = vld [vmem:[%s17202_s4 + $0x1f8] sm:$0xff]   ;;  %v6707_v37 = vld [vmem:[%s17203_s3 + $0x20] sm:$0xff]  ;;  %v3562_v45 = vrot.slane %v15481_v26, %v14085_v43 }
 0x3e4   :  { %v6006_v39 = vpack.c.bf16 %v5998_v60, %v5998_v60  ;;  %11781 = vmatpush3.bf16.msra.mxu1 %v12646_v59  ;;  %11760 = vmatprep.subr.bf16.mxu0 %v12647_v58  ;;  %v12677_v5 = vld [vmem:[%s17202_s4 + $0x130] sm:$0xff]   ;;  %v12681_v4 = vld [vmem:[%s17202_s4 + $0x138] sm:$0xff]   ;;  %v6703_v58 = vld [vmem:[%s17203_s3] sm:$0xff] }
 0x3e5   :  { %6561 = vmatprep.mubr.bf16.mxu0 %v6004_v13  ;;  %11782 = vmatprep.subr.bf16.mxu1 %v12648_v15  ;;  %v12678_v10 = vld [vmem:[%s17202_s4 + $0x1b0] sm:$0xff]   ;;  %v12682_v59 = vld [vmem:[%s17202_s4 + $0x1b8] sm:$0xff]   ;;  %v6704_v46 = vld [vmem:[%s17203_s3 + $0x8] sm:$0xff]  ;;  %v11297_v14 = vcombine.low %v6703_v58, %v6707_v37  ;;  %v11298_v15 = vcombine.high %v6703_v58, %v6707_v37 }
 0x3e6   :  { %6601 = vmatprep.mubr.bf16.mxu1 %v6006_v39  ;;  %v6708_v60 = vld [vmem:[%s17203_s3 + $0x28] sm:$0xff]  ;;  %v3065_v39 = vmul.f32 %v14806_v50, %v3057_v12  ;;  %v3566_v50 = vrot.slane %v15481_v26, %v14091_v9  ;;  %v6727_v12 = vld [vmem:[%s17203_s3 + $0xc0] sm:$0xff] }
 0x3e7   :  { %11761 = vmatpush3.bf16.msra.mxu0 %v12649_v16  ;;  %v11299_v13 = vcombine.low %v6704_v46, %v6708_v60  ;;  %v11300_v16 = vcombine.high %v6704_v46, %v6708_v60  ;;  %v6720_v58 = vld [vmem:[%s17203_s3 + $0x88] sm:$0xff] }
 0x3e8   :  { %11783 = vmatpush3.bf16.msra.mxu1 %v12650_v40  ;;  %11790 = vmatprep.subr.bf16.mxu0 %v12651_v42  ;;  %v15641_v40 = vld [vmem:[%s17201_s6 + $0x18] sm:$0x3f]  ;;  %v6724_v37 = vld [vmem:[%s17203_s3 + $0xa8] sm:$0xff] }
 0x3e9   :  { %11812 = vmatprep.subr.bf16.mxu1 %v12652_v0  ;;  %v3078_v42 = vrot.slane %v15641_v40, %v14048_v8 }
 0x3ea   :  { %6562 = vmatmul.mubr.bf16.vlgmr.msra.gmra.mrb[20].mxu0 %v6003_v47  ;;  %v3574_v47 = vrot.slane %v15481_v26, %v14305_v53  ;;  %v6711_v26 = vld [vmem:[%s17203_s3 + $0x40] sm:$0xff] }
 0x3eb   :  { %6602 = vmatmul.mubr.bf16.vlgmr.msra.gmra.mrb[20].mxu1 %v6005_v19  ;;  %11791 = vmatpush3.bf16.msra.mxu0 %v12653_v25  ;;  %v3102_v0 = vmul.f32 %v3078_v42, %v3065_v39  ;;  %v15650_v25 = vld [vmem:[%s17201_s6 + $0x1e] sm:$0x3f] }
 0x3ec   :  { %11813 = vmatpush3.bf16.msra.mxu1 %v12654_v49  ;;  %11792 = vmatprep.subr.bf16.mxu0 %v12655_v17  ;;  %v3115_v1 = vrot.slane %v15650_v25, %v14048_v8  ;;  %v6731_v39 = vld [vmem:[%s17203_s3 + $0xe0] sm:$0xff] }
 0x3ed   :  { %11814 = vmatprep.subr.bf16.mxu1 %v12656_v20 }
 0x3ef   :  { %11793 = vmatpush3.bf16.msra.mxu0 %v12657_v21  ;;  %v3139_v21 = vadd.f32 %v3115_v1, %v3102_v0  ;;  %v11322_v0 = vcombine.high %v6727_v12, %v6731_v39 }
 0x3f0   :  { %11815 = vmatpush3.bf16.msra.mxu1 %v12658_v22  ;;  %11794 = vmatprep.subr.bf16.mxu0 %v12659_v23 }
 0x3f1   :  { %11816 = vmatprep.subr.bf16.mxu1 %v12660_v63 }
 0x3f3   :  { %11795 = vmatpush3.bf16.msra.mxu0 %v12661_v7 }
 0x3f4   :  { %11817 = vmatpush3.bf16.msra.mxu1 %v12662_v6  ;;  %11796 = vmatprep.subr.bf16.mxu0 %v12663_v27 }
 0x3f5   :  { %11818 = vmatprep.subr.bf16.mxu1 %v12664_v48 }
 0x3f7   :  { %11797 = vmatpush3.bf16.msra.mxu0 %v12665_v31 }
 0x3f8   :  { %11819 = vmatpush3.bf16.msra.mxu1 %v12666_v32  ;;  %11798 = vmatprep.subr.bf16.mxu0 %v12667_v28 }
 0x3f9   :  { %11820 = vmatprep.subr.bf16.mxu1 %v12668_v38 }
 0x3fb   :  { %11799 = vmatpush3.bf16.msra.mxu0 %v12669_v44 }
 0x3fc   :  { %11821 = vmatpush3.bf16.msra.mxu1 %v12670_v51  ;;  %11800 = vmatprep.subr.bf16.mxu0 %v12671_v54  ;;  %v3145_v51 = vmax.f32 %v3139_v21, 0.0  ;;  %v6715_v54 = vld [vmem:[%s17203_s3 + $0x60] sm:$0xff] }
 0x3fd   :  { %11822 = vmatprep.subr.bf16.mxu1 %v12672_v33  ;;  %v11305_v46 = vcombine.low %v6711_v26, %v6715_v54 }
 0x3ff   :  { %11801 = vmatpush3.bf16.msra.mxu0 %v12673_v55  ;;  %v6712_v55 = vld [vmem:[%s17203_s3 + $0x48] sm:$0xff] }
 0x400   :  { %11823 = vmatpush3.bf16.msra.mxu1 %v12674_v2  ;;  %11802 = vmatprep.subr.bf16.mxu0 %v12675_v24  ;;  %v6716_v2 = vld [vmem:[%s17203_s3 + $0x68] sm:$0xff] }
 0x401   :  { %11824 = vmatprep.subr.bf16.mxu1 %v12676_v41 }
 0x403   :  { %11803 = vmatpush3.bf16.msra.mxu0 %v12677_v5 }
 0x404   :  { %11825 = vmatpush3.bf16.msra.mxu1 %v12678_v10  ;;  %11804 = vmatprep.subr.bf16.mxu0 %v12679_v30  ;;  %v11306_v10 = vcombine.high %v6711_v26, %v6715_v54  ;;  %v6719_v30 = vld [vmem:[%s17203_s3 + $0x80] sm:$0xff] }
 0x405   :  { %11826 = vmatprep.subr.bf16.mxu1 %v12680_v11  ;;  %v6723_v11 = vld [vmem:[%s17203_s3 + $0xa0] sm:$0xff] }
 0x406   :  { %v11314_v60 = vcombine.high %v6719_v30, %v6723_v11  ;;  %v11313_v42 = vcombine.low %v6719_v30, %v6723_v11 }
 0x407   :  { %11805 = vmatpush3.bf16.msra.mxu0 %v12681_v4  ;;  %v15678_v4 = vpack.c.bf16 %v3145_v51, %v3145_v51 }
 0x408   :  { %11827 = vmatpush3.bf16.msra.mxu1 %v12682_v59  ;;  %9048 = vmatprep.subr.bf16.mxu0 %v11298_v15  ;;  %v11308_v59 = vcombine.high %v6712_v55, %v6716_v2  ;;  %v11307_v15 = vcombine.low %v6712_v55, %v6716_v2  ;;  %v6759_v55 = vld [vmem:[%s17203_s3 + $0x1c0] sm:$0xff] }
 0x409   :  { %9171 = vmatprep.subr.bf16.mxu1 %v11300_v16  ;;  %v11316_v16 = vcombine.high %v6720_v58, %v6724_v37  ;;  %v6763_v2 = vld [vmem:[%s17203_s3 + $0x1e0] sm:$0xff] }
 0x40a   :  { %v11354_v30 = vcombine.high %v6759_v55, %v6763_v2 }
 0x49d   :  { %v5865_v49 = vpop.f32.mrb[16].mxu0 }
 0x49e   :  { %v11938_v17 = vadd.f32 %v5865_v49, %v3562_v45  ;;  %v5988_v19 = vpop.f32.mrb[16].mxu1  ;;  %v5867_v20 = vpop.f32.mrb[17].mxu0  ;;  %v11315_v45 = vcombine.low %v6720_v58, %v6724_v37  ;;  %v6740_v49 = vld [vmem:[%s17203_s3 + $0x128] sm:$0xff]  ;;  %v6767_v58 = vld [vmem:[%s17203_s3 + $0x200] sm:$0xff] }
 0x49f   :  { %v11940_v22 = vadd.f32 %v5988_v19, %v3570_v35  ;;  %v11939_v23 = vadd.f32 %v5867_v20, %v3566_v50  ;;  %v5990_v63 = vpop.f32.mrb[17].mxu1  ;;  %v5869_v7 = vpop.f32.mrb[18].mxu0  ;;  %v6735_v35 = vld [vmem:[%s17203_s3 + $0x100] sm:$0xff] }
 0x4a0   :  { %v5999_v6 = vmax.f32 %v11938_v17, 0.0  ;;  %v11941_v27 = vadd.f32 %v5990_v63, %v3574_v47  ;;  %v5992_v48 = vpop.f32.mrb[18].mxu1  ;;  %v5870_v31 = vpop.f32.mrb[19].mxu0  ;;  %v6739_v50 = vld [vmem:[%s17203_s3 + $0x120] sm:$0xff]  ;;  %v6736_v47 = vld [vmem:[%s17203_s3 + $0x108] sm:$0xff]  ;;  %v11321_v17 = vcombine.low %v6727_v12, %v6731_v39 }
 0x4a1   :  { %v6001_v32 = vmax.f32 %v11940_v22, 0.0  ;;  %v6000_v28 = vmax.f32 %v11939_v23, 0.0  ;;  %v5993_v38 = vpop.f32.mrb[19].mxu1  ;;  %v11330_v20 = vcombine.high %v6735_v35, %v6739_v50  ;;  %v11332_v21 = vcombine.high %v6736_v47, %v6740_v49  ;;  %v6743_v22 = vld [vmem:[%s17203_s3 + $0x140] sm:$0xff]  ;;  %v6744_v63 = vld [vmem:[%s17203_s3 + $0x148] sm:$0xff] }
 0x4a2   :  { %v6002_v44 = vmax.f32 %v11941_v27, 0.0  ;;  %v6007_v24 = vpack.c.bf16 %v5999_v6, %v5999_v6  ;;  %v6747_v23 = vld [vmem:[%s17203_s3 + $0x160] sm:$0xff]  ;;  %v6748_v7 = vld [vmem:[%s17203_s3 + $0x168] sm:$0xff]  ;;  %v11329_v6 = vcombine.low %v6735_v35, %v6739_v50  ;;  %v11331_v27 = vcombine.low %v6736_v47, %v6740_v49 }
 0x4a3   :  { %v6008_v33 = vpack.c.bf16 %v6000_v28, %v6000_v28  ;;  %v6009_v5 = vpack.c.bf16 %v6001_v32, %v6001_v32  ;;  %v11338_v48 = vcombine.high %v6743_v22, %v6747_v23  ;;  %v11340_v31 = vcombine.high %v6744_v63, %v6748_v7  ;;  %v6751_v32 = vld [vmem:[%s17203_s3 + $0x180] sm:$0xff]  ;;  %v6752_v38 = vld [vmem:[%s17203_s3 + $0x188] sm:$0xff] }
 0x4a4   :  { %v6010_v41 = vpack.c.bf16 %v6002_v44, %v6002_v44  ;;  %v6755_v28 = vld [vmem:[%s17203_s3 + $0x1a0] sm:$0xff]  ;;  %v6756_v44 = vld [vmem:[%s17203_s3 + $0x1a8] sm:$0xff]  ;;  %v11337_v51 = vcombine.low %v6743_v22, %v6747_v23  ;;  %v11339_v26 = vcombine.low %v6744_v63, %v6748_v7 }
 0x4a5   :  { %6641 = vmatprep.mubr.bf16.mxu0 %v6008_v33  ;;  %v11346_v54 = vcombine.high %v6751_v32, %v6755_v28  ;;  %v11348_v33 = vcombine.high %v6752_v38, %v6756_v44  ;;  %v6771_v37 = vld [vmem:[%s17203_s3 + $0x220] sm:$0xff]  ;;  %v6772_v12 = vld [vmem:[%s17203_s3 + $0x228] sm:$0xff] }
 0x4a6   :  { %6681 = vmatprep.mubr.bf16.mxu1 %v6010_v41  ;;  %6642 = vmatmul.mubr.bf16.vlgmr.msra.gmra.mrb[24].mxu0 %v6007_v24  ;;  %v6760_v24 = vld [vmem:[%s17203_s3 + $0x1c8] sm:$0xff]  ;;  %v11362_v50 = vcombine.high %v6767_v58, %v6771_v37  ;;  %v11361_v63 = vcombine.low %v6767_v58, %v6771_v37 }
 0x4a7   :  { %6682 = vmatmul.mubr.bf16.vlgmr.msra.gmra.mrb[24].mxu1 %v6009_v5  ;;  %9049 = vmatpush1.bf16.msra.mxu0 %v11297_v14  ;;  %v6728_v14 = vld [vmem:[%s17203_s3 + $0xc8] sm:$0xff]  ;;  %v11345_v5 = vcombine.low %v6751_v32, %v6755_v28 }
 0x4a8   :  { %9172 = vmatpush1.bf16.msra.mxu1 %v11299_v13  ;;  %9080 = vmatprep.mubr.bf16.mxu0 %v15678_v4  ;;  %v6732_v13 = vld [vmem:[%s17203_s3 + $0xe8] sm:$0xff] }
 0x4a9   :  { %9203 = vmatprep.mubr.bf16.mxu1 %v15678_v4  ;;  %9050 = vmatprep.subr.bf16.mxu0 %v11306_v10  ;;  %v11324_v1 = vcombine.high %v6728_v14, %v6732_v13  ;;  %v11323_v19 = vcombine.low %v6728_v14, %v6732_v13  ;;  %v6764_v41 = vld [vmem:[%s17203_s3 + $0x1e8] sm:$0xff]  ;;  %v11347_v10 = vcombine.low %v6752_v38, %v6756_v44 }
 0x4aa   :  { %9173 = vmatprep.subr.bf16.mxu1 %v11308_v59  ;;  %v11356_v59 = vcombine.high %v6760_v24, %v6764_v41  ;;  %v11355_v35 = vcombine.low %v6760_v24, %v6764_v41  ;;  %v6780_v22 = vld [vmem:[%s17203_s3 + $0x268] sm:$0xff] }
 0x4ab   :  { %9051 = vmatpush1.bf16.msra.mxu0 %v11305_v46  ;;  %v6784_v32 = vld [vmem:[%s17203_s3 + $0x288] sm:$0xff] }
 0x4ac   :  { %9174 = vmatpush1.bf16.msra.mxu1 %v11307_v15  ;;  %9052 = vmatprep.subr.bf16.mxu0 %v11314_v60  ;;  %v11232_v15 = vld [vmem:[%s17201_s6 + $0x34] ss:$0 sm:$0xff]  ;;  %v6788_v28 = vld [vmem:[%s17203_s3 + $0x2a8] sm:$0xff] }
 0x4ad   :  { %9175 = vmatprep.subr.bf16.mxu1 %v11316_v16  ;;  %v6768_v16 = vld [vmem:[%s17203_s3 + $0x208] sm:$0xff]  ;;  %v11379_v41 = vcombine.low %v6784_v32, %v6788_v28 }
 0x4ae   :  { %v11363_v7 = vcombine.low %v6768_v16, %v6772_v12  ;;  %v6804_v58 = vld [vmem:[%s17203_s3 + $0x328] sm:$0xff] }
 0x4af   :  { %9053 = vmatpush1.bf16.msra.mxu0 %v11313_v42  ;;  %v11353_v42 = vcombine.low %v6759_v55, %v6763_v2  ;;  %v6792_v55 = vld [vmem:[%s17203_s3 + $0x2c8] sm:$0xff] }
 0x4b0   :  { %9176 = vmatpush1.bf16.msra.mxu1 %v11315_v45  ;;  %9054 = vmatprep.subr.bf16.mxu0 %v11322_v0  ;;  %v6796_v2 = vld [vmem:[%s17203_s3 + $0x2e8] sm:$0xff] }
 0x4b1   :  { %9177 = vmatprep.subr.bf16.mxu1 %v11324_v1 }
 0x4b3   :  { %9055 = vmatpush1.bf16.msra.mxu0 %v11321_v17  ;;  %v11364_v17 = vcombine.high %v6768_v16, %v6772_v12  ;;  %v6807_v16 = vld [vmem:[%s17203_s3 + $0x340] sm:$0xff] }
 0x4b4   :  { %9178 = vmatpush1.bf16.msra.mxu1 %v11323_v19  ;;  %9056 = vmatprep.subr.bf16.mxu0 %v11330_v20  ;;  %v6775_v19 = vld [vmem:[%s17203_s3 + $0x240] sm:$0xff] }
 0x4b5   :  { %9179 = vmatprep.subr.bf16.mxu1 %v11332_v21  ;;  %v6779_v20 = vld [vmem:[%s17203_s3 + $0x260] sm:$0xff]  ;;  %v6776_v21 = vld [vmem:[%s17203_s3 + $0x248] sm:$0xff] }
 0x4b6   :  { %v11369_v38 = vcombine.low %v6775_v19, %v6779_v20  ;;  %v11371_v44 = vcombine.low %v6776_v21, %v6780_v22  ;;  %v6811_v12 = vld [vmem:[%s17203_s3 + $0x360] sm:$0xff] }
 0x4b7   :  { %9057 = vmatpush1.bf16.msra.mxu0 %v11329_v6  ;;  %v11370_v6 = vcombine.high %v6775_v19, %v6779_v20 }
 0x4b8   :  { %9180 = vmatpush1.bf16.msra.mxu1 %v11331_v27  ;;  %9058 = vmatprep.subr.bf16.mxu0 %v11338_v48  ;;  %v11372_v27 = vcombine.high %v6776_v21, %v6780_v22  ;;  %v6783_v48 = vld [vmem:[%s17203_s3 + $0x280] sm:$0xff] }
 0x4b9   :  { %9181 = vmatprep.subr.bf16.mxu1 %v11340_v31  ;;  %v6787_v31 = vld [vmem:[%s17203_s3 + $0x2a0] sm:$0xff] }
 0x4ba   :  { %v11377_v24 = vcombine.low %v6783_v48, %v6787_v31 }
 0x4bb   :  { %9059 = vmatpush1.bf16.msra.mxu0 %v11337_v51  ;;  %v11378_v51 = vcombine.high %v6783_v48, %v6787_v31 }
 0x4bc   :  { %9182 = vmatpush1.bf16.msra.mxu1 %v11339_v26  ;;  %9060 = vmatprep.subr.bf16.mxu0 %v11346_v54  ;;  %v11380_v26 = vcombine.high %v6784_v32, %v6788_v28  ;;  %v6791_v54 = vld [vmem:[%s17203_s3 + $0x2c0] sm:$0xff] }
 0x4bd   :  { %v11762_v11 = vpop.f32.mrb[20].mxu0  ;;  %9183 = vmatprep.subr.bf16.mxu1 %v11348_v33  ;;  %v6795_v33 = vld [vmem:[%s17203_s3 + $0x2e0] sm:$0xff] }
 0x4be   :  { %v11784_v46 = vpop.f32.mrb[20].mxu1  ;;  %v11763_v60 = vpop.f32.mrb[21].mxu0  ;;  %v11385_v37 = vcombine.low %v6791_v54, %v6795_v33  ;;  %v6831_v28 = vld [vmem:[%s17203_s3 + $0x400] sm:$0xff] }
 0x4bf   :  { %v11764_v39 = vadd.f32 %v11763_v60, %v11762_v11  ;;  %v11785_v14 = vpop.f32.mrb[21].mxu1  ;;  %9061 = vmatpush1.bf16.msra.mxu0 %v11345_v5  ;;  %v11765_v13 = vpop.f32.mrb[22].mxu0  ;;  %v11386_v5 = vcombine.high %v6791_v54, %v6795_v33  ;;  %v6803_v11 = vld [vmem:[%s17203_s3 + $0x320] sm:$0xff] }
 0x4c0   :  { %v11786_v45 = vadd.f32 %v11785_v14, %v11784_v46  ;;  %9184 = vmatpush1.bf16.msra.mxu1 %v11347_v10  ;;  %v11787_v0 = vpop.f32.mrb[22].mxu1  ;;  %v11766_v1 = vpop.f32.mrb[23].mxu0  ;;  %9062 = vmatprep.subr.bf16.mxu0 %v11354_v30  ;;  %v11388_v10 = vcombine.high %v6792_v55, %v6796_v2  ;;  %v6799_v30 = vld [vmem:[%s17203_s3 + $0x300] sm:$0xff]  ;;  %v11387_v46 = vcombine.low %v6792_v55, %v6796_v2  ;;  %v6812_v14 = vld [vmem:[%s17203_s3 + $0x368] sm:$0xff] }
 0x4c1   :  { %v6564_v47 = vadd.f32 %v11764_v39, %v11232_v15  ;;  %v11788_v49 = vpop.f32.mrb[23].mxu1  ;;  %9185 = vmatprep.subr.bf16.mxu1 %v11356_v59  ;;  %v6800_v59 = vld [vmem:[%s17203_s3 + $0x308] sm:$0xff]  ;;  %v11394_v15 = vcombine.high %v6799_v30, %v6803_v11  ;;  %v11393_v13 = vcombine.low %v6799_v30, %v6803_v11  ;;  %v3074_v0 = vrot.slane %v15641_v40, %v14045_v57 }
 0x4c2   :  { %v11396_v60 = vcombine.high %v6800_v59, %v6804_v58  ;;  %v6808_v39 = vld [vmem:[%s17203_s3 + $0x348] sm:$0xff]  ;;  %v11401_v40 = vcombine.low %v6807_v16, %v6811_v12 }
 0x4c3   :  { %v15775_v23 = vadd.f32 %v11786_v45, %v6564_v47  ;;  %9063 = vmatpush1.bf16.msra.mxu0 %v11353_v42  ;;  %v11395_v42 = vcombine.low %v6800_v59, %v6804_v58  ;;  %v11402_v45 = vcombine.high %v6807_v16, %v6811_v12  ;;  %v11404_v1 = vcombine.high %v6808_v39, %v6812_v14  ;;  %v6816_v47 = vld [vmem:[%s17203_s3 + $0x388] sm:$0xff] }
 0x4c4   :  { %9186 = vmatpush1.bf16.msra.mxu1 %v11355_v35  ;;  %9064 = vmatprep.subr.bf16.mxu0 %v11362_v50  ;;  %v6815_v35 = vld [vmem:[%s17203_s3 + $0x380] sm:$0xff]  ;;  %v6820_v49 = vld [vmem:[%s17203_s3 + $0x3a8] sm:$0xff]  ;;  %v11403_v19 = vcombine.low %v6808_v39, %v6812_v14  ;;  %v3101_v21 = vmul.f32 %v3074_v0, %v14821_v18 }
 0x4c5   :  { %9187 = vmatprep.subr.bf16.mxu1 %v11364_v17  ;;  %v6819_v50 = vld [vmem:[%s17203_s3 + $0x3a0] sm:$0xff]  ;;  %v3111_v17 = vrot.slane %v15650_v25, %v14045_v57  ;;  %v11412_v22 = vcombine.high %v6816_v47, %v6820_v49  ;;  %v6824_v25 = vld [vmem:[%s17203_s3 + $0x3c8] sm:$0xff] }
 0x4c6   :  { %v11410_v20 = vcombine.high %v6815_v35, %v6819_v50  ;;  %v11409_v18 = vcombine.low %v6815_v35, %v6819_v50  ;;  %v6840_v30 = vld [vmem:[%s17203_s3 + $0x448] sm:$0xff]  ;;  %v6859_v0 = vld [vmem:[%s17203_s3 + $0x4e0] sm:$0xff] }
 0x4c7   :  { %9065 = vmatpush1.bf16.msra.mxu0 %v11361_v63  ;;  %v6823_v63 = vld [vmem:[%s17203_s3 + $0x3c0] sm:$0xff]  ;;  %v3138_v31 = vadd.f32 %v3111_v17, %v3101_v21  ;;  %v6844_v11 = vld [vmem:[%s17203_s3 + $0x468] sm:$0xff] }
 0x4c8   :  { %9188 = vmatpush1.bf16.msra.mxu1 %v11363_v7  ;;  %9066 = vmatprep.subr.bf16.mxu0 %v11370_v6  ;;  %v6827_v7 = vld [vmem:[%s17203_s3 + $0x3e0] sm:$0xff]  ;;  %v6828_v6 = vld [vmem:[%s17203_s3 + $0x3e8] sm:$0xff]  ;;  %v11435_v14 = vcombine.low %v6840_v30, %v6844_v11 }
 0x4c9   :  { %9189 = vmatprep.subr.bf16.mxu1 %v11372_v27  ;;  %v11411_v27 = vcombine.low %v6816_v47, %v6820_v49  ;;  %v11418_v48 = vcombine.high %v6823_v63, %v6827_v7  ;;  %v11420_v32 = vcombine.high %v6824_v25, %v6828_v6  ;;  %v11419_v54 = vcombine.low %v6824_v25, %v6828_v6  ;;  %v6848_v16 = vld [vmem:[%s17203_s3 + $0x488] sm:$0xff]  ;;  %v6863_v17 = vld [vmem:[%s17203_s3 + $0x500] sm:$0xff] }
 0x4ca   :  { %v3144_v33 = vmax.f32 %v3138_v31, 0.0  ;;  %v6852_v12 = vld [vmem:[%s17203_s3 + $0x4a8] sm:$0xff]  ;;  %v6871_v6 = vld [vmem:[%s17203_s3 + $0x540] sm:$0xff] }
 0x4cb   :  { %9067 = vmatpush1.bf16.msra.mxu0 %v11369_v38  ;;  %v6835_v38 = vld [vmem:[%s17203_s3 + $0x420] sm:$0xff]  ;;  %v6860_v35 = vld [vmem:[%s17203_s3 + $0x4e8] sm:$0xff]  ;;  %v11443_v47 = vcombine.low %v6848_v16, %v6852_v12 }
 0x4cc   :  { %9190 = vmatpush1.bf16.msra.mxu1 %v11371_v44  ;;  %9068 = vmatprep.subr.bf16.mxu0 %v11378_v51  ;;  %v6832_v44 = vld [vmem:[%s17203_s3 + $0x408] sm:$0xff]  ;;  %v11426_v55 = vcombine.high %v6831_v28, %v6835_v38 }
 0x4cd   :  { %9191 = vmatprep.subr.bf16.mxu1 %v11380_v26  ;;  %v6836_v51 = vld [vmem:[%s17203_s3 + $0x428] sm:$0xff]  ;;  %v11417_v26 = vcombine.low %v6823_v63, %v6827_v7 }
 0x4ce   :  { %v11428_v2 = vcombine.high %v6832_v44, %v6836_v51  ;;  %v11427_v59 = vcombine.low %v6832_v44, %v6836_v51  ;;  %v6868_v21 = vld [vmem:[%s17203_s3 + $0x528] sm:$0xff]  ;;  %v6879_v44 = vld [vmem:[%s17203_s3 + $0x580] sm:$0xff] }
 0x4cf   :  { %9069 = vmatpush1.bf16.msra.mxu0 %v11377_v24  ;;  %v3147_v24 = vmax.f32 %v14844_v3, 0.0  ;;  %v15879_v3 = vpack.c.bf16 %v3144_v33, %v3144_v33  ;;  %v6883_v51 = vld [vmem:[%s17203_s3 + $0x5a0] sm:$0xff] }
 0x4d0   :  { %9192 = vmatpush1.bf16.msra.mxu1 %v11379_v41  ;;  %9070 = vmatprep.subr.bf16.mxu0 %v11386_v5  ;;  %v6839_v41 = vld [vmem:[%s17203_s3 + $0x440] sm:$0xff] }
 0x4d1   :  { %9193 = vmatprep.subr.bf16.mxu1 %v11388_v10  ;;  %v6843_v5 = vld [vmem:[%s17203_s3 + $0x460] sm:$0xff]  ;;  %v11425_v10 = vcombine.low %v6831_v28, %v6835_v38 }
 0x4d2   :  { %v11434_v58 = vcombine.high %v6839_v41, %v6843_v5  ;;  %v11433_v39 = vcombine.low %v6839_v41, %v6843_v5  ;;  %v6887_v41 = vld [vmem:[%s17203_s3 + $0x5c0] sm:$0xff] }
 0x4d3   :  { %9071 = vmatpush1.bf16.msra.mxu0 %v11385_v37  ;;  %v6847_v37 = vld [vmem:[%s17203_s3 + $0x480] sm:$0xff] }
 0x4d4   :  { %9194 = vmatpush1.bf16.msra.mxu1 %v11387_v46  ;;  %9072 = vmatprep.subr.bf16.mxu0 %v11394_v15  ;;  %v6851_v46 = vld [vmem:[%s17203_s3 + $0x4a0] sm:$0xff]  ;;  %v15888_v15 = vpack.c.bf16 %v3147_v24, %v3147_v24 }
 0x4d5   :  { %9195 = vmatprep.subr.bf16.mxu1 %v11396_v60  ;;  %v11436_v60 = vcombine.high %v6840_v30, %v6844_v11  ;;  %v11441_v50 = vcombine.low %v6847_v37, %v6851_v46  ;;  %v6891_v5 = vld [vmem:[%s17203_s3 + $0x5e0] sm:$0xff]  ;;  %v6892_v30 = vld [vmem:[%s17203_s3 + $0x5e8] sm:$0xff]  ;;  %v11473_v11 = vcombine.low %v6879_v44, %v6883_v51 }
 0x4d7   :  { %9073 = vmatpush1.bf16.msra.mxu0 %v11393_v13  ;;  %v11442_v13 = vcombine.high %v6847_v37, %v6851_v46  ;;  %v6895_v46 = vld [vmem:[%s17203_s3 + $0x600] sm:$0xff] }
 0x4d8   :  { %9196 = vmatpush1.bf16.msra.mxu1 %v11395_v42  ;;  %9074 = vmatprep.subr.bf16.mxu0 %v11402_v45  ;;  %v11444_v42 = vcombine.high %v6848_v16, %v6852_v12  ;;  %v6855_v45 = vld [vmem:[%s17203_s3 + $0x4c0] sm:$0xff]  ;;  %v6896_v16 = vld [vmem:[%s17203_s3 + $0x608] sm:$0xff] }
 0x4d9   :  { %9197 = vmatprep.subr.bf16.mxu1 %v11404_v1  ;;  %v6856_v1 = vld [vmem:[%s17203_s3 + $0x4c8] sm:$0xff]  ;;  %v11450_v49 = vcombine.high %v6855_v45, %v6859_v0 }
 0x4da   :  { %v11451_v63 = vcombine.low %v6856_v1, %v6860_v35  ;;  %v6900_v12 = vld [vmem:[%s17203_s3 + $0x628] sm:$0xff] }
 0x4db   :  { %9075 = vmatpush1.bf16.msra.mxu0 %v11401_v40  ;;  %v11452_v40 = vcombine.high %v6856_v1, %v6860_v35  ;;  %v6904_v1 = vld [vmem:[%s17203_s3 + $0x648] sm:$0xff] }
 0x4dc   :  { %9198 = vmatpush1.bf16.msra.mxu1 %v11403_v19  ;;  %9076 = vmatprep.subr.bf16.mxu0 %v11410_v20  ;;  %v6867_v19 = vld [vmem:[%s17203_s3 + $0x520] sm:$0xff]  ;;  %v6864_v20 = vld [vmem:[%s17203_s3 + $0x508] sm:$0xff] }
 0x4dd   :  { %9199 = vmatprep.subr.bf16.mxu1 %v11412_v22  ;;  %v11449_v22 = vcombine.low %v6855_v45, %v6859_v0  ;;  %v11458_v7 = vcombine.high %v6863_v17, %v6867_v19  ;;  %v11460_v25 = vcombine.high %v6864_v20, %v6868_v21  ;;  %v11457_v31 = vcombine.low %v6863_v17, %v6867_v19  ;;  %v6903_v45 = vld [vmem:[%s17203_s3 + $0x640] sm:$0xff]  ;;  %v6908_v35 = vld [vmem:[%s17203_s3 + $0x668] sm:$0xff] }
 0x4de   :  { %v6907_v0 = vld [vmem:[%s17203_s3 + $0x660] sm:$0xff] }
 0x4df   :  { %9077 = vmatpush1.bf16.msra.mxu0 %v11409_v18  ;;  %v6875_v18 = vld [vmem:[%s17203_s3 + $0x560] sm:$0xff] }
 0x4e0   :  { %9200 = vmatpush1.bf16.msra.mxu1 %v11411_v27  ;;  %9078 = vmatprep.subr.bf16.mxu0 %v11418_v48  ;;  %v6872_v27 = vld [vmem:[%s17203_s3 + $0x548] sm:$0xff]  ;;  %v11466_v28 = vcombine.high %v6871_v6, %v6875_v18  ;;  %v11465_v33 = vcombine.low %v6871_v6, %v6875_v18  ;;  %v6911_v17 = vld [vmem:[%s17203_s3 + $0x680] sm:$0xff] }
 0x4e1   :  { %9201 = vmatprep.subr.bf16.mxu1 %v11420_v32  ;;  %v6876_v48 = vld [vmem:[%s17203_s3 + $0x568] sm:$0xff]  ;;  %v11459_v32 = vcombine.low %v6864_v20, %v6868_v21  ;;  %v6915_v19 = vld [vmem:[%s17203_s3 + $0x6a0] sm:$0xff] }
 0x4e2   :  { %v11468_v38 = vcombine.high %v6872_v27, %v6876_v48  ;;  %v6912_v20 = vld [vmem:[%s17203_s3 + $0x688] sm:$0xff]  ;;  %v6919_v6 = vld [vmem:[%s17203_s3 + $0x6c0] sm:$0xff] }
 0x4e3   :  { %9079 = vmatpush1.bf16.msra.mxu0 %v11417_v26  ;;  %v6880_v26 = vld [vmem:[%s17203_s3 + $0x588] sm:$0xff]  ;;  %v6923_v18 = vld [vmem:[%s17203_s3 + $0x6e0] sm:$0xff] }
 0x4e4   :  { %9202 = vmatpush1.bf16.msra.mxu1 %v11419_v54  ;;  %9089 = vmatprep.subr.bf16.mxu0 %v11426_v55  ;;  %v6884_v54 = vld [vmem:[%s17203_s3 + $0x5a8] sm:$0xff]  ;;  %v11467_v55 = vcombine.low %v6872_v27, %v6876_v48 }
 0x4e5   :  { %9212 = vmatprep.subr.bf16.mxu1 %v11428_v2  ;;  %v11474_v2 = vcombine.high %v6879_v44, %v6883_v51  ;;  %v11476_v24 = vcombine.high %v6880_v26, %v6884_v54  ;;  %v6916_v21 = vld [vmem:[%s17203_s3 + $0x6a8] sm:$0xff]  ;;  %v6927_v44 = vld [vmem:[%s17203_s3 + $0x700] sm:$0xff] }
 0x4e6   :  { %9081 = vmatmul.mubr.bf16.vlgmr.msra.gmra.mrb[28].mxu0 %v15879_v3  ;;  %v6920_v27 = vld [vmem:[%s17203_s3 + $0x6c8] sm:$0xff]  ;;  %v6931_v51 = vld [vmem:[%s17203_s3 + $0x720] sm:$0xff] }
 0x4e7   :  { %9204 = vmatmul.mubr.bf16.vlgmr.msra.gmra.mrb[28].mxu1 %v15879_v3  ;;  %9090 = vmatpush1.bf16.msra.mxu0 %v11425_v10  ;;  %v6888_v10 = vld [vmem:[%s17203_s3 + $0x5c8] sm:$0xff] }
 0x4e8   :  { %9121 = vmatprep.mubr.bf16.mxu0 %v15888_v15  ;;  %9213 = vmatpush1.bf16.msra.mxu1 %v11427_v59  ;;  %v11475_v59 = vcombine.low %v6880_v26, %v6884_v54  ;;  %v11484_v37 = vcombine.high %v6888_v10, %v6892_v30  ;;  %v6924_v48 = vld [vmem:[%s17203_s3 + $0x6e8] sm:$0xff] }
 0x4e9   :  { %9244 = vmatprep.mubr.bf16.mxu1 %v15888_v15  ;;  %9091 = vmatprep.subr.bf16.mxu0 %v11434_v58  ;;  %v11482_v58 = vcombine.high %v6887_v41, %v6891_v5  ;;  %v6928_v26 = vld [vmem:[%s17203_s3 + $0x708] sm:$0xff] }
 0x4ea   :  { %9214 = vmatprep.subr.bf16.mxu1 %v11436_v60  ;;  %v6899_v60 = vld [vmem:[%s17203_s3 + $0x620] sm:$0xff]  ;;  %v6932_v54 = vld [vmem:[%s17203_s3 + $0x728] sm:$0xff] }
 0x4eb   :  { %9092 = vmatpush1.bf16.msra.mxu0 %v11433_v39  ;;  %v11481_v39 = vcombine.low %v6887_v41, %v6891_v5  ;;  %v6935_v41 = vld [vmem:[%s17203_s3 + $0x740] sm:$0xff] }
 0x4ec   :  { %9215 = vmatpush1.bf16.msra.mxu1 %v11435_v14  ;;  %9093 = vmatprep.subr.bf16.mxu0 %v11442_v13  ;;  %v11483_v14 = vcombine.low %v6888_v10, %v6892_v30  ;;  %v11490_v13 = vcombine.high %v6895_v46, %v6899_v60  ;;  %v6939_v5 = vld [vmem:[%s17203_s3 + $0x760] sm:$0xff]  ;;  %v6936_v10 = vld [vmem:[%s17203_s3 + $0x748] sm:$0xff] }
 0x4ed   :  { %9216 = vmatprep.subr.bf16.mxu1 %v11444_v42  ;;  %v11492_v42 = vcombine.high %v6896_v16, %v6900_v12  ;;  %v6940_v30 = vld [vmem:[%s17203_s3 + $0x768] sm:$0xff] }
 0x4ef   :  { %9094 = vmatpush1.bf16.msra.mxu0 %v11441_v50  ;;  %v11489_v50 = vcombine.low %v6895_v46, %v6899_v60  ;;  %v6943_v46 = vld [vmem:[%s17203_s3 + $0x780] sm:$0xff] }
 0x4f0   :  { %9217 = vmatpush1.bf16.msra.mxu1 %v11443_v47  ;;  %9095 = vmatprep.subr.bf16.mxu0 %v11450_v49  ;;  %v11491_v47 = vcombine.low %v6896_v16, %v6900_v12  ;;  %v11498_v49 = vcombine.high %v6903_v45, %v6907_v0  ;;  %v6947_v60 = vld [vmem:[%s17203_s3 + $0x7a0] sm:$0xff]  ;;  %v6944_v16 = vld [vmem:[%s17203_s3 + $0x788] sm:$0xff] }
 0x4f1   :  { %9218 = vmatprep.subr.bf16.mxu1 %v11452_v40  ;;  %v11500_v40 = vcombine.high %v6904_v1, %v6908_v35  ;;  %v6948_v12 = vld [vmem:[%s17203_s3 + $0x7a8] sm:$0xff] }
 0x4f3   :  { %9096 = vmatpush1.bf16.msra.mxu0 %v11449_v22  ;;  %v11497_v22 = vcombine.low %v6903_v45, %v6907_v0  ;;  %v6951_v45 = vld [vmem:[%s17203_s3 + $0x7c0] sm:$0xff] }
 0x4f4   :  { %9219 = vmatpush1.bf16.msra.mxu1 %v11451_v63  ;;  %9097 = vmatprep.subr.bf16.mxu0 %v11458_v7  ;;  %v11499_v63 = vcombine.low %v6904_v1, %v6908_v35  ;;  %v11506_v7 = vcombine.high %v6911_v17, %v6915_v19  ;;  %v6955_v0 = vld [vmem:[%s17203_s3 + $0x7e0] sm:$0xff]  ;;  %v6952_v1 = vld [vmem:[%s17203_s3 + $0x7c8] sm:$0xff] }
 0x4f5   :  { %9220 = vmatprep.subr.bf16.mxu1 %v11460_v25  ;;  %v11508_v25 = vcombine.high %v6912_v20, %v6916_v21  ;;  %v6956_v35 = vld [vmem:[%s17203_s3 + $0x7e8] sm:$0xff] }
 0x4f7   :  { %9098 = vmatpush1.bf16.msra.mxu0 %v11457_v31  ;;  %v11505_v31 = vcombine.low %v6911_v17, %v6915_v19  ;;  %v6959_v17 = vld [vmem:[%s17203_s3 + $0x800] sm:$0xff] }
 0x4f8   :  { %9221 = vmatpush1.bf16.msra.mxu1 %v11459_v32  ;;  %9099 = vmatprep.subr.bf16.mxu0 %v11466_v28  ;;  %v11507_v32 = vcombine.low %v6912_v20, %v6916_v21  ;;  %v11514_v28 = vcombine.high %v6919_v6, %v6923_v18  ;;  %v6963_v19 = vld [vmem:[%s17203_s3 + $0x820] sm:$0xff]  ;;  %v6960_v20 = vld [vmem:[%s17203_s3 + $0x808] sm:$0xff] }
 0x4f9   :  { %9222 = vmatprep.subr.bf16.mxu1 %v11468_v38  ;;  %v11516_v38 = vcombine.high %v6920_v27, %v6924_v48  ;;  %v6964_v21 = vld [vmem:[%s17203_s3 + $0x828] sm:$0xff] }
 0x4fb   :  { %9100 = vmatpush1.bf16.msra.mxu0 %v11465_v33  ;;  %v11513_v33 = vcombine.low %v6919_v6, %v6923_v18  ;;  %v11556_v6 = vcombine.high %v6960_v20, %v6964_v21  ;;  %v3149_v18 = vmax.f32 %v14854_v34, 0.0 }
 0x4fc   :  { %9223 = vmatpush1.bf16.msra.mxu1 %v11467_v55  ;;  %9101 = vmatprep.subr.bf16.mxu0 %v11474_v2  ;;  %v11515_v55 = vcombine.low %v6920_v27, %v6924_v48  ;;  %v11522_v2 = vcombine.high %v6927_v44, %v6931_v51  ;;  %v6967_v27 = vld [vmem:[%s17203_s3 + $0x840] sm:$0xff] }
 0x4fd   :  { %9224 = vmatprep.subr.bf16.mxu1 %v11476_v24  ;;  %v11524_v24 = vcombine.high %v6928_v26, %v6932_v54  ;;  %v6971_v48 = vld [vmem:[%s17203_s3 + $0x860] sm:$0xff] }
 0x4ff   :  { %9102 = vmatpush1.bf16.msra.mxu0 %v11473_v11  ;;  %v11521_v11 = vcombine.low %v6927_v44, %v6931_v51  ;;  %v6975_v44 = vld [vmem:[%s17203_s3 + $0x880] sm:$0xff] }
 0x500   :  { %9225 = vmatpush1.bf16.msra.mxu1 %v11475_v59  ;;  %9103 = vmatprep.subr.bf16.mxu0 %v11482_v58  ;;  %v11523_v59 = vcombine.low %v6928_v26, %v6932_v54  ;;  %v11530_v58 = vcombine.high %v6935_v41, %v6939_v5  ;;  %v6979_v51 = vld [vmem:[%s17203_s3 + $0x8a0] sm:$0xff]  ;;  %v16090_v26 = vpack.c.bf16 %v3149_v18, %v3149_v18 }
 0x501   :  { %9226 = vmatprep.subr.bf16.mxu1 %v11484_v37  ;;  %v11532_v37 = vcombine.high %v6936_v10, %v6940_v30 }
 0x503   :  { %9104 = vmatpush1.bf16.msra.mxu0 %v11481_v39  ;;  %v11529_v39 = vcombine.low %v6935_v41, %v6939_v5  ;;  %v11570_v41 = vcombine.high %v6975_v44, %v6979_v51 }
 0x504   :  { %9227 = vmatpush1.bf16.msra.mxu1 %v11483_v14  ;;  %9105 = vmatprep.subr.bf16.mxu0 %v11490_v13  ;;  %v11531_v14 = vcombine.low %v6936_v10, %v6940_v30  ;;  %v11538_v13 = vcombine.high %v6943_v46, %v6947_v60  ;;  %v6983_v10 = vld [vmem:[%s17203_s3 + $0x8c0] sm:$0xff] }
 0x505   :  { %9228 = vmatprep.subr.bf16.mxu1 %v11492_v42  ;;  %v11540_v42 = vcombine.high %v6944_v16, %v6948_v12  ;;  %v6987_v30 = vld [vmem:[%s17203_s3 + $0x8e0] sm:$0xff] }
 0x507   :  { %9106 = vmatpush1.bf16.msra.mxu0 %v11489_v50  ;;  %v11537_v50 = vcombine.low %v6943_v46, %v6947_v60  ;;  %v11578_v46 = vcombine.high %v6983_v10, %v6987_v30 }
 0x508   :  { %9229 = vmatpush1.bf16.msra.mxu1 %v11491_v47  ;;  %9107 = vmatprep.subr.bf16.mxu0 %v11498_v49  ;;  %v11539_v47 = vcombine.low %v6944_v16, %v6948_v12  ;;  %v11546_v49 = vcombine.high %v6951_v45, %v6955_v0  ;;  %v6991_v16 = vld [vmem:[%s17203_s3 + $0x900] sm:$0xff] }
 0x509   :  { %9230 = vmatprep.subr.bf16.mxu1 %v11500_v40  ;;  %v11548_v40 = vcombine.high %v6952_v1, %v6956_v35  ;;  %v6995_v12 = vld [vmem:[%s17203_s3 + $0x920] sm:$0xff] }
 0x50b   :  { %9108 = vmatpush1.bf16.msra.mxu0 %v11497_v22  ;;  %v11545_v22 = vcombine.low %v6951_v45, %v6955_v0  ;;  %v11586_v45 = vcombine.high %v6991_v16, %v6995_v12 }
 0x50c   :  { %9231 = vmatpush1.bf16.msra.mxu1 %v11499_v63  ;;  %9109 = vmatprep.subr.bf16.mxu0 %v11506_v7  ;;  %v11547_v63 = vcombine.low %v6952_v1, %v6956_v35  ;;  %v3146_v7 = vmax.f32 %v14846_v29, 0.0  ;;  %v6972_v29 = vld [vmem:[%s17203_s3 + $0x868] sm:$0xff]  ;;  %v6999_v1 = vld [vmem:[%s17203_s3 + $0x940] sm:$0xff] }
 0x50d   :  { %9232 = vmatprep.subr.bf16.mxu1 %v11508_v25  ;;  %v11554_v25 = vcombine.high %v6959_v17, %v6963_v19  ;;  %v7003_v35 = vld [vmem:[%s17203_s3 + $0x960] sm:$0xff] }
 0x50e   :  { %v16081_v34 = vpack.c.bf16 %v3146_v7, %v3146_v7  ;;  %v11593_v7 = vcombine.low %v6999_v1, %v7003_v35 }
 0x50f   :  { %9110 = vmatpush1.bf16.msra.mxu0 %v11505_v31  ;;  %v11553_v31 = vcombine.low %v6959_v17, %v6963_v19  ;;  %v11594_v17 = vcombine.high %v6999_v1, %v7003_v35  ;;  %v7047_v1 = vld [vmem:[%s17203_s3 + $0xac0] sm:$0xff] }
 0x510   :  { %9233 = vmatpush1.bf16.msra.mxu1 %v11507_v32  ;;  %9111 = vmatprep.subr.bf16.mxu0 %v11514_v28  ;;  %v6968_v32 = vld [vmem:[%s17203_s3 + $0x848] sm:$0xff]  ;;  %v11555_v28 = vcombine.low %v6960_v20, %v6964_v21  ;;  %v7007_v20 = vld [vmem:[%s17203_s3 + $0x980] sm:$0xff] }
 0x511   :  { %9234 = vmatprep.subr.bf16.mxu1 %v11516_v38  ;;  %v11562_v38 = vcombine.high %v6967_v27, %v6971_v48  ;;  %v11564_v54 = vcombine.high %v6968_v32, %v6972_v29  ;;  %v7011_v21 = vld [vmem:[%s17203_s3 + $0x9a0] sm:$0xff] }
 0x512   :  { %v7051_v35 = vld [vmem:[%s17203_s3 + $0xae0] sm:$0xff] }
 0x513   :  { %9112 = vmatpush1.bf16.msra.mxu0 %v11513_v33  ;;  %v6976_v33 = vld [vmem:[%s17203_s3 + $0x888] sm:$0xff] }
 0x514   :  { %9235 = vmatpush1.bf16.msra.mxu1 %v11515_v55  ;;  %9113 = vmatprep.subr.bf16.mxu0 %v11522_v2  ;;  %v6980_v55 = vld [vmem:[%s17203_s3 + $0x8a8] sm:$0xff]  ;;  %v11561_v2 = vcombine.low %v6967_v27, %v6971_v48  ;;  %v7015_v27 = vld [vmem:[%s17203_s3 + $0x9c0] sm:$0xff] }
 0x515   :  { %9236 = vmatprep.subr.bf16.mxu1 %v11524_v24  ;;  %v11563_v24 = vcombine.low %v6968_v32, %v6972_v29  ;;  %v11572_v5 = vcombine.high %v6976_v33, %v6980_v55  ;;  %v7019_v48 = vld [vmem:[%s17203_s3 + $0x9e0] sm:$0xff]  ;;  %v7020_v32 = vld [vmem:[%s17203_s3 + $0x9e8] sm:$0xff]  ;;  %v11601_v29 = vcombine.low %v7007_v20, %v7011_v21 }
 0x517   :  { %9114 = vmatpush1.bf16.msra.mxu0 %v11521_v11  ;;  %v6984_v11 = vld [vmem:[%s17203_s3 + $0x8c8] sm:$0xff] }
 0x518   :  { %9237 = vmatpush1.bf16.msra.mxu1 %v11523_v59  ;;  %9115 = vmatprep.subr.bf16.mxu0 %v11530_v58  ;;  %v6988_v59 = vld [vmem:[%s17203_s3 + $0x8e8] sm:$0xff]  ;;  %v11569_v58 = vcombine.low %v6975_v44, %v6979_v51  ;;  %v7023_v51 = vld [vmem:[%s17203_s3 + $0xa00] sm:$0xff] }
 0x519   :  { %9238 = vmatprep.subr.bf16.mxu1 %v11532_v37  ;;  %v11571_v37 = vcombine.low %v6976_v33, %v6980_v55  ;;  %v11580_v60 = vcombine.high %v6984_v11, %v6988_v59  ;;  %v7024_v33 = vld [vmem:[%s17203_s3 + $0xa08] sm:$0xff] }
 0x51a   :  { %v7028_v55 = vld [vmem:[%s17203_s3 + $0xa28] sm:$0xff] }
 0x51b   :  { %9116 = vmatpush1.bf16.msra.mxu0 %v11529_v39  ;;  %v6992_v39 = vld [vmem:[%s17203_s3 + $0x908] sm:$0xff] }
 0x51c   :  { %9239 = vmatpush1.bf16.msra.mxu1 %v11531_v14  ;;  %9117 = vmatprep.subr.bf16.mxu0 %v11538_v13  ;;  %v6996_v14 = vld [vmem:[%s17203_s3 + $0x928] sm:$0xff]  ;;  %v11577_v13 = vcombine.low %v6983_v10, %v6987_v30  ;;  %v7031_v10 = vld [vmem:[%s17203_s3 + $0xa40] sm:$0xff] }
 0x51d   :  { %9240 = vmatprep.subr.bf16.mxu1 %v11540_v42  ;;  %v11579_v42 = vcombine.low %v6984_v11, %v6988_v59  ;;  %v11588_v0 = vcombine.high %v6992_v39, %v6996_v14  ;;  %v7035_v30 = vld [vmem:[%s17203_s3 + $0xa60] sm:$0xff]  ;;  %v7032_v11 = vld [vmem:[%s17203_s3 + $0xa48] sm:$0xff] }
 0x51e   :  { %v7036_v59 = vld [vmem:[%s17203_s3 + $0xa68] sm:$0xff] }
 0x51f   :  { %9118 = vmatpush1.bf16.msra.mxu0 %v11537_v50  ;;  %v7000_v50 = vld [vmem:[%s17203_s3 + $0x948] sm:$0xff] }
 0x520   :  { %9241 = vmatpush1.bf16.msra.mxu1 %v11539_v47  ;;  %9119 = vmatprep.subr.bf16.mxu0 %v11546_v49  ;;  %v7004_v47 = vld [vmem:[%s17203_s3 + $0x968] sm:$0xff]  ;;  %v11585_v49 = vcombine.low %v6991_v16, %v6995_v12  ;;  %v7039_v16 = vld [vmem:[%s17203_s3 + $0xa80] sm:$0xff] }
 0x521   :  { %9242 = vmatprep.subr.bf16.mxu1 %v11548_v40  ;;  %v11587_v40 = vcombine.low %v6992_v39, %v6996_v14  ;;  %v11596_v19 = vcombine.high %v7000_v50, %v7004_v47  ;;  %v7043_v12 = vld [vmem:[%s17203_s3 + $0xaa0] sm:$0xff]  ;;  %v7040_v39 = vld [vmem:[%s17203_s3 + $0xa88] sm:$0xff] }
 0x522   :  { %v7044_v14 = vld [vmem:[%s17203_s3 + $0xaa8] sm:$0xff] }
 0x523   :  { %9120 = vmatpush1.bf16.msra.mxu0 %v11545_v22  ;;  %v7008_v22 = vld [vmem:[%s17203_s3 + $0x988] sm:$0xff] }
 0x524   :  { %9243 = vmatpush1.bf16.msra.mxu1 %v11547_v63  ;;  %9130 = vmatprep.subr.bf16.mxu0 %v11554_v25  ;;  %v7012_v63 = vld [vmem:[%s17203_s3 + $0x9a8] sm:$0xff]  ;;  %v11595_v25 = vcombine.low %v7000_v50, %v7004_v47 }
 0x525   :  { %9253 = vmatprep.subr.bf16.mxu1 %v11556_v6  ;;  %v11602_v6 = vcombine.high %v7007_v20, %v7011_v21  ;;  %v11604_v18 = vcombine.high %v7008_v22, %v7012_v63  ;;  %v7048_v50 = vld [vmem:[%s17203_s3 + $0xac8] sm:$0xff]  ;;  %v7055_v20 = vld [vmem:[%s17203_s3 + $0xb00] sm:$0xff] }
 0x526   :  { %9122 = vmatmul.mubr.bf16.vlgmr.msra.gmra.mrb[28].mxu0 %v16081_v34  ;;  %v7052_v47 = vld [vmem:[%s17203_s3 + $0xae8] sm:$0xff]  ;;  %v7059_v21 = vld [vmem:[%s17203_s3 + $0xb20] sm:$0xff] }
 0x527   :  { %9245 = vmatmul.mubr.bf16.vlgmr.msra.gmra.mrb[28].mxu1 %v16081_v34  ;;  %9131 = vmatpush1.bf16.msra.mxu0 %v11553_v31  ;;  %v7016_v31 = vld [vmem:[%s17203_s3 + $0x9c8] sm:$0xff] }
 0x528   :  { %9162 = vmatprep.mubr.bf16.mxu0 %v16090_v26  ;;  %9254 = vmatpush1.bf16.msra.mxu1 %v11555_v28  ;;  %v11603_v28 = vcombine.low %v7008_v22, %v7012_v63  ;;  %v11612_v44 = vcombine.high %v7016_v31, %v7020_v32  ;;  %v7056_v22 = vld [vmem:[%s17203_s3 + $0xb08] sm:$0xff] }
 0x529   :  { %9285 = vmatprep.mubr.bf16.mxu1 %v16090_v26  ;;  %9132 = vmatprep.subr.bf16.mxu0 %v11562_v38  ;;  %v11610_v38 = vcombine.high %v7015_v27, %v7019_v48  ;;  %v7060_v63 = vld [vmem:[%s17203_s3 + $0xb28] sm:$0xff] }
 0x52a   :  { %9255 = vmatprep.subr.bf16.mxu1 %v11564_v54  ;;  %v7027_v54 = vld [vmem:[%s17203_s3 + $0xa20] sm:$0xff] }
 0x52b   :  { %9133 = vmatpush1.bf16.msra.mxu0 %v11561_v2  ;;  %v11609_v2 = vcombine.low %v7015_v27, %v7019_v48  ;;  %v7063_v27 = vld [vmem:[%s17203_s3 + $0xb40] sm:$0xff] }
 0x52c   :  { %9256 = vmatpush1.bf16.msra.mxu1 %v11563_v24  ;;  %9134 = vmatprep.subr.bf16.mxu0 %v11570_v41  ;;  %v11611_v24 = vcombine.low %v7016_v31, %v7020_v32  ;;  %v11618_v41 = vcombine.high %v7023_v51, %v7027_v54  ;;  %v7067_v48 = vld [vmem:[%s17203_s3 + $0xb60] sm:$0xff]  ;;  %v7064_v31 = vld [vmem:[%s17203_s3 + $0xb48] sm:$0xff] }
 0x52d   :  { %9257 = vmatprep.subr.bf16.mxu1 %v11572_v5  ;;  %v11620_v5 = vcombine.high %v7024_v33, %v7028_v55  ;;  %v7068_v32 = vld [vmem:[%s17203_s3 + $0xb68] sm:$0xff] }
 0x52f   :  { %9135 = vmatpush1.bf16.msra.mxu0 %v11569_v58  ;;  %v11617_v58 = vcombine.low %v7023_v51, %v7027_v54  ;;  %v7071_v51 = vld [vmem:[%s17203_s3 + $0xb80] sm:$0xff] }
 0x530   :  { %9258 = vmatpush1.bf16.msra.mxu1 %v11571_v37  ;;  %9136 = vmatprep.subr.bf16.mxu0 %v11578_v46  ;;  %v11619_v37 = vcombine.low %v7024_v33, %v7028_v55  ;;  %v11626_v46 = vcombine.high %v7031_v10, %v7035_v30  ;;  %v7075_v54 = vld [vmem:[%s17203_s3 + $0xba0] sm:$0xff]  ;;  %v7072_v33 = vld [vmem:[%s17203_s3 + $0xb88] sm:$0xff] }
 0x531   :  { %9259 = vmatprep.subr.bf16.mxu1 %v11580_v60  ;;  %v11628_v60 = vcombine.high %v7032_v11, %v7036_v59  ;;  %v7076_v55 = vld [vmem:[%s17203_s3 + $0xba8] sm:$0xff] }
 0x533   :  { %9137 = vmatpush1.bf16.msra.mxu0 %v11577_v13  ;;  %v11625_v13 = vcombine.low %v7031_v10, %v7035_v30  ;;  %v7079_v10 = vld [vmem:[%s17203_s3 + $0xbc0] sm:$0xff] }
 0x534   :  { %9260 = vmatpush1.bf16.msra.mxu1 %v11579_v42  ;;  %9138 = vmatprep.subr.bf16.mxu0 %v11586_v45  ;;  %v11627_v42 = vcombine.low %v7032_v11, %v7036_v59  ;;  %v11634_v45 = vcombine.high %v7039_v16, %v7043_v12  ;;  %v7083_v30 = vld [vmem:[%s17203_s3 + $0xbe0] sm:$0xff]  ;;  %v7080_v11 = vld [vmem:[%s17203_s3 + $0xbc8] sm:$0xff] }
 0x535   :  { %9261 = vmatprep.subr.bf16.mxu1 %v11588_v0  ;;  %v11636_v0 = vcombine.high %v7040_v39, %v7044_v14  ;;  %v7084_v59 = vld [vmem:[%s17203_s3 + $0xbe8] sm:$0xff] }
 0x537   :  { %9139 = vmatpush1.bf16.msra.mxu0 %v11585_v49  ;;  %v11633_v49 = vcombine.low %v7039_v16, %v7043_v12  ;;  %v6705_v16 = vld [vmem:[%s17203_s3 + $0x10] sm:$0xff] }
 0x538   :  { %9262 = vmatpush1.bf16.msra.mxu1 %v11587_v40  ;;  %9140 = vmatprep.subr.bf16.mxu0 %v11594_v17  ;;  %v11635_v40 = vcombine.low %v7040_v39, %v7044_v14  ;;  %v11642_v17 = vcombine.high %v7047_v1, %v7051_v35  ;;  %v6709_v12 = vld [vmem:[%s17203_s3 + $0x30] sm:$0xff]  ;;  %v6706_v39 = vld [vmem:[%s17203_s3 + $0x18] sm:$0xff] }
 0x539   :  { %9263 = vmatprep.subr.bf16.mxu1 %v11596_v19  ;;  %v11644_v19 = vcombine.high %v7048_v50, %v7052_v47  ;;  %v6710_v14 = vld [vmem:[%s17203_s3 + $0x38] sm:$0xff] }
 0x53b   :  { %9141 = vmatpush1.bf16.msra.mxu0 %v11593_v7  ;;  %v11641_v7 = vcombine.low %v7047_v1, %v7051_v35  ;;  %v11304_v1 = vcombine.high %v6706_v39, %v6710_v14  ;;  %v6713_v35 = vld [vmem:[%s17203_s3 + $0x50] sm:$0xff] }
 0x53c   :  { %9264 = vmatpush1.bf16.msra.mxu1 %v11595_v25  ;;  %9142 = vmatprep.subr.bf16.mxu0 %v11602_v6  ;;  %v11643_v25 = vcombine.low %v7048_v50, %v7052_v47  ;;  %v11650_v6 = vcombine.high %v7055_v20, %v7059_v21  ;;  %v6717_v50 = vld [vmem:[%s17203_s3 + $0x70] sm:$0xff]  ;;  %v11301_v47 = vcombine.low %v6705_v16, %v6709_v12 }
 0x53d   :  { %9265 = vmatprep.subr.bf16.mxu1 %v11604_v18  ;;  %v11652_v18 = vcombine.high %v7056_v22, %v7060_v63 }
 0x53f   :  { %9143 = vmatpush1.bf16.msra.mxu0 %v11601_v29  ;;  %v11649_v29 = vcombine.low %v7055_v20, %v7059_v21  ;;  %v6721_v20 = vld [vmem:[%s17203_s3 + $0x90] sm:$0xff] }
 0x540   :  { %9266 = vmatpush1.bf16.msra.mxu1 %v11603_v28  ;;  %9144 = vmatprep.subr.bf16.mxu0 %v11610_v38  ;;  %v11651_v28 = vcombine.low %v7056_v22, %v7060_v63  ;;  %v11658_v38 = vcombine.high %v7063_v27, %v7067_v48  ;;  %v6725_v21 = vld [vmem:[%s17203_s3 + $0xb0] sm:$0xff]  ;;  %v6722_v63 = vld [vmem:[%s17203_s3 + $0x98] sm:$0xff] }
 0x541   :  { %9267 = vmatprep.subr.bf16.mxu1 %v11612_v44  ;;  %v11660_v44 = vcombine.high %v7064_v31, %v7068_v32 }
 0x543   :  { %9145 = vmatpush1.bf16.msra.mxu0 %v11609_v2  ;;  %v11657_v2 = vcombine.low %v7063_v27, %v7067_v48  ;;  %v6729_v48 = vld [vmem:[%s17203_s3 + $0xd0] sm:$0xff] }
 0x544   :  { %9268 = vmatpush1.bf16.msra.mxu1 %v11611_v24  ;;  %9146 = vmatprep.subr.bf16.mxu0 %v11618_v41  ;;  %v11659_v24 = vcombine.low %v7064_v31, %v7068_v32  ;;  %v11666_v41 = vcombine.high %v7071_v51, %v7075_v54  ;;  %v6733_v31 = vld [vmem:[%s17203_s3 + $0xf0] sm:$0xff]  ;;  %v6730_v32 = vld [vmem:[%s17203_s3 + $0xd8] sm:$0xff] }
 0x545   :  { %9269 = vmatprep.subr.bf16.mxu1 %v11620_v5  ;;  %v11668_v5 = vcombine.high %v7072_v33, %v7076_v55 }
 0x547   :  { %9147 = vmatpush1.bf16.msra.mxu0 %v11617_v58  ;;  %v11665_v58 = vcombine.low %v7071_v51, %v7075_v54  ;;  %v6737_v51 = vld [vmem:[%s17203_s3 + $0x110] sm:$0xff] }
 0x548   :  { %9270 = vmatpush1.bf16.msra.mxu1 %v11619_v37  ;;  %9148 = vmatprep.subr.bf16.mxu0 %v11626_v46  ;;  %v11667_v37 = vcombine.low %v7072_v33, %v7076_v55  ;;  %v11674_v46 = vcombine.high %v7079_v10, %v7083_v30  ;;  %v6741_v54 = vld [vmem:[%s17203_s3 + $0x130] sm:$0xff]  ;;  %v6738_v33 = vld [vmem:[%s17203_s3 + $0x118] sm:$0xff] }
 0x549   :  { %9271 = vmatprep.subr.bf16.mxu1 %v11628_v60  ;;  %v11676_v60 = vcombine.high %v7080_v11, %v7084_v59  ;;  %v6742_v55 = vld [vmem:[%s17203_s3 + $0x138] sm:$0xff] }
 0x54b   :  { %9149 = vmatpush1.bf16.msra.mxu0 %v11625_v13  ;;  %v11673_v13 = vcombine.low %v7079_v10, %v7083_v30  ;;  %v6745_v10 = vld [vmem:[%s17203_s3 + $0x150] sm:$0xff] }
 0x54c   :  { %9272 = vmatpush1.bf16.msra.mxu1 %v11627_v42  ;;  %9150 = vmatprep.subr.bf16.mxu0 %v11634_v45  ;;  %v11675_v42 = vcombine.low %v7080_v11, %v7084_v59  ;;  %v3148_v45 = vmax.f32 %v14856_v36, 0.0  ;;  %v6718_v36 = vld [vmem:[%s17203_s3 + $0x78] sm:$0xff]  ;;  %v6749_v30 = vld [vmem:[%s17203_s3 + $0x170] sm:$0xff] }
 0x54d   :  { %9273 = vmatprep.subr.bf16.mxu1 %v11636_v0  ;;  %v11302_v0 = vcombine.high %v6705_v16, %v6709_v12  ;;  %v6746_v11 = vld [vmem:[%s17203_s3 + $0x158] sm:$0xff]  ;;  %v6753_v16 = vld [vmem:[%s17203_s3 + $0x190] sm:$0xff] }
 0x54e   :  { %v6750_v59 = vld [vmem:[%s17203_s3 + $0x178] sm:$0xff]  ;;  %v6757_v12 = vld [vmem:[%s17203_s3 + $0x1b0] sm:$0xff] }
 0x54f   :  { %9151 = vmatpush1.bf16.msra.mxu0 %v11633_v49  ;;  %v6714_v49 = vld [vmem:[%s17203_s3 + $0x58] sm:$0xff] }
 0x550   :  { %9274 = vmatpush1.bf16.msra.mxu1 %v11635_v40  ;;  %9152 = vmatprep.subr.bf16.mxu0 %v11642_v17  ;;  %v16282_v40 = vpack.c.bf16 %v3148_v45, %v3148_v45  ;;  %v11303_v17 = vcombine.low %v6706_v39, %v6710_v14  ;;  %v11312_v22 = vcombine.high %v6714_v49, %v6718_v36  ;;  %v6754_v39 = vld [vmem:[%s17203_s3 + $0x198] sm:$0xff] }
 0x551   :  { %9275 = vmatprep.subr.bf16.mxu1 %v11644_v19  ;;  %v11310_v19 = vcombine.high %v6713_v35, %v6717_v50  ;;  %v6758_v14 = vld [vmem:[%s17203_s3 + $0x1b8] sm:$0xff]  ;;  %v11350_v45 = vcombine.high %v6753_v16, %v6757_v12 }
 0x553   :  { %9153 = vmatpush1.bf16.msra.mxu0 %v11641_v7  ;;  %v6726_v7 = vld [vmem:[%s17203_s3 + $0xb8] sm:$0xff] }
 0x554   :  { %9276 = vmatpush1.bf16.msra.mxu1 %v11643_v25  ;;  %9154 = vmatprep.subr.bf16.mxu0 %v11650_v6  ;;  %v11309_v25 = vcombine.low %v6713_v35, %v6717_v50  ;;  %v11311_v6 = vcombine.low %v6714_v49, %v6718_v36  ;;  %v11320_v27 = vcombine.high %v6722_v63, %v6726_v7  ;;  %v6761_v35 = vld [vmem:[%s17203_s3 + $0x1d0] sm:$0xff]  ;;  %v6762_v36 = vld [vmem:[%s17203_s3 + $0x1d8] sm:$0xff] }
 0x555   :  { %9277 = vmatprep.subr.bf16.mxu1 %v11652_v18  ;;  %v11318_v18 = vcombine.high %v6721_v20, %v6725_v21  ;;  %v6765_v50 = vld [vmem:[%s17203_s3 + $0x1f0] sm:$0xff] }
 0x557   :  { %9155 = vmatpush1.bf16.msra.mxu0 %v11649_v29  ;;  %v6734_v29 = vld [vmem:[%s17203_s3 + $0xf8] sm:$0xff] }
 0x558   :  { %9278 = vmatpush1.bf16.msra.mxu1 %v11651_v28  ;;  %9156 = vmatprep.subr.bf16.mxu0 %v11658_v38  ;;  %v11319_v28 = vcombine.low %v6722_v63, %v6726_v7  ;;  %v11326_v38 = vcombine.high %v6729_v48, %v6733_v31 }
 0x559   :  { %9279 = vmatprep.subr.bf16.mxu1 %v11660_v44  ;;  %v11328_v44 = vcombine.high %v6730_v32, %v6734_v29 }
 0x55b   :  { %9157 = vmatpush1.bf16.msra.mxu0 %v11657_v2  ;;  %v11325_v2 = vcombine.low %v6729_v48, %v6733_v31 }
 0x55c   :  { %9280 = vmatpush1.bf16.msra.mxu1 %v11659_v24  ;;  %9158 = vmatprep.subr.bf16.mxu0 %v11666_v41  ;;  %v11327_v24 = vcombine.low %v6730_v32, %v6734_v29  ;;  %v11334_v41 = vcombine.high %v6737_v51, %v6741_v54  ;;  %v6769_v32 = vld [vmem:[%s17203_s3 + $0x210] sm:$0xff] }
 0x55d   :  { %9281 = vmatprep.subr.bf16.mxu1 %v11668_v5  ;;  %v11336_v5 = vcombine.high %v6738_v33, %v6742_v55  ;;  %v6773_v29 = vld [vmem:[%s17203_s3 + $0x230] sm:$0xff] }
 0x55f   :  { %9159 = vmatpush1.bf16.msra.mxu0 %v11665_v58  ;;  %v11333_v58 = vcombine.low %v6737_v51, %v6741_v54  ;;  %v11366_v51 = vcombine.high %v6769_v32, %v6773_v29 }
 0x560   :  { %9282 = vmatpush1.bf16.msra.mxu1 %v11667_v37  ;;  %9160 = vmatprep.subr.bf16.mxu0 %v11674_v46  ;;  %v11335_v37 = vcombine.low %v6738_v33, %v6742_v55  ;;  %v11342_v46 = vcombine.high %v6745_v10, %v6749_v30  ;;  %v6777_v55 = vld [vmem:[%s17203_s3 + $0x250] sm:$0xff] }
 0x561   :  { %9283 = vmatprep.subr.bf16.mxu1 %v11676_v60  ;;  %v11344_v60 = vcombine.high %v6746_v11, %v6750_v59 }
 0x563   :  { %9161 = vmatpush1.bf16.msra.mxu0 %v11673_v13  ;;  %v11341_v13 = vcombine.low %v6745_v10, %v6749_v30 }
 0x564   :  { %9284 = vmatpush1.bf16.msra.mxu1 %v11675_v42  ;;  %9294 = vmatprep.subr.bf16.mxu0 %v11302_v0  ;;  %v11343_v42 = vcombine.low %v6746_v11, %v6750_v59  ;;  %v6785_v59 = vld [vmem:[%s17203_s3 + $0x290] sm:$0xff] }
 0x565   :  { %9417 = vmatprep.subr.bf16.mxu1 %v11304_v1  ;;  %v11352_v1 = vcombine.high %v6754_v39, %v6758_v14 }
 0x566   :  { %9163 = vmatmul.mubr.bf16.vlgmr.msra.gmra.mrb[28].mxu0 %v16282_v40 }
 0x567   :  { %9286 = vmatmul.mubr.bf16.vlgmr.msra.gmra.mrb[28].mxu1 %v16282_v40  ;;  %9295 = vmatpush1.bf16.msra.mxu0 %v11301_v47 }
 0x568   :  { %9326 = vmatprep.mubr.bf16.mxu0 %v15678_v4  ;;  %9418 = vmatpush1.bf16.msra.mxu1 %v11303_v17  ;;  %v6766_v17 = vld [vmem:[%s17203_s3 + $0x1f8] sm:$0xff] }
 0x569   :  { %9449 = vmatprep.mubr.bf16.mxu1 %v15678_v4  ;;  %9296 = vmatprep.subr.bf16.mxu0 %v11310_v19  ;;  %v11317_v4 = vcombine.low %v6721_v20, %v6725_v21  ;;  %v11360_v31 = vcombine.high %v6762_v36, %v6766_v17 }
 0x56a   :  { %9419 = vmatprep.subr.bf16.mxu1 %v11312_v22  ;;  %v11349_v22 = vcombine.low %v6753_v16, %v6757_v12 }
 0x56b   :  { %9297 = vmatpush1.bf16.msra.mxu0 %v11309_v25 }
 0x56c   :  { %9420 = vmatpush1.bf16.msra.mxu1 %v11311_v6  ;;  %9298 = vmatprep.subr.bf16.mxu0 %v11318_v18  ;;  %v11351_v6 = vcombine.low %v6754_v39, %v6758_v14  ;;  %v11358_v18 = vcombine.high %v6761_v35, %v6765_v50  ;;  %v6793_v14 = vld [vmem:[%s17203_s3 + $0x2d0] sm:$0xff] }
 0x56d   :  { %9421 = vmatprep.subr.bf16.mxu1 %v11320_v27 }
 0x56f   :  { %9299 = vmatpush1.bf16.msra.mxu0 %v11317_v4  ;;  %v6770_v4 = vld [vmem:[%s17203_s3 + $0x218] sm:$0xff] }
 0x570   :  { %9422 = vmatpush1.bf16.msra.mxu1 %v11319_v28  ;;  %9300 = vmatprep.subr.bf16.mxu0 %v11326_v38  ;;  %v11357_v28 = vcombine.low %v6761_v35, %v6765_v50 }
 0x571   :  { %9423 = vmatprep.subr.bf16.mxu1 %v11328_v44  ;;  %v11359_v44 = vcombine.low %v6762_v36, %v6766_v17  ;;  %v6802_v36 = vld [vmem:[%s17203_s3 + $0x318] sm:$0xff] }
 0x572   :  { %v6806_v17 = vld [vmem:[%s17203_s3 + $0x338] sm:$0xff] }
 0x573   :  { %9301 = vmatpush1.bf16.msra.mxu0 %v11325_v2  ;;  %v6781_v2 = vld [vmem:[%s17203_s3 + $0x270] sm:$0xff] }
 0x574   :  { %9424 = vmatpush1.bf16.msra.mxu1 %v11327_v24  ;;  %9302 = vmatprep.subr.bf16.mxu0 %v11334_v41  ;;  %v6778_v24 = vld [vmem:[%s17203_s3 + $0x258] sm:$0xff]  ;;  %v11374_v30 = vcombine.high %v6777_v55, %v6781_v2 }
 0x575   :  { %9425 = vmatprep.subr.bf16.mxu1 %v11336_v5  ;;  %v6782_v41 = vld [vmem:[%s17203_s3 + $0x278] sm:$0xff]  ;;  %v11365_v5 = vcombine.low %v6769_v32, %v6773_v29  ;;  %v6817_v32 = vld [vmem:[%s17203_s3 + $0x390] sm:$0xff] }
 0x576   :  { %v11376_v11 = vcombine.high %v6778_v24, %v6782_v41  ;;  %v11375_v16 = vcombine.low %v6778_v24, %v6782_v41  ;;  %v6821_v29 = vld [vmem:[%s17203_s3 + $0x3b0] sm:$0xff]  ;;  %v6830_v24 = vld [vmem:[%s17203_s3 + $0x3f8] sm:$0xff] }
 0x577   :  { %9303 = vmatpush1.bf16.msra.mxu0 %v11333_v58  ;;  %v6789_v58 = vld [vmem:[%s17203_s3 + $0x2b0] sm:$0xff]  ;;  %v11413_v41 = vcombine.low %v6817_v32, %v6821_v29 }
 0x578   :  { %9426 = vmatpush1.bf16.msra.mxu1 %v11335_v37  ;;  %9304 = vmatprep.subr.bf16.mxu0 %v11342_v46  ;;  %v6786_v37 = vld [vmem:[%s17203_s3 + $0x298] sm:$0xff]  ;;  %v11382_v12 = vcombine.high %v6785_v59, %v6789_v58 }
 0x579   :  { %v11806_v0 = vpop.f32.mrb[24].mxu0  ;;  %9427 = vmatprep.subr.bf16.mxu1 %v11344_v60  ;;  %v6790_v46 = vld [vmem:[%s17203_s3 + $0x2b8] sm:$0xff]  ;;  %v11373_v60 = vcombine.low %v6777_v55, %v6781_v2  ;;  %v6829_v55 = vld [vmem:[%s17203_s3 + $0x3f0] sm:$0xff] }
 0x57a   :  { %v11828_v47 = vpop.f32.mrb[24].mxu1  ;;  %v11807_v49 = vpop.f32.mrb[25].mxu0  ;;  %v11384_v39 = vcombine.high %v6786_v37, %v6790_v46  ;;  %v6826_v2 = vld [vmem:[%s17203_s3 + $0x3d8] sm:$0xff] }
 0x57b   :  { %v11808_v19 = vadd.f32 %v11807_v49, %v11806_v0  ;;  %v11829_v20 = vpop.f32.mrb[25].mxu1  ;;  %9305 = vmatpush1.bf16.msra.mxu0 %v11341_v13  ;;  %v11809_v21 = vpop.f32.mrb[26].mxu0  ;;  %v6797_v13 = vld [vmem:[%s17203_s3 + $0x2f0] sm:$0xff]  ;;  %v11381_v0 = vcombine.low %v6785_v59, %v6789_v58  ;;  %v6834_v58 = vld [vmem:[%s17203_s3 + $0x418] sm:$0xff] }
 0x57c   :  { %v11830_v63 = vadd.f32 %v11829_v20, %v11828_v47  ;;  %9428 = vmatpush1.bf16.msra.mxu1 %v11343_v42  ;;  %v11831_v7 = vpop.f32.mrb[26].mxu1  ;;  %v11810_v25 = vpop.f32.mrb[27].mxu0  ;;  %9306 = vmatprep.subr.bf16.mxu0 %v11350_v45  ;;  %v6794_v42 = vld [vmem:[%s17203_s3 + $0x2d8] sm:$0xff]  ;;  %v11390_v35 = vcombine.high %v6793_v14, %v6797_v13  ;;  %v6801_v47 = vld [vmem:[%s17203_s3 + $0x310] sm:$0xff] }
 0x57d   :  { %v6644_v27 = vadd.f32 %v11808_v19, %v15775_v23  ;;  %v11832_v48 = vpop.f32.mrb[27].mxu1  ;;  %9429 = vmatprep.subr.bf16.mxu1 %v11352_v1  ;;  %v6774_v23 = vld [vmem:[%s17203_s3 + $0x238] sm:$0xff]  ;;  %v11383_v1 = vcombine.low %v6786_v37, %v6790_v46  ;;  %v6805_v49 = vld [vmem:[%s17203_s3 + $0x330] sm:$0xff]  ;;  %v11389_v19 = vcombine.low %v6793_v14, %v6797_v13 }
 0x57e   :  { %v11368_v33 = vcombine.high %v6770_v4, %v6774_v23  ;;  %v11367_v10 = vcombine.low %v6770_v4, %v6774_v23  ;;  %v6798_v45 = vld [vmem:[%s17203_s3 + $0x2f8] sm:$0xff]  ;;  %v11398_v21 = vcombine.high %v6801_v47, %v6805_v49  ;;  %v6813_v7 = vld [vmem:[%s17203_s3 + $0x370] sm:$0xff] }
 0x57f   :  { %9307 = vmatpush1.bf16.msra.mxu0 %v11349_v22  ;;  %v16373_v38 = vadd.f32 %v11830_v63, %v6644_v27  ;;  %v11392_v50 = vcombine.high %v6794_v42, %v6798_v45  ;;  %v11391_v20 = vcombine.low %v6794_v42, %v6798_v45  ;;  %v11400_v22 = vcombine.high %v6802_v36, %v6806_v17  ;;  %v6809_v63 = vld [vmem:[%s17203_s3 + $0x350] sm:$0xff]  ;;  %v6810_v25 = vld [vmem:[%s17203_s3 + $0x358] sm:$0xff] }
 0x580   :  { %9430 = vmatpush1.bf16.msra.mxu1 %v11351_v6  ;;  %9308 = vmatprep.subr.bf16.mxu0 %v11358_v18  ;;  %v6814_v6 = vld [vmem:[%s17203_s3 + $0x378] sm:$0xff]  ;;  %v11397_v18 = vcombine.low %v6801_v47, %v6805_v49  ;;  %v11399_v27 = vcombine.low %v6802_v36, %v6806_v17  ;;  %v11406_v48 = vcombine.high %v6809_v63, %v6813_v7  ;;  %v6837_v59 = vld [vmem:[%s17203_s3 + $0x430] sm:$0xff] }
 0x581   :  { %9431 = vmatprep.subr.bf16.mxu1 %v11360_v31  ;;  %v6690_v54 = vsel %vm6689_vm0, %v16373_v38, -inf  ;;  %v11408_v31 = vcombine.high %v6810_v25, %v6814_v6  ;;  %v6818_v4 = vld [vmem:[%s17203_s3 + $0x398] sm:$0xff]  ;;  %v6845_v14 = vld [vmem:[%s17203_s3 + $0x470] sm:$0xff] }
 0x582   :  { %6691 = vmax.xlane.f32.xlu0 %v6690_v54  ;;  %v6822_v23 = vld [vmem:[%s17203_s3 + $0x3b8] sm:$0xff] }
 0x583   :  { %9309 = vmatpush1.bf16.msra.mxu0 %v11357_v28  ;;  %v11405_v28 = vcombine.low %v6809_v63, %v6813_v7  ;;  %v11416_v54 = vcombine.high %v6818_v4, %v6822_v23  ;;  %v6838_v37 = vld [vmem:[%s17203_s3 + $0x438] sm:$0xff] }
 0x584   :  { %9432 = vmatpush1.bf16.msra.mxu1 %v11359_v44  ;;  %9310 = vmatprep.subr.bf16.mxu0 %v11366_v51  ;;  %v11407_v44 = vcombine.low %v6810_v25, %v6814_v6  ;;  %v11414_v51 = vcombine.high %v6817_v32, %v6821_v29  ;;  %v6842_v42 = vld [vmem:[%s17203_s3 + $0x458] sm:$0xff]  ;;  %v6865_v6 = vld [vmem:[%s17203_s3 + $0x510] sm:$0xff] }
 0x585   :  { %9433 = vmatprep.subr.bf16.mxu1 %v11368_v33  ;;  %v6825_v33 = vld [vmem:[%s17203_s3 + $0x3d0] sm:$0xff]  ;;  %v6846_v45 = vld [vmem:[%s17203_s3 + $0x478] sm:$0xff] }
 0x586   :  { %v11421_v46 = vcombine.low %v6825_v33, %v6829_v55  ;;  %v11440_v47 = vcombine.high %v6842_v42, %v6846_v45  ;;  %v6850_v49 = vld [vmem:[%s17203_s3 + $0x498] sm:$0xff] }
 0x587   :  { %9311 = vmatpush1.bf16.msra.mxu0 %v11365_v5  ;;  %v11415_v5 = vcombine.low %v6818_v4, %v6822_v23  ;;  %v6854_v36 = vld [vmem:[%s17203_s3 + $0x4b8] sm:$0xff]  ;;  %v6873_v4 = vld [vmem:[%s17203_s3 + $0x550] sm:$0xff] }
 0x588   :  { %9434 = vmatpush1.bf16.msra.mxu1 %v11367_v10  ;;  %9312 = vmatprep.subr.bf16.mxu0 %v11374_v30  ;;  %v11422_v10 = vcombine.high %v6825_v33, %v6829_v55  ;;  %v11424_v30 = vcombine.high %v6826_v2, %v6830_v24  ;;  %v11448_v63 = vcombine.high %v6850_v49, %v6854_v36  ;;  %v6862_v7 = vld [vmem:[%s17203_s3 + $0x4f8] sm:$0xff] }
 0x589   :  { %9435 = vmatprep.subr.bf16.mxu1 %v11376_v11  ;;  %v6833_v11 = vld [vmem:[%s17203_s3 + $0x410] sm:$0xff]  ;;  %v6870_v32 = vld [vmem:[%s17203_s3 + $0x538] sm:$0xff] }
 0x58a   :  { %v11429_v13 = vcombine.low %v6833_v11, %v6837_v59  ;;  %v6878_v33 = vld [vmem:[%s17203_s3 + $0x578] sm:$0xff] }
 0x58b   :  { %9313 = vmatpush1.bf16.msra.mxu0 %v11373_v60  ;;  %v11423_v60 = vcombine.low %v6826_v2, %v6830_v24  ;;  %v6881_v2 = vld [vmem:[%s17203_s3 + $0x590] sm:$0xff] }
 0x58c   :  { %9436 = vmatpush1.bf16.msra.mxu1 %v11375_v16  ;;  %9314 = vmatprep.subr.bf16.mxu0 %v11382_v12  ;;  %v11430_v16 = vcombine.high %v6833_v11, %v6837_v59  ;;  %v11432_v12 = vcombine.high %v6834_v58, %v6838_v37  ;;  %v6886_v11 = vld [vmem:[%s17203_s3 + $0x5b8] sm:$0xff] }
 0x58d   :  { %9437 = vmatprep.subr.bf16.mxu1 %v11384_v39  ;;  %v6841_v39 = vld [vmem:[%s17203_s3 + $0x450] sm:$0xff] }
 0x58e   :  { %v11437_v17 = vcombine.low %v6841_v39, %v6845_v14 }
 0x58f   :  { %9315 = vmatpush1.bf16.msra.mxu0 %v11381_v0  ;;  %v11431_v0 = vcombine.low %v6834_v58, %v6838_v37  ;;  %v6889_v58 = vld [vmem:[%s17203_s3 + $0x5d0] sm:$0xff] }
 0x590   :  { %9438 = vmatpush1.bf16.msra.mxu1 %v11383_v1  ;;  %9316 = vmatprep.subr.bf16.mxu0 %v11390_v35  ;;  %v11438_v1 = vcombine.high %v6841_v39, %v6845_v14  ;;  %v6849_v35 = vld [vmem:[%s17203_s3 + $0x490] sm:$0xff]  ;;  %v6894_v39 = vld [vmem:[%s17203_s3 + $0x5f8] sm:$0xff] }
 0x591   :  { %9439 = vmatprep.subr.bf16.mxu1 %v11392_v50  ;;  %v6853_v50 = vld [vmem:[%s17203_s3 + $0x4b0] sm:$0xff] }
 0x592   :  { %v11445_v25 = vcombine.low %v6849_v35, %v6853_v50 }
 0x593   :  { %9317 = vmatpush1.bf16.msra.mxu0 %v11389_v19  ;;  %v6857_v19 = vld [vmem:[%s17203_s3 + $0x4d0] sm:$0xff] }
 0x594   :  { %9440 = vmatpush1.bf16.msra.mxu1 %v11391_v20  ;;  %9318 = vmatprep.subr.bf16.mxu0 %v11398_v21  ;;  %v11439_v20 = vcombine.low %v6842_v42, %v6846_v45  ;;  %v11446_v21 = vcombine.high %v6849_v35, %v6853_v50  ;;  %v6898_v35 = vld [vmem:[%s17203_s3 + $0x618] sm:$0xff] }
 0x595   :  { %9441 = vmatprep.subr.bf16.mxu1 %v11400_v22  ;;  %v6861_v22 = vld [vmem:[%s17203_s3 + $0x4f0] sm:$0xff]  ;;  %v6902_v50 = vld [vmem:[%s17203_s3 + $0x638] sm:$0xff] }
 0x596   :  { %v11453_v29 = vcombine.low %v6857_v19, %v6861_v22 }
 0x597   :  { %9319 = vmatpush1.bf16.msra.mxu0 %v11397_v18  ;;  %v11454_v18 = vcombine.high %v6857_v19, %v6861_v22  ;;  %v6909_v19 = vld [vmem:[%s17203_s3 + $0x670] sm:$0xff]  ;;  %v6910_v22 = vld [vmem:[%s17203_s3 + $0x678] sm:$0xff] }
 0x598   :  { %9442 = vmatpush1.bf16.msra.mxu1 %v11399_v27  ;;  %9320 = vmatprep.subr.bf16.mxu0 %v11406_v48  ;;  %v6869_v27 = vld [vmem:[%s17203_s3 + $0x530] sm:$0xff] }
 0x599   :  { %9443 = vmatprep.subr.bf16.mxu1 %v11408_v31  ;;  %v6866_v31 = vld [vmem:[%s17203_s3 + $0x518] sm:$0xff]  ;;  %v11461_v55 = vcombine.low %v6865_v6, %v6869_v27 }
 0x59a   :  { %v11463_v24 = vcombine.low %v6866_v31, %v6870_v32 }
 0x59b   :  { %9321 = vmatpush1.bf16.msra.mxu0 %v11405_v28  ;;  %v11462_v28 = vcombine.high %v6865_v6, %v6869_v27  ;;  %v6917_v6 = vld [vmem:[%s17203_s3 + $0x6b0] sm:$0xff]  ;;  %v6918_v27 = vld [vmem:[%s17203_s3 + $0x6b8] sm:$0xff] }
 0x59c   :  { %9444 = vmatpush1.bf16.msra.mxu1 %v11407_v44  ;;  %9322 = vmatprep.subr.bf16.mxu0 %v11414_v51  ;;  %v6877_v44 = vld [vmem:[%s17203_s3 + $0x570] sm:$0xff]  ;;  %v11464_v51 = vcombine.high %v6866_v31, %v6870_v32 }
 0x59d   :  { %9445 = vmatprep.subr.bf16.mxu1 %v11416_v54  ;;  %v6874_v54 = vld [vmem:[%s17203_s3 + $0x558] sm:$0xff]  ;;  %v11469_v59 = vcombine.low %v6873_v4, %v6877_v44  ;;  %v6921_v31 = vld [vmem:[%s17203_s3 + $0x6d0] sm:$0xff] }
 0x59e   :  { %v11471_v37 = vcombine.low %v6874_v54, %v6878_v33  ;;  %v6925_v32 = vld [vmem:[%s17203_s3 + $0x6f0] sm:$0xff] }
 0x59f   :  { %9323 = vmatpush1.bf16.msra.mxu0 %v11413_v41  ;;  %v11470_v41 = vcombine.high %v6873_v4, %v6877_v44 }
 0x5a0   :  { %9446 = vmatpush1.bf16.msra.mxu1 %v11415_v5  ;;  %9324 = vmatprep.subr.bf16.mxu0 %v11422_v10  ;;  %v6885_v5 = vld [vmem:[%s17203_s3 + $0x5b0] sm:$0xff]  ;;  %v11472_v10 = vcombine.high %v6874_v54, %v6878_v33 }
 0x5a1   :  { %9447 = vmatprep.subr.bf16.mxu1 %v11424_v30  ;;  %v6882_v30 = vld [vmem:[%s17203_s3 + $0x598] sm:$0xff]  ;;  %v11477_v14 = vcombine.low %v6881_v2, %v6885_v5  ;;  %v6929_v54 = vld [vmem:[%s17203_s3 + $0x710] sm:$0xff] }
 0x5a2   :  { %v11479_v42 = vcombine.low %v6882_v30, %v6886_v11  ;;  %v6933_v33 = vld [vmem:[%s17203_s3 + $0x730] sm:$0xff] }
 0x5a3   :  { %9325 = vmatpush1.bf16.msra.mxu0 %v11421_v46  ;;  %v11478_v46 = vcombine.high %v6881_v2, %v6885_v5  ;;  %v11518_v2 = vcombine.high %v6921_v31, %v6925_v32 }
 0x5a4   :  { %9448 = vmatpush1.bf16.msra.mxu1 %v11423_v60  ;;  %9335 = vmatprep.subr.bf16.mxu0 %v11430_v16  ;;  %v6893_v60 = vld [vmem:[%s17203_s3 + $0x5f0] sm:$0xff]  ;;  %v11480_v16 = vcombine.high %v6882_v30, %v6886_v11 }
 0x5a5   :  { %9458 = vmatprep.subr.bf16.mxu1 %v11432_v12  ;;  %v6890_v12 = vld [vmem:[%s17203_s3 + $0x5d8] sm:$0xff]  ;;  %v11486_v45 = vcombine.high %v6889_v58, %v6893_v60  ;;  %v6937_v30 = vld [vmem:[%s17203_s3 + $0x750] sm:$0xff] }
 0x5a6   :  { %9327 = vmatmul.mubr.bf16.vlgmr.msra.gmra.mrb[32].mxu0 %v15879_v3  ;;  %v6941_v11 = vld [vmem:[%s17203_s3 + $0x770] sm:$0xff] }
 0x5a7   :  { %9450 = vmatmul.mubr.bf16.vlgmr.msra.gmra.mrb[32].mxu1 %v15879_v3  ;;  %9336 = vmatpush1.bf16.msra.mxu0 %v11429_v13  ;;  %v6858_v3 = vld [vmem:[%s17203_s3 + $0x4d8] sm:$0xff]  ;;  %v6897_v13 = vld [vmem:[%s17203_s3 + $0x610] sm:$0xff] }
 0x5a8   :  { %9367 = vmatprep.mubr.bf16.mxu0 %v15888_v15  ;;  %9459 = vmatpush1.bf16.msra.mxu1 %v11431_v0  ;;  %v11456_v48 = vcombine.high %v6858_v3, %v6862_v7  ;;  %v11455_v23 = vcombine.low %v6858_v3, %v6862_v7  ;;  %v6901_v0 = vld [vmem:[%s17203_s3 + $0x630] sm:$0xff]  ;;  %v11495_v7 = vcombine.low %v6898_v35, %v6902_v50 }
 0x5a9   :  { %9490 = vmatprep.mubr.bf16.mxu1 %v15888_v15  ;;  %9337 = vmatprep.subr.bf16.mxu0 %v11438_v1  ;;  %v11447_v15 = vcombine.low %v6850_v49, %v6854_v36  ;;  %v11488_v1 = vcombine.high %v6890_v12, %v6894_v39  ;;  %v6905_v49 = vld [vmem:[%s17203_s3 + $0x650] sm:$0xff]  ;;  %v11487_v36 = vcombine.low %v6890_v12, %v6894_v39 }
 0x5aa   :  { %9460 = vmatprep.subr.bf16.mxu1 %v11440_v47  ;;  %v11485_v47 = vcombine.low %v6889_v58, %v6893_v60  ;;  %v6913_v3 = vld [vmem:[%s17203_s3 + $0x690] sm:$0xff]  ;;  %v11526_v58 = vcombine.high %v6929_v54, %v6933_v33 }
 0x5ab   :  { %9338 = vmatpush1.bf16.msra.mxu0 %v11437_v17  ;;  %v11494_v17 = vcombine.high %v6897_v13, %v6901_v0  ;;  %v11510_v4 = vcombine.high %v6913_v3, %v6917_v6  ;;  %v6945_v12 = vld [vmem:[%s17203_s3 + $0x790] sm:$0xff] }
 0x5ac   :  { %9461 = vmatpush1.bf16.msra.mxu1 %v11439_v20  ;;  %9339 = vmatprep.subr.bf16.mxu0 %v11446_v21  ;;  %v11496_v20 = vcombine.high %v6898_v35, %v6902_v50  ;;  %v6906_v21 = vld [vmem:[%s17203_s3 + $0x658] sm:$0xff]  ;;  %v6949_v39 = vld [vmem:[%s17203_s3 + $0x7b0] sm:$0xff] }
 0x5ad   :  { %9462 = vmatprep.subr.bf16.mxu1 %v11448_v63  ;;  %v11493_v63 = vcombine.low %v6897_v13, %v6901_v0  ;;  %v11534_v13 = vcombine.high %v6937_v30, %v6941_v11  ;;  %v6953_v35 = vld [vmem:[%s17203_s3 + $0x7d0] sm:$0xff] }
 0x5ae   :  { %v6957_v50 = vld [vmem:[%s17203_s3 + $0x7f0] sm:$0xff] }
 0x5af   :  { %9340 = vmatpush1.bf16.msra.mxu0 %v11445_v25  ;;  %v11502_v25 = vcombine.high %v6905_v49, %v6909_v19 }
 0x5b0   :  { %9463 = vmatpush1.bf16.msra.mxu1 %v11447_v15  ;;  %9341 = vmatprep.subr.bf16.mxu0 %v11454_v18  ;;  %v11504_v15 = vcombine.high %v6906_v21, %v6910_v22  ;;  %v6914_v18 = vld [vmem:[%s17203_s3 + $0x698] sm:$0xff] }
 0x5b1   :  { %9464 = vmatprep.subr.bf16.mxu1 %v11456_v48  ;;  %v11501_v48 = vcombine.low %v6905_v49, %v6909_v19  ;;  %v11512_v44 = vcombine.high %v6914_v18, %v6918_v27  ;;  %v11542_v49 = vcombine.high %v6945_v12, %v6949_v39 }
 0x5b3   :  { %9342 = vmatpush1.bf16.msra.mxu0 %v11453_v29  ;;  %v11503_v29 = vcombine.low %v6906_v21, %v6910_v22  ;;  %v11550_v22 = vcombine.high %v6953_v35, %v6957_v50 }
 0x5b4   :  { %9465 = vmatpush1.bf16.msra.mxu1 %v11455_v23  ;;  %9343 = vmatprep.subr.bf16.mxu0 %v11462_v28  ;;  %v6922_v23 = vld [vmem:[%s17203_s3 + $0x6d8] sm:$0xff] }
 0x5b5   :  { %9466 = vmatprep.subr.bf16.mxu1 %v11464_v51  ;;  %v6926_v28 = vld [vmem:[%s17203_s3 + $0x6f8] sm:$0xff]  ;;  %v11509_v51 = vcombine.low %v6913_v3, %v6917_v6  ;;  %v6961_v3 = vld [vmem:[%s17203_s3 + $0x810] sm:$0xff] }
 0x5b6   :  { %v11520_v5 = vcombine.high %v6922_v23, %v6926_v28  ;;  %v6966_v6 = vld [vmem:[%s17203_s3 + $0x838] sm:$0xff] }
 0x5b7   :  { %9344 = vmatpush1.bf16.msra.mxu0 %v11461_v55  ;;  %v11511_v55 = vcombine.low %v6914_v18, %v6918_v27 }
 0x5b8   :  { %9467 = vmatpush1.bf16.msra.mxu1 %v11463_v24  ;;  %9345 = vmatprep.subr.bf16.mxu0 %v11470_v41  ;;  %v6930_v24 = vld [vmem:[%s17203_s3 + $0x718] sm:$0xff] }
 0x5b9   :  { %9468 = vmatprep.subr.bf16.mxu1 %v11472_v10  ;;  %v6934_v41 = vld [vmem:[%s17203_s3 + $0x738] sm:$0xff]  ;;  %v11517_v10 = vcombine.low %v6921_v31, %v6925_v32  ;;  %v6969_v31 = vld [vmem:[%s17203_s3 + $0x850] sm:$0xff] }
 0x5ba   :  { %v11528_v60 = vcombine.high %v6930_v24, %v6934_v41  ;;  %v6973_v32 = vld [vmem:[%s17203_s3 + $0x870] sm:$0xff] }
 0x5bb   :  { %9346 = vmatpush1.bf16.msra.mxu0 %v11469_v59  ;;  %v11519_v59 = vcombine.low %v6922_v23, %v6926_v28  ;;  %v6974_v23 = vld [vmem:[%s17203_s3 + $0x878] sm:$0xff] }
 0x5bc   :  { %9469 = vmatpush1.bf16.msra.mxu1 %v11471_v37  ;;  %9347 = vmatprep.subr.bf16.mxu0 %v11478_v46  ;;  %v6938_v37 = vld [vmem:[%s17203_s3 + $0x758] sm:$0xff] }
 0x5bd   :  { %9470 = vmatprep.subr.bf16.mxu1 %v11480_v16  ;;  %v6942_v46 = vld [vmem:[%s17203_s3 + $0x778] sm:$0xff]  ;;  %v11525_v16 = vcombine.low %v6929_v54, %v6933_v33  ;;  %v6981_v54 = vld [vmem:[%s17203_s3 + $0x8b0] sm:$0xff] }
 0x5be   :  { %v11536_v0 = vcombine.high %v6938_v37, %v6942_v46 }
 0x5bf   :  { %9348 = vmatpush1.bf16.msra.mxu0 %v11477_v14  ;;  %v11527_v14 = vcombine.low %v6930_v24, %v6934_v41  ;;  %v11565_v24 = vcombine.low %v6969_v31, %v6973_v32 }
 0x5c0   :  { %9471 = vmatpush1.bf16.msra.mxu1 %v11479_v42  ;;  %9349 = vmatprep.subr.bf16.mxu0 %v11486_v45  ;;  %v6946_v42 = vld [vmem:[%s17203_s3 + $0x798] sm:$0xff] }
 0x5c1   :  { %9472 = vmatprep.subr.bf16.mxu1 %v11488_v1  ;;  %v6950_v45 = vld [vmem:[%s17203_s3 + $0x7b8] sm:$0xff]  ;;  %v11533_v1 = vcombine.low %v6937_v30, %v6941_v11  ;;  %v6985_v30 = vld [vmem:[%s17203_s3 + $0x8d0] sm:$0xff] }
 0x5c2   :  { %v11544_v19 = vcombine.high %v6946_v42, %v6950_v45  ;;  %v11543_v21 = vcombine.low %v6946_v42, %v6950_v45  ;;  %v6989_v11 = vld [vmem:[%s17203_s3 + $0x8f0] sm:$0xff] }
 0x5c3   :  { %9350 = vmatpush1.bf16.msra.mxu0 %v11485_v47  ;;  %v11535_v47 = vcombine.low %v6938_v37, %v6942_v46  ;;  %v11582_v37 = vcombine.high %v6985_v30, %v6989_v11 }
 0x5c4   :  { %9473 = vmatpush1.bf16.msra.mxu1 %v11487_v36  ;;  %9351 = vmatprep.subr.bf16.mxu0 %v11494_v17  ;;  %v6954_v36 = vld [vmem:[%s17203_s3 + $0x7d8] sm:$0xff] }
 0x5c5   :  { %9474 = vmatprep.subr.bf16.mxu1 %v11496_v20  ;;  %v6958_v17 = vld [vmem:[%s17203_s3 + $0x7f8] sm:$0xff]  ;;  %v11541_v20 = vcombine.low %v6945_v12, %v6949_v39 }
 0x5c6   :  { %v11551_v18 = vcombine.low %v6954_v36, %v6958_v17  ;;  %v6994_v12 = vld [vmem:[%s17203_s3 + $0x918] sm:$0xff] }
 0x5c7   :  { %9352 = vmatpush1.bf16.msra.mxu0 %v11493_v63  ;;  %v11552_v63 = vcombine.high %v6954_v36, %v6958_v17  ;;  %v6998_v39 = vld [vmem:[%s17203_s3 + $0x938] sm:$0xff] }
 0x5c8   :  { %9475 = vmatpush1.bf16.msra.mxu1 %v11495_v7  ;;  %9353 = vmatprep.subr.bf16.mxu0 %v11502_v25  ;;  %v6965_v7 = vld [vmem:[%s17203_s3 + $0x830] sm:$0xff]  ;;  %v6962_v25 = vld [vmem:[%s17203_s3 + $0x818] sm:$0xff]  ;;  %v11592_v45 = vcombine.high %v6994_v12, %v6998_v39 }
 0x5c9   :  { %9476 = vmatprep.subr.bf16.mxu1 %v11504_v15  ;;  %v11549_v15 = vcombine.low %v6953_v35, %v6957_v50  ;;  %v11558_v27 = vcombine.high %v6961_v3, %v6965_v7  ;;  %v11559_v28 = vcombine.low %v6962_v25, %v6966_v6  ;;  %v7002_v35 = vld [vmem:[%s17203_s3 + $0x958] sm:$0xff] }
 0x5ca   :  { %v7006_v50 = vld [vmem:[%s17203_s3 + $0x978] sm:$0xff] }
 0x5cb   :  { %9354 = vmatpush1.bf16.msra.mxu0 %v11501_v48  ;;  %v11560_v48 = vcombine.high %v6962_v25, %v6966_v6  ;;  %v11600_v17 = vcombine.high %v7002_v35, %v7006_v50  ;;  %v7017_v6 = vld [vmem:[%s17203_s3 + $0x9d0] sm:$0xff] }
 0x5cc   :  { %9477 = vmatpush1.bf16.msra.mxu1 %v11503_v29  ;;  %9355 = vmatprep.subr.bf16.mxu0 %v11510_v4  ;;  %v11557_v29 = vcombine.low %v6961_v3, %v6965_v7  ;;  %v6970_v4 = vld [vmem:[%s17203_s3 + $0x858] sm:$0xff]  ;;  %v11599_v3 = vcombine.low %v7002_v35, %v7006_v50  ;;  %v7057_v50 = vld [vmem:[%s17203_s3 + $0xb10] sm:$0xff] }
 0x5cd   :  { %9478 = vmatprep.subr.bf16.mxu1 %v11512_v44  ;;  %v11566_v44 = vcombine.high %v6969_v31, %v6973_v32  ;;  %v11568_v33 = vcombine.high %v6970_v4, %v6974_v23  ;;  %v11567_v41 = vcombine.low %v6970_v4, %v6974_v23  ;;  %v7025_v4 = vld [vmem:[%s17203_s3 + $0xa10] sm:$0xff] }
 0x5ce   :  { %v7029_v23 = vld [vmem:[%s17203_s3 + $0xa30] sm:$0xff] }
 0x5cf   :  { %9356 = vmatpush1.bf16.msra.mxu0 %v11509_v51  ;;  %v6977_v51 = vld [vmem:[%s17203_s3 + $0x890] sm:$0xff] }
 0x5d0   :  { %9479 = vmatpush1.bf16.msra.mxu1 %v11511_v55  ;;  %9357 = vmatprep.subr.bf16.mxu0 %v11518_v2  ;;  %v6978_v55 = vld [vmem:[%s17203_s3 + $0x898] sm:$0xff] }
 0x5d1   :  { %9480 = vmatprep.subr.bf16.mxu1 %v11520_v5  ;;  %v6982_v2 = vld [vmem:[%s17203_s3 + $0x8b8] sm:$0xff]  ;;  %v11574_v5 = vcombine.high %v6977_v51, %v6981_v54 }
 0x5d3   :  { %9358 = vmatpush1.bf16.msra.mxu0 %v11517_v10  ;;  %v11576_v10 = vcombine.high %v6978_v55, %v6982_v2 }
 0x5d4   :  { %9481 = vmatpush1.bf16.msra.mxu1 %v11519_v59  ;;  %9359 = vmatprep.subr.bf16.mxu0 %v11526_v58  ;;  %v6990_v59 = vld [vmem:[%s17203_s3 + $0x8f8] sm:$0xff]  ;;  %v11575_v58 = vcombine.low %v6978_v55, %v6982_v2  ;;  %v7033_v2 = vld [vmem:[%s17203_s3 + $0xa50] sm:$0xff] }
 0x5d5   :  { %9482 = vmatprep.subr.bf16.mxu1 %v11528_v60  ;;  %v6993_v60 = vld [vmem:[%s17203_s3 + $0x910] sm:$0xff] }
 0x5d7   :  { %9360 = vmatpush1.bf16.msra.mxu0 %v11525_v16  ;;  %v6997_v16 = vld [vmem:[%s17203_s3 + $0x930] sm:$0xff] }
 0x5d8   :  { %9483 = vmatpush1.bf16.msra.mxu1 %v11527_v14  ;;  %9361 = vmatprep.subr.bf16.mxu0 %v11534_v13  ;;  %v11581_v14 = vcombine.low %v6985_v30, %v6989_v11  ;;  %v11590_v42 = vcombine.high %v6993_v60, %v6997_v16 }
 0x5d9   :  { %9484 = vmatprep.subr.bf16.mxu1 %v11536_v0  ;;  %v7001_v0 = vld [vmem:[%s17203_s3 + $0x950] sm:$0xff] }
 0x5db   :  { %9362 = vmatpush1.bf16.msra.mxu0 %v11533_v1  ;;  %v7005_v1 = vld [vmem:[%s17203_s3 + $0x970] sm:$0xff] }
 0x5dc   :  { %9485 = vmatpush1.bf16.msra.mxu1 %v11535_v47  ;;  %9363 = vmatprep.subr.bf16.mxu0 %v11542_v49  ;;  %v11589_v47 = vcombine.low %v6993_v60, %v6997_v16  ;;  %v11591_v49 = vcombine.low %v6994_v12, %v6998_v39  ;;  %v11598_v36 = vcombine.high %v7001_v0, %v7005_v1  ;;  %v7049_v39 = vld [vmem:[%s17203_s3 + $0xad0] sm:$0xff] }
 0x5dd   :  { %9486 = vmatprep.subr.bf16.mxu1 %v11544_v19  ;;  %v7009_v19 = vld [vmem:[%s17203_s3 + $0x990] sm:$0xff] }
 0x5df   :  { %9364 = vmatpush1.bf16.msra.mxu0 %v11541_v20  ;;  %v7013_v20 = vld [vmem:[%s17203_s3 + $0x9b0] sm:$0xff] }
 0x5e0   :  { %9487 = vmatpush1.bf16.msra.mxu1 %v11543_v21  ;;  %9365 = vmatprep.subr.bf16.mxu0 %v11550_v22  ;;  %v7010_v21 = vld [vmem:[%s17203_s3 + $0x998] sm:$0xff]  ;;  %v11606_v7 = vcombine.high %v7009_v19, %v7013_v20 }
 0x5e1   :  { %9488 = vmatprep.subr.bf16.mxu1 %v11552_v63  ;;  %v7014_v22 = vld [vmem:[%s17203_s3 + $0x9b8] sm:$0xff]  ;;  %v11597_v63 = vcombine.low %v7001_v0, %v7005_v1 }
 0x5e2   :  { %v11608_v25 = vcombine.high %v7010_v21, %v7014_v22  ;;  %v11607_v31 = vcombine.low %v7010_v21, %v7014_v22 }
 0x5e3   :  { %9366 = vmatpush1.bf16.msra.mxu0 %v11549_v15  ;;  %v7021_v15 = vld [vmem:[%s17203_s3 + $0x9f0] sm:$0xff] }
 0x5e4   :  { %9489 = vmatpush1.bf16.msra.mxu1 %v11551_v18  ;;  %9376 = vmatprep.subr.bf16.mxu0 %v11558_v27  ;;  %v7018_v18 = vld [vmem:[%s17203_s3 + $0x9d8] sm:$0xff]  ;;  %v11614_v32 = vcombine.high %v7017_v6, %v7021_v15 }
 0x5e5   :  { %9499 = vmatprep.subr.bf16.mxu1 %v11560_v48  ;;  %v7022_v27 = vld [vmem:[%s17203_s3 + $0x9f8] sm:$0xff]  ;;  %v11605_v48 = vcombine.low %v7009_v19, %v7013_v20 }
 0x5e6   :  { %9368 = vmatmul.mubr.bf16.vlgmr.msra.gmra.mrb[32].mxu0 %v16081_v34 }
 0x5e7   :  { %9491 = vmatmul.mubr.bf16.vlgmr.msra.gmra.mrb[32].mxu1 %v16081_v34  ;;  %9377 = vmatpush1.bf16.msra.mxu0 %v11557_v29  ;;  %v6986_v34 = vld [vmem:[%s17203_s3 + $0x8d8] sm:$0xff]  ;;  %v11616_v29 = vcombine.high %v7018_v18, %v7022_v27 }
 0x5e8   :  { %9408 = vmatprep.mubr.bf16.mxu0 %v16090_v26  ;;  %9500 = vmatpush1.bf16.msra.mxu1 %v11559_v28  ;;  %v11584_v46 = vcombine.high %v6986_v34, %v6990_v59  ;;  %v11583_v13 = vcombine.low %v6986_v34, %v6990_v59  ;;  %v7026_v28 = vld [vmem:[%s17203_s3 + $0xa18] sm:$0xff]  ;;  %v7041_v59 = vld [vmem:[%s17203_s3 + $0xa90] sm:$0xff] }
 0x5e9   :  { %9531 = vmatprep.mubr.bf16.mxu1 %v16090_v26  ;;  %9378 = vmatprep.subr.bf16.mxu0 %v11566_v44  ;;  %v11573_v26 = vcombine.low %v6977_v51, %v6981_v54  ;;  %v7030_v44 = vld [vmem:[%s17203_s3 + $0xa38] sm:$0xff]  ;;  %v11613_v51 = vcombine.low %v7017_v6, %v7021_v15  ;;  %v11615_v54 = vcombine.low %v7018_v18, %v7022_v27 }
 0x5ea   :  { %9501 = vmatprep.subr.bf16.mxu1 %v11568_v33  ;;  %v11622_v33 = vcombine.high %v7025_v4, %v7029_v23  ;;  %v11624_v55 = vcombine.high %v7026_v28, %v7030_v44  ;;  %v11623_v30 = vcombine.low %v7026_v28, %v7030_v44  ;;  %v7066_v6 = vld [vmem:[%s17203_s3 + $0xb58] sm:$0xff] }
 0x5eb   :  { %9379 = vmatpush1.bf16.msra.mxu0 %v11565_v24  ;;  %v7037_v24 = vld [vmem:[%s17203_s3 + $0xa70] sm:$0xff] }
 0x5ec   :  { %9502 = vmatpush1.bf16.msra.mxu1 %v11567_v41  ;;  %9380 = vmatprep.subr.bf16.mxu0 %v11574_v5  ;;  %v7034_v41 = vld [vmem:[%s17203_s3 + $0xa58] sm:$0xff]  ;;  %v11630_v11 = vcombine.high %v7033_v2, %v7037_v24 }
 0x5ed   :  { %9503 = vmatprep.subr.bf16.mxu1 %v11576_v10  ;;  %v7038_v5 = vld [vmem:[%s17203_s3 + $0xa78] sm:$0xff]  ;;  %v11621_v10 = vcombine.low %v7025_v4, %v7029_v23 }
 0x5ee   :  { %v11632_v34 = vcombine.high %v7034_v41, %v7038_v5  ;;  %v11631_v60 = vcombine.low %v7034_v41, %v7038_v5  ;;  %v7078_v4 = vld [vmem:[%s17203_s3 + $0xbb8] sm:$0xff] }
 0x5ef   :  { %9381 = vmatpush1.bf16.msra.mxu0 %v11573_v26  ;;  %v7045_v26 = vld [vmem:[%s17203_s3 + $0xab0] sm:$0xff] }
 0x5f0   :  { %9504 = vmatpush1.bf16.msra.mxu1 %v11575_v58  ;;  %9382 = vmatprep.subr.bf16.mxu0 %v11582_v37  ;;  %v7042_v58 = vld [vmem:[%s17203_s3 + $0xa98] sm:$0xff]  ;;  %v11638_v16 = vcombine.high %v7041_v59, %v7045_v26 }
 0x5f1   :  { %9505 = vmatprep.subr.bf16.mxu1 %v11584_v46  ;;  %v7046_v37 = vld [vmem:[%s17203_s3 + $0xab8] sm:$0xff]  ;;  %v11629_v46 = vcombine.low %v7033_v2, %v7037_v24 }
 0x5f2   :  { %v11640_v12 = vcombine.high %v7042_v58, %v7046_v37  ;;  %v11639_v0 = vcombine.low %v7042_v58, %v7046_v37  ;;  %v7086_v2 = vld [vmem:[%s17203_s3 + $0xbf8] sm:$0xff]  ;;  %v12684_v58 = vld [vmem:[%s17204_s5 + $0xc0] sm:$0xff]  }
 0x5f3   :  { %9383 = vmatpush1.bf16.msra.mxu0 %v11581_v14  ;;  %v7053_v14 = vld [vmem:[%s17203_s3 + $0xaf0] sm:$0xff]  ;;  %v12685_v37 = vld [vmem:[%s17204_s5] sm:$0xff]  }
 0x5f4   :  { %9506 = vmatpush1.bf16.msra.mxu1 %v11583_v13  ;;  %9384 = vmatprep.subr.bf16.mxu0 %v11590_v42  ;;  %v7050_v13 = vld [vmem:[%s17203_s3 + $0xad8] sm:$0xff]  ;;  %v11646_v1 = vcombine.high %v7049_v39, %v7053_v14  ;;  %v11645_v19 = vcombine.low %v7049_v39, %v7053_v14  ;;  %v12690_v39 = vld [vmem:[%s17204_s5 + $0x88] sm:$0xff]   ;;  %v12691_v14 = vld [vmem:[%s17204_s5 + $0x50] sm:$0xff]  }
 0x5f5   :  { %9507 = vmatprep.subr.bf16.mxu1 %v11592_v45  ;;  %v7054_v42 = vld [vmem:[%s17203_s3 + $0xaf8] sm:$0xff]  ;;  %v11637_v45 = vcombine.low %v7041_v59, %v7045_v26  ;;  %v12683_v26 = vld [vmem:[%s17204_s5 + $0x40] sm:$0xff]  }
 0x5f6   :  { %v11648_v35 = vcombine.high %v7050_v13, %v7054_v42  ;;  %v11647_v21 = vcombine.low %v7050_v13, %v7054_v42  ;;  %v12693_v13 = vld [vmem:[%s17204_s5 + $0x10] sm:$0xff]  }
 0x5f7   :  { %9385 = vmatpush1.bf16.msra.mxu0 %v11589_v47  ;;  %v7061_v47 = vld [vmem:[%s17203_s3 + $0xb30] sm:$0xff] }
 0x5f8   :  { %9508 = vmatpush1.bf16.msra.mxu1 %v11591_v49  ;;  %9386 = vmatprep.subr.bf16.mxu0 %v11598_v36  ;;  %v7058_v49 = vld [vmem:[%s17203_s3 + $0xb18] sm:$0xff]  ;;  %v11654_v22 = vcombine.high %v7057_v50, %v7061_v47  ;;  %v11653_v15 = vcombine.low %v7057_v50, %v7061_v47  ;;  %v12694_v42 = vld [vmem:[%s17204_s5 + $0x90] sm:$0xff]   ;;  %v12699_v50 = vld [vmem:[%s17204_s5 + $0x60] sm:$0xff]  }
 0x5f9   :  { %9509 = vmatprep.subr.bf16.mxu1 %v11600_v17  ;;  %v7062_v36 = vld [vmem:[%s17203_s3 + $0xb38] sm:$0xff]  ;;  %v12700_v47 = vld [vmem:[%s17204_s5 + $0xe0] sm:$0xff]  }
 0x5fa   :  { %v11655_v18 = vcombine.low %v7058_v49, %v7062_v36 }
 0x5fb   :  { %9387 = vmatpush1.bf16.msra.mxu0 %v11597_v63  ;;  %v11656_v63 = vcombine.high %v7058_v49, %v7062_v36  ;;  %v12701_v49 = vld [vmem:[%s17204_s5 + $0x20] sm:$0xff]  }
 0x5fc   :  { %9510 = vmatpush1.bf16.msra.mxu1 %v11599_v3  ;;  %9388 = vmatprep.subr.bf16.mxu0 %v11606_v7  ;;  %v7065_v3 = vld [vmem:[%s17203_s3 + $0xb50] sm:$0xff]  ;;  %v12702_v36 = vld [vmem:[%s17204_s5 + $0xa0] sm:$0xff]  }
 0x5fd   :  { %9511 = vmatprep.subr.bf16.mxu1 %v11608_v25  ;;  %v7069_v7 = vld [vmem:[%s17203_s3 + $0xb70] sm:$0xff] }
 0x5fe   :  { %v11662_v27 = vcombine.high %v7065_v3, %v7069_v7  ;;  %v11661_v23 = vcombine.low %v7065_v3, %v7069_v7  ;;  %v12706_v7 = vld [vmem:[%s17204_s5 + $0xa8] sm:$0xff]  }
 0x5ff   :  { %9389 = vmatpush1.bf16.msra.mxu0 %v11605_v48 }
 0x600   :  { %9512 = vmatpush1.bf16.msra.mxu1 %v11607_v31  ;;  %9390 = vmatprep.subr.bf16.mxu0 %v11614_v32  ;;  %v7073_v31 = vld [vmem:[%s17203_s3 + $0xb90] sm:$0xff] }
 0x601   :  { %9513 = vmatprep.subr.bf16.mxu1 %v11616_v29  ;;  %v7077_v32 = vld [vmem:[%s17203_s3 + $0xbb0] sm:$0xff]  ;;  %v7074_v29 = vld [vmem:[%s17203_s3 + $0xb98] sm:$0xff] }
 0x602   :  { %v11670_v44 = vcombine.high %v7073_v31, %v7077_v32  ;;  %v11669_v24 = vcombine.low %v7073_v31, %v7077_v32  ;;  %v11671_v41 = vcombine.low %v7074_v29, %v7078_v4 }
 0x603   :  { %9391 = vmatpush1.bf16.msra.mxu0 %v11613_v51  ;;  %v11672_v51 = vcombine.high %v7074_v29, %v7078_v4  ;;  %v12709_v29 = vld [vmem:[%s17204_s5 + $0x30] sm:$0xff]  }
 0x604   :  { %9514 = vmatpush1.bf16.msra.mxu1 %v11615_v54  ;;  %9392 = vmatprep.subr.bf16.mxu0 %v11622_v33  ;;  %v7081_v54 = vld [vmem:[%s17203_s3 + $0xbd0] sm:$0xff] }
 0x605   :  { %9515 = vmatprep.subr.bf16.mxu1 %v11624_v55  ;;  %v7085_v33 = vld [vmem:[%s17203_s3 + $0xbf0] sm:$0xff]  ;;  %v7082_v55 = vld [vmem:[%s17203_s3 + $0xbd8] sm:$0xff] }
 0x606   :  { %v11678_v5 = vcombine.high %v7081_v54, %v7085_v33  ;;  %v11679_v59 = vcombine.low %v7082_v55, %v7086_v2 }
 0x607   :  { %9393 = vmatpush1.bf16.msra.mxu0 %v11621_v10  ;;  %v11680_v10 = vcombine.high %v7082_v55, %v7086_v2 }
 0x608   :  { %9516 = vmatpush1.bf16.msra.mxu1 %v11623_v30  ;;  %9394 = vmatprep.subr.bf16.mxu0 %v11630_v11 }
 0x609   :  { %9517 = vmatprep.subr.bf16.mxu1 %v11632_v34  ;;  %v11677_v34 = vcombine.low %v7081_v54, %v7085_v33  ;;  %v12711_v54 = vld [vmem:[%s17204_s5 + $0x78] sm:$0xff]  }
 0x60b   :  { %9395 = vmatpush1.bf16.msra.mxu0 %v11629_v46  ;;  %v12686_v46 = vld [vmem:[%s17204_s5 + $0x80] sm:$0xff]  }
 0x60c   :  { %9518 = vmatpush1.bf16.msra.mxu1 %v11631_v60  ;;  %9396 = vmatprep.subr.bf16.mxu0 %v11638_v16  ;;  %v12687_v60 = vld [vmem:[%s17204_s5 + $0x48] sm:$0xff]  }
 0x60d   :  { %9519 = vmatprep.subr.bf16.mxu1 %v11640_v12  ;;  %v12688_v16 = vld [vmem:[%s17204_s5 + $0xc8] sm:$0xff]  }
 0x60e   :  { %v12689_v12 = vld [vmem:[%s17204_s5 + $0x8] sm:$0xff]  }
 0x60f   :  { %9397 = vmatpush1.bf16.msra.mxu0 %v11637_v45  ;;  %v6692_v17 = vpop.xlane.xlu0 %6691  ;;  %v12695_v45 = vld [vmem:[%s17204_s5 + $0x58] sm:$0xff]  }
 0x610   :  { %9520 = vmatpush1.bf16.msra.mxu1 %v11639_v0  ;;  %v6693_v20 = vsub.f32 %v16373_v38, %v6692_v17  ;;  %9398 = vmatprep.subr.bf16.mxu0 %v11646_v1  ;;  %v7070_v38 = vld [vmem:[%s17203_s3 + $0xb78] sm:$0xff]  ;;  %v16923_v17 = vld [vmem:[%s17201_s6 + $0x2c] sm:$0xff] }
 0x611   :  { %9521 = vmatprep.subr.bf16.mxu1 %v11648_v35  ;;  %v11664_v48 = vcombine.high %v7066_v6, %v7070_v38  ;;  %v11663_v28 = vcombine.low %v7066_v6, %v7070_v38  ;;  %v12696_v0 = vld [vmem:[%s17204_s5 + $0xd8] sm:$0xff]   ;;  %v7103_v3 = vrot.slane %v16923_v17, %v14063_v62  ;;  %v7099_v38 = vrot.slane %v16923_v17, %v14060_v61 }
 0x612   :  { %v6694_v25 = vmul.f32 1.442695, %v6693_v20  ;;  %v12697_v1 = vld [vmem:[%s17204_s5 + $0x18] sm:$0xff]   ;;  %v12704_v20 = vld [vmem:[%s17204_s5 + $0xe8] sm:$0xff]  }
 0x613   :  { %9399 = vmatpush1.bf16.msra.mxu0 %v11645_v19  ;;  %v12698_v35 = vld [vmem:[%s17204_s5 + $0x98] sm:$0xff]   ;;  %v12703_v19 = vld [vmem:[%s17204_s5 + $0x68] sm:$0xff]  }
 0x614   :  { %12751 = vpow2.f32 %v6694_v25  ;;  %9522 = vmatpush1.bf16.msra.mxu1 %v11647_v21  ;;  %9400 = vmatprep.subr.bf16.mxu0 %v11654_v22  ;;  %v7095_v21 = vrot.slane %v16923_v17, %v14048_v8  ;;  %v12705_v22 = vld [vmem:[%s17204_s5 + $0x28] sm:$0xff]   ;;  %v12707_v25 = vld [vmem:[%s17204_s5 + $0x70] sm:$0xff]  }
 0x615   :  { %9523 = vmatprep.subr.bf16.mxu1 %v11656_v63  ;;  %v7091_v63 = vrot.slane %v16923_v17, %v14045_v57 }
 0x617   :  { %9401 = vmatpush1.bf16.msra.mxu0 %v11653_v15  ;;  %v12708_v15 = vld [vmem:[%s17204_s5 + $0xf0] sm:$0xff]  }
 0x618   :  { %9524 = vmatpush1.bf16.msra.mxu1 %v11655_v18  ;;  %9402 = vmatprep.subr.bf16.mxu0 %v11662_v27 }
 0x619   :  { %9525 = vmatprep.subr.bf16.mxu1 %v11664_v48 }
 0x61b   :  { %9403 = vmatpush1.bf16.msra.mxu0 %v11661_v23 }
 0x61c   :  { %9526 = vmatpush1.bf16.msra.mxu1 %v11663_v28  ;;  %9404 = vmatprep.subr.bf16.mxu0 %v11670_v44 }
 0x61d   :  { %9527 = vmatprep.subr.bf16.mxu1 %v11672_v51  ;;  %v12710_v51 = vld [vmem:[%s17204_s5 + $0xb0] sm:$0xff]  }
 0x61e   :  { %v16854_v30 = vpop.eup %12751 }
 0x61f   :  { %9405 = vmatpush1.bf16.msra.mxu0 %v11669_v24  ;;  %v6696_v11 = vsel %vm6689_vm0, %v16854_v30, 0.0  ;;  %v12712_v24 = vld [vmem:[%s17204_s5 + $0xf8] sm:$0xff]  }
 0x620   :  { %9528 = vmatpush1.bf16.msra.mxu1 %v11671_v41  ;;  %6697 = vadd.xlane.f32.xlu0 %v6696_v11 }
 0x621   :  { %9406 = vmatprep.subr.bf16.mxu0 %v11678_v5  ;;  %9529 = vmatprep.subr.bf16.mxu1 %v11680_v10  ;;  %v12713_v10 = vld [vmem:[%s17204_s5 + $0x38] sm:$0xff]  }
 0x623   :  { %9407 = vmatpush1.bf16.msra.mxu0 %v11677_v34 }
 0x624   :  { %9530 = vmatpush1.bf16.msra.mxu1 %v11679_v59  ;;  %11834 = vmatprep.subr.bf16.mxu0 %v12683_v26  ;;  %v12714_v59 = vld [vmem:[%s17204_s5 + $0xb8] sm:$0xff]  }
 0x625   :  { %11856 = vmatprep.subr.bf16.mxu1 %v12684_v58 }
 0x626   :  { %9409 = vmatmul.mubr.bf16.vlgmr.msra.gmra.mrb[32].mxu0 %v16282_v40 }
 0x627   :  { %9532 = vmatmul.mubr.bf16.vlgmr.msra.gmra.mrb[32].mxu1 %v16282_v40  ;;  %11835 = vmatpush3.bf16.msra.mxu0 %v12685_v37  ;;  %v12692_v40 = vld [vmem:[%s17204_s5 + $0xd0] sm:$0xff]  }
 0x628   :  { %11857 = vmatpush3.bf16.msra.mxu1 %v12686_v46  ;;  %11836 = vmatprep.subr.bf16.mxu0 %v12687_v60  ;;  %v12715_v46 = vld [vmem:[%s17204_s5 + $0x140] sm:$0xff]  }
 0x629   :  { %11858 = vmatprep.subr.bf16.mxu1 %v12688_v16  ;;  %v12716_v60 = vld [vmem:[%s17204_s5 + $0x1c0] sm:$0xff]  }
 0x62a   :  { %v12717_v16 = vld [vmem:[%s17204_s5 + $0x100] sm:$0xff]  }
 0x62b   :  { %11837 = vmatpush3.bf16.msra.mxu0 %v12689_v12  ;;  %v12718_v12 = vld [vmem:[%s17204_s5 + $0x180] sm:$0xff]  }
 0x62c   :  { %11859 = vmatpush3.bf16.msra.mxu1 %v12690_v39  ;;  %11838 = vmatprep.subr.bf16.mxu0 %v12691_v14  ;;  %v12719_v39 = vld [vmem:[%s17204_s5 + $0x148] sm:$0xff]  }
 0x62d   :  { %11860 = vmatprep.subr.bf16.mxu1 %v12692_v40  ;;  %v12720_v14 = vld [vmem:[%s17204_s5 + $0x1c8] sm:$0xff]  }
 0x62e   :  { %v12721_v40 = vld [vmem:[%s17204_s5 + $0x108] sm:$0xff]  }
 0x62f   :  { %11839 = vmatpush3.bf16.msra.mxu0 %v12693_v13  ;;  %v12722_v13 = vld [vmem:[%s17204_s5 + $0x188] sm:$0xff]  }
 0x630   :  { %11861 = vmatpush3.bf16.msra.mxu1 %v12694_v42  ;;  %11840 = vmatprep.subr.bf16.mxu0 %v12695_v45  ;;  %v12723_v42 = vld [vmem:[%s17204_s5 + $0x150] sm:$0xff]  }
 0x631   :  { %11862 = vmatprep.subr.bf16.mxu1 %v12696_v0  ;;  %v12724_v45 = vld [vmem:[%s17204_s5 + $0x1d0] sm:$0xff]  }
 0x632   :  { %v12725_v0 = vld [vmem:[%s17204_s5 + $0x110] sm:$0xff]  }
 0x633   :  { %11841 = vmatpush3.bf16.msra.mxu0 %v12697_v1  ;;  %v12726_v1 = vld [vmem:[%s17204_s5 + $0x190] sm:$0xff]  }
 0x634   :  { %11863 = vmatpush3.bf16.msra.mxu1 %v12698_v35  ;;  %11842 = vmatprep.subr.bf16.mxu0 %v12699_v50  ;;  %v12727_v35 = vld [vmem:[%s17204_s5 + $0x158] sm:$0xff]  }
 0x635   :  { %11864 = vmatprep.subr.bf16.mxu1 %v12700_v47  ;;  %v12728_v50 = vld [vmem:[%s17204_s5 + $0x1d8] sm:$0xff]  }
 0x636   :  { %v12729_v47 = vld [vmem:[%s17204_s5 + $0x118] sm:$0xff]  }
 0x637   :  { %11843 = vmatpush3.bf16.msra.mxu0 %v12701_v49  ;;  %v12730_v49 = vld [vmem:[%s17204_s5 + $0x198] sm:$0xff]  }
 0x638   :  { %11865 = vmatpush3.bf16.msra.mxu1 %v12702_v36  ;;  %11844 = vmatprep.subr.bf16.mxu0 %v12703_v19  ;;  %v12731_v36 = vld [vmem:[%s17204_s5 + $0x160] sm:$0xff]  }
 0x639   :  { %v9164_v6 = vpop.f32.mrb[28].mxu0  ;;  %11866 = vmatprep.subr.bf16.mxu1 %v12704_v20  ;;  %v12732_v19 = vld [vmem:[%s17204_s5 + $0x1e0] sm:$0xff]  }
 0x63a   :  { %v9287_v18 = vpop.f32.mrb[28].mxu1  ;;  %v9166_v27 = vpop.f32.mrb[29].mxu0  ;;  %v11942_v4 = vadd.f32 %v9164_v6, %v7091_v63  ;;  %v12733_v20 = vld [vmem:[%s17204_s5 + $0x120] sm:$0xff]   ;;  %v12736_v63 = vld [vmem:[%s17204_s5 + $0x1e8] sm:$0xff]   ;;  %v12740_v6 = vld [vmem:[%s17204_s5 + $0x1f0] sm:$0xff]  }
 0x63b   :  { %v11943_v48 = vadd.f32 %v9166_v27, %v7095_v21  ;;  %v9289_v31 = vpop.f32.mrb[29].mxu1  ;;  %v9168_v32 = vpop.f32.mrb[30].mxu0  ;;  %11845 = vmatpush3.bf16.msra.mxu0 %v12705_v22  ;;  %v11944_v33 = vadd.f32 %v9287_v18, %v7099_v38  ;;  %v12734_v21 = vld [vmem:[%s17204_s5 + $0x1a0] sm:$0xff]   ;;  %v12735_v22 = vld [vmem:[%s17204_s5 + $0x168] sm:$0xff]   ;;  %v12741_v38 = vld [vmem:[%s17204_s5 + $0x130] sm:$0xff]  }
 0x63c   :  { %v11945_v23 = vadd.f32 %v9289_v31, %v7103_v3  ;;  %v9291_v28 = vpop.f32.mrb[30].mxu1  ;;  %11867 = vmatpush3.bf16.msra.mxu1 %v12706_v7  ;;  %v9169_v44 = vpop.f32.mrb[31].mxu0  ;;  %11846 = vmatprep.subr.bf16.mxu0 %v12707_v25  ;;  %v9540_v11 = vmax.f32 %v11942_v4, 0.0  ;;  %v12737_v3 = vld [vmem:[%s17204_s5 + $0x128] sm:$0xff]   ;;  %v12739_v25 = vld [vmem:[%s17204_s5 + $0x170] sm:$0xff]   ;;  %v12743_v18 = vld [vmem:[%s17204_s5 + $0x178] sm:$0xff]  }
 0x63d   :  { %v9541_v55 = vmax.f32 %v11943_v48, 0.0  ;;  %v9292_v2 = vpop.f32.mrb[31].mxu1  ;;  %11868 = vmatprep.subr.bf16.mxu1 %v12708_v15  ;;  %v9542_v26 = vmax.f32 %v11944_v33, 0.0  ;;  %v12738_v7 = vld [vmem:[%s17204_s5 + $0x1a8] sm:$0xff]   ;;  %v12742_v15 = vld [vmem:[%s17204_s5 + $0x1b0] sm:$0xff]   ;;  %v12744_v27 = vld [vmem:[%s17204_s5 + $0x1f8] sm:$0xff]   ;;  %v7115_v33 = vrot.slane %v16923_v17, %v14302_v52 }
 0x63e   :  { %v9543_v41 = vmax.f32 %v11945_v23, 0.0  ;;  %v9548_v58 = vpack.c.bf16 %v9540_v11, %v9540_v11  ;;  %v12745_v48 = vld [vmem:[%s17204_s5 + $0x138] sm:$0xff]   ;;  %v7119_v2 = vrot.slane %v16923_v17, %v14305_v53 }
 0x63f   :  { %v9549_v5 = vpack.c.bf16 %v9541_v55, %v9541_v55  ;;  %11847 = vmatpush3.bf16.msra.mxu0 %v12709_v29  ;;  %v9550_v37 = vpack.c.bf16 %v9542_v26, %v9542_v26  ;;  %v12746_v31 = vld [vmem:[%s17204_s5 + $0x1b8] sm:$0xff]   ;;  %v7111_v55 = vrot.slane %v16923_v17, %v14091_v9 }
 0x640   :  { %v9551_v34 = vpack.c.bf16 %v9543_v41, %v9543_v41  ;;  %11869 = vmatpush3.bf16.msra.mxu1 %v12710_v51  ;;  %11848 = vmatprep.subr.bf16.mxu0 %v12711_v54  ;;  %v7107_v54 = vrot.slane %v16923_v17, %v14085_v43 }
 0x641   :  { %10106 = vmatprep.mubr.bf16.mxu0 %v9549_v5  ;;  %11870 = vmatprep.subr.bf16.mxu1 %v12712_v24 }
 0x642   :  { %10146 = vmatprep.mubr.bf16.mxu1 %v9551_v34 }
 0x643   :  { %11849 = vmatpush3.bf16.msra.mxu0 %v12713_v10 }
 0x644   :  { %11871 = vmatpush3.bf16.msra.mxu1 %v12714_v59  ;;  %11878 = vmatprep.subr.bf16.mxu0 %v12715_v46 }
 0x645   :  { %11900 = vmatprep.subr.bf16.mxu1 %v12716_v60 }
 0x646   :  { %10107 = vmatmul.mubr.bf16.vlgmr.msra.gmra.mrb[36].mxu0 %v9548_v58 }
 0x647   :  { %10147 = vmatmul.mubr.bf16.vlgmr.msra.gmra.mrb[36].mxu1 %v9550_v37  ;;  %11879 = vmatpush3.bf16.msra.mxu0 %v12717_v16 }
 0x648   :  { %11901 = vmatpush3.bf16.msra.mxu1 %v12718_v12  ;;  %11880 = vmatprep.subr.bf16.mxu0 %v12719_v39 }
 0x649   :  { %11902 = vmatprep.subr.bf16.mxu1 %v12720_v14 }
 0x64b   :  { %11881 = vmatpush3.bf16.msra.mxu0 %v12721_v40 }
 0x64c   :  { %11903 = vmatpush3.bf16.msra.mxu1 %v12722_v13  ;;  %11882 = vmatprep.subr.bf16.mxu0 %v12723_v42  ;;  %v11681_v13 = vld [vmem:[%s17201_s6 + $0x35] ss:$0 sm:$0xff] }
 0x64d   :  { %11904 = vmatprep.subr.bf16.mxu1 %v12724_v45 }
 0x64f   :  { %11883 = vmatpush3.bf16.msra.mxu0 %v12725_v0 }
 0x650   :  { %11905 = vmatpush3.bf16.msra.mxu1 %v12726_v1  ;;  %11884 = vmatprep.subr.bf16.mxu0 %v12727_v35 }
 0x651   :  { %11906 = vmatprep.subr.bf16.mxu1 %v12728_v50 }
 0x653   :  { %11885 = vmatpush3.bf16.msra.mxu0 %v12729_v47 }
 0x654   :  { %11907 = vmatpush3.bf16.msra.mxu1 %v12730_v49  ;;  %11886 = vmatprep.subr.bf16.mxu0 %v12731_v36 }
 0x655   :  { %11908 = vmatprep.subr.bf16.mxu1 %v12732_v19 }
 0x657   :  { %11887 = vmatpush3.bf16.msra.mxu0 %v12733_v20 }
 0x658   :  { %11909 = vmatpush3.bf16.msra.mxu1 %v12734_v21  ;;  %11888 = vmatprep.subr.bf16.mxu0 %v12735_v22 }
 0x659   :  { %11910 = vmatprep.subr.bf16.mxu1 %v12736_v63 }
 0x65b   :  { %11889 = vmatpush3.bf16.msra.mxu0 %v12737_v3 }
 0x65c   :  { %11911 = vmatpush3.bf16.msra.mxu1 %v12738_v7  ;;  %11890 = vmatprep.subr.bf16.mxu0 %v12739_v25 }
 0x65d   :  { %11912 = vmatprep.subr.bf16.mxu1 %v12740_v6 }
 0x65f   :  { %11891 = vmatpush3.bf16.msra.mxu0 %v12741_v38 }
 0x660   :  { %11913 = vmatpush3.bf16.msra.mxu1 %v12742_v15  ;;  %11892 = vmatprep.subr.bf16.mxu0 %v12743_v18 }
 0x661   :  { %11914 = vmatprep.subr.bf16.mxu1 %v12744_v27 }
 0x663   :  { %11893 = vmatpush3.bf16.msra.mxu0 %v12745_v48 }
 0x664   :  { %11915 = vmatpush3.bf16.msra.mxu1 %v12746_v31 }
 0x6ad   :  { %v6698_v32 = vpop.xlane.xlu0 %6697 }
 0x6ae   :  { %12753 = vrcp.f32 %v6698_v32 }
 0x6b8   :  { %v12754_v29 = vpop.eup %12753 }
 0x6b9   :  { %v17066_v4 = vmul.f32 %v12754_v29, %v16854_v30 }
 0x6bb   :  { %v17070_v23 = vrot.slane %v17066_v4, %v14045_v57  ;;  %v17075_v28 = vrot.slane %v17066_v4, %v14060_v61  ;;  %v17080_v44 = vrot.slane %v17066_v4, %v14063_v62  ;;  %v17085_v30 = vrot.slane %v17066_v4, %v14085_v43 }
 0x6bc   :  { %v17090_v51 = vrot.slane %v17066_v4, %v14091_v9  ;;  %v17095_v61 = vrot.slane %v17066_v4, %v14302_v52  ;;  %v17100_v62 = vrot.slane %v17066_v4, %v14305_v53  ;;  %v10260_v31 = vrot.slane %v17066_v4, %v14048_v8 }
 0x6bd   :  { %10251 = vbcast.lane.b32.xlu0 %v17070_v23, 256 }
 0x6c1   :  { %10273 = vbcast.lane.b32.xlu0 %v17075_v28, 256 }
 0x6c5   :  { %10284 = vbcast.lane.b32.xlu0 %v17080_v44, 256 }
 0x6c9   :  { %10295 = vbcast.lane.b32.xlu0 %v17085_v30, 256 }
 0x6cd   :  { %10306 = vbcast.lane.b32.xlu0 %v17090_v51, 256 }
 0x6d1   :  { %10317 = vbcast.lane.b32.xlu0 %v17095_v61, 256 }
 0x6d5   :  { %10328 = vbcast.lane.b32.xlu0 %v17100_v62, 256 }
 0x6f9   :  { %v9410_v24 = vpop.f32.mrb[32].mxu0 }
 0x6fa   :  { %v11946_v41 = vadd.f32 %v9410_v24, %v7107_v54  ;;  %v9533_v5 = vpop.f32.mrb[32].mxu1  ;;  %v9412_v10 = vpop.f32.mrb[33].mxu0 }
 0x6fb   :  { %v11948_v11 = vadd.f32 %v9533_v5, %v7115_v33  ;;  %v11947_v34 = vadd.f32 %v9412_v10, %v7111_v55  ;;  %v9535_v59 = vpop.f32.mrb[33].mxu1  ;;  %v9414_v26 = vpop.f32.mrb[34].mxu0  ;;  %v12761_v5 = vmov 1966171168  }
 0x6fc   :  { %v9544_v58 = vmax.f32 %v11946_v41, 0.0  ;;  %v11949_v37 = vadd.f32 %v9535_v59, %v7119_v2  ;;  %v9537_v43 = vpop.f32.mrb[34].mxu1  ;;  %v9415_v46 = vpop.f32.mrb[35].mxu0  ;;  %v10337_v10 = vunpack.c.l.s4 %v12761_v5 }
 0x6fd   :  { %v9546_v60 = vmax.f32 %v11948_v11, 0.0  ;;  %v9545_v52 = vmax.f32 %v11947_v34, 0.0  ;;  %v9538_v16 = vpop.f32.mrb[35].mxu1 }
 0x6fe   :  { %v9547_v12 = vmax.f32 %v11949_v37, 0.0  ;;  %v9552_v39 = vpack.c.bf16 %v9544_v58, %v9544_v58  ;;  %v10338_v34 = vunpack.c.0.s8 %v10337_v10 }
 0x6ff   :  { %v9553_v9 = vpack.c.bf16 %v9545_v52, %v9545_v52  ;;  %v9554_v53 = vpack.c.bf16 %v9546_v60, %v9546_v60 }
 0x700   :  { %v9555_v14 = vpack.c.bf16 %v9547_v12, %v9547_v12 }
 0x701   :  { %10186 = vmatprep.mubr.bf16.mxu0 %v9553_v9 }
 0x702   :  { %10226 = vmatprep.mubr.bf16.mxu1 %v9555_v14  ;;  %10187 = vmatmul.mubr.bf16.vlgmr.msra.gmra.mrb[40].mxu0 %v9552_v39 }
 0x703   :  { %10227 = vmatmul.mubr.bf16.vlgmr.msra.gmra.mrb[40].mxu1 %v9554_v53 }
 0x719   :  { %v11850_v17 = vpop.f32.mrb[36].mxu0 }
 0x71a   :  { %v11872_v40 = vpop.f32.mrb[36].mxu1  ;;  %v11851_v42 = vpop.f32.mrb[37].mxu0 }
 0x71b   :  { %v11852_v45 = vadd.f32 %v11851_v42, %v11850_v17  ;;  %v11873_v0 = vpop.f32.mrb[37].mxu1  ;;  %v11853_v1 = vpop.f32.mrb[38].mxu0 }
 0x71c   :  { %v11874_v35 = vadd.f32 %v11873_v0, %v11872_v40  ;;  %v11875_v50 = vpop.f32.mrb[38].mxu1  ;;  %v11854_v47 = vpop.f32.mrb[39].mxu0 }
 0x71d   :  { %v10109_v49 = vadd.f32 %v11852_v45, %v11681_v13  ;;  %v11876_v36 = vpop.f32.mrb[39].mxu1 }
 0x71f   :  { %v10149_v19 = vadd.f32 %v11874_v35, %v10109_v49 }
 0x72f   :  { %v10252_v2 = vpop.permute.xlu0 %10251 }
 0x733   :  { %v10274_v24 = vpop.permute.xlu0 %10273 }
 0x737   :  { %v10285_v11 = vpop.permute.xlu0 %10284 }
 0x73b   :  { %v10296_v59 = vpop.permute.xlu0 %10295 }
 0x73f   :  { %v10307_v43 = vpop.permute.xlu0 %10306 }
 0x743   :  { %v10318_v13 = vpop.permute.xlu0 %10317 }
 0x7d5   :  { %v11894_v20 = vpop.f32.mrb[40].mxu0 }
 0x7d6   :  { %v11916_v21 = vpop.f32.mrb[40].mxu1  ;;  %v11895_v22 = vpop.f32.mrb[41].mxu0 }
 0x7d7   :  { %v11896_v63 = vadd.f32 %v11895_v22, %v11894_v20  ;;  %v11917_v3 = vpop.f32.mrb[41].mxu1  ;;  %v11897_v7 = vpop.f32.mrb[42].mxu0 }
 0x7d8   :  { %v11918_v25 = vadd.f32 %v11917_v3, %v11916_v21  ;;  %v11919_v6 = vpop.f32.mrb[42].mxu1  ;;  %v11898_v38 = vpop.f32.mrb[43].mxu0 }
 0x7d9   :  { %v10189_v15 = vadd.f32 %v11896_v63, %v10149_v19  ;;  %v11920_v18 = vpop.f32.mrb[43].mxu1 }
 0x7db   :  { %v10229_v27 = vadd.f32 %v11918_v25, %v10189_v15 }
 0x7dd   :  { %v10235_v48 = vsel %vm10234_vm1, %v10229_v27, -inf }
 0x7de   :  { %10236 = vmax.xlane.f32.xlu1 %v10235_v48  ;;  %v10329_v48 = vpop.permute.xlu0 %10328 }
 0x7ef   :  { %10255 = vbcast.lane.b32.xlu1 %v17070_v23, 264 }
 0x7f3   :  { %10262 = vbcast.lane.b32.xlu1 %v10260_v31, 256 }
 0x7f7   :  { %10266 = vbcast.lane.b32.xlu1 %v10260_v31, 264 }
 0x7fb   :  { %10277 = vbcast.lane.b32.xlu1 %v17075_v28, 264 }
 0x7ff   :  { %10288 = vbcast.lane.b32.xlu1 %v17080_v44, 264 }
 0x803   :  { %10299 = vbcast.lane.b32.xlu1 %v17085_v30, 264 }
 0x807   :  { %10310 = vbcast.lane.b32.xlu1 %v17090_v51, 264 }
 0x86b   :  { %v10237_v32 = vpop.xlane.xlu1 %10236 }
 0x86c   :  { %v10238_v29 = vsub.f32 %v10229_v27, %v10237_v32 }
 0x86e   :  { %v10239_v54 = vmul.f32 1.442695, %v10238_v29 }
 0x86f   :  { %v10256_v8 = vpop.permute.xlu1 %10255 }
 0x870   :  { %12755 = vpow2.f32 %v10239_v54 }
 0x873   :  { %v10263_v4 = vpop.permute.xlu1 %10262 }
 0x877   :  { %v10267_v28 = vpop.permute.xlu1 %10266 }
 0x87a   :  { %v12756_v33 = vpop.eup %12755 }
 0x87b   :  { %v10241_v23 = vsel %vm10234_vm1, %v12756_v33, 0.0  ;;  %v10278_v44 = vpop.permute.xlu1 %10277 }
 0x87c   :  { %10242 = vadd.xlane.f32.xlu1 %v10241_v23 }
 0x87f   :  { %v10289_v55 = vpop.permute.xlu1 %10288 }
 0x883   :  { %v10300_v30 = vpop.permute.xlu1 %10299 }
 0x887   :  { %v10311_v51 = vpop.permute.xlu1 %10310 }
 0x88d   :  { %10321 = vbcast.lane.b32.xlu1 %v17095_v61, 264  ;;  %v10341_v61 = vsub.s32 %v10338_v34, %v14042_v56 }
 0x891   :  { %10332 = vbcast.lane.b32.xlu1 %v17100_v62, 264 }
 0x909   :  { %v10243_v41 = vpop.xlane.xlu1 %10242 }
 0x90a   :  { %12757 = vrcp.f32 %v10243_v41 }
 0x90d   :  { %v10322_v1 = vpop.permute.xlu1 %10321 }
 0x911   :  { %v10333_v31 = vpop.permute.xlu1 %10332 }
 0x914   :  { %v12758_v26 = vpop.eup %12757 }
 0x915   :  { %v10245_v62 = vmul.f32 %v12758_v26, %v12756_v33 }
 0x917   :  { %v10342_v58 = vrot.slane %v10245_v62, %v10341_v61  ;;  %v10335_v37 = vcombine.high %v10245_v62, %v10245_v62 }
 0x919   :  { %v10350_v46 = vcombine.high %v10342_v58, %v10342_v58  ;;  %v10358_v60 = vrot.slane %v10342_v58, %v10341_v61  ;;  %v10349_v52 = vrot.slane %v10335_v37, %v10341_v61 }
 0x91b   :  { %v10372_v16 = vrot.slane %v10350_v46, %v10341_v61  ;;  %v10380_v12 = vcombine.high %v10358_v60, %v10358_v60  ;;  %v10387_v9 = vrot.slane %v10358_v60, %v14045_v57  ;;  %v10365_v39 = vrot.slane %v10349_v52, %v10341_v61 }
 0x91c   :  { %v10351_v14 = vcombine.high %v10349_v52, %v10349_v52 }
 0x91d   :  { %v10382_v53 = vcombine.high %v10372_v16, %v10372_v16  ;;  %v10391_v17 = vrot.slane %v10372_v16, %v14045_v57  ;;  %v10395_v40 = vrot.slane %v10380_v12, %v14045_v57  ;;  %v10424_v56 = vmul.f32 %v10387_v9, %v10252_v2 }
 0x91e   :  { %v10425_v42 = vmul.f32 %v10387_v9, %v10256_v8  ;;  %v10381_v45 = vcombine.high %v10365_v39, %v10365_v39  ;;  %v10403_v0 = vrot.slane %v10365_v39, %v14045_v57  ;;  %v10379_v35 = vrot.slane %v10351_v14, %v10341_v61 }
 0x91f   :  { %v10399_v50 = vrot.slane %v10382_v53, %v14045_v57  ;;  %v10426_v47 = vmul.f32 %v10391_v17, %v10263_v4  ;;  %v10427_v49 = vmul.f32 %v10391_v17, %v10267_v28  ;;  %v10428_v36 = vmul.f32 %v10395_v40, %v10274_v24  ;;  %10440 = vst.msk [vmem:[%s17205_s7] sm:$0xff] %vm10234_vm1, %v10424_v56 }
 0x920   :  { %v10429_v19 = vmul.f32 %v10395_v40, %v10278_v44  ;;  %10441 = vst.msk [vmem:[%s17205_s7 + $0x8] sm:$0xff] %vm10234_vm1, %v10425_v42  ;;  %v10411_v20 = vrot.slane %v10381_v45, %v14045_v57  ;;  %v10433_v21 = vmul.f32 %v10403_v0, %v10300_v30  ;;  %v10432_v22 = vmul.f32 %v10403_v0, %v10296_v59 }
 0x921   :  { %v10430_v63 = vmul.f32 %v10399_v50, %v10285_v11  ;;  %v10431_v3 = vmul.f32 %v10399_v50, %v10289_v55  ;;  %10442 = vst.msk [vmem:[%s17205_s7 + $0x10] sm:$0xff] %vm10234_vm1, %v10426_v47  ;;  %10443 = vst.msk [vmem:[%s17205_s7 + $0x18] sm:$0xff] %vm10234_vm1, %v10427_v49  ;;  %v10383_v7 = vcombine.high %v10379_v35, %v10379_v35 }
 0x922   :  { %10444 = vst.msk [vmem:[%s17205_s7 + $0x20] sm:$0xff] %vm10234_vm1, %v10428_v36  ;;  %v10407_v25 = vrot.slane %v10379_v35, %v14045_v57  ;;  %10445 = vst.msk [vmem:[%s17205_s7 + $0x28] sm:$0xff] %vm10234_vm1, %v10429_v19  ;;  %v10436_v6 = vmul.f32 %v10411_v20, %v10318_v13  ;;  %v10437_v38 = vmul.f32 %v10411_v20, %v10322_v1 }
 0x923   :  { %10449 = vst.msk [vmem:[%s17205_s7 + $0x48] sm:$0xff] %vm10234_vm1, %v10433_v21  ;;  %10448 = vst.msk [vmem:[%s17205_s7 + $0x40] sm:$0xff] %vm10234_vm1, %v10432_v22  ;;  %v10415_v15 = vrot.slane %v10383_v7, %v14045_v57 }
 0x924   :  { %10446 = vst.msk [vmem:[%s17205_s7 + $0x30] sm:$0xff] %vm10234_vm1, %v10430_v63  ;;  %10447 = vst.msk [vmem:[%s17205_s7 + $0x38] sm:$0xff] %vm10234_vm1, %v10431_v3  ;;  %v10435_v18 = vmul.f32 %v10407_v25, %v10311_v51  ;;  %v10434_v27 = vmul.f32 %v10407_v25, %v10307_v43 }
 0x925   :  { %10452 = vst.msk [vmem:[%s17205_s7 + $0x60] sm:$0xff] %vm10234_vm1, %v10436_v6  ;;  %10453 = vst.msk [vmem:[%s17205_s7 + $0x68] sm:$0xff] %vm10234_vm1, %v10437_v38  ;;  %v10438_v57 = vmul.f32 %v10415_v15, %v10329_v48  ;;  %v10439_v32 = vmul.f32 %v10415_v15, %v10333_v31 }
 0x926   :  { %10451 = vst.msk [vmem:[%s17205_s7 + $0x58] sm:$0xff] %vm10234_vm1, %v10435_v18  ;;  %10450 = vst.msk [vmem:[%s17205_s7 + $0x50] sm:$0xff] %vm10234_vm1, %v10434_v27 }
 0x927   :  { %10454 = vst.msk [vmem:[%s17205_s7 + $0x70] sm:$0xff] %vm10234_vm1, %v10438_v57  ;;  %10455 = vst.msk [vmem:[%s17205_s7 + $0x78] sm:$0xff] %vm10234_vm1, %v10439_v32 }

</bundles_post_ra>
